<compile_context>
chip_gen: v6e
topology: v6e:2x2x1
jax: 0.10.0
libtpu: 0.0.40
codegen_flags: <defaults>
</compile_context>

<pallas_src>
import functools

import jax
import jax.numpy as jnp
from jax.experimental import pallas as pl
from jax.experimental.pallas import tpu as pltpu

KPAD = 8  # padded number of frequencies (L_max=7 -> 8)


# ------------------------------------------------------------ the fused kernel

def _fused_forward_kernel(
        # per-forward data (DMA'd once, VMEM resident)
        s_feat_ref, ra0_ref, rb0_ref, dist_ref, eck_ref, esk_ref,
        cthk_ref, sthk_ref, expand_ref, g_row_ref, g_col_ref,
        u_last_ref, v_last_ref,
        # node embedding
        emb_w_ref, emb_b_ref,
        # stacked EqBlock params (leading dim = num_layers), fused layouts
        we1_ref, be1_ref, we2_ref, be2_ref,
        wn1_ref, bn1_ref, wn2_ref, bn2_ref,
        # SO2LayerNorm
        ln_g_ref, ln_b_ref, ln_rg_ref,
        # fused SO2OutU / SO2OutV head
        wh1_ref, bh1_ref, wh2_ref, bh2_ref,
        # output (N, 3): [u_out, v_out_x, v_out_y]  (residuals included)
        out_ref,
        *, r_real):
    f32 = jnp.float32

    def dot(a, b):
        return jnp.dot(a, b, preferred_element_type=f32)

    C = emb_w_ref.shape[1]          # n_scalars
    R = ra0_ref.shape[1]            # lane-padded rot width (128)

    # ---- node embedding (scalar Linear + SiLU; rot lift precomputed) -------
    s = jax.nn.silu(dot(s_feat_ref[...], emb_w_ref[...]) + emb_b_ref[...])
    ra = ra0_ref[...]                                               # (N, R)
    rb = rb0_ref[...]

    # ---- expand (., 8) multi-K trig tables to (., R) k-major via 0/1 matmul
    expand = expand_ref[...]                                        # (8, R)
    ec = dot(eck_ref[...], expand)                                  # (E, R)
    es = dot(esk_ref[...], expand)
    cth = dot(cthk_ref[...], expand)                                # (N, R)
    sth = dot(sthk_ref[...], expand)

    dist = dist_ref[...]                                            # (E, r_dim)
    g_row = g_row_ref[...]                                          # (E, N) dst
    g_col = g_col_ref[...]                                          # (E, N) src

    num_layers = we1_ref.shape[0]
    for l in range(num_layers):      # unrolled; weights stay VMEM resident
        # ---- EqBlock (TODO(synk): EqBlock not provided; SO(2)-equivariant
        #      invariant-gated message passing used) -------------------------
        # one wide source-gather matmul: [ra | rb | s]  (128 | 128 | 32)
        node_cat = jnp.concatenate([ra, rb, s], axis=-1)            # (N, 2R+C)
        src = dot(g_col, node_cat)                                  # (E, 2R+C)
        ra_col = src[:, :R]
        rb_col = src[:, R:2 * R]
        s_col = src[:, 2 * R:]
        s_row = dot(g_row, s)                                       # (E, C)

        # fused edge MLP: [s_row | s_col | dist] @ we1, then [gate|h_dir|m_s]
        e_in = jnp.concatenate([s_row, s_col, dist], axis=-1)       # (E, 2C+r)
        h_e = jax.nn.silu(dot(e_in, we1_ref[l]) + be1_ref[l])       # (E, He)
        h2 = dot(h_e, we2_ref[l]) + be2_ref[l]                      # (E, 2R+C)
        gate_e = jax.nn.sigmoid(h2[:, :R])
        h_dir = h2[:, R:2 * R]
        m_s = jax.nn.silu(h2[:, 2 * R:])

        # equivariant edge messages: invariant gate on neighbor rot features
        # plus an invariant weight on the edge-direction frequency embedding.
        ra_msg = gate_e * ra_col + h_dir * ec
        rb_msg = gate_e * rb_col + h_dir * es
        m_all = jnp.concatenate([ra_msg, rb_msg, m_s], axis=-1)     # (E, 2R+C)

        # scatter-add to destination nodes: g_row^T @ m_all (g_row reused,
        # transpose folded into the MXU operand feed — no extra (N, E) input).
        agg = jax.lax.dot_general(g_row, m_all, (((0,), (0,)), ((), ())),
                                  preferred_element_type=f32)       # (N, 2R+C)
        ra_agg = agg[:, :R]
        rb_agg = agg[:, R:2 * R]
        s_agg = agg[:, 2 * R:]

        # fused node MLP: [inv | s | s_agg] @ wn1, then [gate_n | ds]
        inv = jnp.sqrt(ra_agg * ra_agg + rb_agg * rb_agg + 1e-8)    # (N, R)
        n_in = jnp.concatenate([inv, s, s_agg], axis=-1)            # (N, R+2C)
        h_n = jax.nn.silu(dot(n_in, wn1_ref[l]) + bn1_ref[l])       # (N, Hn)
        h2n = dot(h_n, wn2_ref[l]) + bn2_ref[l]                     # (N, R+C)
        gate_n = jax.nn.sigmoid(h2n[:, :R])
        s = s + h2n[:, R:]
        ra = ra + gate_n * ra_agg
        rb = rb + gate_n * rb_agg

    # ---- SO2LayerNorm (TODO(synk): not provided; LN on scalars + RMS over
    #      rot-channel magnitudes, shared scale on both components) ----------
    mu = jnp.mean(s, axis=-1, keepdims=True)
    xc = s - mu
    var = jnp.mean(xc * xc, axis=-1, keepdims=True)
    s = xc * jax.lax.rsqrt(var + 1e-5) * ln_g_ref[...] + ln_b_ref[...]
    nrm2 = ra * ra + rb * rb
    inv_rms = jax.lax.rsqrt(                     # mean over the 112 real chans
        jnp.sum(nrm2, axis=-1, keepdims=True) * (1.0 / r_real) + 1e-5)
    rg = ln_rg_ref[...]
    ra = ra * inv_rms * rg
    rb = rb * inv_rms * rg

    # ---- rotate rot features into the node frame (x_rot @ rot_theta^T) -----
    fa = ra * cth - rb * sth
    fb = ra * sth + rb * cth

    # ---- fused SO2OutU + SO2OutV heads: one 1536-wide hidden layer ----------
    head_in = jnp.concatenate([fa, fb, s], axis=-1)                 # (N, 2R+C)
    h = jax.nn.leaky_relu(dot(head_in, wh1_ref[...]) + bh1_ref[...])
    out3 = dot(h, wh2_ref[...]) + bh2_ref[...]                      # (N, 3)

    # SO2OutV: rotate the 2-vector back with rot_theta[:, 0]  (k = 1 frame)
    c1, s1 = cth[:, 0:1], sth[:, 0:1]
    y0, y1 = out3[:, 1:2], out3[:, 2:3]
    v0 = y0 * c1 + y1 * s1
    v1 = -y0 * s1 + y1 * c1

    # ---- residuals + narrow (N, 3) output -----------------------------------
    v_last = v_last_ref[...]
    out_ref[...] = jnp.concatenate(
        [u_last_ref[...] + out3[:, 0:1],
         v_last[:, 0:1] + v0,
         v_last[:, 1:2] + v1], axis=-1)


# --------------------------------------------------------------- param init

def init_params(key, time_slize, *, L_max=7, num_rep=16, r_dim=16,
                num_layers=2, n_scalars=32, edge_hidden=128, node_hidden=128):
    state = {'key': key}

    def nk():
        state['key'], sub = jax.random.split(state['key'])
        return sub

    def dense(fi, fo):
        return jax.random.normal(nk(), (fi, fo), jnp.float32) / jnp.sqrt(float(fi))

    def stack(fi, fo):
        return (jax.random.normal(nk(), (num_layers, fi, fo), jnp.float32)
                / jnp.sqrt(float(fi)))

    def stack_b(fo):
        return jnp.zeros((num_layers, 1, fo), jnp.float32)

    R = L_max * num_rep                # 112 real rot channels
    Rp = 128                           # lane-padded rot width
    P = time_slize + 2                 # lifted vectors: v_t (T), boundary, force
    Fs = 3 * time_slize + 4            # invariant scalar features
    C = n_scalars
    D = C + 2 * R                      # SO2Out* MLP input dim (per spec: 256)
    H = 3 * D                          # SO2Out* hidden dim   (per spec: 768)

    p = {}
    # Node_embedding_vel (TODO(synk): inferred)
    p['lift_w'] = (jax.random.normal(nk(), (L_max, P, num_rep), jnp.float32)
                   / jnp.sqrt(float(P)))
    p['emb_w'], p['emb_b'] = dense(Fs, C), jnp.zeros((1, C), jnp.float32)

    # EqBlock stacks, fused layouts (TODO(synk): inferred)
    p['we1'] = stack(2 * C + r_dim, edge_hidden)            # [s_row|s_col|dist]
    p['be1'] = stack_b(edge_hidden)
    p['we2'] = stack(edge_hidden, 2 * Rp + C)                # [gate|h_dir|m_s]
    p['be2'] = stack_b(2 * Rp + C)
    wn1 = stack(Rp + 2 * C, node_hidden)                     # [inv|s|s_agg]
    wn1 = wn1.at[:, R:Rp, :].set(0.0)     # padded rot channels never leak
    p['wn1'] = wn1
    p['bn1'] = stack_b(node_hidden)
    p['wn2'] = stack(node_hidden, Rp + C)                    # [gate_n|ds]
    p['bn2'] = stack_b(Rp + C)

    # SO2LayerNorm (TODO(synk): inferred)
    p['ln_g'] = jnp.ones((1, C), jnp.float32)
    p['ln_b'] = jnp.zeros((1, C), jnp.float32)
    p['ln_rg'] = jnp.ones((1, Rp), jnp.float32)

    # fused SO2OutU + SO2OutV heads: Linear(D, 3D) -> leaky_relu -> Linear
    p['wh1'] = dense(2 * Rp + C, 2 * H)                      # [fa|fb|s]->[hu|hv]
    p['bh1'] = jnp.zeros((1, 2 * H), jnp.float32)
    wh2 = jnp.zeros((2 * H, 3), jnp.float32)
    wh2 = wh2.at[:H, 0:1].set(dense(H, 1))                   # u head (block diag)
    wh2 = wh2.at[H:, 1:3].set(dense(H, 2))                   # v head (block diag)
    p['wh2'] = wh2
    p['bh2'] = jnp.zeros((1, 3), jnp.float32)
    return p


# ----------------------------------------------------------------- forward

def so2_transformer_forward(params, u, v, boundary_norm, is_boundary, y_force,
                            pos, edge_index, *, L_max=7, num_rep=16, r_dim=16):
    eps = 1e-6
    f32 = jnp.float32
    N = pos.shape[0]
    E = edge_index.shape[1]
    R = L_max * num_rep
    Rp = 128
    assert L_max <= KPAD and R <= Rp and KPAD * num_rep >= Rp

    # ------------------ geometry (torch.no_grad block) ----------------------
    pos = pos - jnp.mean(pos, axis=0, keepdims=True)
    row, col = edge_index[0], edge_index[1]

    def multik_trig(vec2):
        """cos(k*phi), sin(k*phi) for k=1..L_max and |vec| (angle-free)."""
        r = jnp.sqrt(jnp.sum(vec2 * vec2, axis=-1, keepdims=True))
        d = vec2 / jnp.maximum(r, eps)
        c1, s1 = d[..., 0], d[..., 1]
        cs, ss = [c1], [s1]
        for _ in range(L_max - 1):
            ck, sk = cs[-1], ss[-1]
            cs.append(ck * c1 - sk * s1)
            ss.append(sk * c1 + ck * s1)
        return jnp.stack(cs, axis=-1), jnp.stack(ss, axis=-1), r[..., 0]

    def pad_k(x):            # (., L_max) -> (., KPAD) zero-padded
        return jnp.pad(x, ((0, 0), (0, KPAD - L_max))).astype(f32)

    # node frames = get_rot(pos, L_max)   (TODO(synk): get_rot not provided)
    cthk, sthk, _ = multik_trig(pos)                           # (N, L_max)

    # edge frames + distances, Bessel RBF
    edge_vec = pos[row] - pos[col]
    eck, esk, dist = multik_trig(edge_vec)
    # TODO(synk): besel_linspace not provided; clamped Bessel RBF on [eps, 1].
    nb = jnp.arange(1, r_dim + 1, dtype=f32)
    d_c = jnp.clip(dist, eps, 1.0)[:, None]
    dist_emb = jnp.sqrt(2.0) * jnp.sin(nb * jnp.pi * d_c) / d_c        # (E, r)

    # k-major expansion matrix (KPAD, Rp): row k -> lanes [k*num_rep, (k+1)*num_rep)
    lanes = jnp.arange(Rp)[None, :] // num_rep
    ks = jnp.arange(KPAD)[:, None]
    expand = ((lanes == ks) & (ks < L_max)).astype(f32)

    # gather/scatter one-hots, consumed on the MXU inside the kernel.
    # TODO(synk): switch to index-gather (scalar-prefetched row/col) +
    # edge-tiled grid once E*N*4B no longer fits the VMEM budget below.
    g_row = jax.nn.one_hot(row, N, dtype=f32)                  # (E, N) dst
    g_col = jax.nn.one_hot(col, N, dtype=f32)                  # (E, N) src

    # ------------- Node_embedding_vel inputs (TODO(synk): inferred) ---------
    is_b = is_boundary.reshape(N, 1).astype(f32)
    v_norm = jnp.linalg.norm(v, axis=-1)                                # (N, T)
    v_dot_n = jnp.sum(v * boundary_norm[:, None, :], axis=-1)           # (N, T)
    n_norm = jnp.linalg.norm(boundary_norm, axis=-1, keepdims=True)
    f_norm = jnp.linalg.norm(y_force, axis=-1, keepdims=True)
    f_dot_n = jnp.sum(y_force * boundary_norm, axis=-1, keepdims=True)
    s_feat = jnp.concatenate(
        [u, v_norm, v_dot_n, n_norm, f_norm, f_dot_n, is_b], axis=-1).astype(f32)

    # equivariant lift of the raw 2-vectors to frequencies 1..L_max
    vecs = jnp.concatenate([v, boundary_norm[:, None, :], y_force[:, None, :]],
                           axis=1)                                      # (N, P, 2)
    lc, ls, lmag = multik_trig(vecs)                                    # (N, P, L)
    ra0 = jnp.einsum('npk,kpj->nkj', lmag[..., None] * lc,
                     params['lift_w']).reshape(N, R)
    rb0 = jnp.einsum('npk,kpj->nkj', lmag[..., None] * ls,
                     params['lift_w']).reshape(N, R)
    ra0 = jnp.pad(ra0, ((0, 0), (0, Rp - R))).astype(f32)               # (N, Rp)
    rb0 = jnp.pad(rb0, ((0, 0), (0, Rp - R))).astype(f32)

    u_last = u[:, -1:].astype(f32)                                      # (N, 1)
    v_last = v[:, -1, :].astype(f32)                                    # (N, 2)

    args = [
        s_feat, ra0, rb0, dist_emb, pad_k(eck), pad_k(esk),
        pad_k(cthk), pad_k(sthk), expand, g_row, g_col, u_last, v_last,
        params['emb_w'], params['emb_b'],
        params['we1'], params['be1'], params['we2'], params['be2'],
        params['wn1'], params['bn1'], params['wn2'], params['bn2'],
        params['ln_g'], params['ln_b'], params['ln_rg'],
        params['wh1'], params['bh1'], params['wh2'], params['bh2'],
    ]

    # VMEM budget guard: whole graph + weights must stay resident.
    # (v7x has only 64 MiB physical VMEM — assert well under it.)
    arg_bytes = sum(int(a.size) * a.dtype.itemsize for a in args)
    act_bytes = 4 * (E * (4 * (2 * Rp + 32) + 256) + N * (6 * 288 + 4 * 768))
    vmem_budget = 40 * 1024 * 1024
    assert arg_bytes + act_bytes < vmem_budget, (
        f"graph too large for the fused single-block kernel: "
        f"{arg_bytes + act_bytes} B > {vmem_budget} B")

    vmem = pl.BlockSpec(memory_space=pltpu.MemorySpace.VMEM)
    out = pl.pallas_call(
        functools.partial(_fused_forward_kernel, r_real=R),
        out_shape=jax.ShapeDtypeStruct((N, 3), f32),
        in_specs=[vmem] * len(args),
        out_specs=vmem,
        compiler_params=pltpu.CompilerParams(
            vmem_limit_bytes=64 * 1024 * 1024),
    )(*args)

    u_out = out[:, 0]                   # already includes u[:, -1] residual
    v_out = out[:, 1:3]                 # already includes v[:, -1, :] residual
    return u_out, v_out


# ----------------------------------------------------------------------- main

if __name__ == "__main__":
    N, E, T = 32, 64, 4
    L_max, num_rep, r_dim, num_layers, n_scalars = 7, 16, 16, 2, 32

    key = jax.random.PRNGKey(0)
    k = jax.random.split(key, 8)
    u = jax.random.normal(k[0], (N, T), jnp.float32)
    v = jax.random.normal(k[1], (N, T, 2), jnp.float32)
    boundary_norm = jax.random.normal(k[2], (N, 2), jnp.float32)
    is_boundary = (jax.random.uniform(k[3], (N,)) > 0.5).astype(jnp.float32)
    y_force = jax.random.normal(k[4], (N, 2), jnp.float32)
    pos = jax.random.normal(k[5], (N, 2), jnp.float32)
    # random edges without self-loops (avoids zero-length edge vectors)
    src = jax.random.randint(k[6], (E,), 0, N, dtype=jnp.int32)
    off = jax.random.randint(jax.random.fold_in(k[6], 1), (E,), 0, N - 1,
                             dtype=jnp.int32)
    dst = (src + 1 + off) % N
    edge_index = jnp.stack([dst, src]).astype(jnp.int32)      # [row, col]

    params = init_params(k[7], T, L_max=L_max, num_rep=num_rep, r_dim=r_dim,
                         num_layers=num_layers, n_scalars=n_scalars)

    fwd = jax.jit(functools.partial(so2_transformer_forward,
                                    L_max=L_max, num_rep=num_rep, r_dim=r_dim))
    u_out, v_out = fwd(params, u, v, boundary_norm, is_boundary, y_force,
                       pos, edge_index)
    jax.block_until_ready((u_out, v_out))

    assert u_out.shape == (N,) and v_out.shape == (N, 2)
    assert bool(jnp.all(jnp.isfinite(u_out))) and bool(jnp.all(jnp.isfinite(v_out)))
    print("KERNEL_OK")
</pallas_src>

<mosaic_0001>
module attributes {stable_mosaic.version = 11 : i64} {
  func.func @_fused_forward_kernel(%arg0: memref<32x16xf32, #tpu.memory_space<vmem>>, %arg1: memref<32x128xf32, #tpu.memory_space<vmem>>, %arg2: memref<32x128xf32, #tpu.memory_space<vmem>>, %arg3: memref<64x16xf32, #tpu.memory_space<vmem>>, %arg4: memref<64x8xf32, #tpu.memory_space<vmem>>, %arg5: memref<64x8xf32, #tpu.memory_space<vmem>>, %arg6: memref<32x8xf32, #tpu.memory_space<vmem>>, %arg7: memref<32x8xf32, #tpu.memory_space<vmem>>, %arg8: memref<8x128xf32, #tpu.memory_space<vmem>>, %arg9: memref<64x32xf32, #tpu.memory_space<vmem>>, %arg10: memref<64x32xf32, #tpu.memory_space<vmem>>, %arg11: memref<32x1xf32, #tpu.memory_space<vmem>>, %arg12: memref<32x2xf32, #tpu.memory_space<vmem>>, %arg13: memref<16x32xf32, #tpu.memory_space<vmem>>, %arg14: memref<1x32xf32, #tpu.memory_space<vmem>>, %arg15: memref<2x80x128xf32, #tpu.memory_space<vmem>>, %arg16: memref<2x1x128xf32, #tpu.memory_space<vmem>>, %arg17: memref<2x128x288xf32, #tpu.memory_space<vmem>>, %arg18: memref<2x1x288xf32, #tpu.memory_space<vmem>>, %arg19: memref<2x192x128xf32, #tpu.memory_space<vmem>>, %arg20: memref<2x1x128xf32, #tpu.memory_space<vmem>>, %arg21: memref<2x128x160xf32, #tpu.memory_space<vmem>>, %arg22: memref<2x1x160xf32, #tpu.memory_space<vmem>>, %arg23: memref<1x32xf32, #tpu.memory_space<vmem>>, %arg24: memref<1x32xf32, #tpu.memory_space<vmem>>, %arg25: memref<1x128xf32, #tpu.memory_space<vmem>>, %arg26: memref<288x1536xf32, #tpu.memory_space<vmem>>, %arg27: memref<1x1536xf32, #tpu.memory_space<vmem>>, %arg28: memref<1536x3xf32, #tpu.memory_space<vmem>>, %arg29: memref<1x3xf32, #tpu.memory_space<vmem>>, %arg30: memref<32x3xf32, #tpu.memory_space<vmem>>) attributes {dimension_semantics = [], scalar_prefetch = 0 : i64, scratch_operands = 0 : i64, tpu.core_type = #tpu.core_type<tc>} {
    %c0 = arith.constant 0 : index
    %c0_0 = arith.constant 0 : index
    %0 = vector.load %arg0[%c0, %c0_0] : memref<32x16xf32, #tpu.memory_space<vmem>>, vector<32x16xf32>
    %c0_1 = arith.constant 0 : index
    %c0_2 = arith.constant 0 : index
    %1 = vector.load %arg13[%c0_1, %c0_2] : memref<16x32xf32, #tpu.memory_space<vmem>>, vector<16x32xf32>
    %cst = arith.constant dense<0.000000e+00> : vector<32x32xf32>
    %2 = tpu.matmul %0, %1, %cst {dimension_numbers = #tpu.dot_dimension_numbers<[1], [0], [0], [1], [0, 0, 1, 1], [], []>} : vector<32x16xf32>, vector<16x32xf32>, vector<32x32xf32> -> vector<32x32xf32>
    %c0_3 = arith.constant 0 : index
    %c0_4 = arith.constant 0 : index
    %3 = vector.load %arg14[%c0_3, %c0_4] : memref<1x32xf32, #tpu.memory_space<vmem>>, vector<1x32xf32>
    %4 = vector.broadcast %3 : vector<1x32xf32> to vector<32x32xf32>
    %5 = arith.addf %2, %4 : vector<32x32xf32>
    %6 = arith.negf %5 : vector<32x32xf32>
    %7 = math.exp %6 : vector<32x32xf32>
    %cst_5 = arith.constant 1.000000e+00 : f32
    %8 = vector.broadcast %cst_5 : f32 to vector<32x32xf32>
    %9 = arith.addf %8, %7 : vector<32x32xf32>
    %10 = arith.divf %8, %9 : vector<32x32xf32>
    %11 = arith.mulf %5, %10 : vector<32x32xf32>
    %c0_6 = arith.constant 0 : index
    %c0_7 = arith.constant 0 : index
    %12 = vector.load %arg1[%c0_6, %c0_7] : memref<32x128xf32, #tpu.memory_space<vmem>>, vector<32x128xf32>
    %c0_8 = arith.constant 0 : index
    %c0_9 = arith.constant 0 : index
    %13 = vector.load %arg2[%c0_8, %c0_9] : memref<32x128xf32, #tpu.memory_space<vmem>>, vector<32x128xf32>
    %c0_10 = arith.constant 0 : index
    %c0_11 = arith.constant 0 : index
    %14 = vector.load %arg8[%c0_10, %c0_11] : memref<8x128xf32, #tpu.memory_space<vmem>>, vector<8x128xf32>
    %c0_12 = arith.constant 0 : index
    %c0_13 = arith.constant 0 : index
    %15 = vector.load %arg4[%c0_12, %c0_13] : memref<64x8xf32, #tpu.memory_space<vmem>>, vector<64x8xf32>
    %cst_14 = arith.constant dense<0.000000e+00> : vector<64x128xf32>
    %16 = tpu.matmul %15, %14, %cst_14 {dimension_numbers = #tpu.dot_dimension_numbers<[1], [0], [0], [1], [0, 0, 1, 1], [], []>} : vector<64x8xf32>, vector<8x128xf32>, vector<64x128xf32> -> vector<64x128xf32>
    %c0_15 = arith.constant 0 : index
    %c0_16 = arith.constant 0 : index
    %17 = vector.load %arg5[%c0_15, %c0_16] : memref<64x8xf32, #tpu.memory_space<vmem>>, vector<64x8xf32>
    %cst_17 = arith.constant dense<0.000000e+00> : vector<64x128xf32>
    %18 = tpu.matmul %17, %14, %cst_17 {dimension_numbers = #tpu.dot_dimension_numbers<[1], [0], [0], [1], [0, 0, 1, 1], [], []>} : vector<64x8xf32>, vector<8x128xf32>, vector<64x128xf32> -> vector<64x128xf32>
    %c0_18 = arith.constant 0 : index
    %c0_19 = arith.constant 0 : index
    %19 = vector.load %arg6[%c0_18, %c0_19] : memref<32x8xf32, #tpu.memory_space<vmem>>, vector<32x8xf32>
    %cst_20 = arith.constant dense<0.000000e+00> : vector<32x128xf32>
    %20 = tpu.matmul %19, %14, %cst_20 {dimension_numbers = #tpu.dot_dimension_numbers<[1], [0], [0], [1], [0, 0, 1, 1], [], []>} : vector<32x8xf32>, vector<8x128xf32>, vector<32x128xf32> -> vector<32x128xf32>
    %c0_21 = arith.constant 0 : index
    %c0_22 = arith.constant 0 : index
    %21 = vector.load %arg7[%c0_21, %c0_22] : memref<32x8xf32, #tpu.memory_space<vmem>>, vector<32x8xf32>
    %cst_23 = arith.constant dense<0.000000e+00> : vector<32x128xf32>
    %22 = tpu.matmul %21, %14, %cst_23 {dimension_numbers = #tpu.dot_dimension_numbers<[1], [0], [0], [1], [0, 0, 1, 1], [], []>} : vector<32x8xf32>, vector<8x128xf32>, vector<32x128xf32> -> vector<32x128xf32>
    %c0_24 = arith.constant 0 : index
    %c0_25 = arith.constant 0 : index
    %23 = vector.load %arg3[%c0_24, %c0_25] : memref<64x16xf32, #tpu.memory_space<vmem>>, vector<64x16xf32>
    %c0_26 = arith.constant 0 : index
    %c0_27 = arith.constant 0 : index
    %24 = vector.load %arg9[%c0_26, %c0_27] : memref<64x32xf32, #tpu.memory_space<vmem>>, vector<64x32xf32>
    %c0_28 = arith.constant 0 : index
    %c0_29 = arith.constant 0 : index
    %25 = vector.load %arg10[%c0_28, %c0_29] : memref<64x32xf32, #tpu.memory_space<vmem>>, vector<64x32xf32>
    %26 = tpu.concatenate %12, %13, %11 in 1 : vector<32x128xf32>, vector<32x128xf32>, vector<32x32xf32> -> vector<32x288xf32>
    %cst_30 = arith.constant dense<0.000000e+00> : vector<64x288xf32>
    %27 = tpu.matmul %25, %26, %cst_30 {dimension_numbers = #tpu.dot_dimension_numbers<[1], [0], [0], [1], [0, 0, 1, 1], [], []>} : vector<64x32xf32>, vector<32x288xf32>, vector<64x288xf32> -> vector<64x288xf32>
    %28 = vector.extract_strided_slice %27 {offsets = [0, 0], sizes = [64, 128], strides = [1, 1]} : vector<64x288xf32> to vector<64x128xf32>
    %29 = vector.extract_strided_slice %27 {offsets = [0, 128], sizes = [64, 128], strides = [1, 1]} : vector<64x288xf32> to vector<64x128xf32>
    %30 = vector.extract_strided_slice %27 {offsets = [0, 256], sizes = [64, 32], strides = [1, 1]} : vector<64x288xf32> to vector<64x32xf32>
    %cst_31 = arith.constant dense<0.000000e+00> : vector<64x32xf32>
    %31 = tpu.matmul %24, %11, %cst_31 {dimension_numbers = #tpu.dot_dimension_numbers<[1], [0], [0], [1], [0, 0, 1, 1], [], []>} : vector<64x32xf32>, vector<32x32xf32>, vector<64x32xf32> -> vector<64x32xf32>
    %32 = tpu.concatenate %31, %30, %23 in 1 : vector<64x32xf32>, vector<64x32xf32>, vector<64x16xf32> -> vector<64x80xf32>
    %c0_32 = arith.constant 0 : index
    %c0_33 = arith.constant 0 : index
    %c0_34 = arith.constant 0 : index
    %33 = vector.load %arg15[%c0_32, %c0_33, %c0_34] : memref<2x80x128xf32, #tpu.memory_space<vmem>>, vector<1x80x128xf32>
    %34 = vector.shape_cast %33 : vector<1x80x128xf32> to vector<80x128xf32>
    %cst_35 = arith.constant dense<0.000000e+00> : vector<64x128xf32>
    %35 = tpu.matmul %32, %34, %cst_35 {dimension_numbers = #tpu.dot_dimension_numbers<[1], [0], [0], [1], [0, 0, 1, 1], [], []>} : vector<64x80xf32>, vector<80x128xf32>, vector<64x128xf32> -> vector<64x128xf32>
    %c0_36 = arith.constant 0 : index
    %c0_37 = arith.constant 0 : index
    %c0_38 = arith.constant 0 : index
    %36 = vector.load %arg16[%c0_36, %c0_37, %c0_38] : memref<2x1x128xf32, #tpu.memory_space<vmem>>, vector<1x1x128xf32>
    %37 = vector.shape_cast %36 : vector<1x1x128xf32> to vector<1x128xf32>
    %38 = vector.broadcast %37 : vector<1x128xf32> to vector<64x128xf32>
    %39 = arith.addf %35, %38 : vector<64x128xf32>
    %40 = arith.negf %39 : vector<64x128xf32>
    %41 = math.exp %40 : vector<64x128xf32>
    %cst_39 = arith.constant 1.000000e+00 : f32
    %42 = vector.broadcast %cst_39 : f32 to vector<64x128xf32>
    %43 = arith.addf %42, %41 : vector<64x128xf32>
    %44 = arith.divf %42, %43 : vector<64x128xf32>
    %45 = arith.mulf %39, %44 : vector<64x128xf32>
    %c0_40 = arith.constant 0 : index
    %c0_41 = arith.constant 0 : index
    %c0_42 = arith.constant 0 : index
    %46 = vector.load %arg17[%c0_40, %c0_41, %c0_42] : memref<2x128x288xf32, #tpu.memory_space<vmem>>, vector<1x128x288xf32>
    %47 = vector.shape_cast %46 : vector<1x128x288xf32> to vector<128x288xf32>
    %cst_43 = arith.constant dense<0.000000e+00> : vector<64x288xf32>
    %48 = tpu.matmul %45, %47, %cst_43 {dimension_numbers = #tpu.dot_dimension_numbers<[1], [0], [0], [1], [0, 0, 1, 1], [], []>} : vector<64x128xf32>, vector<128x288xf32>, vector<64x288xf32> -> vector<64x288xf32>
    %c0_44 = arith.constant 0 : index
    %c0_45 = arith.constant 0 : index
    %c0_46 = arith.constant 0 : index
    %49 = vector.load %arg18[%c0_44, %c0_45, %c0_46] : memref<2x1x288xf32, #tpu.memory_space<vmem>>, vector<1x1x288xf32>
    %50 = vector.shape_cast %49 : vector<1x1x288xf32> to vector<1x288xf32>
    %51 = vector.broadcast %50 : vector<1x288xf32> to vector<64x288xf32>
    %52 = arith.addf %48, %51 : vector<64x288xf32>
    %53 = vector.extract_strided_slice %52 {offsets = [0, 0], sizes = [64, 128], strides = [1, 1]} : vector<64x288xf32> to vector<64x128xf32>
    %54 = arith.negf %53 : vector<64x128xf32>
    %55 = math.exp %54 : vector<64x128xf32>
    %cst_47 = arith.constant 1.000000e+00 : f32
    %56 = vector.broadcast %cst_47 : f32 to vector<64x128xf32>
    %57 = arith.addf %56, %55 : vector<64x128xf32>
    %58 = arith.divf %56, %57 : vector<64x128xf32>
    %59 = vector.extract_strided_slice %52 {offsets = [0, 128], sizes = [64, 128], strides = [1, 1]} : vector<64x288xf32> to vector<64x128xf32>
    %60 = vector.extract_strided_slice %52 {offsets = [0, 256], sizes = [64, 32], strides = [1, 1]} : vector<64x288xf32> to vector<64x32xf32>
    %61 = arith.negf %60 : vector<64x32xf32>
    %62 = math.exp %61 : vector<64x32xf32>
    %cst_48 = arith.constant 1.000000e+00 : f32
    %63 = vector.broadcast %cst_48 : f32 to vector<64x32xf32>
    %64 = arith.addf %63, %62 : vector<64x32xf32>
    %65 = arith.divf %63, %64 : vector<64x32xf32>
    %66 = arith.mulf %60, %65 : vector<64x32xf32>
    %67 = arith.mulf %58, %28 : vector<64x128xf32>
    %68 = arith.mulf %59, %16 : vector<64x128xf32>
    %69 = arith.addf %67, %68 : vector<64x128xf32>
    %70 = arith.mulf %58, %29 : vector<64x128xf32>
    %71 = arith.mulf %59, %18 : vector<64x128xf32>
    %72 = arith.addf %70, %71 : vector<64x128xf32>
    %73 = tpu.concatenate %69, %72, %66 in 1 : vector<64x128xf32>, vector<64x128xf32>, vector<64x32xf32> -> vector<64x288xf32>
    %cst_49 = arith.constant dense<0.000000e+00> : vector<32x288xf32>
    %74 = tpu.matmul %24, %73, %cst_49 {dimension_numbers = #tpu.dot_dimension_numbers<[0], [0], [1], [1], [0, 1, 1, 1], [], []>} : vector<64x32xf32>, vector<64x288xf32>, vector<32x288xf32> -> vector<32x288xf32>
    %75 = vector.extract_strided_slice %74 {offsets = [0, 0], sizes = [32, 128], strides = [1, 1]} : vector<32x288xf32> to vector<32x128xf32>
    %76 = vector.extract_strided_slice %74 {offsets = [0, 128], sizes = [32, 128], strides = [1, 1]} : vector<32x288xf32> to vector<32x128xf32>
    %77 = vector.extract_strided_slice %74 {offsets = [0, 256], sizes = [32, 32], strides = [1, 1]} : vector<32x288xf32> to vector<32x32xf32>
    %78 = arith.mulf %75, %75 : vector<32x128xf32>
    %79 = arith.mulf %76, %76 : vector<32x128xf32>
    %80 = arith.addf %78, %79 : vector<32x128xf32>
    %cst_50 = arith.constant 9.99999993E-9 : f32
    %81 = vector.broadcast %cst_50 : f32 to vector<32x128xf32>
    %82 = arith.addf %80, %81 : vector<32x128xf32>
    %83 = math.sqrt %82 : vector<32x128xf32>
    %84 = tpu.concatenate %83, %11, %77 in 1 : vector<32x128xf32>, vector<32x32xf32>, vector<32x32xf32> -> vector<32x192xf32>
    %c0_51 = arith.constant 0 : index
    %c0_52 = arith.constant 0 : index
    %c0_53 = arith.constant 0 : index
    %85 = vector.load %arg19[%c0_51, %c0_52, %c0_53] : memref<2x192x128xf32, #tpu.memory_space<vmem>>, vector<1x192x128xf32>
    %86 = vector.shape_cast %85 : vector<1x192x128xf32> to vector<192x128xf32>
    %cst_54 = arith.constant dense<0.000000e+00> : vector<32x128xf32>
    %87 = tpu.matmul %84, %86, %cst_54 {dimension_numbers = #tpu.dot_dimension_numbers<[1], [0], [0], [1], [0, 0, 1, 1], [], []>} : vector<32x192xf32>, vector<192x128xf32>, vector<32x128xf32> -> vector<32x128xf32>
    %c0_55 = arith.constant 0 : index
    %c0_56 = arith.constant 0 : index
    %c0_57 = arith.constant 0 : index
    %88 = vector.load %arg20[%c0_55, %c0_56, %c0_57] : memref<2x1x128xf32, #tpu.memory_space<vmem>>, vector<1x1x128xf32>
    %89 = vector.shape_cast %88 : vector<1x1x128xf32> to vector<1x128xf32>
    %90 = vector.broadcast %89 : vector<1x128xf32> to vector<32x128xf32>
    %91 = arith.addf %87, %90 : vector<32x128xf32>
    %92 = arith.negf %91 : vector<32x128xf32>
    %93 = math.exp %92 : vector<32x128xf32>
    %cst_58 = arith.constant 1.000000e+00 : f32
    %94 = vector.broadcast %cst_58 : f32 to vector<32x128xf32>
    %95 = arith.addf %94, %93 : vector<32x128xf32>
    %96 = arith.divf %94, %95 : vector<32x128xf32>
    %97 = arith.mulf %91, %96 : vector<32x128xf32>
    %c0_59 = arith.constant 0 : index
    %c0_60 = arith.constant 0 : index
    %c0_61 = arith.constant 0 : index
    %98 = vector.load %arg21[%c0_59, %c0_60, %c0_61] : memref<2x128x160xf32, #tpu.memory_space<vmem>>, vector<1x128x160xf32>
    %99 = vector.shape_cast %98 : vector<1x128x160xf32> to vector<128x160xf32>
    %cst_62 = arith.constant dense<0.000000e+00> : vector<32x160xf32>
    %100 = tpu.matmul %97, %99, %cst_62 {dimension_numbers = #tpu.dot_dimension_numbers<[1], [0], [0], [1], [0, 0, 1, 1], [], []>} : vector<32x128xf32>, vector<128x160xf32>, vector<32x160xf32> -> vector<32x160xf32>
    %c0_63 = arith.constant 0 : index
    %c0_64 = arith.constant 0 : index
    %c0_65 = arith.constant 0 : index
    %101 = vector.load %arg22[%c0_63, %c0_64, %c0_65] : memref<2x1x160xf32, #tpu.memory_space<vmem>>, vector<1x1x160xf32>
    %102 = vector.shape_cast %101 : vector<1x1x160xf32> to vector<1x160xf32>
    %103 = vector.broadcast %102 : vector<1x160xf32> to vector<32x160xf32>
    %104 = arith.addf %100, %103 : vector<32x160xf32>
    %105 = vector.extract_strided_slice %104 {offsets = [0, 0], sizes = [32, 128], strides = [1, 1]} : vector<32x160xf32> to vector<32x128xf32>
    %106 = arith.negf %105 : vector<32x128xf32>
    %107 = math.exp %106 : vector<32x128xf32>
    %cst_66 = arith.constant 1.000000e+00 : f32
    %108 = vector.broadcast %cst_66 : f32 to vector<32x128xf32>
    %109 = arith.addf %108, %107 : vector<32x128xf32>
    %110 = arith.divf %108, %109 : vector<32x128xf32>
    %111 = vector.extract_strided_slice %104 {offsets = [0, 128], sizes = [32, 32], strides = [1, 1]} : vector<32x160xf32> to vector<32x32xf32>
    %112 = arith.addf %11, %111 : vector<32x32xf32>
    %113 = arith.mulf %110, %75 : vector<32x128xf32>
    %114 = arith.addf %12, %113 : vector<32x128xf32>
    %115 = arith.mulf %110, %76 : vector<32x128xf32>
    %116 = arith.addf %13, %115 : vector<32x128xf32>
    %117 = tpu.concatenate %114, %116, %112 in 1 : vector<32x128xf32>, vector<32x128xf32>, vector<32x32xf32> -> vector<32x288xf32>
    %cst_67 = arith.constant dense<0.000000e+00> : vector<64x288xf32>
    %118 = tpu.matmul %25, %117, %cst_67 {dimension_numbers = #tpu.dot_dimension_numbers<[1], [0], [0], [1], [0, 0, 1, 1], [], []>} : vector<64x32xf32>, vector<32x288xf32>, vector<64x288xf32> -> vector<64x288xf32>
    %119 = vector.extract_strided_slice %118 {offsets = [0, 0], sizes = [64, 128], strides = [1, 1]} : vector<64x288xf32> to vector<64x128xf32>
    %120 = vector.extract_strided_slice %118 {offsets = [0, 128], sizes = [64, 128], strides = [1, 1]} : vector<64x288xf32> to vector<64x128xf32>
    %121 = vector.extract_strided_slice %118 {offsets = [0, 256], sizes = [64, 32], strides = [1, 1]} : vector<64x288xf32> to vector<64x32xf32>
    %cst_68 = arith.constant dense<0.000000e+00> : vector<64x32xf32>
    %122 = tpu.matmul %24, %112, %cst_68 {dimension_numbers = #tpu.dot_dimension_numbers<[1], [0], [0], [1], [0, 0, 1, 1], [], []>} : vector<64x32xf32>, vector<32x32xf32>, vector<64x32xf32> -> vector<64x32xf32>
    %123 = tpu.concatenate %122, %121, %23 in 1 : vector<64x32xf32>, vector<64x32xf32>, vector<64x16xf32> -> vector<64x80xf32>
    %c1 = arith.constant 1 : index
    %c0_69 = arith.constant 0 : index
    %c0_70 = arith.constant 0 : index
    %124 = vector.load %arg15[%c1, %c0_69, %c0_70] : memref<2x80x128xf32, #tpu.memory_space<vmem>>, vector<1x80x128xf32>
    %125 = vector.shape_cast %124 : vector<1x80x128xf32> to vector<80x128xf32>
    %cst_71 = arith.constant dense<0.000000e+00> : vector<64x128xf32>
    %126 = tpu.matmul %123, %125, %cst_71 {dimension_numbers = #tpu.dot_dimension_numbers<[1], [0], [0], [1], [0, 0, 1, 1], [], []>} : vector<64x80xf32>, vector<80x128xf32>, vector<64x128xf32> -> vector<64x128xf32>
    %c1_72 = arith.constant 1 : index
    %c0_73 = arith.constant 0 : index
    %c0_74 = arith.constant 0 : index
    %127 = vector.load %arg16[%c1_72, %c0_73, %c0_74] : memref<2x1x128xf32, #tpu.memory_space<vmem>>, vector<1x1x128xf32>
    %128 = vector.shape_cast %127 : vector<1x1x128xf32> to vector<1x128xf32>
    %129 = vector.broadcast %128 : vector<1x128xf32> to vector<64x128xf32>
    %130 = arith.addf %126, %129 : vector<64x128xf32>
    %131 = arith.negf %130 : vector<64x128xf32>
    %132 = math.exp %131 : vector<64x128xf32>
    %cst_75 = arith.constant 1.000000e+00 : f32
    %133 = vector.broadcast %cst_75 : f32 to vector<64x128xf32>
    %134 = arith.addf %133, %132 : vector<64x128xf32>
    %135 = arith.divf %133, %134 : vector<64x128xf32>
    %136 = arith.mulf %130, %135 : vector<64x128xf32>
    %c1_76 = arith.constant 1 : index
    %c0_77 = arith.constant 0 : index
    %c0_78 = arith.constant 0 : index
    %137 = vector.load %arg17[%c1_76, %c0_77, %c0_78] : memref<2x128x288xf32, #tpu.memory_space<vmem>>, vector<1x128x288xf32>
    %138 = vector.shape_cast %137 : vector<1x128x288xf32> to vector<128x288xf32>
    %cst_79 = arith.constant dense<0.000000e+00> : vector<64x288xf32>
    %139 = tpu.matmul %136, %138, %cst_79 {dimension_numbers = #tpu.dot_dimension_numbers<[1], [0], [0], [1], [0, 0, 1, 1], [], []>} : vector<64x128xf32>, vector<128x288xf32>, vector<64x288xf32> -> vector<64x288xf32>
    %c1_80 = arith.constant 1 : index
    %c0_81 = arith.constant 0 : index
    %c0_82 = arith.constant 0 : index
    %140 = vector.load %arg18[%c1_80, %c0_81, %c0_82] : memref<2x1x288xf32, #tpu.memory_space<vmem>>, vector<1x1x288xf32>
    %141 = vector.shape_cast %140 : vector<1x1x288xf32> to vector<1x288xf32>
    %142 = vector.broadcast %141 : vector<1x288xf32> to vector<64x288xf32>
    %143 = arith.addf %139, %142 : vector<64x288xf32>
    %144 = vector.extract_strided_slice %143 {offsets = [0, 0], sizes = [64, 128], strides = [1, 1]} : vector<64x288xf32> to vector<64x128xf32>
    %145 = arith.negf %144 : vector<64x128xf32>
    %146 = math.exp %145 : vector<64x128xf32>
    %cst_83 = arith.constant 1.000000e+00 : f32
    %147 = vector.broadcast %cst_83 : f32 to vector<64x128xf32>
    %148 = arith.addf %147, %146 : vector<64x128xf32>
    %149 = arith.divf %147, %148 : vector<64x128xf32>
    %150 = vector.extract_strided_slice %143 {offsets = [0, 128], sizes = [64, 128], strides = [1, 1]} : vector<64x288xf32> to vector<64x128xf32>
    %151 = vector.extract_strided_slice %143 {offsets = [0, 256], sizes = [64, 32], strides = [1, 1]} : vector<64x288xf32> to vector<64x32xf32>
    %152 = arith.negf %151 : vector<64x32xf32>
    %153 = math.exp %152 : vector<64x32xf32>
    %cst_84 = arith.constant 1.000000e+00 : f32
    %154 = vector.broadcast %cst_84 : f32 to vector<64x32xf32>
    %155 = arith.addf %154, %153 : vector<64x32xf32>
    %156 = arith.divf %154, %155 : vector<64x32xf32>
    %157 = arith.mulf %151, %156 : vector<64x32xf32>
    %158 = arith.mulf %149, %119 : vector<64x128xf32>
    %159 = arith.mulf %150, %16 : vector<64x128xf32>
    %160 = arith.addf %158, %159 : vector<64x128xf32>
    %161 = arith.mulf %149, %120 : vector<64x128xf32>
    %162 = arith.mulf %150, %18 : vector<64x128xf32>
    %163 = arith.addf %161, %162 : vector<64x128xf32>
    %164 = tpu.concatenate %160, %163, %157 in 1 : vector<64x128xf32>, vector<64x128xf32>, vector<64x32xf32> -> vector<64x288xf32>
    %cst_85 = arith.constant dense<0.000000e+00> : vector<32x288xf32>
    %165 = tpu.matmul %24, %164, %cst_85 {dimension_numbers = #tpu.dot_dimension_numbers<[0], [0], [1], [1], [0, 1, 1, 1], [], []>} : vector<64x32xf32>, vector<64x288xf32>, vector<32x288xf32> -> vector<32x288xf32>
    %166 = vector.extract_strided_slice %165 {offsets = [0, 0], sizes = [32, 128], strides = [1, 1]} : vector<32x288xf32> to vector<32x128xf32>
    %167 = vector.extract_strided_slice %165 {offsets = [0, 128], sizes = [32, 128], strides = [1, 1]} : vector<32x288xf32> to vector<32x128xf32>
    %168 = vector.extract_strided_slice %165 {offsets = [0, 256], sizes = [32, 32], strides = [1, 1]} : vector<32x288xf32> to vector<32x32xf32>
    %169 = arith.mulf %166, %166 : vector<32x128xf32>
    %170 = arith.mulf %167, %167 : vector<32x128xf32>
    %171 = arith.addf %169, %170 : vector<32x128xf32>
    %cst_86 = arith.constant 9.99999993E-9 : f32
    %172 = vector.broadcast %cst_86 : f32 to vector<32x128xf32>
    %173 = arith.addf %171, %172 : vector<32x128xf32>
    %174 = math.sqrt %173 : vector<32x128xf32>
    %175 = tpu.concatenate %174, %112, %168 in 1 : vector<32x128xf32>, vector<32x32xf32>, vector<32x32xf32> -> vector<32x192xf32>
    %c1_87 = arith.constant 1 : index
    %c0_88 = arith.constant 0 : index
    %c0_89 = arith.constant 0 : index
    %176 = vector.load %arg19[%c1_87, %c0_88, %c0_89] : memref<2x192x128xf32, #tpu.memory_space<vmem>>, vector<1x192x128xf32>
    %177 = vector.shape_cast %176 : vector<1x192x128xf32> to vector<192x128xf32>
    %cst_90 = arith.constant dense<0.000000e+00> : vector<32x128xf32>
    %178 = tpu.matmul %175, %177, %cst_90 {dimension_numbers = #tpu.dot_dimension_numbers<[1], [0], [0], [1], [0, 0, 1, 1], [], []>} : vector<32x192xf32>, vector<192x128xf32>, vector<32x128xf32> -> vector<32x128xf32>
    %c1_91 = arith.constant 1 : index
    %c0_92 = arith.constant 0 : index
    %c0_93 = arith.constant 0 : index
    %179 = vector.load %arg20[%c1_91, %c0_92, %c0_93] : memref<2x1x128xf32, #tpu.memory_space<vmem>>, vector<1x1x128xf32>
    %180 = vector.shape_cast %179 : vector<1x1x128xf32> to vector<1x128xf32>
    %181 = vector.broadcast %180 : vector<1x128xf32> to vector<32x128xf32>
    %182 = arith.addf %178, %181 : vector<32x128xf32>
    %183 = arith.negf %182 : vector<32x128xf32>
    %184 = math.exp %183 : vector<32x128xf32>
    %cst_94 = arith.constant 1.000000e+00 : f32
    %185 = vector.broadcast %cst_94 : f32 to vector<32x128xf32>
    %186 = arith.addf %185, %184 : vector<32x128xf32>
    %187 = arith.divf %185, %186 : vector<32x128xf32>
    %188 = arith.mulf %182, %187 : vector<32x128xf32>
    %c1_95 = arith.constant 1 : index
    %c0_96 = arith.constant 0 : index
    %c0_97 = arith.constant 0 : index
    %189 = vector.load %arg21[%c1_95, %c0_96, %c0_97] : memref<2x128x160xf32, #tpu.memory_space<vmem>>, vector<1x128x160xf32>
    %190 = vector.shape_cast %189 : vector<1x128x160xf32> to vector<128x160xf32>
    %cst_98 = arith.constant dense<0.000000e+00> : vector<32x160xf32>
    %191 = tpu.matmul %188, %190, %cst_98 {dimension_numbers = #tpu.dot_dimension_numbers<[1], [0], [0], [1], [0, 0, 1, 1], [], []>} : vector<32x128xf32>, vector<128x160xf32>, vector<32x160xf32> -> vector<32x160xf32>
    %c1_99 = arith.constant 1 : index
    %c0_100 = arith.constant 0 : index
    %c0_101 = arith.constant 0 : index
    %192 = vector.load %arg22[%c1_99, %c0_100, %c0_101] : memref<2x1x160xf32, #tpu.memory_space<vmem>>, vector<1x1x160xf32>
    %193 = vector.shape_cast %192 : vector<1x1x160xf32> to vector<1x160xf32>
    %194 = vector.broadcast %193 : vector<1x160xf32> to vector<32x160xf32>
    %195 = arith.addf %191, %194 : vector<32x160xf32>
    %196 = vector.extract_strided_slice %195 {offsets = [0, 0], sizes = [32, 128], strides = [1, 1]} : vector<32x160xf32> to vector<32x128xf32>
    %197 = arith.negf %196 : vector<32x128xf32>
    %198 = math.exp %197 : vector<32x128xf32>
    %cst_102 = arith.constant 1.000000e+00 : f32
    %199 = vector.broadcast %cst_102 : f32 to vector<32x128xf32>
    %200 = arith.addf %199, %198 : vector<32x128xf32>
    %201 = arith.divf %199, %200 : vector<32x128xf32>
    %202 = vector.extract_strided_slice %195 {offsets = [0, 128], sizes = [32, 32], strides = [1, 1]} : vector<32x160xf32> to vector<32x32xf32>
    %203 = arith.addf %112, %202 : vector<32x32xf32>
    %204 = arith.mulf %201, %166 : vector<32x128xf32>
    %205 = arith.addf %114, %204 : vector<32x128xf32>
    %206 = arith.mulf %201, %167 : vector<32x128xf32>
    %207 = arith.addf %116, %206 : vector<32x128xf32>
    %cst_103 = arith.constant dense<0.000000e+00> : vector<32xf32>
    %208 = vector.multi_reduction <add>, %203, %cst_103 [1] : vector<32x32xf32> to vector<32xf32>
    %209 = vector.shape_cast %208 : vector<32xf32> to vector<32x1xf32>
    %cst_104 = arith.constant 3.200000e+01 : f32
    %210 = vector.broadcast %cst_104 : f32 to vector<32x1xf32>
    %211 = arith.divf %209, %210 : vector<32x1xf32>
    %212 = vector.broadcast %211 : vector<32x1xf32> to vector<32x32xf32>
    %213 = arith.subf %203, %212 : vector<32x32xf32>
    %214 = arith.mulf %213, %213 : vector<32x32xf32>
    %cst_105 = arith.constant dense<0.000000e+00> : vector<32xf32>
    %215 = vector.multi_reduction <add>, %214, %cst_105 [1] : vector<32x32xf32> to vector<32xf32>
    %216 = vector.shape_cast %215 : vector<32xf32> to vector<32x1xf32>
    %cst_106 = arith.constant 3.200000e+01 : f32
    %217 = vector.broadcast %cst_106 : f32 to vector<32x1xf32>
    %218 = arith.divf %216, %217 : vector<32x1xf32>
    %cst_107 = arith.constant 9.99999974E-6 : f32
    %219 = vector.broadcast %cst_107 : f32 to vector<32x1xf32>
    %220 = arith.addf %218, %219 : vector<32x1xf32>
    %221 = math.rsqrt %220 : vector<32x1xf32>
    %222 = vector.broadcast %221 : vector<32x1xf32> to vector<32x32xf32>
    %223 = arith.mulf %213, %222 : vector<32x32xf32>
    %c0_108 = arith.constant 0 : index
    %c0_109 = arith.constant 0 : index
    %224 = vector.load %arg23[%c0_108, %c0_109] : memref<1x32xf32, #tpu.memory_space<vmem>>, vector<1x32xf32>
    %225 = vector.broadcast %224 : vector<1x32xf32> to vector<32x32xf32>
    %226 = arith.mulf %223, %225 : vector<32x32xf32>
    %c0_110 = arith.constant 0 : index
    %c0_111 = arith.constant 0 : index
    %227 = vector.load %arg24[%c0_110, %c0_111] : memref<1x32xf32, #tpu.memory_space<vmem>>, vector<1x32xf32>
    %228 = vector.broadcast %227 : vector<1x32xf32> to vector<32x32xf32>
    %229 = arith.addf %226, %228 : vector<32x32xf32>
    %230 = arith.mulf %205, %205 : vector<32x128xf32>
    %231 = arith.mulf %207, %207 : vector<32x128xf32>
    %232 = arith.addf %230, %231 : vector<32x128xf32>
    %cst_112 = arith.constant dense<0.000000e+00> : vector<32xf32>
    %233 = vector.multi_reduction <add>, %232, %cst_112 [1] : vector<32x128xf32> to vector<32xf32>
    %234 = vector.shape_cast %233 : vector<32xf32> to vector<32x1xf32>
    %cst_113 = arith.constant 0.00892857183 : f32
    %235 = vector.broadcast %cst_113 : f32 to vector<32x1xf32>
    %236 = arith.mulf %234, %235 : vector<32x1xf32>
    %cst_114 = arith.constant 9.99999974E-6 : f32
    %237 = vector.broadcast %cst_114 : f32 to vector<32x1xf32>
    %238 = arith.addf %236, %237 : vector<32x1xf32>
    %239 = math.rsqrt %238 : vector<32x1xf32>
    %c0_115 = arith.constant 0 : index
    %c0_116 = arith.constant 0 : index
    %240 = vector.load %arg25[%c0_115, %c0_116] : memref<1x128xf32, #tpu.memory_space<vmem>>, vector<1x128xf32>
    %241 = vector.broadcast %239 : vector<32x1xf32> to vector<32x128xf32>
    %242 = arith.mulf %205, %241 : vector<32x128xf32>
    %243 = vector.broadcast %240 : vector<1x128xf32> to vector<32x128xf32>
    %244 = arith.mulf %242, %243 : vector<32x128xf32>
    %245 = vector.broadcast %239 : vector<32x1xf32> to vector<32x128xf32>
    %246 = arith.mulf %207, %245 : vector<32x128xf32>
    %247 = vector.broadcast %240 : vector<1x128xf32> to vector<32x128xf32>
    %248 = arith.mulf %246, %247 : vector<32x128xf32>
    %249 = arith.mulf %244, %20 : vector<32x128xf32>
    %250 = arith.mulf %248, %22 : vector<32x128xf32>
    %251 = arith.subf %249, %250 : vector<32x128xf32>
    %252 = arith.mulf %244, %22 : vector<32x128xf32>
    %253 = arith.mulf %248, %20 : vector<32x128xf32>
    %254 = arith.addf %252, %253 : vector<32x128xf32>
    %255 = tpu.concatenate %251, %254, %229 in 1 : vector<32x128xf32>, vector<32x128xf32>, vector<32x32xf32> -> vector<32x288xf32>
    %c0_117 = arith.constant 0 : index
    %c0_118 = arith.constant 0 : index
    %256 = vector.load %arg26[%c0_117, %c0_118] : memref<288x1536xf32, #tpu.memory_space<vmem>>, vector<288x1536xf32>
    %cst_119 = arith.constant dense<0.000000e+00> : vector<32x1536xf32>
    %257 = tpu.matmul %255, %256, %cst_119 {dimension_numbers = #tpu.dot_dimension_numbers<[1], [0], [0], [1], [0, 0, 1, 1], [], []>} : vector<32x288xf32>, vector<288x1536xf32>, vector<32x1536xf32> -> vector<32x1536xf32>
    %c0_120 = arith.constant 0 : index
    %c0_121 = arith.constant 0 : index
    %258 = vector.load %arg27[%c0_120, %c0_121] : memref<1x1536xf32, #tpu.memory_space<vmem>>, vector<1x1536xf32>
    %259 = vector.broadcast %258 : vector<1x1536xf32> to vector<32x1536xf32>
    %260 = arith.addf %257, %259 : vector<32x1536xf32>
    %cst_122 = arith.constant 0.000000e+00 : f32
    %261 = vector.broadcast %cst_122 : f32 to vector<32x1536xf32>
    %262 = arith.cmpf oge, %260, %261 : vector<32x1536xf32>
    %cst_123 = arith.constant 0.00999999977 : f32
    %263 = vector.broadcast %cst_123 : f32 to vector<32x1536xf32>
    %264 = arith.mulf %263, %260 : vector<32x1536xf32>
    %265 = arith.select %262, %260, %264 : vector<32x1536xi1>, vector<32x1536xf32>
    %c0_124 = arith.constant 0 : index
    %c0_125 = arith.constant 0 : index
    %266 = vector.load %arg28[%c0_124, %c0_125] : memref<1536x3xf32, #tpu.memory_space<vmem>>, vector<1536x3xf32>
    %cst_126 = arith.constant dense<0.000000e+00> : vector<32x3xf32>
    %267 = tpu.matmul %265, %266, %cst_126 {dimension_numbers = #tpu.dot_dimension_numbers<[1], [0], [0], [1], [0, 0, 1, 1], [], []>} : vector<32x1536xf32>, vector<1536x3xf32>, vector<32x3xf32> -> vector<32x3xf32>
    %c0_127 = arith.constant 0 : index
    %c0_128 = arith.constant 0 : index
    %268 = vector.load %arg29[%c0_127, %c0_128] : memref<1x3xf32, #tpu.memory_space<vmem>>, vector<1x3xf32>
    %269 = vector.broadcast %268 : vector<1x3xf32> to vector<32x3xf32>
    %270 = arith.addf %267, %269 : vector<32x3xf32>
    %271 = vector.extract_strided_slice %20 {offsets = [0, 0], sizes = [32, 1], strides = [1, 1]} : vector<32x128xf32> to vector<32x1xf32>
    %272 = vector.extract_strided_slice %22 {offsets = [0, 0], sizes = [32, 1], strides = [1, 1]} : vector<32x128xf32> to vector<32x1xf32>
    %273 = vector.extract_strided_slice %270 {offsets = [0, 1], sizes = [32, 1], strides = [1, 1]} : vector<32x3xf32> to vector<32x1xf32>
    %274 = vector.extract_strided_slice %270 {offsets = [0, 2], sizes = [32, 1], strides = [1, 1]} : vector<32x3xf32> to vector<32x1xf32>
    %275 = arith.mulf %273, %271 : vector<32x1xf32>
    %276 = arith.mulf %274, %272 : vector<32x1xf32>
    %277 = arith.addf %275, %276 : vector<32x1xf32>
    %cst_129 = arith.constant 0.000000e+00 : f32
    %278 = vector.broadcast %cst_129 : f32 to vector<32x1xf32>
    %279 = arith.subf %278, %273 : vector<32x1xf32>
    %280 = arith.mulf %279, %272 : vector<32x1xf32>
    %281 = arith.mulf %274, %271 : vector<32x1xf32>
    %282 = arith.addf %280, %281 : vector<32x1xf32>
    %c0_130 = arith.constant 0 : index
    %c0_131 = arith.constant 0 : index
    %283 = vector.load %arg12[%c0_130, %c0_131] : memref<32x2xf32, #tpu.memory_space<vmem>>, vector<32x2xf32>
    %c0_132 = arith.constant 0 : index
    %c0_133 = arith.constant 0 : index
    %284 = vector.load %arg11[%c0_132, %c0_133] : memref<32x1xf32, #tpu.memory_space<vmem>>, vector<32x1xf32>
    %285 = vector.extract_strided_slice %270 {offsets = [0, 0], sizes = [32, 1], strides = [1, 1]} : vector<32x3xf32> to vector<32x1xf32>
    %286 = arith.addf %284, %285 : vector<32x1xf32>
    %287 = vector.extract_strided_slice %283 {offsets = [0, 0], sizes = [32, 1], strides = [1, 1]} : vector<32x2xf32> to vector<32x1xf32>
    %288 = arith.addf %287, %277 : vector<32x1xf32>
    %289 = vector.extract_strided_slice %283 {offsets = [0, 1], sizes = [32, 1], strides = [1, 1]} : vector<32x2xf32> to vector<32x1xf32>
    %290 = arith.addf %289, %282 : vector<32x1xf32>
    %291 = tpu.concatenate %286, %288, %290 in 1 : vector<32x1xf32>, vector<32x1xf32>, vector<32x1xf32> -> vector<32x3xf32>
    %c0_134 = arith.constant 0 : index
    %c0_135 = arith.constant 0 : index
    %292 = vector.load %arg30[%c0_134, %c0_135] : memref<32x3xf32, #tpu.memory_space<vmem>>, vector<32x3xf32>
    tpu.vector_store %arg30[%c0_134, %c0_135], %291 {strides = array<i32>} : memref<32x3xf32, #tpu.memory_space<vmem>>, vector<32x3xf32>,
    return
  }
}

</mosaic_0001>

<bundles_post_ra>
// kernel: so2_transformer_forward.1
= control target key start
LH: loop header
LB: loop body
LE: loop exit
PB: predicated region body
PF: predicated region fallthrough
CT: control target
= control target key end

     0   :  { %s8366_s3 = smov 13   ;;  %vm139_vm0 = vcmask 130048   ;;  %s8367_s10 = smov 8   ;;  %vm282_vm1 = vcmask 64512   ;;  %vm775_vm2 = vcmask 261120   ;;  %vm1219_vm3 = vcmask 523264   ;;  %s10883_s0 = inlined_call_operand.smem [shape: u32[31], index: -1, kind: input, shape index: {}] }
   0x1   :  { %s6866_s6 = sld [smem:[%s10883_s0 + %s8366_s3]]   ;;  %s8368_s14 = smov 4   ;;  %vm1245_vm4 = vcmask 654336  }
   0x2   :  { %s1_s9 = sld [smem:[%s10883_s0]]   ;;  %s8369_s18 = smov 6  }
   0x3   :  { %s6861_s13 = sld [smem:[%s10883_s0 + %s8367_s10]]   ;;  %s8370_s22 = smov 7  }
   0x4   :  { %s6857_s17 = sld [smem:[%s10883_s0 + %s8368_s14]]   ;;  %s8371_s26 = smov 10  }
   0x5   :  { %s6859_s21 = sld [smem:[%s10883_s0 + %s8369_s18]]   ;;  %s8372_s30 = smov 3  }
   0x6   :  { %s6860_s25 = sld [smem:[%s10883_s0 + %s8370_s22]]   ;;  %s8373_s4 = smov 64  }
   0x7   :  { %v131_v0 = vld [vmem:[%s6866_s6 + $0x8] sm:$0xff]  ;;  %v130_v1 = vld [vmem:[%s6866_s6] sm:$0xff]  ;;  %s8440_s29 = sld [smem:[%s10883_s0 + %s8371_s26]]   ;;  %s8374_s5 = smov 14  }
   0x8   :  { %7673 = vmatprep.subr.mxu0 %v131_v0  ;;  %v126_v2 = vld [vmem:[%s1_s9] sm:$0xff]  ;;  %v127_v3 = vld [vmem:[%s1_s9 + $0x8] sm:$0xff]  ;;  %v128_v4 = vld [vmem:[%s1_s9 + $0x10] sm:$0xff]  ;;  %s8452_s3 = sld [smem:[%s10883_s0 + %s8372_s30]]   ;;  %s8381_s30 = smov 32  }
   0x9   :  { %7674 = vmatpush3.msra.mxu0 %v131_v0  ;;  %7677 = vmatprep.mubr.msk.f32.mxu0 %vm139_vm0, %v126_v2  ;;  %v129_v5 = vld [vmem:[%s1_s9 + $0x18] sm:$0xff]  ;;  %v273_v6 = vld [vmem:[%s6861_s13] sm:$0xff]  ;;  %s6867_s8 = sld [smem:[%s10883_s0 + %s8374_s5]]   ;;  %s8375_s9 = smov 9  }
   0xa   :  { %7675 = vmatprep.subr.mxu0 %v130_v1  ;;  %7683 = vmatprep.subr.mxu1 %v273_v6  ;;  %v274_v7 = vld [vmem:[%s6857_s17] sm:$0xff]  ;;  %v275_v8 = vld [vmem:[%s6857_s17 + $0x8] sm:$0xff]  ;;  %v276_v9 = vld [vmem:[%s6857_s17 + $0x10] sm:$0xff]  ;;  %s8505_s12 = sld [smem:[%s10883_s0 + %s8375_s9]]   ;;  %s8376_s13 = smov 5  }
   0xb   :  { %7676 = vmatpush3.msra.mxu0 %v130_v1  ;;  %7684 = vmatpush3.msra.mxu1 %v273_v6  ;;  %v277_v10 = vld [vmem:[%s6857_s17 + $0x18] sm:$0xff]  ;;  %v278_v11 = vld [vmem:[%s6857_s17 + $0x20] sm:$0xff]  ;;  %v279_v12 = vld [vmem:[%s6857_s17 + $0x28] sm:$0xff]  ;;  %s8576_s16 = sld [smem:[%s10883_s0 + %s8376_s13]]   ;;  %s8382_s1 = smov 17  }
   0xc   :  { %7678 = vmatmul.mubr.msk.f32.vlgmr.msra.gmra.mxu0 %vm139_vm0, %v127_v3  ;;  %7697 = vmatprep.subr.mxu0 %v273_v6  ;;  %v280_v13 = vld [vmem:[%s6857_s17 + $0x30] sm:$0xff]  ;;  %v281_v14 = vld [vmem:[%s6857_s17 + $0x38] sm:$0xff]  ;;  %v549_v15 = vld [vmem:[%s6859_s21] sm:$0xff]  ;;  %s8378_s17 = smov 2   ;;  %s8383_s5 = smov 16  }
   0xd   :  { %7680 = vmatprep.mubr.msk.f32.mxu0 %vm139_vm0, %v128_v4  ;;  %7685 = vmatprep.mubr.msk.f32.mxu1 %vm282_vm1, %v274_v7  ;;  %v550_v16 = vld [vmem:[%s6859_s21 + $0x8] sm:$0xff]  ;;  %v551_v17 = vld [vmem:[%s6859_s21 + $0x10] sm:$0xff]  ;;  %v552_v18 = vld [vmem:[%s6859_s21 + $0x18] sm:$0xff]  ;;  %s8583_s20 = sld [smem:[%s10883_s0 + %s8378_s17]]   ;;  %s8379_s21 = smov 1  }
   0xe   :  { %7686 = vmatmul.mubr.msk.f32.vlgmr.msra.gmra.mxu1 %vm282_vm1, %v275_v8  ;;  %7711 = vmatprep.subr.mxu1 %v273_v6  ;;  %v650_v19 = vld [vmem:[%s6860_s25] sm:$0xff]  ;;  %v651_v20 = vld [vmem:[%s6860_s25 + $0x8] sm:$0xff]  ;;  %v652_v21 = vld [vmem:[%s6860_s25 + $0x10] sm:$0xff]  ;;  %s8589_s24 = sld [smem:[%s10883_s0 + %s8379_s21]]   ;;  %s8384_s9 = smov 18  }
   0xf   :  { %7712 = vmatpush3.msra.mxu1 %v273_v6  ;;  %7698 = vmatpush3.msra.mxu0 %v273_v6  ;;  %v653_v22 = vld [vmem:[%s6860_s25 + $0x18] sm:$0xff]  ;;  %v8445_v23 = vld [vmem:[%s8440_s29] sm:$0xff]  ;;  %v753_v25 = vld [vmem:[%s8452_s3 + $0x10] sm:$0xff]  ;;  %s8380_s25 = smov 15   ;;  %s8878_s13 = sld [smem:[%s10883_s0 + %s8384_s9]]  }
  0x10   :  { %7681 = vmatmul.mubr.msk.f32.gmra.mxu0 %vm139_vm0, %v129_v5  ;;  %7719 = vmatprep.subr.mxu1 %v273_v6  ;;  %v751_v24 = vld [vmem:[%s8452_s3] sm:$0xff]  ;;  %v752_v26 = vld [vmem:[%s8452_s3 + $0x8] sm:$0xff]  ;;  %v754_v28 = vld [vmem:[%s8452_s3 + $0x18] sm:$0xff]  ;;  %s8598_s28 = sld [smem:[%s10883_s0 + %s8380_s25]]   ;;  %s8385_s14 = smov 19  }
  0x11   :  { %7688 = vmatprep.mubr.msk.f32.mxu1 %vm282_vm1, %v276_v9  ;;  %1187 = vrot.lane.b32.xlu1 %v751_v24, %s8373_s4  ;;  %v755_v27 = vld [vmem:[%s8452_s3 + $0x20] sm:$0xff]  ;;  %v8482_v58 = vld [vmem:[%s8440_s29 + $0x8] sm:$0xff]  ;;  %v8486_v59 = vld [vmem:[%s8440_s29 + $0x10] sm:$0xff]  ;;  %s9026_s18 = sld [smem:[%s10883_s0 + %s8385_s14]]   ;;  %s8386_s19 = smov 21  }
  0x12   :  { %7689 = vmatmul.mubr.msk.f32.gmra.mxu1 %vm282_vm1, %v277_v10  ;;  %1191 = vrot.lane.b32.xlu0 %v753_v25, %s8373_s4  ;;  %v6884_v29 = vld [vmem:[%s6867_s8] ss:$0 sm:$0xff]  ;;  %v8496_v60 = vld [vmem:[%s8440_s29 + $0x18] sm:$0xff]  ;;  %v8515_v62 = vld [vmem:[%s8440_s29 + $0x28] sm:$0xff]  ;;  %v10884_v10 = vmov 0.0   ;;  %s8854_s8 = sld [smem:[%s10883_s0 + %s8383_s5]]   ;;  %s8387_s26 = smov 20  }
  0x13   :  { %7691 = vmatprep.mubr.msk.f32.mxu1 %vm282_vm1, %v278_v11  ;;  %v8500_v61 = vld [vmem:[%s8440_s29 + $0x20] sm:$0xff]  ;;  %v8519_v63 = vld [vmem:[%s8440_s29 + $0x30] sm:$0xff]  ;;  %v8527_v0 = vld [vmem:[%s8440_s29 + $0x38] sm:$0xff]  ;;  %s9131_s25 = sld [smem:[%s10883_s0 + %s8386_s19]]   ;;  %s8391_s9 = smov 24  }
  0x14   :  { %v8530_v1 = vld [vmem:[%s8505_s12] sm:$0xff]  ;;  %v8537_v2 = vld [vmem:[%s8505_s12 + $0x8] sm:$0xff]  ;;  %v8540_v3 = vld [vmem:[%s8505_s12 + $0x10] sm:$0xff]  ;;  %s9168_s2 = sld [smem:[%s10883_s0 + %s8387_s26]]  }
  0x15   :  { %1189 = vrot.lane.b32.xlu1 %v752_v26, %s8373_s4  ;;  %v8547_v4 = vld [vmem:[%s8505_s12 + $0x18] sm:$0xff]  ;;  %v8550_v5 = vld [vmem:[%s8505_s12 + $0x20] sm:$0xff]  ;;  %v8560_v7 = vld [vmem:[%s8505_s12 + $0x30] sm:$0xff]  ;;  %s6877_s11 = sld [smem:[%s10883_s0 + %s8391_s9]]   ;;  %s8399_s9 = smov 30  }
  0x16   :  { %7692 = vmatmul.mubr.msk.f32.gmra.mxu1 %vm282_vm1, %v279_v12  ;;  %1195 = vrot.lane.b32.xlu0 %v755_v27, %s8373_s4  ;;  %v8567_v8 = vld [vmem:[%s8505_s12 + $0x38] sm:$0xff]  ;;  %v756_v9 = vld [vmem:[%s8452_s3 + $0x28] sm:$0xff]  ;;  %v412_v11 = vld [vmem:[%s8576_s16] sm:$0xff] }
  0x17   :  { %7694 = vmatprep.mubr.msk.f32.mxu1 %vm282_vm1, %v280_v13  ;;  %v413_v12 = vld [vmem:[%s8576_s16 + $0x8] sm:$0xff]  ;;  %v414_v13 = vld [vmem:[%s8576_s16 + $0x10] sm:$0xff]  ;;  %7699 = vmatprep.mubr.msk.f32.mxu0 %vm282_vm1, %v412_v11  ;;  %v269_v24 = vld [vmem:[%s8583_s20] sm:$0xff] }
  0x18   :  { %7700 = vmatmul.mubr.msk.f32.vlgmr.msra.gmra.mxu0 %vm282_vm1, %v413_v12  ;;  %v418_v25 = vld [vmem:[%s8576_s16 + $0x30] sm:$0xff]  ;;  %v265_v26 = vld [vmem:[%s8589_s24] sm:$0xff]  ;;  %v1237_v27 = vld [vmem:[%s8598_s28 + $0x48] sm:$0xff] }
  0x19   :  { %1193 = vrot.lane.b32.xlu1 %v754_v28, %s8373_s4  ;;  %7702 = vmatprep.mubr.msk.f32.mxu0 %vm282_vm1, %v414_v13  ;;  %v419_v28 = vld [vmem:[%s8576_s16 + $0x38] sm:$0xff]  ;;  %v757_v11 = vld [vmem:[%s8452_s3 + $0x30] sm:$0xff] }
  0x1a   :  { %7695 = vmatmul.mubr.msk.f32.gmra.mxu1 %vm282_vm1, %v281_v14  ;;  %v272_v14 = vld [vmem:[%s8583_s20 + $0x18] sm:$0xff] }
  0x1b   :  { %7713 = vmatprep.mubr.msk.f32.mxu1 %vm282_vm1, %v549_v15  ;;  %v268_v15 = vld [vmem:[%s8589_s24 + $0x18] sm:$0xff]  ;;  %824 = vmatprep.subr.mxu0 %v272_v14 }
  0x1c   :  { %825 = vmatpush1.msra.mxu0 %v268_v15 }
  0x1d   :  { %1197 = vrot.lane.b32.xlu1 %v756_v9, %s8373_s4 }
  0x1e   :  { %7714 = vmatmul.mubr.msk.f32.vlgmr.msra.gmra.mxu1 %vm282_vm1, %v550_v16  ;;  %v271_v16 = vld [vmem:[%s8583_s20 + $0x10] sm:$0xff] }
  0x1f   :  { %7720 = vmatpush3.msra.mxu1 %v273_v6  ;;  %7716 = vmatprep.mubr.msk.f32.mxu1 %vm282_vm1, %v551_v17  ;;  %v8557_v6 = vld [vmem:[%s8505_s12 + $0x28] sm:$0xff]  ;;  %v415_v17 = vld [vmem:[%s8576_s16 + $0x18] sm:$0xff] }
  0x20   :  { %826 = vmatprep.subr.mxu0 %v271_v16  ;;  %7703 = vmatmul.mubr.msk.f32.gmra.mxu0 %vm282_vm1, %v415_v17 }
  0x22   :  { %7717 = vmatmul.mubr.msk.f32.gmra.mxu1 %vm282_vm1, %v552_v18  ;;  %v416_v18 = vld [vmem:[%s8576_s16 + $0x20] sm:$0xff] }
  0x23   :  { %7721 = vmatprep.mubr.msk.f32.mxu1 %vm282_vm1, %v650_v19  ;;  %v267_v19 = vld [vmem:[%s8589_s24 + $0x10] sm:$0xff]  ;;  %7705 = vmatprep.mubr.msk.f32.mxu0 %vm282_vm1, %v416_v18 }
  0x24   :  { %827 = vmatpush1.msra.mxu0 %v267_v19 }
  0x26   :  { %7722 = vmatmul.mubr.msk.f32.vlgmr.msra.gmra.mxu1 %vm282_vm1, %v651_v20  ;;  %v270_v20 = vld [vmem:[%s8583_s20 + $0x8] sm:$0xff] }
  0x27   :  { %7724 = vmatprep.mubr.msk.f32.mxu1 %vm282_vm1, %v652_v21  ;;  %v266_v21 = vld [vmem:[%s8589_s24 + $0x8] sm:$0xff]  ;;  %828 = vmatprep.subr.mxu0 %v270_v20 }
  0x28   :  { %829 = vmatpush1.msra.mxu0 %v266_v21 }
  0x29   :  { %830 = vmatprep.subr.mxu0 %v269_v24 }
  0x2a   :  { %7725 = vmatmul.mubr.msk.f32.gmra.mxu1 %vm282_vm1, %v653_v22  ;;  %v417_v22 = vld [vmem:[%s8576_s16 + $0x28] sm:$0xff]  ;;  %831 = vmatpush1.msra.mxu0 %v265_v26 }
  0x2b   :  { %7735 = vmatprep.mubr.msk.f32.mxu1 %vm775_vm2, %v8445_v23  ;;  %7706 = vmatmul.mubr.msk.f32.gmra.mxu0 %vm282_vm1, %v417_v22 }
  0x2c   :  { %7708 = vmatprep.mubr.msk.f32.mxu0 %vm282_vm1, %v418_v25  ;;  %7767 = vmatprep.subr.mxu0 %v1237_v27 }
  0x2f   :  { %7709 = vmatmul.mubr.msk.f32.gmra.mxu0 %vm282_vm1, %v419_v28 }
  0x30   :  { %864 = vmatprep.mubr.f32.mxu0 %v10884_v10 }
  0x33   :  { %6917 = vmatmul.mubr.msk.f32.vlgmr.msra.gmra.mxu0 %vm775_vm2, %v8445_v23  ;;  %v1231_v23 = vld [vmem:[%s8598_s28 + $0x18] sm:$0xff] }
  0x34   :  { %870 = vmatprep.mubr.f32.mxu0 %v10884_v10  ;;  %7768 = vmatpush3.msra.mxu0 %v1237_v27 }
  0x37   :  { %6918 = vmatmul.mubr.msk.f32.gmra.mxu0 %vm775_vm2, %v8482_v58 }
  0x38   :  { %876 = vmatprep.mubr.f32.mxu0 %v10884_v10 }
  0x3b   :  { %6919 = vmatmul.mubr.msk.f32.gmra.mxu0 %vm775_vm2, %v8486_v59 }
  0x3c   :  { %882 = vmatprep.mubr.f32.mxu0 %v10884_v10 }
  0x3f   :  { %6920 = vmatmul.mubr.msk.f32.gmra.mxu0 %vm775_vm2, %v8496_v60 }
  0x40   :  { %888 = vmatprep.mubr.f32.mxu0 %v10884_v10 }
  0x43   :  { %6921 = vmatmul.mubr.msk.f32.gmra.mxu0 %vm775_vm2, %v8500_v61 }
  0x44   :  { %894 = vmatprep.mubr.f32.mxu0 %v10884_v10 }
  0x47   :  { %6922 = vmatmul.mubr.msk.f32.gmra.mxu0 %vm775_vm2, %v8515_v62 }
  0x48   :  { %900 = vmatprep.mubr.f32.mxu0 %v10884_v10 }
  0x4b   :  { %6923 = vmatmul.mubr.msk.f32.gmra.mxu0 %vm775_vm2, %v8519_v63 }
  0x4c   :  { %906 = vmatprep.mubr.f32.mxu0 %v10884_v10 }
  0x4f   :  { %6924 = vmatmul.mubr.msk.f32.gmra.mxu0 %vm775_vm2, %v8527_v0 }
  0x83   :  { %v8706_v12 = vpop.permute.xlu1 %1187 }
  0x84   :  { %10966 = vst [vmem:[#allocation17_spill] sm:$0xff] %v8706_v12  ;;  %v8710_v14 = vpop.permute.xlu0 %1191 }
  0x85   :  { %10968 = vst [vmem:[#allocation19_spill] sm:$0xff] %v8710_v14 }
  0x87   :  { %v8708_v13 = vpop.permute.xlu1 %1189 }
  0x88   :  { %10967 = vst [vmem:[#allocation18_spill] sm:$0xff] %v8708_v13 }
  0xcc   :  { %v7679_v30 = vpop.f32.mrf.mxu0 }
  0xcd   :  { %v224_v31 = vadd.f32 %v7679_v30, %v6884_v29  ;;  %v1235_v30 = vld [vmem:[%s8598_s28 + $0x38] sm:$0xff] }
  0xce   :  { %v218_v32 = vpop.f32.mrf.mxu0 }
  0xcf   :  { %v6890_v33 = vmul.f32 -1.442695, %v224_v31  ;;  %v219_v34 = vadd.f32 %v6884_v29, %v218_v32  ;;  %v1233_v32 = vld [vmem:[%s8598_s28 + $0x28] sm:$0xff] }
  0xd0   :  { %v7682_v35 = vpop.f32.mrf.mxu0 }
  0xd1   :  { %v6889_v36 = vmul.f32 -1.442695, %v219_v34  ;;  %v234_v37 = vadd.f32 %v7682_v35, %v6884_v29  ;;  %8037 = vpow2.f32 %v6890_v33  ;;  %v1232_v33 = vld [vmem:[%s8598_s28 + $0x20] sm:$0xff] }
  0xd2   :  { %v228_v38 = vpop.f32.mrf.mxu0 }
  0xd3   :  { %v6892_v39 = vmul.f32 -1.442695, %v234_v37  ;;  %v229_v40 = vadd.f32 %v6884_v29, %v228_v38  ;;  %8039 = vpow2.f32 %v6889_v36  ;;  %v1236_v29 = vld [vmem:[%s8598_s28 + $0x40] sm:$0xff] }
  0xd4   :  { %7769 = vmatprep.subr.mxu0 %v1236_v29 }
  0xd5   :  { %8041 = vpow2.f32 %v6892_v39  ;;  %v6891_v41 = vmul.f32 -1.442695, %v229_v40  ;;  %7770 = vmatpush3.msra.mxu0 %v1236_v29 }
  0xd6   :  { %7771 = vmatprep.subr.mxu0 %v1235_v30 }
  0xd7   :  { %8043 = vpow2.f32 %v6891_v41  ;;  %7772 = vmatpush3.msra.mxu0 %v1235_v30 }
  0xde   :  { %v8038_v42 = vpop.eup %8037 }
  0xdf   :  { %v250_v45 = vadd.f32 1.0, %v8038_v42 }
  0xe0   :  { %v8040_v43 = vpop.eup %8039 }
  0xe1   :  { %v249_v48 = vadd.f32 1.0, %v8040_v43 }
  0xe2   :  { %v8042_v44 = vpop.eup %8041 }
  0xe3   :  { %v252_v46 = vadd.f32 1.0, %v8042_v44 }
  0xe4   :  { %v8044_v47 = vpop.eup %8043 }
  0xe5   :  { %8045 = vrcp.f32 %v252_v46  ;;  %v251_v49 = vadd.f32 1.0, %v8044_v47  ;;  %v1230_v47 = vld [vmem:[%s8598_s28 + $0x10] sm:$0xff] }
  0xe6   :  { %8047 = vrcp.f32 %v250_v45 }
  0xe7   :  { %8049 = vrcp.f32 %v251_v49 }
  0xe8   :  { %8051 = vrcp.f32 %v249_v48  ;;  %v1229_v48 = vld [vmem:[%s8598_s28 + $0x8] sm:$0xff] }
  0xf2   :  { %v8046_v50 = vpop.eup %8045 }
  0xf3   :  { %v8048_v51 = vpop.eup %8047  ;;  %v8467_v52 = vmul.f32 %v8046_v50, %v234_v37  ;;  %v1228_v50 = vld [vmem:[%s8598_s28] sm:$0xff] }
  0xf4   :  { %v8050_v53 = vpop.eup %8049  ;;  %v8473_v56 = vmul.f32 %v8048_v51, %v224_v31  ;;  %v1234_v31 = vld [vmem:[%s8598_s28 + $0x30] sm:$0xff] }
  0xf5   :  { %10951 = vst [vmem:[#allocation2_spill] sm:$0xff] %v8467_v52  ;;  %v8469_v54 = vmul.f32 %v8050_v53, %v229_v40  ;;  %7727 = vmatprep.subr.mxu1 %v8467_v52  ;;  %v8052_v55 = vpop.eup %8051  ;;  %7773 = vmatprep.subr.mxu0 %v1234_v31 }
  0xf6   :  { %7728 = vmatpush3.msra.mxu1 %v8467_v52  ;;  %10953 = vst [vmem:[#allocation4_spill] sm:$0xff] %v8473_v56  ;;  %v8477_v57 = vmul.f32 %v8052_v55, %v219_v34  ;;  %7774 = vmatpush3.msra.mxu0 %v1234_v31  ;;  %v8643_v34 = vpop.f32.mrf.mxu1 }
  0xf7   :  { %10952 = vst [vmem:[#allocation3_spill] sm:$0xff] %v8469_v54  ;;  %7729 = vmatprep.subr.mxu1 %v8469_v54  ;;  %7775 = vmatprep.subr.mxu0 %v1233_v32  ;;  %10955 = vst [vmem:[#allocation6_spill] sm:$0xff] %v8643_v34 }
  0xf8   :  { %7730 = vmatpush3.msra.mxu1 %v8469_v54  ;;  %10954 = vst [vmem:[#allocation5_spill] sm:$0xff] %v8477_v57  ;;  %7776 = vmatpush3.msra.mxu0 %v1233_v32  ;;  %v8648_v35 = vpop.f32.mrf.mxu1 }
  0xf9   :  { %7731 = vmatprep.subr.mxu1 %v8473_v56  ;;  %7777 = vmatprep.subr.mxu0 %v1232_v33  ;;  %10956 = vst [vmem:[#allocation7_spill] sm:$0xff] %v8648_v35 }
  0xfa   :  { %7732 = vmatpush3.msra.mxu1 %v8473_v56  ;;  %7778 = vmatpush3.msra.mxu0 %v1232_v33  ;;  %v8653_v36 = vpop.f32.mrf.mxu1 }
  0xfb   :  { %7733 = vmatprep.subr.mxu1 %v8477_v57  ;;  %7779 = vmatprep.subr.mxu0 %v1231_v23 }
  0xfc   :  { %7734 = vmatpush3.msra.mxu1 %v8477_v57  ;;  %7780 = vmatpush3.msra.mxu0 %v1231_v23  ;;  %v8657_v37 = vpop.f32.mrf.mxu1 }
  0xfd   :  { %7736 = vmatmul.mubr.msk.f32.vlgmr.msra.gmra.mxu1 %vm775_vm2, %v8482_v58  ;;  %7747 = vmatprep.subr.mxu1 %v8467_v52  ;;  %10957 = vst [vmem:[#allocation8_spill] sm:$0xff] %v8657_v37 }
  0xfe   :  { %7748 = vmatpush3.msra.mxu1 %v8467_v52  ;;  %7738 = vmatprep.mubr.msk.f32.mxu1 %vm775_vm2, %v8486_v59  ;;  %v8659_v38 = vpop.f32.mrf.mxu1 }
  0xff   :  { %7749 = vmatprep.subr.mxu1 %v8469_v54  ;;  %7781 = vmatprep.subr.mxu0 %v1230_v47 }
 0x100   :  { %7750 = vmatpush3.msra.mxu1 %v8469_v54  ;;  %v8661_v39 = vpop.f32.mrf.mxu1  ;;  %7782 = vmatpush3.msra.mxu0 %v1230_v47 }
 0x101   :  { %7739 = vmatmul.mubr.msk.f32.gmra.mxu1 %vm775_vm2, %v8496_v60  ;;  %7751 = vmatprep.subr.mxu1 %v8473_v56 }
 0x102   :  { %7752 = vmatpush3.msra.mxu1 %v8473_v56  ;;  %7741 = vmatprep.mubr.msk.f32.mxu1 %vm775_vm2, %v8500_v61  ;;  %v8663_v40 = vpop.f32.mrf.mxu1 }
 0x103   :  { %7753 = vmatprep.subr.mxu1 %v8477_v57  ;;  %7783 = vmatprep.subr.mxu0 %v1229_v48 }
 0x104   :  { %7754 = vmatpush3.msra.mxu1 %v8477_v57  ;;  %v8665_v41 = vpop.f32.mrf.mxu1  ;;  %7784 = vmatpush3.msra.mxu0 %v1229_v48 }
 0x105   :  { %7742 = vmatmul.mubr.msk.f32.gmra.mxu1 %vm775_vm2, %v8515_v62  ;;  %7785 = vmatprep.subr.mxu0 %v1228_v50 }
 0x106   :  { %7744 = vmatprep.mubr.msk.f32.mxu1 %vm775_vm2, %v8519_v63  ;;  %v8667_v42 = vpop.f32.mrf.mxu1  ;;  %7786 = vmatpush3.msra.mxu0 %v1228_v50 }
 0x107   :  { %10958 = vst [vmem:[#allocation9_spill] sm:$0xff] %v8667_v42 }
 0x108   :  { %v8669_v43 = vpop.f32.mrf.mxu1 }
 0x109   :  { %7745 = vmatmul.mubr.msk.f32.gmra.mxu1 %vm775_vm2, %v8527_v0  ;;  %10959 = vst [vmem:[#allocation10_spill] sm:$0xff] %v8669_v43  ;;  %v758_v0 = vld [vmem:[%s8452_s3 + $0x38] sm:$0xff]  ;;  %s8388_s3 = smov 22  }
 0x10a   :  { %7755 = vmatprep.mubr.msk.f32.mxu1 %vm775_vm2, %v8530_v1  ;;  %v8671_v44 = vpop.f32.mrf.mxu1  ;;  %s9178_s7 = sld [smem:[%s10883_s0 + %s8388_s3]]  }
 0x10b   :  { %10960 = vst [vmem:[#allocation11_spill] sm:$0xff] %v8671_v44 }
 0x10c   :  { %v8673_v45 = vpop.f32.mrf.mxu1 }
 0x10d   :  { %7756 = vmatmul.mubr.msk.f32.vlgmr.msra.gmra.mxu1 %vm775_vm2, %v8537_v2  ;;  %10961 = vst [vmem:[#allocation12_spill] sm:$0xff] %v8673_v45 }
 0x10e   :  { %7758 = vmatprep.mubr.msk.f32.mxu1 %vm775_vm2, %v8540_v3  ;;  %v8675_v46 = vpop.f32.mrf.mxu1 }
 0x10f   :  { %10962 = vst [vmem:[#allocation13_spill] sm:$0xff] %v8675_v46 }
 0x110   :  { %v8679_v49 = vpop.f32.mrf.mxu1 }
 0x111   :  { %7759 = vmatmul.mubr.msk.f32.gmra.mxu1 %vm775_vm2, %v8547_v4  ;;  %10963 = vst [vmem:[#allocation14_spill] sm:$0xff] %v8679_v49 }
 0x112   :  { %7761 = vmatprep.mubr.msk.f32.mxu1 %vm775_vm2, %v8550_v5  ;;  %v8682_v51 = vpop.f32.mrf.mxu1 }
 0x113   :  { %10964 = vst [vmem:[#allocation15_spill] sm:$0xff] %v8682_v51 }
 0x114   :  { %v8684_v53 = vpop.f32.mrf.mxu1 }
 0x115   :  { %7762 = vmatmul.mubr.msk.f32.gmra.mxu1 %vm775_vm2, %v8557_v6  ;;  %10965 = vst [vmem:[#allocation16_spill] sm:$0xff] %v8684_v53 }
 0x116   :  { %7764 = vmatprep.mubr.msk.f32.mxu1 %vm775_vm2, %v8560_v7 }
 0x119   :  { %7765 = vmatmul.mubr.msk.f32.gmra.mxu1 %vm775_vm2, %v8567_v8 }
 0x11a   :  { %1560 = vmatprep.mubr.f32.mxu1 %v10884_v10 }
 0x1bd   :  { %v7737_v55 = vpop.f32.mrf.mxu1 }
 0x1be   :  { %1157 = vrot.lane.b32.xlu0 %v7737_v55, %s8381_s30 }
 0x1bf   :  { %v979_v58 = vpop.f32.mrf.mxu1 }
 0x1c1   :  { %v7740_v59 = vpop.f32.mrf.mxu1 }
 0x1c2   :  { %1155 = vrot.lane.b32.xlu0 %v979_v58, %s8381_s30  ;;  %1161 = vrot.lane.b32.xlu1 %v7740_v59, %s8381_s30 }
 0x1c3   :  { %v989_v60 = vpop.f32.mrf.mxu1 }
 0x1c5   :  { %v7743_v61 = vpop.f32.mrf.mxu1 }
 0x1c6   :  { %1159 = vrot.lane.b32.xlu0 %v989_v60, %s8381_s30  ;;  %1165 = vrot.lane.b32.xlu1 %v7743_v61, %s8381_s30 }
 0x1c7   :  { %v999_v62 = vpop.f32.mrf.mxu1 }
 0x1c9   :  { %v7746_v63 = vpop.f32.mrf.mxu1 }
 0x1ca   :  { %1163 = vrot.lane.b32.xlu0 %v999_v62, %s8381_s30  ;;  %1169 = vrot.lane.b32.xlu1 %v7746_v63, %s8381_s30 }
 0x1cb   :  { %v1009_v9 = vpop.f32.mrf.mxu1 }
 0x1ce   :  { %1201 = vrot.lane.b32.xlu1 %v758_v0, %s8373_s4  ;;  %1167 = vrot.lane.b32.xlu0 %v1009_v9, %s8381_s30 }
 0x1d2   :  { %1199 = vrot.lane.b32.xlu0 %v757_v11, %s8373_s4  ;;  %s8757_s4 = sld [smem:[%s10883_s0 + %s8382_s1]]  }
 0x1d8   :  { %v1477_v0 = vld [vmem:[%s8757_s4 + $0x170] sm:$0xff]  ;;  %v1476_v9 = vld [vmem:[%s8757_s4 + $0x168] sm:$0xff]  ;;  %v1478_v11 = vld [vmem:[%s8757_s4 + $0x178] sm:$0xff] }
 0x1d9   :  { %1496 = vmatprep.subr.mxu1 %v1477_v0  ;;  %7799 = vmatprep.subr.mxu0 %v1478_v11  ;;  %v1445_v0 = vld [vmem:[%s8757_s4 + $0x70] sm:$0xff] }
 0x1da   :  { %1497 = vmatpush1.msra.mxu1 %v1476_v9  ;;  %v1441_v9 = vld [vmem:[%s8757_s4 + $0x50] sm:$0xff] }
 0x1f0   :  { %1866 = vxpose.xlu0.b32.start [1/8] (short) (narrow) %v8530_v1, 32  ;;  %v7757_v1 = vpop.f32.mrf.mxu1 }
 0x1f4   :  { %1867 = vxpose.xlu0.b32.cont [2/8] (short) (narrow) %v8537_v2, 32  ;;  %v8712_v2 = vpop.permute.xlu1 %1193 }
 0x1f5   :  { %10969 = vst [vmem:[#allocation20_spill] sm:$0xff] %v8712_v2 }
 0x1f8   :  { %1868 = vxpose.xlu0.b32.cont [3/8] (short) (narrow) %v8540_v3, 32  ;;  %v8714_v3 = vpop.permute.xlu0 %1195  ;;  %v8716_v15 = vpop.permute.xlu1 %1197 }
 0x1f9   :  { %10970 = vst [vmem:[#allocation21_spill] sm:$0xff] %v8714_v3  ;;  %10971 = vst [vmem:[#allocation22_spill] sm:$0xff] %v8716_v15 }
 0x1fc   :  { %1869 = vxpose.xlu0.b32.cont [4/8] (short) (narrow) %v8547_v4, 32  ;;  %v1108_v4 = vpop.f32.mrf.mxu1 }
 0x200   :  { %1870 = vxpose.xlu0.b32.cont [5/8] (short) (narrow) %v8550_v5, 32  ;;  %v7760_v5 = vpop.f32.mrf.mxu1 }
 0x202   :  { %v1118_v16 = vpop.f32.mrf.mxu1 }
 0x204   :  { %1871 = vxpose.xlu0.b32.cont [6/8] (short) (narrow) %v8557_v6, 32  ;;  %v7763_v21 = vpop.f32.mrf.mxu1 }
 0x206   :  { %v1128_v27 = vpop.f32.mrf.mxu1 }
 0x208   :  { %1872 = vxpose.xlu0.b32.cont [7/8] (short) (narrow) %v8560_v7, 32  ;;  %v7766_v23 = vpop.f32.mrf.mxu1 }
 0x20a   :  { %v1138_v55 = vpop.f32.mrf.mxu1 }
 0x20c   :  { %1873 = vxpose.xlu0.b32.end [8/8] (short) (narrow) %v8567_v8, 32 }
 0x230   :  { %v1158_v6 = vpop.permute.xlu0 %1157 }
 0x231   :  { %v1212_v7 = vsel %vm775_vm2, %v7757_v1, %v1158_v6  ;;  %v1474_v1 = vld [vmem:[%s8757_s4 + $0x158] sm:$0xff]  ;;  %v1471_v6 = vld [vmem:[%s8757_s4 + $0x140] sm:$0xff] }
 0x232   :  { %v1221_v20 = vsel %vm1219_vm3, %v1212_v7, %v8708_v13  ;;  %1498 = vmatprep.subr.mxu1 %v1474_v1  ;;  %v1472_v7 = vld [vmem:[%s8757_s4 + $0x148] sm:$0xff]  ;;  %v1442_v1 = vld [vmem:[%s8757_s4 + $0x58] sm:$0xff] }
 0x234   :  { %v1156_v8 = vpop.permute.xlu0 %1155  ;;  %v1162_v17 = vpop.permute.xlu1 %1161 }
 0x235   :  { %v1211_v18 = vsel %vm775_vm2, %v1108_v4, %v1156_v8  ;;  %v1214_v22 = vsel %vm775_vm2, %v7760_v5, %v1162_v17  ;;  %v1473_v4 = vld [vmem:[%s8757_s4 + $0x150] sm:$0xff]  ;;  %v1475_v5 = vld [vmem:[%s8757_s4 + $0x160] sm:$0xff]  ;;  %v1468_v8 = vld [vmem:[%s8757_s4 + $0x128] sm:$0xff] }
 0x236   :  { %v1220_v19 = vsel %vm1219_vm3, %v1211_v18, %v8706_v12  ;;  %v1223_v29 = vsel %vm1219_vm3, %v1214_v22, %v8712_v2  ;;  %1499 = vmatpush1.msra.mxu1 %v1473_v4  ;;  %v1467_v17 = vld [vmem:[%s8757_s4 + $0x120] sm:$0xff]  ;;  %v1469_v18 = vld [vmem:[%s8757_s4 + $0x130] sm:$0xff]  ;;  %v1462_v22 = vld [vmem:[%s8757_s4 + $0xf8] sm:$0xff]  ;;  %v8798_v4 = vpop.f32.mrf.mxu0 }
 0x237   :  { %7787 = vmatprep.mubr.msk.f32.mxu0 %vm1245_vm4, %v1220_v19  ;;  %1500 = vmatprep.subr.mxu1 %v1471_v6  ;;  %v1465_v19 = vld [vmem:[%s8757_s4 + $0x110] sm:$0xff]  ;;  %10974 = vst [vmem:[#allocation25_spill] sm:$0xff] %v8798_v4 }
 0x238   :  { %v1160_v24 = vpop.permute.xlu0 %1159  ;;  %v1166_v25 = vpop.permute.xlu1 %1165  ;;  %7788 = vmatmul.mubr.msk.f32.vlgmr.msra.gmra.mxu0 %vm1245_vm4, %v1221_v20  ;;  %v1464_v20 = vld [vmem:[%s8757_s4 + $0x108] sm:$0xff]  ;;  %v1437_v6 = vld [vmem:[%s8757_s4 + $0x30] sm:$0xff] }
 0x239   :  { %v1213_v26 = vsel %vm775_vm2, %v1118_v16, %v1160_v24  ;;  %v1216_v30 = vsel %vm775_vm2, %v7763_v21, %v1166_v25  ;;  %7800 = vmatpush3.msra.mxu0 %v1478_v11  ;;  %v1470_v16 = vld [vmem:[%s8757_s4 + $0x138] sm:$0xff]  ;;  %v1461_v24 = vld [vmem:[%s8757_s4 + $0xf0] sm:$0xff]  ;;  %v1463_v25 = vld [vmem:[%s8757_s4 + $0x100] sm:$0xff] }
 0x23a   :  { %v1222_v28 = vsel %vm1219_vm3, %v1213_v26, %v8710_v14  ;;  %v1225_v48 = vsel %vm1219_vm3, %v1216_v30, %v8716_v15  ;;  %7801 = vmatprep.subr.mxu0 %v1475_v5  ;;  %1501 = vmatpush1.msra.mxu1 %v1470_v16  ;;  %v1466_v21 = vld [vmem:[%s8757_s4 + $0x118] sm:$0xff]  ;;  %v1459_v26 = vld [vmem:[%s8757_s4 + $0xe0] sm:$0xff]  ;;  %v1440_v11 = vld [vmem:[%s8757_s4 + $0x48] sm:$0xff] }
 0x23b   :  { %7790 = vmatprep.mubr.msk.f32.mxu0 %vm1245_vm4, %v1222_v28  ;;  %7802 = vmatpush3.msra.mxu0 %v1475_v5  ;;  %v1460_v28 = vld [vmem:[%s8757_s4 + $0xe8] sm:$0xff]  ;;  %v1455_v30 = vld [vmem:[%s8757_s4 + $0xc0] sm:$0xff]  ;;  %v1438_v5 = vld [vmem:[%s8757_s4 + $0x38] sm:$0xff] }
 0x23c   :  { %v1164_v31 = vpop.permute.xlu0 %1163  ;;  %7791 = vmatmul.mubr.msk.f32.gmra.mxu0 %vm1245_vm4, %v1223_v29  ;;  %v1170_v32 = vpop.permute.xlu1 %1169  ;;  %7803 = vmatprep.subr.mxu0 %v1472_v7  ;;  %v1456_v29 = vld [vmem:[%s8757_s4 + $0xc8] sm:$0xff]  ;;  %v1439_v16 = vld [vmem:[%s8757_s4 + $0x40] sm:$0xff] }
 0x23d   :  { %v1215_v33 = vsel %vm775_vm2, %v1128_v27, %v1164_v31  ;;  %v1218_v58 = vsel %vm775_vm2, %v7766_v23, %v1170_v32  ;;  %1502 = vmatprep.subr.mxu1 %v1468_v8  ;;  %7804 = vmatpush3.msra.mxu0 %v1472_v7  ;;  %v1458_v27 = vld [vmem:[%s8757_s4 + $0xd8] sm:$0xff]  ;;  %v1457_v31 = vld [vmem:[%s8757_s4 + $0xd0] sm:$0xff]  ;;  %v1435_v7 = vld [vmem:[%s8757_s4 + $0x20] sm:$0xff] }
 0x23e   :  { %v1224_v47 = vsel %vm1219_vm3, %v1215_v33, %v8714_v3  ;;  %1503 = vmatpush1.msra.mxu1 %v1467_v17  ;;  %7805 = vmatprep.subr.mxu0 %v1469_v18  ;;  %v1453_v32 = vld [vmem:[%s8757_s4 + $0xb0] sm:$0xff]  ;;  %v1452_v33 = vld [vmem:[%s8757_s4 + $0xa8] sm:$0xff]  ;;  %v1454_v23 = vld [vmem:[%s8757_s4 + $0xb8] sm:$0xff] }
 0x23f   :  { %7793 = vmatprep.mubr.msk.f32.mxu0 %vm1245_vm4, %v1224_v47  ;;  %1504 = vmatprep.subr.mxu1 %v1465_v19  ;;  %v1450_v47 = vld [vmem:[%s8757_s4 + $0x98] sm:$0xff]  ;;  %v1436_v17 = vld [vmem:[%s8757_s4 + $0x28] sm:$0xff] }
 0x240   :  { %v1168_v50 = vpop.permute.xlu0 %1167  ;;  %7794 = vmatmul.mubr.msk.f32.gmra.mxu0 %vm1245_vm4, %v1225_v48  ;;  %v8743_v59 = vpop.permute.xlu1 %1201  ;;  %1505 = vmatpush1.msra.mxu1 %v1464_v20  ;;  %v1449_v48 = vld [vmem:[%s8757_s4 + $0x90] sm:$0xff]  ;;  %v1434_v8 = vld [vmem:[%s8757_s4 + $0x18] sm:$0xff]  ;;  %v1432_v19 = vld [vmem:[%s8757_s4 + $0x8] sm:$0xff] }
 0x241   :  { %10972 = vst [vmem:[#allocation23_spill] sm:$0xff] %v8743_v59  ;;  %v1217_v60 = vsel %vm775_vm2, %v1138_v55, %v1168_v50  ;;  %v1227_v63 = vsel %vm1219_vm3, %v1218_v58, %v8743_v59  ;;  %7806 = vmatpush3.msra.mxu0 %v1469_v18  ;;  %1506 = vmatprep.subr.mxu1 %v1462_v22  ;;  %v1451_v50 = vld [vmem:[%s8757_s4 + $0xa0] sm:$0xff]  ;;  %v1446_v58 = vld [vmem:[%s8757_s4 + $0x78] sm:$0xff]  ;;  %v8806_v18 = vpop.f32.mrf.mxu0 }
 0x242   :  { %7807 = vmatprep.subr.mxu0 %v1466_v21  ;;  %1507 = vmatpush1.msra.mxu1 %v1461_v24  ;;  %v1447_v55 = vld [vmem:[%s8757_s4 + $0x80] sm:$0xff]  ;;  %10975 = vst [vmem:[#allocation26_spill] sm:$0xff] %v8806_v18 }
 0x243   :  { %7808 = vmatpush3.msra.mxu0 %v1466_v21  ;;  %1508 = vmatprep.subr.mxu1 %v1459_v26  ;;  %v1431_v20 = vld [vmem:[%s8757_s4] sm:$0xff]  ;;  %v1433_v21 = vld [vmem:[%s8757_s4 + $0x10] sm:$0xff]  ;;  %v8811_v22 = vpop.f32.mrf.mxu0 }
 0x244   :  { %v8746_v61 = vpop.permute.xlu0 %1199  ;;  %7809 = vmatprep.subr.mxu0 %v1463_v25  ;;  %1509 = vmatpush1.msra.mxu1 %v1458_v27 }
 0x245   :  { %10973 = vst [vmem:[#allocation24_spill] sm:$0xff] %v8746_v61  ;;  %v1226_v62 = vsel %vm1219_vm3, %v1217_v60, %v8746_v61  ;;  %7810 = vmatpush3.msra.mxu0 %v1463_v25  ;;  %1510 = vmatprep.subr.mxu1 %v1456_v29  ;;  %v1448_v60 = vld [vmem:[%s8757_s4 + $0x88] sm:$0xff]  ;;  %v8813_v24 = vpop.f32.mrf.mxu0 }
 0x246   :  { %7796 = vmatprep.mubr.msk.f32.mxu0 %vm1245_vm4, %v1226_v62  ;;  %7811 = vmatprep.subr.mxu0 %v1460_v28  ;;  %v1444_v62 = vld [vmem:[%s8757_s4 + $0x68] sm:$0xff]  ;;  %10976 = vst [vmem:[#allocation27_spill] sm:$0xff] %v8813_v24 }
 0x247   :  { %7797 = vmatmul.mubr.msk.f32.gmra.mxu0 %vm1245_vm4, %v1227_v63  ;;  %1511 = vmatpush1.msra.mxu1 %v1455_v30  ;;  %v1443_v63 = vld [vmem:[%s8757_s4 + $0x60] sm:$0xff]  ;;  %v8815_v25 = vpop.f32.mrf.mxu0 }
 0x248   :  { %7812 = vmatpush3.msra.mxu0 %v1460_v28  ;;  %1512 = vmatprep.subr.mxu1 %v1453_v32 }
 0x249   :  { %7813 = vmatprep.subr.mxu0 %v1457_v31  ;;  %1513 = vmatpush1.msra.mxu1 %v1452_v33  ;;  %v8817_v26 = vpop.f32.mrf.mxu0 }
 0x24a   :  { %7814 = vmatpush3.msra.mxu0 %v1457_v31  ;;  %1514 = vmatprep.subr.mxu1 %v1450_v47 }
 0x24b   :  { %7815 = vmatprep.subr.mxu0 %v1454_v23  ;;  %1515 = vmatpush1.msra.mxu1 %v1449_v48  ;;  %v8819_v27 = vpop.f32.mrf.mxu0 }
 0x24c   :  { %7816 = vmatpush3.msra.mxu0 %v1454_v23  ;;  %1516 = vmatprep.subr.mxu1 %v1447_v55 }
 0x24d   :  { %7817 = vmatprep.subr.mxu0 %v1451_v50  ;;  %1517 = vmatpush1.msra.mxu1 %v1446_v58  ;;  %v8821_v28 = vpop.f32.mrf.mxu0 }
 0x24e   :  { %7818 = vmatpush3.msra.mxu0 %v1451_v50  ;;  %1518 = vmatprep.subr.mxu1 %v1444_v62 }
 0x24f   :  { %7819 = vmatprep.subr.mxu0 %v1448_v60  ;;  %1519 = vmatpush1.msra.mxu1 %v1443_v63  ;;  %v8823_v29 = vpop.f32.mrf.mxu0 }
 0x250   :  { %7820 = vmatpush3.msra.mxu0 %v1448_v60  ;;  %1520 = vmatprep.subr.mxu1 %v1441_v9  ;;  %10977 = vst [vmem:[#allocation28_spill] sm:$0xff] %v8823_v29 }
 0x251   :  { %7821 = vmatprep.subr.mxu0 %v1445_v0  ;;  %1521 = vmatpush1.msra.mxu1 %v1440_v11  ;;  %v8825_v30 = vpop.f32.mrf.mxu0  ;;  %v6941_v11 = vld [vmem:[%s8854_s8] ss:$0 sm:$0xff] }
 0x252   :  { %7822 = vmatpush3.msra.mxu0 %v1445_v0  ;;  %1522 = vmatprep.subr.mxu1 %v1438_v5  ;;  %10978 = vst [vmem:[#allocation29_spill] sm:$0xff] %v8825_v30 }
 0x253   :  { %7823 = vmatprep.subr.mxu0 %v1442_v1  ;;  %1523 = vmatpush1.msra.mxu1 %v1437_v6  ;;  %v8827_v31 = vpop.f32.mrf.mxu0 }
 0x254   :  { %7824 = vmatpush3.msra.mxu0 %v1442_v1  ;;  %1524 = vmatprep.subr.mxu1 %v1435_v7  ;;  %10979 = vst [vmem:[#allocation30_spill] sm:$0xff] %v8827_v31 }
 0x255   :  { %7825 = vmatprep.subr.mxu0 %v1439_v16  ;;  %1525 = vmatpush1.msra.mxu1 %v1434_v8  ;;  %v8829_v32 = vpop.f32.mrf.mxu0 }
 0x256   :  { %7826 = vmatpush3.msra.mxu0 %v1439_v16  ;;  %1526 = vmatprep.subr.mxu1 %v1432_v19  ;;  %10980 = vst [vmem:[#allocation31_spill] sm:$0xff] %v8829_v32 }
 0x257   :  { %7827 = vmatprep.subr.mxu0 %v1436_v17  ;;  %1527 = vmatpush1.msra.mxu1 %v1431_v20  ;;  %v8831_v33 = vpop.f32.mrf.mxu0 }
 0x258   :  { %7828 = vmatpush3.msra.mxu0 %v1436_v17 }
 0x259   :  { %7829 = vmatprep.subr.mxu0 %v1433_v21  ;;  %v8833_v23 = vpop.f32.mrf.mxu0 }
 0x25a   :  { %7830 = vmatpush3.msra.mxu0 %v1433_v21 }
 0x25b   :  { %v8835_v47 = vpop.f32.mrf.mxu0 }
 0x25d   :  { %v8837_v48 = vpop.f32.mrf.mxu0 }
 0x25f   :  { %v8839_v50 = vpop.f32.mrf.mxu0 }
 0x261   :  { %v8841_v55 = vpop.f32.mrf.mxu0 }
 0x263   :  { %v8843_v58 = vpop.f32.mrf.mxu0 }
 0x265   :  { %v8845_v60 = vpop.f32.mrf.mxu0 }
 0x267   :  { %v8847_v62 = vpop.f32.mrf.mxu0 }
 0x269   :  { %v8849_v63 = vpop.f32.mrf.mxu0 }
 0x26b   :  { %v8856_v0 = vpop.f32.mrf.mxu0 }
 0x26d   :  { %v8858_v9 = vpop.f32.mrf.mxu0 }
 0x2f8   :  { %v7789_v1 = vpop.f32.mrf.mxu0 }
 0x2f9   :  { %v1342_v5 = vadd.f32 %v7789_v1, %v6941_v11 }
 0x2fa   :  { %v1336_v6 = vpop.f32.mrf.mxu0 }
 0x2fb   :  { %v6951_v16 = vmul.f32 -1.442695, %v1342_v5  ;;  %v1337_v7 = vadd.f32 %v6941_v11, %v1336_v6 }
 0x2fc   :  { %v7792_v8 = vpop.f32.mrf.mxu0 }
 0x2fd   :  { %8053 = vpow2.f32 %v6951_v16  ;;  %v6950_v17 = vmul.f32 -1.442695, %v1337_v7  ;;  %v1352_v19 = vadd.f32 %v7792_v8, %v6941_v11 }
 0x2fe   :  { %v1346_v20 = vpop.f32.mrf.mxu0 }
 0x2ff   :  { %8055 = vpow2.f32 %v6950_v17  ;;  %v6953_v21 = vmul.f32 -1.442695, %v1352_v19  ;;  %v1347_v10 = vadd.f32 %v6941_v11, %v1346_v20 }
 0x300   :  { %v7795_v44 = vpop.f32.mrf.mxu0 }
 0x301   :  { %8057 = vpow2.f32 %v6953_v21  ;;  %v6952_v42 = vmul.f32 -1.442695, %v1347_v10  ;;  %v1362_v51 = vadd.f32 %v7795_v44, %v6941_v11 }
 0x302   :  { %v1356_v53 = vpop.f32.mrf.mxu0 }
 0x303   :  { %8059 = vpow2.f32 %v6952_v42  ;;  %v6955_v45 = vmul.f32 -1.442695, %v1362_v51  ;;  %v1357_v49 = vadd.f32 %v6941_v11, %v1356_v53 }
 0x305   :  { %8061 = vpow2.f32 %v6955_v45  ;;  %v6954_v1 = vmul.f32 -1.442695, %v1357_v49 }
 0x307   :  { %8063 = vpow2.f32 %v6954_v1  ;;  %v7798_v6 = vpop.f32.mrf.mxu0 }
 0x308   :  { %v1372_v43 = vadd.f32 %v7798_v6, %v6941_v11 }
 0x309   :  { %v1366_v16 = vpop.f32.mrf.mxu0 }
 0x30a   :  { %v8054_v46 = vpop.eup %8053  ;;  %v6957_v8 = vmul.f32 -1.442695, %v1372_v43  ;;  %v1367_v59 = vadd.f32 %v6941_v11, %v1366_v16 }
 0x30b   :  { %v1400_v17 = vadd.f32 1.0, %v8054_v46 }
 0x30c   :  { %v8056_v61 = vpop.eup %8055  ;;  %8065 = vpow2.f32 %v6957_v8  ;;  %v6956_v20 = vmul.f32 -1.442695, %v1367_v59 }
 0x30d   :  { %8067 = vrcp.f32 %v1400_v17  ;;  %v1399_v21 = vadd.f32 1.0, %v8056_v61 }
 0x30e   :  { %v8058_v44 = vpop.eup %8057  ;;  %8069 = vpow2.f32 %v6956_v20 }
 0x30f   :  { %8071 = vrcp.f32 %v1399_v21  ;;  %v1402_v42 = vadd.f32 1.0, %v8058_v44 }
 0x310   :  { %v8060_v53 = vpop.eup %8059 }
 0x311   :  { %v1401_v45 = vadd.f32 1.0, %v8060_v53  ;;  %8073 = vrcp.f32 %v1402_v42 }
 0x312   :  { %v8062_v15 = vpop.eup %8061 }
 0x313   :  { %8075 = vrcp.f32 %v1401_v45  ;;  %v1404_v1 = vadd.f32 1.0, %v8062_v15  ;;  %v10981_v15 = vmov 0.0  }
 0x314   :  { %v8064_v6 = vpop.eup %8063 }
 0x315   :  { %v1403_v3 = vadd.f32 1.0, %v8064_v6  ;;  %8077 = vrcp.f32 %v1404_v1 }
 0x317   :  { %8079 = vrcp.f32 %v1403_v3 }
 0x319   :  { %v8066_v46 = vpop.eup %8065 }
 0x31a   :  { %v8068_v11 = vpop.eup %8067  ;;  %v1406_v16 = vadd.f32 1.0, %v8066_v46 }
 0x31b   :  { %v8070_v8 = vpop.eup %8069  ;;  %v1424_v20 = vmul.f32 %v8068_v11, %v1342_v5 }
 0x31c   :  { %v8072_v17 = vpop.eup %8071  ;;  %v1405_v61 = vadd.f32 1.0, %v8070_v8  ;;  %8081 = vrcp.f32 %v1406_v16 }
 0x31d   :  { %v1423_v2 = vmul.f32 %v8072_v17, %v1337_v7 }
 0x31e   :  { %8083 = vrcp.f32 %v1405_v61  ;;  %v8074_v21 = vpop.eup %8073 }
 0x31f   :  { %1561 = vmatmul.mubr.f32.vlgmr.msra.gmra.mxu1 %v1423_v2  ;;  %7831 = vmatprep.mubr.f32.mxu0 %v1423_v2  ;;  %v1426_v53 = vmul.f32 %v8074_v21, %v1352_v19 }
 0x320   :  { %v8076_v44 = vpop.eup %8075  ;;  %7832 = vmatmul.mubr.f32.vlgmr.msra.gmra.mxu0 %v1424_v20  ;;  %1566 = vmatprep.mubr.f32.mxu1 %v10981_v15 }
 0x321   :  { %v1425_v42 = vmul.f32 %v8076_v44, %v1347_v10  ;;  %v8890_v44 = vld [vmem:[%s8878_s13] sm:$0x7] }
 0x322   :  { %v8078_v3 = vpop.eup %8077 }
 0x323   :  { %1567 = vmatmul.mubr.f32.gmra.mxu1 %v1424_v20  ;;  %7834 = vmatprep.mubr.f32.mxu0 %v1425_v42  ;;  %v1428_v1 = vmul.f32 %v8078_v3, %v1362_v51  ;;  %v1481_v51 = vlaneseq }
 0x324   :  { %v8080_v45 = vpop.eup %8079  ;;  %7835 = vmatmul.mubr.f32.gmra.mxu0 %v1426_v53  ;;  %1572 = vmatprep.mubr.f32.mxu1 %v10981_v15 }
 0x325   :  { %v1427_v7 = vmul.f32 %v8080_v45, %v1357_v49  ;;  %v8869_v49 = vpop.trf.xlu0  ;;  %v8882_v16 = vshrl.u32 %v1481_v51, 7 }
 0x326   :  { %10982 = vst [vmem:[#allocation32_spill] sm:$0xff] %v8869_v49 }
 0x327   :  { %1573 = vmatmul.mubr.f32.gmra.mxu1 %v1425_v42  ;;  %7837 = vmatprep.mubr.f32.mxu0 %v1427_v7  ;;  %10983 = vst [vmem:[#allocation33_spill] sm:$0xff] %v8882_v16  ;;  %v8887_v21 = vsub.s32 2, %v8882_v16 }
 0x328   :  { %7838 = vmatmul.mubr.f32.gmra.mxu0 %v1428_v1  ;;  %1578 = vmatprep.mubr.f32.mxu1 %v10981_v15 }
 0x329   :  { %v8082_v2 = vpop.eup %8081  ;;  %10984 = vst [vmem:[#allocation34_spill] sm:$0xff] %v8887_v21  ;;  %v1492_v45 = vrot.slane %v8890_v44, %v8887_v21 }
 0x32a   :  { %v1430_v10 = vmul.f32 %v8082_v2, %v1372_v43 }
 0x32b   :  { %v8084_v5 = vpop.eup %8083  ;;  %1579 = vmatmul.mubr.f32.gmra.mxu1 %v1426_v53 }
 0x32c   :  { %v1429_v6 = vmul.f32 %v8084_v5, %v1367_v59  ;;  %1584 = vmatprep.mubr.f32.mxu1 %v10981_v15 }
 0x32e   :  { %7840 = vmatprep.mubr.f32.mxu0 %v1429_v6 }
 0x32f   :  { %1585 = vmatmul.mubr.f32.gmra.mxu1 %v1427_v7  ;;  %7841 = vmatmul.mubr.f32.gmra.mxu0 %v1430_v10 }
 0x330   :  { %1590 = vmatprep.mubr.f32.mxu1 %v10981_v15  ;;  %1974 = vmatprep.mubr.f32.mxu0 %v10981_v15 }
 0x333   :  { %1591 = vmatmul.mubr.f32.gmra.mxu1 %v1428_v1 }
 0x334   :  { %1596 = vmatprep.mubr.f32.mxu1 %v10981_v15 }
 0x337   :  { %1597 = vmatmul.mubr.f32.gmra.mxu1 %v1429_v6 }
 0x338   :  { %1602 = vmatprep.mubr.f32.mxu1 %v10981_v15 }
 0x33b   :  { %1603 = vmatmul.mubr.f32.gmra.mxu1 %v1430_v10  ;;  %v8901_v10 = vsub.s32 0, %v8882_v16 }
 0x33c   :  { %7859 = vmatprep.mubr.msk.f32.mxu1 %vm1219_vm3, %v8869_v49 }
 0x33d   :  { %10985 = vst [vmem:[#allocation35_spill] sm:$0xff] %v8901_v10 }
 0x3df   :  { %v8873_v43 = vpop.f32.mrf.mxu1 }
 0x3e0   :  { %v7833_v59 = vpop.f32.mrf.mxu0 }
 0x3e1   :  { %v8880_v19 = vpop.f32.mrf.mxu1  ;;  %v8898_v6 = vadd.f32 %v7833_v59, %v1492_v45  ;;  %v1484_v59 = vrot.slane %v8890_v44, %v8901_v10 }
 0x3e2   :  { %v1675_v46 = vpop.f32.mrf.mxu0 }
 0x3e3   :  { %v1568_v11 = vpop.f32.mrf.mxu1  ;;  %v6967_v54 = vmul.f32 -1.442695, %v8898_v6  ;;  %v8930_v31 = vadd.f32 %v1675_v46, %v1492_v45 }
 0x3e4   :  { %v7836_v8 = vpop.f32.mrf.mxu0 }
 0x3e5   :  { %v8884_v17 = vpop.f32.mrf.mxu1  ;;  %v8909_v12 = vadd.f32 %v7836_v8, %v1492_v45  ;;  %8085 = vpow2.f32 %v6967_v54 }
 0x3e6   :  { %v1685_v61 = vpop.f32.mrf.mxu0 }
 0x3e7   :  { %v1574_v20 = vpop.f32.mrf.mxu1  ;;  %v8916_v57 = vadd.f32 %v1685_v61, %v1492_v45  ;;  %v6969_v8 = vmul.f32 -1.442695, %v8909_v12 }
 0x3e8   :  { %v7839_v42 = vpop.f32.mrf.mxu0 }
 0x3e9   :  { %v8892_v53 = vpop.f32.mrf.mxu1  ;;  %v8903_v51 = vadd.f32 %v7839_v42, %v1492_v45  ;;  %v6968_v10 = vmul.f32 -1.442695, %v8916_v57 }
 0x3ea   :  { %v1695_v7 = vpop.f32.mrf.mxu0 }
 0x3eb   :  { %v1580_v3 = vpop.f32.mrf.mxu1  ;;  %v8912_v56 = vadd.f32 %v1695_v7, %v1492_v45  ;;  %v6971_v42 = vmul.f32 -1.442695, %v8903_v51 }
 0x3ec   :  { %v1581_v35 = vadd.f32 %v1580_v3, %v1484_v59 }
 0x3ed   :  { %v8896_v1 = vpop.f32.mrf.mxu1  ;;  %v6970_v7 = vmul.f32 -1.442695, %v8912_v56  ;;  %8087 = vpow2.f32 %v6971_v42 }
 0x3ef   :  { %v1586_v2 = vpop.f32.mrf.mxu1  ;;  %v7842_v5 = vpop.f32.mrf.mxu0 }
 0x3f0   :  { %v8907_v13 = vadd.f32 %v7842_v5, %v1492_v45  ;;  %v1587_v34 = vadd.f32 %v1586_v2, %v1484_v59  ;;  %v1575_v2 = vadd.f32 %v1574_v20, %v1484_v59 }
 0x3f1   :  { %v8905_v14 = vpop.f32.mrf.mxu1  ;;  %v1705_v52 = vpop.f32.mrf.mxu0 }
 0x3f2   :  { %v6973_v5 = vmul.f32 -1.442695, %v8907_v13  ;;  %v8922_v15 = vadd.f32 %v1705_v52, %v1492_v45  ;;  %v6961_v52 = vmul.f32 -1.442695, %v1581_v35  ;;  %v6962_v54 = vmul.f32 -1.442695, %v1587_v34  ;;  %v8086_v34 = vpop.eup %8085 }
 0x3f3   :  { %v1592_v21 = vpop.f32.mrf.mxu1  ;;  %v6960_v35 = vmul.f32 -1.442695, %v1575_v2 }
 0x3f4   :  { %v1593_v61 = vadd.f32 %v1592_v21, %v1484_v59  ;;  %8089 = vpow2.f32 %v6973_v5  ;;  %v6972_v30 = vmul.f32 -1.442695, %v8922_v15  ;;  %v1569_v21 = vadd.f32 %v1568_v11, %v1484_v59 }
 0x3f5   :  { %v8919_v49 = vpop.f32.mrf.mxu1  ;;  %8091 = vpow2.f32 %v6969_v8  ;;  %v6966_v5 = vmul.f32 -1.442695, %v8930_v31 }
 0x3f6   :  { %8093 = vpow2.f32 %v6970_v7  ;;  %v6963_v32 = vmul.f32 -1.442695, %v1593_v61  ;;  %v6959_v46 = vmul.f32 -1.442695, %v1569_v21 }
 0x3f7   :  { %v1598_v18 = vpop.f32.mrf.mxu1  ;;  %8095 = vpow2.f32 %v6968_v10 }
 0x3f8   :  { %v1599_v4 = vadd.f32 %v1598_v18, %v1484_v59  ;;  %8097 = vpow2.f32 %v6972_v30  ;;  %v1563_v18 = vadd.f32 %v8873_v43, %v1484_v59 }
 0x3f9   :  { %v8927_v29 = vpop.f32.mrf.mxu1  ;;  %8099 = vpow2.f32 %v6961_v52 }
 0x3fa   :  { %v6964_v42 = vmul.f32 -1.442695, %v1599_v4  ;;  %8101 = vpow2.f32 %v6962_v54  ;;  %v8088_v20 = vpop.eup %8087 }
 0x3fb   :  { %v1604_v37 = vpop.f32.mrf.mxu1  ;;  %8103 = vpow2.f32 %v6963_v32  ;;  %v1791_v10 = vadd.f32 1.0, %v8088_v20 }
 0x3fc   :  { %v1605_v3 = vadd.f32 %v1604_v37, %v1484_v59  ;;  %8105 = vpow2.f32 %v6964_v42  ;;  %v6958_v37 = vmul.f32 -1.442695, %v1563_v18 }
 0x3fe   :  { %v6965_v24 = vmul.f32 -1.442695, %v1605_v3 }
 0x400   :  { %8107 = vpow2.f32 %v6965_v24 }
 0x401   :  { %8109 = vpow2.f32 %v6966_v5  ;;  %v8090_v30 = vpop.eup %8089 }
 0x402   :  { %8111 = vpow2.f32 %v6960_v35  ;;  %v8092_v4 = vpop.eup %8091  ;;  %v1793_v11 = vadd.f32 1.0, %v8090_v30 }
 0x403   :  { %8113 = vpow2.f32 %v6959_v46  ;;  %v8094_v45 = vpop.eup %8093  ;;  %v1789_v59 = vadd.f32 1.0, %v8092_v4 }
 0x404   :  { %8115 = vpow2.f32 %v6958_v37  ;;  %v8096_v8 = vpop.eup %8095  ;;  %v1790_v7 = vadd.f32 1.0, %v8094_v45  ;;  %v1787_v37 = vadd.f32 1.0, %v8086_v34 }
 0x405   :  { %8117 = vrcp.f32 %v1793_v11  ;;  %v8098_v43 = vpop.eup %8097  ;;  %v1788_v42 = vadd.f32 1.0, %v8096_v8 }
 0x406   :  { %v8100_v32 = vpop.eup %8099  ;;  %v1792_v61 = vadd.f32 1.0, %v8098_v43  ;;  %8119 = vrcp.f32 %v1791_v10  ;;  %v8935_v10 = vsub.s32 1, %v8882_v16 }
 0x407   :  { %v8102_v24 = vpop.eup %8101  ;;  %v1741_v20 = vadd.f32 1.0, %v8100_v32  ;;  %v1606_v32 = vpop.f32.mrf.mxu1 }
 0x408   :  { %v8104_v52 = vpop.eup %8103  ;;  %8121 = vrcp.f32 %v1792_v61  ;;  %v1742_v18 = vadd.f32 1.0, %v8102_v24  ;;  %v1488_v61 = vrot.slane %v8890_v44, %v8935_v10 }
 0x409   :  { %v8106_v54 = vpop.eup %8105  ;;  %8123 = vrcp.f32 %v1789_v59  ;;  %v1743_v3 = vadd.f32 1.0, %v8104_v52 }
 0x40a   :  { %8125 = vrcp.f32 %v1790_v7  ;;  %v1744_v21 = vadd.f32 1.0, %v8106_v54  ;;  %v8947_v44 = vadd.f32 %v8884_v17, %v1488_v61 }
 0x40b   :  { %8127 = vrcp.f32 %v1743_v3  ;;  %v1607_v3 = vadd.f32 %v1606_v32, %v1488_v61 }
 0x40c   :  { %8129 = vrcp.f32 %v1744_v21  ;;  %v1589_v21 = vadd.f32 %v8905_v14, %v1488_v61 }
 0x40d   :  { %v8108_v2 = vpop.eup %8107  ;;  %v1833_v14 = vmul.f32 %v8663_v40, %v1607_v3  ;;  %v1857_v17 = vmul.f32 %v8819_v27, %v1607_v3 }
 0x40e   :  { %v8110_v5 = vpop.eup %8109  ;;  %v1745_v35 = vadd.f32 1.0, %v8108_v2 }
 0x40f   :  { %v8112_v46 = vpop.eup %8111  ;;  %v1786_v4 = vadd.f32 1.0, %v8110_v5 }
 0x410   :  { %8131 = vrcp.f32 %v1745_v35  ;;  %v8114_v30 = vpop.eup %8113  ;;  %v1740_v11 = vadd.f32 1.0, %v8112_v46  ;;  %v1601_v35 = vadd.f32 %v8927_v29, %v1488_v61  ;;  %v8951_v46 = vadd.f32 %v8892_v53, %v1488_v61 }
 0x411   :  { %8133 = vrcp.f32 %v1788_v42  ;;  %v8116_v45 = vpop.eup %8115  ;;  %v1739_v43 = vadd.f32 1.0, %v8114_v30  ;;  %v8958_v30 = vpop.trf.xlu0 }
 0x412   :  { %8135 = vrcp.f32 %v1742_v18  ;;  %v8118_v8 = vpop.eup %8117  ;;  %v1738_v34 = vadd.f32 1.0, %v8116_v45  ;;  %v8944_v18 = vadd.f32 %v8880_v19, %v1488_v61  ;;  %10986 = vst [vmem:[#allocation36_spill] sm:$0xff] %v8958_v30  ;;  %v1832_v32 = vmul.f32 %v1601_v35, %v8665_v41 }
 0x413   :  { %8137 = vrcp.f32 %v1787_v37  ;;  %v1817_v59 = vmul.f32 %v8118_v8, %v8907_v13  ;;  %v8120_v7 = vpop.eup %8119  ;;  %v1856_v8 = vmul.f32 %v1601_v35, %v8821_v28 }
 0x414   :  { %8139 = vrcp.f32 %v1741_v20  ;;  %v1815_v13 = vmul.f32 %v8120_v7, %v8903_v51  ;;  %v1595_v51 = vadd.f32 %v8919_v49, %v1488_v61  ;;  %v1583_v49 = vadd.f32 %v8896_v1, %v1488_v61 }
 0x415   :  { %8141 = vrcp.f32 %v1786_v4  ;;  %7843 = vmatprep.subr.mxu1 %v1817_v59  ;;  %v8122_v24 = vpop.eup %8121  ;;  %v8977_v3 = vpop.trf.xlu0 }
 0x416   :  { %8143 = vrcp.f32 %v1740_v11  ;;  %7844 = vmatpush3.msra.mxu1 %v1817_v59  ;;  %v8124_v52 = vpop.eup %8123  ;;  %v1816_v54 = vmul.f32 %v8122_v24, %v8922_v15  ;;  %v1830_v11 = vmul.f32 %v1589_v21, %v8661_v39  ;;  %v1831_v1 = vmul.f32 %v8659_v38, %v1595_v51  ;;  %10987 = vst [vmem:[#allocation37_spill] sm:$0xff] %v8977_v3 }
 0x417   :  { %8145 = vrcp.f32 %v1739_v43  ;;  %v8126_v2 = vpop.eup %8125  ;;  %v1855_v7 = vmul.f32 %v8815_v25, %v1595_v51 }
 0x418   :  { %8147 = vrcp.f32 %v1738_v34  ;;  %v8128_v42 = vpop.eup %8127  ;;  %7845 = vmatprep.subr.mxu1 %v1816_v54  ;;  %v1814_v37 = vmul.f32 %v8126_v2, %v8912_v56  ;;  %v1813_v56 = vmul.f32 %v8124_v52, %v8909_v12 }
 0x419   :  { %v8130_v5 = vpop.eup %8129  ;;  %7846 = vmatpush3.msra.mxu1 %v1816_v54  ;;  %v1823_v12 = vmul.f32 %v8128_v42, %v8843_v58  ;;  %v1854_v58 = vmul.f32 %v1589_v21, %v8817_v26 }
 0x41a   :  { %7847 = vmatprep.subr.mxu1 %v1815_v13  ;;  %v1848_v53 = vmul.f32 %v8130_v5, %v8849_v63  ;;  %v1824_v45 = vmul.f32 %v8130_v5, %v8847_v62 }
 0x41b   :  { %7848 = vmatpush3.msra.mxu1 %v1815_v13 }
 0x41c   :  { %7849 = vmatprep.subr.mxu1 %v1814_v37  ;;  %v1864_v61 = vadd.f32 %v1856_v8, %v1848_v53  ;;  %v1840_v54 = vadd.f32 %v1832_v32, %v1824_v45  ;;  %v10991_v53 = vld [vmem:[#allocation8_spill] sm:$0xff]  ;;  %v10994_v45 = vld [vmem:[#allocation29_spill] sm:$0xff] }
 0x41d   :  { %v8132_v15 = vpop.eup %8131  ;;  %7850 = vmatpush3.msra.mxu1 %v1814_v37  ;;  %v10995_v8 = vld [vmem:[#allocation28_spill] sm:$0xff] }
 0x41e   :  { %v8134_v20 = vpop.eup %8133  ;;  %v1825_v19 = vmul.f32 %v8132_v15, %v8856_v0  ;;  %v1849_v29 = vmul.f32 %v8132_v15, %v8858_v9  ;;  %v1847_v9 = vmul.f32 %v8128_v42, %v8845_v60  ;;  %7851 = vmatprep.subr.mxu1 %v1813_v56 }
 0x41f   :  { %v8136_v4 = vpop.eup %8135  ;;  %v1812_v63 = vmul.f32 %v8134_v20, %v8916_v57  ;;  %7852 = vmatpush3.msra.mxu1 %v1813_v56  ;;  %v10989_v20 = vld [vmem:[#allocation31_spill] sm:$0xff] }
 0x420   :  { %v8138_v0 = vpop.eup %8137  ;;  %v1841_v43 = vadd.f32 %v1833_v14, %v1825_v19  ;;  %v1865_v59 = vadd.f32 %v1857_v17, %v1849_v29  ;;  %v1846_v24 = vmul.f32 %v8136_v4, %v8841_v55  ;;  %v1822_v57 = vmul.f32 %v8136_v4, %v8839_v50  ;;  %v10990_v17 = vld [vmem:[#allocation30_spill] sm:$0xff] }
 0x421   :  { %v8140_v34 = vpop.eup %8139  ;;  %v1811_v60 = vmul.f32 %v8138_v0, %v8898_v6  ;;  %7853 = vmatprep.subr.mxu1 %v1812_v63  ;;  %v1863_v2 = vadd.f32 %v1855_v7, %v1847_v9  ;;  %v1839_v6 = vadd.f32 %v1831_v1, %v1823_v12  ;;  %v1853_v50 = vmul.f32 %v8811_v22, %v1583_v49  ;;  %v10998_v1 = vld [vmem:[#allocation7_spill] sm:$0xff] }
 0x422   :  { %v8142_v62 = vpop.eup %8141  ;;  %1926 = vmatprep.subr.mxu0 %v1865_v59  ;;  %7854 = vmatpush3.msra.mxu1 %v1812_v63  ;;  %v1845_v42 = vmul.f32 %v8140_v34, %v8837_v48  ;;  %v1821_v5 = vmul.f32 %v8140_v34, %v8835_v47  ;;  %v1862_v21 = vadd.f32 %v1854_v58, %v1846_v24  ;;  %v10997_v34 = vld [vmem:[#allocation26_spill] sm:$0xff]  ;;  %v11000_v24 = vld [vmem:[#allocation32_spill] sm:$0xff] }
 0x423   :  { %v8144_v52 = vpop.eup %8143  ;;  %1927 = vmatpush1.msra.mxu0 %v1841_v43  ;;  %v1810_v55 = vmul.f32 %v8142_v62, %v8930_v31  ;;  %7855 = vmatprep.subr.mxu1 %v1811_v60  ;;  %v1829_v48 = vmul.f32 %v8653_v36, %v1583_v49  ;;  %v1838_v51 = vadd.f32 %v1830_v11, %v1822_v57  ;;  %v10988_v31 = vld [vmem:[#allocation27_spill] sm:$0xff]  ;;  %v8998_v49 = vpop.trf.xlu0  ;;  %v2160_v57 = vld [vmem:[%s9026_s18 + $0x60] sm:$0xff]  ;;  %v2158_v58 = vld [vmem:[%s9026_s18 + $0x50] sm:$0xff] }
 0x424   :  { %1928 = vmatprep.subr.mxu0 %v1864_v61  ;;  %v8146_v13 = vpop.eup %8145  ;;  %7856 = vmatpush3.msra.mxu1 %v1811_v60  ;;  %v1844_v35 = vmul.f32 %v8144_v52, %v8833_v23  ;;  %v1820_v37 = vmul.f32 %v8144_v52, %v8831_v33  ;;  %v1852_v47 = vmul.f32 %v8951_v46, %v10988_v31  ;;  %v10992_v33 = vld [vmem:[#allocation25_spill] sm:$0xff]  ;;  %v10999_v61 = vmov 0.0   ;;  %v2162_v52 = vld [vmem:[%s9026_s18 + $0x70] sm:$0xff]  ;;  %v2161_v60 = vld [vmem:[%s9026_s18 + $0x68] sm:$0xff] }
 0x425   :  { %1929 = vmatpush1.msra.mxu0 %v1840_v54  ;;  %v8148_v15 = vpop.eup %8147  ;;  %7857 = vmatprep.subr.mxu1 %v1810_v55  ;;  %v1861_v14 = vadd.f32 %v1853_v50, %v1845_v42  ;;  %v1843_v19 = vmul.f32 %v8146_v13, %v10989_v20  ;;  %v1819_v29 = vmul.f32 %v8146_v13, %v10990_v17  ;;  %v2159_v54 = vld [vmem:[%s9026_s18 + $0x58] sm:$0xff]  ;;  %v2156_v42 = vld [vmem:[%s9026_s18 + $0x40] sm:$0xff]  ;;  %v2166_v20 = vld [vmem:[%s9026_s18 + $0x90] sm:$0xff] }
 0x426   :  { %1930 = vmatprep.subr.mxu0 %v1863_v2  ;;  %7858 = vmatpush3.msra.mxu1 %v1810_v55  ;;  %v1828_v23 = vmul.f32 %v8951_v46, %v10991_v53  ;;  %v1837_v4 = vadd.f32 %v1829_v48, %v1821_v5  ;;  %v1851_v56 = vmul.f32 %v10992_v33, %v8947_v44  ;;  %v10996_v46 = vld [vmem:[#allocation6_spill] sm:$0xff]  ;;  %v2157_v2 = vld [vmem:[%s9026_s18 + $0x48] sm:$0xff]  ;;  %v2155_v13 = vld [vmem:[%s9026_s18 + $0x38] sm:$0xff] }
 0x427   :  { %1931 = vmatpush1.msra.mxu0 %v1839_v6  ;;  %7860 = vmatmul.mubr.msk.f32.vlgmr.msra.gmra.mxu1 %vm1219_vm3, %v8958_v30  ;;  %10993 = vst [vmem:[#allocation27_spill] sm:$0xff] %v8998_v49  ;;  %v1860_v11 = vadd.f32 %v1852_v47, %v1844_v35  ;;  %v1842_v0 = vmul.f32 %v8148_v15, %v10994_v45  ;;  %v2154_v55 = vld [vmem:[%s9026_s18 + $0x30] sm:$0xff]  ;;  %v2153_v5 = vld [vmem:[%s9026_s18 + $0x28] sm:$0xff]  ;;  %v2152_v6 = vld [vmem:[%s9026_s18 + $0x20] sm:$0xff] }
 0x428   :  { %1932 = vmatprep.subr.mxu0 %v1862_v21  ;;  %7862 = vmatprep.mubr.msk.f32.mxu1 %vm1219_vm3, %v8977_v3  ;;  %v1818_v43 = vmul.f32 %v8148_v15, %v10995_v8  ;;  %v1827_v59 = vmul.f32 %v10996_v46, %v8947_v44  ;;  %v1836_v9 = vadd.f32 %v1828_v23, %v1820_v37  ;;  %v2151_v50 = vld [vmem:[%s9026_s18 + $0x18] sm:$0xff]  ;;  %v2150_v21 = vld [vmem:[%s9026_s18 + $0x10] sm:$0xff]  ;;  %v2149_v35 = vld [vmem:[%s9026_s18 + $0x8] sm:$0xff] }
 0x429   :  { %1933 = vmatpush1.msra.mxu0 %v1838_v51  ;;  %v1850_v63 = vmul.f32 %v8944_v18, %v10997_v34  ;;  %v1859_v12 = vadd.f32 %v1851_v56, %v1843_v19  ;;  %v1826_v32 = vmul.f32 %v8944_v18, %v10998_v1  ;;  %v2163_v18 = vld [vmem:[%s9026_s18 + $0x78] sm:$0xff]  ;;  %v2148_v15 = vld [vmem:[%s9026_s18] sm:$0xff]  ;;  %v2170_v48 = vld [vmem:[%s9026_s18 + $0xb0] sm:$0xff] }
 0x42a   :  { %1934 = vmatprep.subr.mxu0 %v1861_v14  ;;  %v1835_v62 = vadd.f32 %v1827_v59, %v1819_v29  ;;  %v2171_v37 = vld [vmem:[%s9026_s18 + $0xb8] sm:$0xff]  ;;  %v2169_v51 = vld [vmem:[%s9026_s18 + $0xa8] sm:$0xff]  ;;  %v2168_v47 = vld [vmem:[%s9026_s18 + $0xa0] sm:$0xff] }
 0x42b   :  { %1935 = vmatpush1.msra.mxu0 %v1837_v4  ;;  %7863 = vmatmul.mubr.msk.f32.gmra.mxu1 %vm1219_vm3, %v8998_v49  ;;  %v1858_v7 = vadd.f32 %v1850_v63, %v1842_v0  ;;  %v1834_v44 = vadd.f32 %v1826_v32, %v1818_v43  ;;  %v2167_v14 = vld [vmem:[%s9026_s18 + $0x98] sm:$0xff]  ;;  %v2165_v19 = vld [vmem:[%s9026_s18 + $0x88] sm:$0xff]  ;;  %v2164_v17 = vld [vmem:[%s9026_s18 + $0x80] sm:$0xff] }
 0x42c   :  { %1936 = vmatprep.subr.mxu0 %v1860_v11  ;;  %2412 = vmatprep.mubr.f32.mxu1 %v10999_v61 }
 0x42d   :  { %1937 = vmatpush1.msra.mxu0 %v1836_v9 }
 0x42e   :  { %1938 = vmatprep.subr.mxu0 %v1859_v12 }
 0x42f   :  { %1939 = vmatpush1.msra.mxu0 %v1835_v62 }
 0x430   :  { %1940 = vmatprep.subr.mxu0 %v1858_v7 }
 0x431   :  { %1941 = vmatpush1.msra.mxu0 %v1834_v44 }
 0x432   :  { %6974 = vmatmul.mubr.msk.f32.vlgmr.msra.gmra.mxu0 %vm1219_vm3, %v11000_v24  ;;  %2191 = vmatprep.subr.mxu0 %v10999_v61 }
 0x433   :  { %1980 = vmatprep.mubr.f32.mxu0 %v10999_v61  ;;  %2192 = vmatpush1.msra.mxu0 %v2163_v18 }
 0x434   :  { %2193 = vmatprep.subr.mxu0 %v10999_v61 }
 0x435   :  { %2194 = vmatpush1.msra.mxu0 %v2162_v52 }
 0x436   :  { %6975 = vmatmul.mubr.msk.f32.gmra.mxu0 %vm1219_vm3, %v8958_v30  ;;  %2195 = vmatprep.subr.mxu0 %v10999_v61 }
 0x437   :  { %1986 = vmatprep.mubr.f32.mxu0 %v10999_v61  ;;  %2196 = vmatpush1.msra.mxu0 %v2161_v60 }
 0x438   :  { %2197 = vmatprep.subr.mxu0 %v10999_v61 }
 0x439   :  { %2198 = vmatpush1.msra.mxu0 %v2160_v57 }
 0x43a   :  { %6976 = vmatmul.mubr.msk.f32.gmra.mxu0 %vm1219_vm3, %v8977_v3  ;;  %2199 = vmatprep.subr.mxu0 %v10999_v61 }
 0x43b   :  { %1992 = vmatprep.mubr.f32.mxu0 %v10999_v61  ;;  %2200 = vmatpush1.msra.mxu0 %v2159_v54 }
 0x43c   :  { %2201 = vmatprep.subr.mxu0 %v10999_v61 }
 0x43d   :  { %2202 = vmatpush1.msra.mxu0 %v2158_v58 }
 0x43e   :  { %6977 = vmatmul.mubr.msk.f32.gmra.mxu0 %vm1219_vm3, %v8998_v49  ;;  %2203 = vmatprep.subr.mxu0 %v10999_v61 }
 0x43f   :  { %2204 = vmatpush1.msra.mxu0 %v2157_v2 }
 0x440   :  { %2205 = vmatprep.subr.mxu0 %v10999_v61 }
 0x441   :  { %2206 = vmatpush1.msra.mxu0 %v2156_v42 }
 0x442   :  { %2207 = vmatprep.subr.mxu0 %v10999_v61 }
 0x443   :  { %2208 = vmatpush1.msra.mxu0 %v2155_v13 }
 0x444   :  { %2209 = vmatprep.subr.mxu0 %v10999_v61 }
 0x445   :  { %2210 = vmatpush1.msra.mxu0 %v2154_v55 }
 0x446   :  { %2211 = vmatprep.subr.mxu0 %v10999_v61 }
 0x447   :  { %2212 = vmatpush1.msra.mxu0 %v2153_v5 }
 0x448   :  { %2213 = vmatprep.subr.mxu0 %v10999_v61 }
 0x449   :  { %2214 = vmatpush1.msra.mxu0 %v2152_v6 }
 0x44a   :  { %2215 = vmatprep.subr.mxu0 %v10999_v61 }
 0x44b   :  { %2216 = vmatpush1.msra.mxu0 %v2151_v50 }
 0x44c   :  { %2217 = vmatprep.subr.mxu0 %v10999_v61 }
 0x44d   :  { %2218 = vmatpush1.msra.mxu0 %v2150_v21 }
 0x44e   :  { %2219 = vmatprep.subr.mxu0 %v10999_v61 }
 0x44f   :  { %2220 = vmatpush1.msra.mxu0 %v2149_v35 }
 0x450   :  { %2221 = vmatprep.subr.mxu0 %v10999_v61 }
 0x451   :  { %2222 = vmatpush1.msra.mxu0 %v2148_v15 }
 0x452   :  { %2239 = vmatprep.subr.mxu0 %v10999_v61 }
 0x453   :  { %2240 = vmatpush2.msra.mxu0 %v2171_v37 }
 0x454   :  { %2241 = vmatprep.subr.mxu0 %v10999_v61 }
 0x455   :  { %2242 = vmatpush2.msra.mxu0 %v2170_v48 }
 0x456   :  { %2243 = vmatprep.subr.mxu0 %v10999_v61 }
 0x457   :  { %2244 = vmatpush2.msra.mxu0 %v2169_v51 }
 0x458   :  { %2245 = vmatprep.subr.mxu0 %v10999_v61 }
 0x459   :  { %2246 = vmatpush2.msra.mxu0 %v2168_v47  ;;  %v11001_v47 = vld [vmem:[#allocation5_spill] sm:$0xff] }
 0x45a   :  { %2247 = vmatprep.subr.mxu0 %v10999_v61 }
 0x45b   :  { %2248 = vmatpush2.msra.mxu0 %v2167_v14 }
 0x45c   :  { %2249 = vmatprep.subr.mxu0 %v10999_v61 }
 0x45d   :  { %2250 = vmatpush2.msra.mxu0 %v2166_v20 }
 0x45e   :  { %2251 = vmatprep.subr.mxu0 %v10999_v61 }
 0x45f   :  { %2252 = vmatpush2.msra.mxu0 %v2165_v19 }
 0x460   :  { %2253 = vmatprep.subr.mxu0 %v10999_v61 }
 0x461   :  { %2254 = vmatpush2.msra.mxu0 %v2164_v17 }
 0x4e7   :  { %v7861_v29 = vpop.f32.mrf.mxu1 }
 0x4e9   :  { %v2065_v23 = vpop.f32.mrf.mxu1 }
 0x4ea   :  { %2132 = vrot.lane.b32.xlu1 %v2065_v23, %s8381_s30 }
 0x4eb   :  { %v7864_v4 = vpop.f32.mrf.mxu1 }
 0x4ed   :  { %v2075_v56 = vpop.f32.mrf.mxu1 }
 0x4ee   :  { %2134 = vrot.lane.b32.xlu1 %v7861_v29, %s8381_s30 }
 0x4f2   :  { %2136 = vrot.lane.b32.xlu1 %v2075_v56, %s8381_s30  ;;  %v9079_v11 = vpop.f32.mrf.mxu0  ;;  %v11002_v56 = vld [vmem:[#allocation4_spill] sm:$0xff] }
 0x4f3   :  { %v2084_v63 = vmul.f32 %v9079_v11, %v9079_v11 }
 0x4f4   :  { %v9081_v45 = vpop.f32.mrf.mxu0 }
 0x4f5   :  { %v2088_v59 = vmul.f32 %v9081_v45, %v9081_v45 }
 0x4f6   :  { %2138 = vrot.lane.b32.xlu1 %v7864_v4, %s8381_s30  ;;  %v9083_v0 = vpop.f32.mrf.mxu0 }
 0x4f7   :  { %v2092_v12 = vadd.f32 %v2088_v59, %v2084_v63  ;;  %v2085_v7 = vmul.f32 %v9083_v0, %v9083_v0 }
 0x4f8   :  { %v9085_v8 = vpop.f32.mrf.mxu0 }
 0x4f9   :  { %v2089_v32 = vmul.f32 %v9085_v8, %v9085_v8  ;;  %v2096_v44 = vadd.f32 1e-08, %v2092_v12 }
 0x4fa   :  { %v9087_v43 = vpop.f32.mrf.mxu0 }
 0x4fb   :  { %v2093_v18 = vadd.f32 %v2089_v32, %v2085_v7  ;;  %v2086_v57 = vmul.f32 %v9087_v43, %v9087_v43  ;;  %8149 = vrsqrt.f32 %v2096_v44  ;;  %vm2102_vm5 = vcmp.eq.f32.partialorder %v2096_v44, inf }
 0x4fc   :  { %v9091_v9 = vpop.f32.mrf.mxu0  ;;  %v2105_v51 = vand.u32 2147483648, %v2096_v44  ;;  %vm2104_vm6 = vcmp.eq.f32.partialorder %v2096_v44, 0.0 }
 0x4fd   :  { %v2090_v52 = vmul.f32 %v9091_v9, %v9091_v9  ;;  %v2097_v54 = vadd.f32 1e-08, %v2093_v18  ;;  %v11003_v18 = vld [vmem:[#allocation3_spill] sm:$0xff] }
 0x4fe   :  { %v9097_v62 = vpop.f32.mrf.mxu0 }
 0x4ff   :  { %v2094_v58 = vadd.f32 %v2090_v52, %v2086_v57  ;;  %v2087_v42 = vmul.f32 %v9097_v62, %v9097_v62  ;;  %8151 = vrsqrt.f32 %v2097_v54  ;;  %vm2109_vm7 = vcmp.eq.f32.partialorder %v2097_v54, inf }
 0x500   :  { %v9103_v60 = vpop.f32.mrf.mxu0  ;;  %v2112_v4 = vand.u32 2147483648, %v2097_v54  ;;  %vm2111_vm8 = vcmp.eq.f32.partialorder %v2097_v54, 0.0 }
 0x501   :  { %v2091_v2 = vmul.f32 %v9103_v60, %v9103_v60  ;;  %v2098_v13 = vadd.f32 1e-08, %v2094_v58 }
 0x503   :  { %v2095_v55 = vadd.f32 %v2091_v2, %v2087_v42  ;;  %8153 = vrsqrt.f32 %v2098_v13  ;;  %vm2116_vm9 = vcmp.eq.f32.partialorder %v2098_v13, inf  ;;  %vm2118_vm10 = vcmp.eq.f32.partialorder %v2098_v13, 0.0  ;;  %v11004_v42 = vld [vmem:[#allocation2_spill] sm:$0xff] }
 0x505   :  { %v2099_v5 = vadd.f32 1e-08, %v2095_v55 }
 0x507   :  { %8155 = vrsqrt.f32 %v2099_v5  ;;  %vm2123_vm11 = vcmp.eq.f32.partialorder %v2099_v5, inf  ;;  %v2126_v2 = vand.u32 2147483648, %v2099_v5  ;;  %vm2125_vm12 = vcmp.eq.f32.partialorder %v2099_v5, 0.0 }
 0x508   :  { %v8150_v6 = vpop.eup %8149 }
 0x509   :  { %v2101_v50 = vmul.f32 %v8150_v6, %v2096_v44 }
 0x50b   :  { %v2103_v35 = vsel %vm2102_vm5, %v2096_v44, %v2101_v50  ;;  %v2119_v44 = vand.u32 2147483648, %v2098_v13  ;;  %v9124_v50 = vld [vmem:[%s8440_s29] sm:$0xff] }
 0x50c   :  { %v8152_v21 = vpop.eup %8151  ;;  %v2106_v20 = vsel %vm2104_vm6, %v2105_v51, %v2103_v35  ;;  %v2332_v35 = vld [vmem:[%s9131_s25 + $0xe0] sm:$0xff] }
 0x50d   :  { %v2108_v15 = vmul.f32 %v8152_v21, %v2097_v54  ;;  %v2333_v21 = vld [vmem:[%s9131_s25 + $0xe8] sm:$0xff]  ;;  %v2328_v51 = vld [vmem:[%s9131_s25 + $0xc0] sm:$0xff] }
 0x50f   :  { %v2110_v19 = vsel %vm2109_vm7, %v2097_v54, %v2108_v15  ;;  %v2331_v15 = vld [vmem:[%s9131_s25 + $0xd8] sm:$0xff] }
 0x510   :  { %v8154_v37 = vpop.eup %8153  ;;  %v2113_v63 = vsel %vm2111_vm8, %v2112_v4, %v2110_v19  ;;  %v2325_v19 = vld [vmem:[%s9131_s25 + $0xa8] sm:$0xff] }
 0x511   :  { %v2115_v17 = vmul.f32 %v8154_v37, %v2098_v13  ;;  %v2330_v37 = vld [vmem:[%s9131_s25 + $0xd0] sm:$0xff]  ;;  %v2321_v4 = vld [vmem:[%s9131_s25 + $0x88] sm:$0xff] }
 0x513   :  { %v2117_v12 = vsel %vm2116_vm9, %v2098_v13, %v2115_v17  ;;  %v2335_v13 = vld [vmem:[%s9131_s25 + $0xf8] sm:$0xff]  ;;  %v2324_v17 = vld [vmem:[%s9131_s25 + $0xa0] sm:$0xff] }
 0x514   :  { %v8156_v29 = vpop.eup %8155  ;;  %v2120_v57 = vsel %vm2118_vm10, %v2119_v44, %v2117_v12  ;;  %2348 = vmatprep.subr.mxu1 %v2335_v13  ;;  %v2318_v12 = vld [vmem:[%s9131_s25 + $0x70] sm:$0xff]  ;;  %v2315_v44 = vld [vmem:[%s9131_s25 + $0x58] sm:$0xff] }
 0x515   :  { %v2122_v32 = vmul.f32 %v8156_v29, %v2099_v5  ;;  %v2323_v29 = vld [vmem:[%s9131_s25 + $0x98] sm:$0xff] }
 0x516   :  { %v2307_v13 = vld [vmem:[%s9131_s25 + $0x18] sm:$0xff] }
 0x517   :  { %v2124_v54 = vsel %vm2123_vm11, %v2099_v5, %v2122_v32  ;;  %v2334_v5 = vld [vmem:[%s9131_s25 + $0xf0] sm:$0xff]  ;;  %v2317_v32 = vld [vmem:[%s9131_s25 + $0x68] sm:$0xff] }
 0x518   :  { %v2127_v6 = vsel %vm2125_vm12, %v2126_v2, %v2124_v54  ;;  %2349 = vmatpush1.msra.mxu1 %v2334_v5  ;;  %v2312_v54 = vld [vmem:[%s9131_s25 + $0x40] sm:$0xff]  ;;  %v2310_v2 = vld [vmem:[%s9131_s25 + $0x30] sm:$0xff] }
 0x519   :  { %2350 = vmatprep.subr.mxu1 %v2333_v21  ;;  %v2306_v5 = vld [vmem:[%s9131_s25 + $0x10] sm:$0xff]  ;;  %v2305_v21 = vld [vmem:[%s9131_s25 + $0x8] sm:$0xff] }
 0x51a   :  { %2351 = vmatpush1.msra.mxu1 %v2332_v35  ;;  %v2304_v35 = vld [vmem:[%s9131_s25] sm:$0xff] }
 0x51b   :  { %2352 = vmatprep.subr.mxu1 %v2331_v15  ;;  %v6982_v15 = vld [vmem:[%s9168_s2] ss:$0 sm:$0xff] }
 0x51c   :  { %2353 = vmatpush1.msra.mxu1 %v2330_v37 }
 0x55c   :  { %v2133_v48 = vpop.permute.xlu1 %2132 }
 0x55d   :  { %v2144_v14 = vsel %vm775_vm2, %v11001_v47, %v2133_v48  ;;  %v2329_v48 = vld [vmem:[%s9131_s25 + $0xc8] sm:$0xff] }
 0x55e   :  { %6983 = vmatprep.mubr.msk.f32.mxu0 %vm1219_vm3, %v2144_v14  ;;  %2354 = vmatprep.subr.mxu1 %v2329_v48  ;;  %v2327_v14 = vld [vmem:[%s9131_s25 + $0xb8] sm:$0xff] }
 0x55f   :  { %2256 = vmatmul.mubr.f32.vlgmr.msra.gmra.mxu0 %v2106_v20  ;;  %2355 = vmatpush1.msra.mxu1 %v2328_v51  ;;  %v2326_v20 = vld [vmem:[%s9131_s25 + $0xb0] sm:$0xff] }
 0x560   :  { %v2135_v23 = vpop.permute.xlu1 %2134  ;;  %2356 = vmatprep.subr.mxu1 %v2327_v14 }
 0x561   :  { %v2145_v59 = vsel %vm775_vm2, %v11002_v56, %v2135_v23  ;;  %2357 = vmatpush1.msra.mxu1 %v2326_v20  ;;  %v2322_v23 = vld [vmem:[%s9131_s25 + $0x90] sm:$0xff] }
 0x562   :  { %6984 = vmatprep.mubr.msk.f32.mxu0 %vm1219_vm3, %v2145_v59  ;;  %2358 = vmatprep.subr.mxu1 %v2325_v19  ;;  %v2320_v59 = vld [vmem:[%s9131_s25 + $0x80] sm:$0xff] }
 0x563   :  { %2261 = vmatmul.mubr.f32.gmra.mxu0 %v2113_v63  ;;  %2359 = vmatpush1.msra.mxu1 %v2324_v17  ;;  %v2319_v63 = vld [vmem:[%s9131_s25 + $0x78] sm:$0xff] }
 0x564   :  { %v2137_v7 = vpop.permute.xlu1 %2136  ;;  %2360 = vmatprep.subr.mxu1 %v2323_v29 }
 0x565   :  { %v2146_v52 = vsel %vm775_vm2, %v11003_v18, %v2137_v7  ;;  %2361 = vmatpush1.msra.mxu1 %v2322_v23  ;;  %v2316_v7 = vld [vmem:[%s9131_s25 + $0x60] sm:$0xff] }
 0x566   :  { %6985 = vmatprep.mubr.msk.f32.mxu0 %vm1219_vm3, %v2146_v52  ;;  %2362 = vmatprep.subr.mxu1 %v2321_v4  ;;  %v2314_v52 = vld [vmem:[%s9131_s25 + $0x50] sm:$0xff] }
 0x567   :  { %2266 = vmatmul.mubr.f32.gmra.mxu0 %v2120_v57  ;;  %2363 = vmatpush1.msra.mxu1 %v2320_v59  ;;  %v2313_v57 = vld [vmem:[%s9131_s25 + $0x48] sm:$0xff] }
 0x568   :  { %v2139_v58 = vpop.permute.xlu1 %2138  ;;  %2364 = vmatprep.subr.mxu1 %v2319_v63 }
 0x569   :  { %v2147_v55 = vsel %vm775_vm2, %v11004_v42, %v2139_v58  ;;  %2365 = vmatpush1.msra.mxu1 %v2318_v12  ;;  %v2311_v58 = vld [vmem:[%s9131_s25 + $0x38] sm:$0xff] }
 0x56a   :  { %6986 = vmatprep.mubr.msk.f32.mxu0 %vm1219_vm3, %v2147_v55  ;;  %2366 = vmatprep.subr.mxu1 %v2317_v32  ;;  %v2309_v55 = vld [vmem:[%s9131_s25 + $0x28] sm:$0xff] }
 0x56b   :  { %2271 = vmatmul.mubr.f32.gmra.mxu0 %v2127_v6  ;;  %2367 = vmatpush1.msra.mxu1 %v2316_v7  ;;  %v2308_v6 = vld [vmem:[%s9131_s25 + $0x20] sm:$0xff] }
 0x56c   :  { %7873 = vmatprep.mubr.msk.f32.mxu0 %vm775_vm2, %v9124_v50  ;;  %2368 = vmatprep.subr.mxu1 %v2315_v44 }
 0x56d   :  { %2369 = vmatpush1.msra.mxu1 %v2314_v52 }
 0x56e   :  { %2370 = vmatprep.subr.mxu1 %v2313_v57 }
 0x56f   :  { %2371 = vmatpush1.msra.mxu1 %v2312_v54 }
 0x570   :  { %2372 = vmatprep.subr.mxu1 %v2311_v58 }
 0x571   :  { %2373 = vmatpush1.msra.mxu1 %v2310_v2 }
 0x572   :  { %2374 = vmatprep.subr.mxu1 %v2309_v55 }
 0x573   :  { %2375 = vmatpush1.msra.mxu1 %v2308_v6 }
 0x574   :  { %2376 = vmatprep.subr.mxu1 %v2307_v13 }
 0x575   :  { %2377 = vmatpush1.msra.mxu1 %v2306_v5 }
 0x576   :  { %2378 = vmatprep.subr.mxu1 %v2305_v21 }
 0x577   :  { %2379 = vmatpush1.msra.mxu1 %v2304_v35 }
 0x61f   :  { %v2257_v37 = vpop.f32.mrf.mxu0 }
 0x620   :  { %v2258_v48 = vadd.f32 %v6982_v15, %v2257_v37 }
 0x621   :  { %v2259_v51 = vpop.f32.mrf.mxu0 }
 0x622   :  { %v6987_v14 = vmul.f32 -1.442695, %v2258_v48 }
 0x623   :  { %v2262_v20 = vpop.f32.mrf.mxu0 }
 0x624   :  { %8157 = vpow2.f32 %v6987_v14  ;;  %v2263_v19 = vadd.f32 %v6982_v15, %v2262_v20 }
 0x625   :  { %v2264_v17 = vpop.f32.mrf.mxu0 }
 0x626   :  { %v6988_v29 = vmul.f32 -1.442695, %v2263_v19 }
 0x627   :  { %v2267_v23 = vpop.f32.mrf.mxu0 }
 0x628   :  { %8159 = vpow2.f32 %v6988_v29  ;;  %v2268_v4 = vadd.f32 %v6982_v15, %v2267_v23  ;;  %v11005_v29 = vld [vmem:[#allocation35_spill] sm:$0xff] }
 0x629   :  { %v2269_v59 = vpop.f32.mrf.mxu0 }
 0x62a   :  { %v6989_v63 = vmul.f32 -1.442695, %v2268_v4 }
 0x62b   :  { %v2272_v12 = vpop.f32.mrf.mxu0 }
 0x62c   :  { %8161 = vpow2.f32 %v6989_v63  ;;  %v2273_v32 = vadd.f32 %v6982_v15, %v2272_v12 }
 0x62d   :  { %v2274_v7 = vpop.f32.mrf.mxu0 }
 0x62e   :  { %v6990_v44 = vmul.f32 -1.442695, %v2273_v32 }
 0x630   :  { %8163 = vpow2.f32 %v6990_v44 }
 0x631   :  { %v8158_v52 = vpop.eup %8157 }
 0x632   :  { %v2288_v57 = vadd.f32 1.0, %v8158_v52 }
 0x634   :  { %8165 = vrcp.f32 %v2288_v57 }
 0x635   :  { %v8160_v54 = vpop.eup %8159 }
 0x636   :  { %v2289_v58 = vadd.f32 1.0, %v8160_v54 }
 0x638   :  { %8167 = vrcp.f32 %v2289_v58 }
 0x639   :  { %v8162_v2 = vpop.eup %8161 }
 0x63a   :  { %v2290_v55 = vadd.f32 1.0, %v8162_v2 }
 0x63c   :  { %8169 = vrcp.f32 %v2290_v55 }
 0x63d   :  { %v8164_v6 = vpop.eup %8163 }
 0x63e   :  { %v2291_v13 = vadd.f32 1.0, %v8164_v6 }
 0x640   :  { %8171 = vrcp.f32 %v2291_v13 }
 0x641   :  { %v8166_v5 = vpop.eup %8165 }
 0x642   :  { %v2300_v21 = vmul.f32 %v8166_v5, %v2258_v48  ;;  %v2336_v48 = vld [vmem:[%s9178_s7] sm:$0x3] }
 0x643   :  { %v2341_v23 = vrot.slane %v2336_v48, %v11005_v29  ;;  %v2345_v2 = vrot.slane %v2336_v48, %v8935_v10  ;;  %v9204_v48 = vld [vmem:[%s8440_s29 + $0x8] sm:$0xff] }
 0x644   :  { %2413 = vmatmul.mubr.f32.vlgmr.msra.gmra.mxu1 %v2300_v21 }
 0x645   :  { %v8168_v35 = vpop.eup %8167  ;;  %2418 = vmatprep.mubr.f32.mxu1 %v10999_v61 }
 0x646   :  { %v2301_v15 = vmul.f32 %v8168_v35, %v2263_v19 }
 0x648   :  { %2419 = vmatmul.mubr.f32.gmra.mxu1 %v2301_v15 }
 0x649   :  { %v8170_v37 = vpop.eup %8169  ;;  %2424 = vmatprep.mubr.f32.mxu1 %v10999_v61 }
 0x64a   :  { %v2302_v51 = vmul.f32 %v8170_v37, %v2268_v4 }
 0x64c   :  { %2425 = vmatmul.mubr.f32.gmra.mxu1 %v2302_v51 }
 0x64d   :  { %v8172_v14 = vpop.eup %8171  ;;  %2430 = vmatprep.mubr.f32.mxu1 %v10999_v61 }
 0x64e   :  { %v2303_v20 = vmul.f32 %v8172_v14, %v2273_v32 }
 0x650   :  { %2431 = vmatmul.mubr.f32.gmra.mxu1 %v2303_v20 }
 0x651   :  { %2545 = vmatprep.mubr.f32.mxu1 %v10999_v61 }
 0x704   :  { %v2414_v19 = vpop.f32.mrf.mxu1 }
 0x705   :  { %v2415_v12 = vadd.f32 %v2414_v19, %v2341_v23 }
 0x706   :  { %v2416_v17 = vpop.f32.mrf.mxu1 }
 0x707   :  { %v6991_v57 = vmul.f32 -1.442695, %v2415_v12  ;;  %v2417_v37 = vadd.f32 %v2416_v17, %v2345_v2  ;;  %v9211_v17 = vld [vmem:[%s8440_s29 + $0x10] sm:$0xff]  ;;  %v9225_v12 = vld [vmem:[%s8440_s29 + $0x20] sm:$0xff] }
 0x708   :  { %v2420_v4 = vpop.f32.mrf.mxu1 }
 0x709   :  { %v2421_v59 = vadd.f32 %v2420_v4, %v2341_v23 }
 0x70a   :  { %v2422_v63 = vpop.f32.mrf.mxu1 }
 0x70b   :  { %v6992_v32 = vmul.f32 -1.442695, %v2421_v59  ;;  %v2423_v35 = vadd.f32 %v2422_v63, %v2345_v2  ;;  %v9219_v63 = vld [vmem:[%s8440_s29 + $0x18] sm:$0xff] }
 0x70c   :  { %v2426_v7 = vpop.f32.mrf.mxu1 }
 0x70d   :  { %v2427_v44 = vadd.f32 %v2426_v7, %v2341_v23  ;;  %8173 = vpow2.f32 %v6992_v32  ;;  %v9192_v14 = vadd.f32 %v2423_v35, %v11002_v56  ;;  %v9232_v32 = vld [vmem:[%s8440_s29 + $0x28] sm:$0xff]  ;;  %v9237_v7 = vld [vmem:[%s8440_s29 + $0x30] sm:$0xff] }
 0x70e   :  { %v2428_v52 = vpop.f32.mrf.mxu1 }
 0x70f   :  { %v6993_v54 = vmul.f32 -1.442695, %v2427_v44  ;;  %v2429_v13 = vadd.f32 %v2428_v52, %v2345_v2  ;;  %11008 = vst [vmem:[#allocation25_spill] sm:$0xff] %v9192_v14  ;;  %v9242_v44 = vld [vmem:[%s8440_s29 + $0x38] sm:$0xff]  ;;  %v8349_v52 = vld [vmem:[%s8505_s12] sm:$0xff]  ;;  %s8389_s29 = smov 26  }
 0x710   :  { %v2432_v58 = vpop.f32.mrf.mxu1 }
 0x711   :  { %8175 = vpow2.f32 %v6993_v54  ;;  %v2433_v55 = vadd.f32 %v2432_v58, %v2341_v23  ;;  %v9187_v51 = vadd.f32 %v2429_v13, %v11003_v18  ;;  %v8351_v58 = vld [vmem:[%s8505_s12 + $0x10] sm:$0xff] }
 0x712   :  { %v2434_v6 = vpop.f32.mrf.mxu1  ;;  %8177 = vpow2.f32 %v6991_v57  ;;  %v8350_v57 = vld [vmem:[%s8505_s12 + $0x8] sm:$0xff] }
 0x713   :  { %v6994_v5 = vmul.f32 -1.442695, %v2433_v55  ;;  %v2435_v21 = vadd.f32 %v2434_v6, %v2345_v2  ;;  %11007 = vst [vmem:[#allocation30_spill] sm:$0xff] %v9187_v51 }
 0x715   :  { %8179 = vpow2.f32 %v6994_v5  ;;  %v9184_v15 = vadd.f32 %v2435_v21, %v11004_v42  ;;  %v9197_v42 = vadd.f32 %v2417_v37, %v11001_v47  ;;  %v8352_v21 = vld [vmem:[%s8505_s12 + $0x18] sm:$0xff] }
 0x717   :  { %11006 = vst [vmem:[#allocation31_spill] sm:$0xff] %v9184_v15  ;;  %7865 = vmatprep.subr.mxu0 %v9184_v15  ;;  %11009 = vst [vmem:[#allocation29_spill] sm:$0xff] %v9197_v42 }
 0x718   :  { %7866 = vmatpush3.msra.mxu0 %v9184_v15 }
 0x719   :  { %7867 = vmatprep.subr.mxu0 %v9187_v51 }
 0x71a   :  { %7868 = vmatpush3.msra.mxu0 %v9187_v51  ;;  %v8174_v18 = vpop.eup %8173 }
 0x71b   :  { %7869 = vmatprep.subr.mxu0 %v9192_v14  ;;  %v2450_v19 = vadd.f32 1.0, %v8174_v18  ;;  %v8353_v18 = vld [vmem:[%s8505_s12 + $0x20] sm:$0xff] }
 0x71c   :  { %7870 = vmatpush3.msra.mxu0 %v9192_v14 }
 0x71d   :  { %7871 = vmatprep.subr.mxu0 %v9197_v42 }
 0x71e   :  { %v8176_v20 = vpop.eup %8175  ;;  %7872 = vmatpush3.msra.mxu0 %v9197_v42 }
 0x71f   :  { %v2451_v56 = vadd.f32 1.0, %v8176_v20  ;;  %7874 = vmatmul.mubr.msk.f32.vlgmr.msra.gmra.mxu0 %vm775_vm2, %v9204_v48  ;;  %7885 = vmatprep.subr.mxu0 %v9184_v15  ;;  %v8178_v47 = vpop.eup %8177  ;;  %v8354_v20 = vld [vmem:[%s8583_s20 + $0x18] sm:$0xff] }
 0x720   :  { %7886 = vmatpush3.msra.mxu0 %v9184_v15  ;;  %7876 = vmatprep.mubr.msk.f32.mxu0 %vm775_vm2, %v9211_v17  ;;  %v2449_v4 = vadd.f32 1.0, %v8178_v47 }
 0x721   :  { %7887 = vmatprep.subr.mxu0 %v9187_v51  ;;  %8181 = vrcp.f32 %v2451_v56 }
 0x722   :  { %v8180_v23 = vpop.eup %8179  ;;  %7888 = vmatpush3.msra.mxu0 %v9187_v51  ;;  %8183 = vrcp.f32 %v2450_v19 }
 0x723   :  { %v2452_v59 = vadd.f32 1.0, %v8180_v23  ;;  %7889 = vmatprep.subr.mxu0 %v9192_v14  ;;  %7877 = vmatmul.mubr.msk.f32.gmra.mxu0 %vm775_vm2, %v9219_v63 }
 0x724   :  { %7890 = vmatpush3.msra.mxu0 %v9192_v14  ;;  %7879 = vmatprep.mubr.msk.f32.mxu0 %vm775_vm2, %v9225_v12 }
 0x725   :  { %8185 = vrcp.f32 %v2452_v59  ;;  %7891 = vmatprep.subr.mxu0 %v9197_v42  ;;  %v8358_v59 = vld [vmem:[%s8589_s24 + $0x10] sm:$0xff] }
 0x726   :  { %7892 = vmatpush3.msra.mxu0 %v9197_v42  ;;  %8187 = vrcp.f32 %v2449_v4  ;;  %v8357_v4 = vld [vmem:[%s8505_s12 + $0x28] sm:$0xff] }
 0x727   :  { %7880 = vmatmul.mubr.msk.f32.gmra.mxu0 %vm775_vm2, %v9232_v32 }
 0x728   :  { %7882 = vmatprep.mubr.msk.f32.mxu0 %vm775_vm2, %v9237_v7 }
 0x72b   :  { %7883 = vmatmul.mubr.msk.f32.gmra.mxu0 %vm775_vm2, %v9242_v44 }
 0x72c   :  { %7893 = vmatprep.mubr.msk.f32.mxu0 %vm775_vm2, %v8349_v52 }
 0x72e   :  { %v8182_v54 = vpop.eup %8181 }
 0x72f   :  { %7894 = vmatmul.mubr.msk.f32.vlgmr.msra.gmra.mxu0 %vm775_vm2, %v8350_v57  ;;  %v8184_v2 = vpop.eup %8183  ;;  %v2475_v5 = vmul.f32 %v8182_v54, %v9091_v9  ;;  %v2467_v37 = vmul.f32 %v8182_v54, %v9087_v43  ;;  %v8356_v43 = vld [vmem:[%s8583_s20 + $0x10] sm:$0xff]  ;;  %v8360_v57 = vld [vmem:[%s8583_s20 + $0x8] sm:$0xff] }
 0x730   :  { %7896 = vmatprep.mubr.msk.f32.mxu0 %vm775_vm2, %v8351_v58  ;;  %v2474_v9 = vmul.f32 %v8184_v2, %v9085_v8  ;;  %v8359_v8 = vld [vmem:[%s8505_s12 + $0x30] sm:$0xff]  ;;  %v8361_v54 = vld [vmem:[%s8589_s24 + $0x8] sm:$0xff] }
 0x731   :  { %v9270_v19 = vadd.f32 %v8356_v43, %v2475_v5  ;;  %v9277_v52 = vadd.f32 %v8358_v59, %v2467_v37  ;;  %v7020_v5 = vld [vmem:[%s8598_s28 + $0x58] sm:$0xff] }
 0x732   :  { %v8186_v55 = vpop.eup %8185 }
 0x733   :  { %v2476_v6 = vmul.f32 %v8186_v55, %v9103_v60  ;;  %v2468_v13 = vmul.f32 %v8186_v55, %v9097_v62  ;;  %7897 = vmatmul.mubr.msk.f32.gmra.mxu0 %vm775_vm2, %v8352_v21  ;;  %v8188_v35 = vpop.eup %8187  ;;  %v8355_v60 = vld [vmem:[%s8589_s24 + $0x18] sm:$0xff]  ;;  %v2466_v62 = vmul.f32 %v8184_v2, %v9083_v0  ;;  %11012 = vst [vmem:[#allocation4_spill] sm:$0xff] %v9270_v19  ;;  %11013 = vst [vmem:[#allocation3_spill] sm:$0xff] %v9277_v52  ;;  %v8362_v2 = vld [vmem:[%s8583_s20] sm:$0xff] }
 0x734   :  { %7899 = vmatprep.mubr.msk.f32.mxu0 %vm775_vm2, %v8353_v18  ;;  %v2473_v23 = vmul.f32 %v8188_v35, %v9081_v45  ;;  %v2465_v0 = vmul.f32 %v8188_v35, %v9079_v11  ;;  %v9284_v45 = vadd.f32 %v8360_v57, %v2474_v9  ;;  %v8364_v11 = vld [vmem:[%s8589_s24] sm:$0xff]  ;;  %v7019_v21 = vld [vmem:[%s8598_s28 + $0x50] sm:$0xff]  ;;  %s9761_s24 = sld [smem:[%s10883_s0 + %s8389_s29]]   ;;  %s8397_s29 = smov 12  }
 0x735   :  { %v9261_v56 = vadd.f32 %v8354_v20, %v2476_v6  ;;  %v9264_v47 = vadd.f32 %v8355_v60, %v2468_v13  ;;  %v9288_v58 = vadd.f32 %v8361_v54, %v2466_v62  ;;  %v8363_v6 = vld [vmem:[%s8505_s12 + $0x38] sm:$0xff] }
 0x736   :  { %11014 = vst [vmem:[#allocation2_spill] sm:$0xff] %v9284_v45  ;;  %v9292_v55 = vadd.f32 %v8362_v2, %v2473_v23  ;;  %v9298_v13 = vadd.f32 %v8364_v11, %v2465_v0  ;;  %v11018_v54 = vld [vmem:[#allocation17_spill] sm:$0xff] }
 0x737   :  { %11010 = vst [vmem:[#allocation28_spill] sm:$0xff] %v9261_v56  ;;  %11011 = vst [vmem:[#allocation5_spill] sm:$0xff] %v9264_v47  ;;  %2505 = vmatprep.subr.mxu1 %v9261_v56  ;;  %7900 = vmatmul.mubr.msk.f32.gmra.mxu0 %vm775_vm2, %v8357_v4 }
 0x738   :  { %2506 = vmatpush1.msra.mxu1 %v9264_v47  ;;  %7902 = vmatprep.mubr.msk.f32.mxu0 %vm775_vm2, %v8359_v8  ;;  %11015 = vst [vmem:[#allocation38_spill] sm:$0xff] %v9288_v58  ;;  %11016 = vst [vmem:[#allocation39_spill] sm:$0xff] %v9292_v55 }
 0x739   :  { %2507 = vmatprep.subr.mxu1 %v9270_v19  ;;  %11017 = vst [vmem:[#allocation40_spill] sm:$0xff] %v9298_v13 }
 0x73a   :  { %2508 = vmatpush1.msra.mxu1 %v9277_v52 }
 0x73b   :  { %2509 = vmatprep.subr.mxu1 %v9284_v45  ;;  %7903 = vmatmul.mubr.msk.f32.gmra.mxu0 %vm775_vm2, %v8363_v6  ;;  %v11019_v6 = vld [vmem:[#allocation18_spill] sm:$0xff] }
 0x73c   :  { %2510 = vmatpush1.msra.mxu1 %v9288_v58  ;;  %3187 = vmatprep.mubr.f32.mxu0 %v10999_v61 }
 0x73d   :  { %2511 = vmatprep.subr.mxu1 %v9292_v55 }
 0x73e   :  { %2512 = vmatpush1.msra.mxu1 %v9298_v13 }
 0x73f   :  { %6995 = vmatmul.mubr.msk.f32.vlgmr.msra.gmra.mxu1 %vm775_vm2, %v9124_v50  ;;  %v7028_v50 = vld [vmem:[%s8598_s28 + $0x98] sm:$0xff] }
 0x740   :  { %2551 = vmatprep.mubr.f32.mxu1 %v10999_v61  ;;  %7905 = vmatprep.subr.mxu1 %v7028_v50 }
 0x741   :  { %7906 = vmatpush3.msra.mxu1 %v7028_v50 }
 0x743   :  { %6996 = vmatmul.mubr.msk.f32.gmra.mxu1 %vm775_vm2, %v9204_v48  ;;  %v7027_v48 = vld [vmem:[%s8598_s28 + $0x90] sm:$0xff] }
 0x744   :  { %2557 = vmatprep.mubr.f32.mxu1 %v10999_v61  ;;  %7907 = vmatprep.subr.mxu1 %v7027_v48 }
 0x745   :  { %7908 = vmatpush3.msra.mxu1 %v7027_v48 }
 0x747   :  { %6997 = vmatmul.mubr.msk.f32.gmra.mxu1 %vm775_vm2, %v9211_v17  ;;  %v7026_v17 = vld [vmem:[%s8598_s28 + $0x88] sm:$0xff] }
 0x748   :  { %2563 = vmatprep.mubr.f32.mxu1 %v10999_v61  ;;  %7909 = vmatprep.subr.mxu1 %v7026_v17 }
 0x749   :  { %7910 = vmatpush3.msra.mxu1 %v7026_v17 }
 0x74b   :  { %6998 = vmatmul.mubr.msk.f32.gmra.mxu1 %vm775_vm2, %v9219_v63  ;;  %v7025_v63 = vld [vmem:[%s8598_s28 + $0x80] sm:$0xff] }
 0x74c   :  { %2569 = vmatprep.mubr.f32.mxu1 %v10999_v61  ;;  %7911 = vmatprep.subr.mxu1 %v7025_v63 }
 0x74d   :  { %7912 = vmatpush3.msra.mxu1 %v7025_v63 }
 0x74f   :  { %6999 = vmatmul.mubr.msk.f32.gmra.mxu1 %vm775_vm2, %v9225_v12  ;;  %v7024_v12 = vld [vmem:[%s8598_s28 + $0x78] sm:$0xff] }
 0x750   :  { %2575 = vmatprep.mubr.f32.mxu1 %v10999_v61  ;;  %7913 = vmatprep.subr.mxu1 %v7024_v12 }
 0x751   :  { %7914 = vmatpush3.msra.mxu1 %v7024_v12 }
 0x753   :  { %7000 = vmatmul.mubr.msk.f32.gmra.mxu1 %vm775_vm2, %v9232_v32  ;;  %v7023_v32 = vld [vmem:[%s8598_s28 + $0x70] sm:$0xff] }
 0x754   :  { %2581 = vmatprep.mubr.f32.mxu1 %v10999_v61  ;;  %7915 = vmatprep.subr.mxu1 %v7023_v32 }
 0x755   :  { %7916 = vmatpush3.msra.mxu1 %v7023_v32 }
 0x757   :  { %7001 = vmatmul.mubr.msk.f32.gmra.mxu1 %vm775_vm2, %v9237_v7  ;;  %v7022_v7 = vld [vmem:[%s8598_s28 + $0x68] sm:$0xff] }
 0x758   :  { %2587 = vmatprep.mubr.f32.mxu1 %v10999_v61  ;;  %7917 = vmatprep.subr.mxu1 %v7022_v7 }
 0x759   :  { %7918 = vmatpush3.msra.mxu1 %v7022_v7 }
 0x75b   :  { %7002 = vmatmul.mubr.msk.f32.gmra.mxu1 %vm775_vm2, %v9242_v44  ;;  %v7021_v44 = vld [vmem:[%s8598_s28 + $0x60] sm:$0xff]  ;;  %s8390_s28 = smov 23  }
 0x75c   :  { %7919 = vmatprep.subr.mxu1 %v7021_v44 }
 0x75d   :  { %7920 = vmatpush3.msra.mxu1 %v7021_v44  ;;  %v11020_v44 = vld [vmem:[#allocation19_spill] sm:$0xff] }
 0x75e   :  { %7921 = vmatprep.subr.mxu1 %v7020_v5 }
 0x75f   :  { %7922 = vmatpush3.msra.mxu1 %v7020_v5 }
 0x760   :  { %7923 = vmatprep.subr.mxu1 %v7019_v21 }
 0x761   :  { %7924 = vmatpush3.msra.mxu1 %v7019_v21 }
 0x7df   :  { %v7875_v35 = vpop.f32.mrf.mxu0 }
 0x7e0   :  { %2814 = vrot.lane.b32.xlu1 %v7875_v35, %s8381_s30  ;;  %v11021_v35 = vld [vmem:[#allocation20_spill] sm:$0xff] }
 0x7e1   :  { %v2660_v37 = vpop.f32.mrf.mxu0 }
 0x7e3   :  { %v7878_v18 = vpop.f32.mrf.mxu0 }
 0x7e4   :  { %2812 = vrot.lane.b32.xlu1 %v2660_v37, %s8381_s30 }
 0x7e5   :  { %v2670_v20 = vpop.f32.mrf.mxu0 }
 0x7e7   :  { %v7881_v60 = vpop.f32.mrf.mxu0 }
 0x7e8   :  { %2818 = vrot.lane.b32.xlu1 %v7878_v18, %s8381_s30 }
 0x7e9   :  { %v2680_v9 = vpop.f32.mrf.mxu0 }
 0x7eb   :  { %v7884_v62 = vpop.f32.mrf.mxu0 }
 0x7ec   :  { %2816 = vrot.lane.b32.xlu1 %v2670_v20, %s8381_s30 }
 0x7ed   :  { %v2690_v43 = vpop.f32.mrf.mxu0 }
 0x7ef   :  { %v7895_v4 = vpop.f32.mrf.mxu0 }
 0x7f0   :  { %2822 = vrot.lane.b32.xlu1 %v7881_v60, %s8381_s30 }
 0x7f1   :  { %v2765_v59 = vpop.f32.mrf.mxu0 }
 0x7f3   :  { %v7898_v48 = vpop.f32.mrf.mxu0 }
 0x7f4   :  { %2820 = vrot.lane.b32.xlu1 %v2680_v9, %s8381_s30 }
 0x7f5   :  { %v2775_v17 = vpop.f32.mrf.mxu0 }
 0x7f7   :  { %v7901_v32 = vpop.f32.mrf.mxu0 }
 0x7f8   :  { %2824 = vrot.lane.b32.xlu1 %v2690_v43, %s8381_s30  ;;  %v11022_v43 = vld [vmem:[#allocation21_spill] sm:$0xff] }
 0x7f9   :  { %v2785_v21 = vpop.f32.mrf.mxu0 }
 0x7fb   :  { %v7904_v20 = vpop.f32.mrf.mxu0 }
 0x7fc   :  { %2826 = vrot.lane.b32.xlu1 %v7884_v62, %s8381_s30 }
 0x852   :  { %v2815_v23 = vpop.permute.xlu1 %2814 }
 0x853   :  { %v2837_v0 = vsel %vm775_vm2, %v7895_v4, %v2815_v23  ;;  %v2795_v4 = vpop.f32.mrf.mxu0 }
 0x854   :  { %v2845_v11 = vsel %vm1219_vm3, %v2837_v0, %v11019_v6 }
 0x856   :  { %v2813_v8 = vpop.permute.xlu1 %2812 }
 0x857   :  { %v2836_v57 = vsel %vm775_vm2, %v2765_v59, %v2813_v8  ;;  %v11023_v59 = vld [vmem:[#allocation22_spill] sm:$0xff] }
 0x858   :  { %v2844_v2 = vsel %vm1219_vm3, %v2836_v57, %v11018_v54  ;;  %v11024_v54 = vld [vmem:[#allocation24_spill] sm:$0xff] }
 0x859   :  { %7925 = vmatprep.mubr.msk.f32.mxu1 %vm1245_vm4, %v2844_v2 }
 0x85a   :  { %v2819_v50 = vpop.permute.xlu1 %2818  ;;  %7926 = vmatmul.mubr.msk.f32.vlgmr.msra.gmra.mxu1 %vm1245_vm4, %v2845_v11 }
 0x85b   :  { %v2839_v63 = vsel %vm775_vm2, %v7898_v48, %v2819_v50  ;;  %v11025_v50 = vld [vmem:[#allocation23_spill] sm:$0xff] }
 0x85c   :  { %v2847_v37 = vsel %vm1219_vm3, %v2839_v63, %v11021_v35  ;;  %v7092_v63 = vld [vmem:[%s8757_s4 + $0x2e8] sm:$0xff] }
 0x85d   :  { %v7088_v35 = vld [vmem:[%s8757_s4 + $0x2c8] sm:$0xff] }
 0x85e   :  { %v2817_v12 = vpop.permute.xlu1 %2816 }
 0x85f   :  { %v2838_v7 = vsel %vm775_vm2, %v2775_v17, %v2817_v12  ;;  %v7093_v17 = vld [vmem:[%s8757_s4 + $0x2f0] sm:$0xff]  ;;  %v7094_v12 = vld [vmem:[%s8757_s4 + $0x2f8] sm:$0xff] }
 0x860   :  { %v2846_v5 = vsel %vm1219_vm3, %v2838_v7, %v11020_v44  ;;  %3123 = vmatprep.subr.mxu0 %v7093_v17  ;;  %7937 = vmatprep.subr.mxu1 %v7094_v12  ;;  %v7089_v7 = vld [vmem:[%s8757_s4 + $0x2d0] sm:$0xff]  ;;  %v7091_v44 = vld [vmem:[%s8757_s4 + $0x2e0] sm:$0xff] }
 0x861   :  { %7928 = vmatprep.mubr.msk.f32.mxu1 %vm1245_vm4, %v2846_v5  ;;  %3124 = vmatpush1.msra.mxu0 %v7092_v63  ;;  %v7087_v5 = vld [vmem:[%s8757_s4 + $0x2c0] sm:$0xff]  ;;  %v7065_v17 = vld [vmem:[%s8757_s4 + $0x210] sm:$0xff] }
 0x862   :  { %v2823_v18 = vpop.permute.xlu1 %2822  ;;  %7929 = vmatmul.mubr.msk.f32.gmra.mxu1 %vm1245_vm4, %v2847_v37  ;;  %v7084_v37 = vld [vmem:[%s8757_s4 + $0x2a8] sm:$0xff]  ;;  %v7067_v63 = vld [vmem:[%s8757_s4 + $0x220] sm:$0xff] }
 0x863   :  { %v2841_v60 = vsel %vm775_vm2, %v7901_v32, %v2823_v18  ;;  %v7090_v32 = vld [vmem:[%s8757_s4 + $0x2d8] sm:$0xff]  ;;  %7938 = vmatpush3.msra.mxu1 %v7094_v12  ;;  %v7083_v18 = vld [vmem:[%s8757_s4 + $0x2a0] sm:$0xff] }
 0x864   :  { %v2849_v0 = vsel %vm1219_vm3, %v2841_v60, %v11023_v59  ;;  %3125 = vmatprep.subr.mxu0 %v7090_v32  ;;  %7939 = vmatprep.subr.mxu1 %v7091_v44  ;;  %v7081_v60 = vld [vmem:[%s8757_s4 + $0x290] sm:$0xff]  ;;  %v7075_v59 = vld [vmem:[%s8757_s4 + $0x260] sm:$0xff]  ;;  %v7062_v32 = vld [vmem:[%s8757_s4 + $0x1f8] sm:$0xff] }
 0x865   :  { %3126 = vmatpush1.msra.mxu0 %v7089_v7  ;;  %7940 = vmatpush3.msra.mxu1 %v7091_v44  ;;  %v7063_v12 = vld [vmem:[%s8757_s4 + $0x200] sm:$0xff]  ;;  %v7064_v7 = vld [vmem:[%s8757_s4 + $0x208] sm:$0xff] }
 0x866   :  { %v2821_v9 = vpop.permute.xlu1 %2820  ;;  %3127 = vmatprep.subr.mxu0 %v7087_v5  ;;  %7941 = vmatprep.subr.mxu1 %v7088_v35  ;;  %v7060_v44 = vld [vmem:[%s8757_s4 + $0x1e8] sm:$0xff]  ;;  %v7059_v5 = vld [vmem:[%s8757_s4 + $0x1e0] sm:$0xff] }
 0x867   :  { %v2840_v62 = vsel %vm775_vm2, %v2785_v21, %v2821_v9  ;;  %v7086_v21 = vld [vmem:[%s8757_s4 + $0x2b8] sm:$0xff]  ;;  %7942 = vmatpush3.msra.mxu1 %v7088_v35  ;;  %v7080_v9 = vld [vmem:[%s8757_s4 + $0x288] sm:$0xff]  ;;  %v7057_v35 = vld [vmem:[%s8757_s4 + $0x1d0] sm:$0xff] }
 0x868   :  { %v2848_v23 = vsel %vm1219_vm3, %v2840_v62, %v11022_v43  ;;  %3128 = vmatpush1.msra.mxu0 %v7086_v21  ;;  %v7082_v62 = vld [vmem:[%s8757_s4 + $0x298] sm:$0xff]  ;;  %v7061_v21 = vld [vmem:[%s8757_s4 + $0x1f0] sm:$0xff] }
 0x869   :  { %7931 = vmatprep.mubr.msk.f32.mxu1 %vm1245_vm4, %v2848_v23  ;;  %3129 = vmatprep.subr.mxu0 %v7084_v37  ;;  %v7078_v43 = vld [vmem:[%s8757_s4 + $0x278] sm:$0xff]  ;;  %v7077_v23 = vld [vmem:[%s8757_s4 + $0x270] sm:$0xff]  ;;  %v7056_v37 = vld [vmem:[%s8757_s4 + $0x1c8] sm:$0xff] }
 0x86a   :  { %v2825_v8 = vpop.permute.xlu1 %2824  ;;  %7932 = vmatmul.mubr.msk.f32.gmra.mxu1 %vm1245_vm4, %v2849_v0  ;;  %3130 = vmatpush1.msra.mxu0 %v7083_v18  ;;  %v7074_v0 = vld [vmem:[%s8757_s4 + $0x258] sm:$0xff] }
 0x86b   :  { %v2842_v57 = vsel %vm775_vm2, %v2795_v4, %v2825_v8  ;;  %3131 = vmatprep.subr.mxu0 %v7081_v60  ;;  %v7079_v4 = vld [vmem:[%s8757_s4 + $0x280] sm:$0xff]  ;;  %v7076_v8 = vld [vmem:[%s8757_s4 + $0x268] sm:$0xff]  ;;  %v7058_v18 = vld [vmem:[%s8757_s4 + $0x1d8] sm:$0xff] }
 0x86c   :  { %v2850_v2 = vsel %vm1219_vm3, %v2842_v57, %v11024_v54  ;;  %3132 = vmatpush1.msra.mxu0 %v7080_v9  ;;  %v7072_v57 = vld [vmem:[%s8757_s4 + $0x248] sm:$0xff]  ;;  %v7071_v54 = vld [vmem:[%s8757_s4 + $0x240] sm:$0xff]  ;;  %v7053_v60 = vld [vmem:[%s8757_s4 + $0x1b0] sm:$0xff] }
 0x86d   :  { %7934 = vmatprep.mubr.msk.f32.mxu1 %vm1245_vm4, %v2850_v2  ;;  %3133 = vmatprep.subr.mxu0 %v7078_v43  ;;  %v7073_v2 = vld [vmem:[%s8757_s4 + $0x250] sm:$0xff]  ;;  %v7055_v9 = vld [vmem:[%s8757_s4 + $0x1c0] sm:$0xff]  ;;  %v7050_v43 = vld [vmem:[%s8757_s4 + $0x198] sm:$0xff] }
 0x86e   :  { %v2827_v6 = vpop.permute.xlu1 %2826  ;;  %3134 = vmatpush1.msra.mxu0 %v7077_v23  ;;  %v7052_v23 = vld [vmem:[%s8757_s4 + $0x1a8] sm:$0xff] }
 0x86f   :  { %v2843_v11 = vsel %vm775_vm2, %v7904_v20, %v2827_v6  ;;  %v7085_v20 = vld [vmem:[%s8757_s4 + $0x2b0] sm:$0xff]  ;;  %3135 = vmatprep.subr.mxu0 %v7075_v59  ;;  %v7047_v59 = vld [vmem:[%s8757_s4 + $0x180] sm:$0xff] }
 0x870   :  { %v2851_v48 = vsel %vm1219_vm3, %v2843_v11, %v11025_v50  ;;  %7943 = vmatprep.subr.mxu1 %v7085_v20  ;;  %3136 = vmatpush1.msra.mxu0 %v7074_v0  ;;  %v7069_v6 = vld [vmem:[%s8757_s4 + $0x230] sm:$0xff]  ;;  %v7068_v11 = vld [vmem:[%s8757_s4 + $0x228] sm:$0xff]  ;;  %v7070_v50 = vld [vmem:[%s8757_s4 + $0x238] sm:$0xff] }
 0x871   :  { %7935 = vmatmul.mubr.msk.f32.gmra.mxu1 %vm1245_vm4, %v2851_v48  ;;  %3137 = vmatprep.subr.mxu0 %v7072_v57  ;;  %v7066_v48 = vld [vmem:[%s8757_s4 + $0x218] sm:$0xff]  ;;  %v7049_v0 = vld [vmem:[%s8757_s4 + $0x190] sm:$0xff] }
 0x872   :  { %7944 = vmatpush3.msra.mxu1 %v7085_v20  ;;  %3138 = vmatpush1.msra.mxu0 %v7071_v54  ;;  %v7054_v20 = vld [vmem:[%s8757_s4 + $0x1b8] sm:$0xff] }
 0x873   :  { %7945 = vmatprep.subr.mxu1 %v7082_v62  ;;  %3139 = vmatprep.subr.mxu0 %v7069_v6 }
 0x874   :  { %7946 = vmatpush3.msra.mxu1 %v7082_v62  ;;  %3140 = vmatpush1.msra.mxu0 %v7068_v11  ;;  %v7051_v62 = vld [vmem:[%s8757_s4 + $0x1a0] sm:$0xff] }
 0x875   :  { %7947 = vmatprep.subr.mxu1 %v7079_v4  ;;  %3141 = vmatprep.subr.mxu0 %v7066_v48 }
 0x876   :  { %7948 = vmatpush3.msra.mxu1 %v7079_v4  ;;  %3142 = vmatpush1.msra.mxu0 %v7065_v17  ;;  %v7048_v4 = vld [vmem:[%s8757_s4 + $0x188] sm:$0xff] }
 0x877   :  { %7949 = vmatprep.subr.mxu1 %v7076_v8  ;;  %3143 = vmatprep.subr.mxu0 %v7063_v12 }
 0x878   :  { %7950 = vmatpush3.msra.mxu1 %v7076_v8  ;;  %3144 = vmatpush1.msra.mxu0 %v7062_v32  ;;  %v9424_v8 = vpop.f32.mrf.mxu1 }
 0x879   :  { %7951 = vmatprep.subr.mxu1 %v7073_v2  ;;  %3145 = vmatprep.subr.mxu0 %v7060_v44  ;;  %11026 = vst [vmem:[#allocation17_spill] sm:$0xff] %v9424_v8 }
 0x87a   :  { %7952 = vmatpush3.msra.mxu1 %v7073_v2  ;;  %3146 = vmatpush1.msra.mxu0 %v7059_v5  ;;  %v9426_v57 = vpop.f32.mrf.mxu1 }
 0x87b   :  { %7953 = vmatprep.subr.mxu1 %v7070_v50  ;;  %3147 = vmatprep.subr.mxu0 %v7057_v35  ;;  %11027 = vst [vmem:[#allocation18_spill] sm:$0xff] %v9426_v57  ;;  %v7030_v35 = vld [vmem:[%s8854_s8 + $0x1] ss:$0 sm:$0xff]  ;;  %s6876_s8 = sld [smem:[%s10883_s0 + %s8390_s28]]   ;;  %s8398_s28 = smov 11  }
 0x87c   :  { %7954 = vmatpush3.msra.mxu1 %v7070_v50  ;;  %3148 = vmatpush1.msra.mxu0 %v7056_v37  ;;  %v9428_v54 = vpop.f32.mrf.mxu1 }
 0x87d   :  { %7955 = vmatprep.subr.mxu1 %v7067_v63  ;;  %3149 = vmatprep.subr.mxu0 %v7054_v20 }
 0x87e   :  { %7956 = vmatpush3.msra.mxu1 %v7067_v63  ;;  %3150 = vmatpush1.msra.mxu0 %v7053_v60  ;;  %v9430_v2 = vpop.f32.mrf.mxu1 }
 0x87f   :  { %7957 = vmatprep.subr.mxu1 %v7064_v7  ;;  %3151 = vmatprep.subr.mxu0 %v7051_v62 }
 0x880   :  { %7958 = vmatpush3.msra.mxu1 %v7064_v7  ;;  %3152 = vmatpush1.msra.mxu0 %v7050_v43  ;;  %v9432_v6 = vpop.f32.mrf.mxu1 }
 0x881   :  { %7959 = vmatprep.subr.mxu1 %v7061_v21  ;;  %3153 = vmatprep.subr.mxu0 %v7048_v4 }
 0x882   :  { %7960 = vmatpush3.msra.mxu1 %v7061_v21  ;;  %3154 = vmatpush1.msra.mxu0 %v7047_v59  ;;  %v9434_v11 = vpop.f32.mrf.mxu1 }
 0x883   :  { %7961 = vmatprep.subr.mxu1 %v7058_v18 }
 0x884   :  { %7962 = vmatpush3.msra.mxu1 %v7058_v18  ;;  %v9436_v50 = vpop.f32.mrf.mxu1 }
 0x885   :  { %7963 = vmatprep.subr.mxu1 %v7055_v9 }
 0x886   :  { %7964 = vmatpush3.msra.mxu1 %v7055_v9  ;;  %v9438_v48 = vpop.f32.mrf.mxu1 }
 0x887   :  { %7965 = vmatprep.subr.mxu1 %v7052_v23 }
 0x888   :  { %7966 = vmatpush3.msra.mxu1 %v7052_v23  ;;  %v9440_v17 = vpop.f32.mrf.mxu1 }
 0x889   :  { %7967 = vmatprep.subr.mxu1 %v7049_v0 }
 0x88a   :  { %7968 = vmatpush3.msra.mxu1 %v7049_v0  ;;  %v9442_v63 = vpop.f32.mrf.mxu1 }
 0x88c   :  { %v9444_v12 = vpop.f32.mrf.mxu1 }
 0x88e   :  { %v9446_v32 = vpop.f32.mrf.mxu1 }
 0x890   :  { %v9448_v7 = vpop.f32.mrf.mxu1 }
 0x892   :  { %v9450_v44 = vpop.f32.mrf.mxu1 }
 0x894   :  { %v9452_v5 = vpop.f32.mrf.mxu1 }
 0x896   :  { %v9454_v21 = vpop.f32.mrf.mxu1 }
 0x91a   :  { %v7927_v37 = vpop.f32.mrf.mxu1 }
 0x91b   :  { %v2967_v18 = vadd.f32 %v7927_v37, %v7030_v35 }
 0x91c   :  { %v2961_v20 = vpop.f32.mrf.mxu1 }
 0x91d   :  { %v7040_v60 = vmul.f32 -1.442695, %v2967_v18  ;;  %v2962_v9 = vadd.f32 %v7030_v35, %v2961_v20 }
 0x91f   :  { %8189 = vpow2.f32 %v7040_v60  ;;  %v7039_v62 = vmul.f32 -1.442695, %v2962_v9 }
 0x921   :  { %8191 = vpow2.f32 %v7039_v62 }
 0x922   :  { %v7930_v43 = vpop.f32.mrf.mxu1 }
 0x923   :  { %v2977_v23 = vadd.f32 %v7930_v43, %v7030_v35 }
 0x924   :  { %v2971_v4 = vpop.f32.mrf.mxu1 }
 0x925   :  { %v7042_v59 = vmul.f32 -1.442695, %v2977_v23  ;;  %v2972_v0 = vadd.f32 %v7030_v35, %v2971_v4 }
 0x927   :  { %8193 = vpow2.f32 %v7042_v59  ;;  %v7041_v16 = vmul.f32 -1.442695, %v2972_v0 }
 0x929   :  { %8195 = vpow2.f32 %v7041_v16 }
 0x92a   :  { %v7933_v56 = vpop.f32.mrf.mxu1 }
 0x92b   :  { %v2987_v47 = vadd.f32 %v7933_v56, %v7030_v35 }
 0x92c   :  { %v8190_v19 = vpop.eup %8189  ;;  %v2981_v52 = vpop.f32.mrf.mxu1 }
 0x92d   :  { %v3025_v45 = vadd.f32 1.0, %v8190_v19  ;;  %v7044_v37 = vmul.f32 -1.442695, %v2987_v47  ;;  %v2982_v58 = vadd.f32 %v7030_v35, %v2981_v52 }
 0x92e   :  { %v8192_v55 = vpop.eup %8191 }
 0x92f   :  { %8197 = vrcp.f32 %v3025_v45  ;;  %v3024_v20 = vadd.f32 1.0, %v8192_v55  ;;  %v7043_v60 = vmul.f32 -1.442695, %v2982_v58 }
 0x930   :  { %8199 = vpow2.f32 %v7044_v37 }
 0x931   :  { %8201 = vrcp.f32 %v3024_v20  ;;  %v7936_v62 = vpop.f32.mrf.mxu1 }
 0x932   :  { %8203 = vpow2.f32 %v7043_v60  ;;  %v2997_v43 = vadd.f32 %v7936_v62, %v7030_v35 }
 0x933   :  { %v2991_v4 = vpop.f32.mrf.mxu1 }
 0x934   :  { %v8194_v59 = vpop.eup %8193  ;;  %v7046_v13 = vmul.f32 -1.442695, %v2997_v43  ;;  %v2992_v16 = vadd.f32 %v7030_v35, %v2991_v4 }
 0x935   :  { %v3027_v15 = vadd.f32 1.0, %v8194_v59 }
 0x936   :  { %v8196_v56 = vpop.eup %8195  ;;  %8205 = vpow2.f32 %v7046_v13  ;;  %v7045_v51 = vmul.f32 -1.442695, %v2992_v16 }
 0x937   :  { %8207 = vrcp.f32 %v3027_v15  ;;  %v3026_v19 = vadd.f32 1.0, %v8196_v56 }
 0x938   :  { %8209 = vpow2.f32 %v7045_v51 }
 0x939   :  { %8211 = vrcp.f32 %v3026_v19 }
 0x93c   :  { %v8198_v52 = vpop.eup %8197 }
 0x93d   :  { %v8200_v45 = vpop.eup %8199  ;;  %v3049_v60 = vmul.f32 %v8198_v52, %v2967_v18 }
 0x93e   :  { %v8202_v55 = vpop.eup %8201  ;;  %v3029_v37 = vadd.f32 1.0, %v8200_v45 }
 0x93f   :  { %v8204_v20 = vpop.eup %8203  ;;  %v3048_v14 = vmul.f32 %v8202_v55, %v2962_v9 }
 0x940   :  { %v3028_v62 = vadd.f32 1.0, %v8204_v20  ;;  %8213 = vrcp.f32 %v3029_v37 }
 0x941   :  { %3188 = vmatmul.mubr.f32.vlgmr.msra.gmra.mxu0 %v3048_v14  ;;  %7969 = vmatprep.mubr.f32.mxu1 %v3048_v14 }
 0x942   :  { %8215 = vrcp.f32 %v3028_v62  ;;  %7970 = vmatmul.mubr.f32.vlgmr.msra.gmra.mxu1 %v3049_v60  ;;  %3193 = vmatprep.mubr.f32.mxu0 %v10999_v61 }
 0x943   :  { %v8206_v13 = vpop.eup %8205 }
 0x944   :  { %v8208_v15 = vpop.eup %8207  ;;  %v3031_v35 = vadd.f32 1.0, %v8206_v13 }
 0x945   :  { %v8210_v51 = vpop.eup %8209  ;;  %3194 = vmatmul.mubr.f32.gmra.mxu0 %v3049_v60  ;;  %v3051_v18 = vmul.f32 %v8208_v15, %v2977_v23 }
 0x946   :  { %v8212_v4 = vpop.eup %8211  ;;  %v3030_v59 = vadd.f32 1.0, %v8210_v51  ;;  %3199 = vmatprep.mubr.f32.mxu0 %v10999_v61  ;;  %8217 = vrcp.f32 %v3031_v35  ;;  %v9474_v35 = vld [vmem:[%s8878_s13 + $0x3] sm:$0x7]  ;;  %s8392_s13 = smov 25  }
 0x947   :  { %v3050_v56 = vmul.f32 %v8212_v4, %v2972_v0  ;;  %s6878_s16 = sld [smem:[%s10883_s0 + %s8392_s13]]  }
 0x948   :  { %8219 = vrcp.f32 %v3030_v59  ;;  %v11028_v59 = vld [vmem:[#allocation34_spill] sm:$0xff] }
 0x949   :  { %3200 = vmatmul.mubr.f32.gmra.mxu0 %v3050_v56  ;;  %7972 = vmatprep.mubr.f32.mxu1 %v3050_v56  ;;  %v3119_v56 = vrot.slane %v9474_v35, %v11028_v59 }
 0x94a   :  { %7973 = vmatmul.mubr.f32.gmra.mxu1 %v3051_v18  ;;  %3205 = vmatprep.mubr.f32.mxu0 %v10999_v61 }
 0x94d   :  { %3206 = vmatmul.mubr.f32.gmra.mxu0 %v3051_v18  ;;  %v8214_v14 = vpop.eup %8213 }
 0x94e   :  { %3211 = vmatprep.mubr.f32.mxu0 %v10999_v61  ;;  %v3053_v52 = vmul.f32 %v8214_v14, %v2987_v47 }
 0x94f   :  { %v8216_v9 = vpop.eup %8215 }
 0x950   :  { %v3052_v19 = vmul.f32 %v8216_v9, %v2982_v58 }
 0x952   :  { %3212 = vmatmul.mubr.f32.gmra.mxu0 %v3052_v19  ;;  %7975 = vmatprep.mubr.f32.mxu1 %v3052_v19 }
 0x953   :  { %7976 = vmatmul.mubr.f32.gmra.mxu1 %v3053_v52  ;;  %3217 = vmatprep.mubr.f32.mxu0 %v10999_v61  ;;  %v8218_v0 = vpop.eup %8217 }
 0x954   :  { %v3055_v55 = vmul.f32 %v8218_v0, %v2997_v43 }
 0x955   :  { %v8220_v23 = vpop.eup %8219 }
 0x956   :  { %v3054_v45 = vmul.f32 %v8220_v23, %v2992_v16  ;;  %3218 = vmatmul.mubr.f32.gmra.mxu0 %v3053_v52  ;;  %v3111_v52 = vrot.slane %v9474_v35, %v11005_v29 }
 0x957   :  { %3223 = vmatprep.mubr.f32.mxu0 %v10999_v61 }
 0x958   :  { %7978 = vmatprep.mubr.f32.mxu1 %v3054_v45 }
 0x959   :  { %7979 = vmatmul.mubr.f32.gmra.mxu1 %v3055_v55 }
 0x95a   :  { %3224 = vmatmul.mubr.f32.gmra.mxu0 %v3054_v45  ;;  %3557 = vmatprep.mubr.f32.mxu1 %v10999_v61 }
 0x95b   :  { %3229 = vmatprep.mubr.f32.mxu0 %v10999_v61 }
 0x95e   :  { %3230 = vmatmul.mubr.f32.gmra.mxu0 %v3055_v55 }
 0x95f   :  { %7997 = vmatprep.mubr.msk.f32.mxu0 %vm1219_vm3, %v11000_v24 }
 0xa01   :  { %v3189_v47 = vpop.f32.mrf.mxu0 }
 0xa02   :  { %v7971_v37 = vpop.f32.mrf.mxu1 }
 0xa03   :  { %v9467_v58 = vpop.f32.mrf.mxu0 }
 0xa04   :  { %v3302_v60 = vpop.f32.mrf.mxu1 }
 0xa05   :  { %v3195_v16 = vpop.f32.mrf.mxu0 }
 0xa07   :  { %v9469_v43 = vpop.f32.mrf.mxu0 }
 0xa09   :  { %v3201_v20 = vpop.f32.mrf.mxu0 }
 0xa0a   :  { %v7974_v13 = vpop.f32.mrf.mxu1  ;;  %v3202_v57 = vadd.f32 %v3201_v20, %v3111_v52 }
 0xa0b   :  { %v9471_v62 = vpop.f32.mrf.mxu0  ;;  %v9486_v0 = vadd.f32 %v7974_v13, %v3119_v56 }
 0xa0c   :  { %v3312_v4 = vpop.f32.mrf.mxu1 }
 0xa0d   :  { %v3207_v15 = vpop.f32.mrf.mxu0 }
 0xa0e   :  { %v3208_v45 = vadd.f32 %v3207_v15, %v3111_v52 }
 0xa0f   :  { %v9476_v51 = vpop.f32.mrf.mxu0 }
 0xa10   :  { %v7099_v34 = vmul.f32 -1.442695, %v3208_v45  ;;  %v3196_v45 = vadd.f32 %v3195_v16, %v3111_v52 }
 0xa12   :  { %v3213_v18 = vpop.f32.mrf.mxu0 }
 0xa13   :  { %v7977_v14 = vpop.f32.mrf.mxu1  ;;  %v3214_v59 = vadd.f32 %v3213_v18, %v3111_v52 }
 0xa14   :  { %v9480_v9 = vadd.f32 %v7977_v14, %v3119_v56  ;;  %v9482_v19 = vpop.f32.mrf.mxu0  ;;  %v7107_v14 = vmul.f32 -1.442695, %v9486_v0 }
 0xa15   :  { %v3322_v55 = vpop.f32.mrf.mxu1 }
 0xa16   :  { %v3219_v23 = vpop.f32.mrf.mxu0  ;;  %v7109_v42 = vmul.f32 -1.442695, %v9480_v9  ;;  %v9492_v3 = vadd.f32 %v3322_v55, %v3119_v56 }
 0xa17   :  { %v3220_v61 = vadd.f32 %v3219_v23, %v3111_v52  ;;  %v7100_v23 = vmul.f32 -1.442695, %v3214_v59  ;;  %v9507_v59 = vadd.f32 %v3302_v60, %v3119_v56 }
 0xa18   :  { %v9489_v24 = vpop.f32.mrf.mxu0  ;;  %8221 = vpow2.f32 %v7109_v42  ;;  %v7108_v55 = vmul.f32 -1.442695, %v9492_v3 }
 0xa19   :  { %v7980_v49 = vpop.f32.mrf.mxu1  ;;  %v7101_v30 = vmul.f32 -1.442695, %v3220_v61  ;;  %v9501_v61 = vadd.f32 %v3312_v4, %v3119_v56  ;;  %11029 = vst [vmem:[#allocation19_spill] sm:$0xff] %v9507_v59 }
 0xa1a   :  { %v3225_v1 = vpop.f32.mrf.mxu0  ;;  %v9494_v13 = vadd.f32 %v7980_v49, %v3119_v56 }
 0xa1b   :  { %v3226_v29 = vadd.f32 %v3225_v1, %v3111_v52  ;;  %v3332_v46 = vpop.f32.mrf.mxu1  ;;  %8223 = vpow2.f32 %v7101_v30  ;;  %v9504_v1 = vadd.f32 %v7971_v37, %v3119_v56  ;;  %v3190_v30 = vadd.f32 %v3189_v47, %v3111_v52 }
 0xa1c   :  { %v9496_v15 = vpop.f32.mrf.mxu0  ;;  %v9498_v8 = vadd.f32 %v3332_v46, %v3119_v56  ;;  %8225 = vpow2.f32 %v7107_v14  ;;  %v7111_v49 = vmul.f32 -1.442695, %v9494_v13  ;;  %v7106_v4 = vmul.f32 -1.442695, %v9501_v61 }
 0xa1d   :  { %v7102_v18 = vmul.f32 -1.442695, %v3226_v29  ;;  %8227 = vpow2.f32 %v7099_v34  ;;  %v7098_v29 = vmul.f32 -1.442695, %v3202_v57  ;;  %v7105_v34 = vmul.f32 -1.442695, %v9504_v1 }
 0xa1e   :  { %v3231_v53 = vpop.f32.mrf.mxu0  ;;  %v7110_v42 = vmul.f32 -1.442695, %v9498_v8  ;;  %v7097_v37 = vmul.f32 -1.442695, %v3196_v45  ;;  %v7096_v14 = vmul.f32 -1.442695, %v3190_v30 }
 0xa1f   :  { %8229 = vpow2.f32 %v7102_v18  ;;  %v3232_v46 = vadd.f32 %v3231_v53, %v3111_v52  ;;  %v7104_v53 = vmul.f32 -1.442695, %v9507_v59 }
 0xa20   :  { %8231 = vpow2.f32 %v7100_v23 }
 0xa21   :  { %8233 = vpow2.f32 %v7108_v55  ;;  %v7103_v20 = vmul.f32 -1.442695, %v3232_v46 }
 0xa22   :  { %8235 = vpow2.f32 %v7111_v49 }
 0xa23   :  { %8237 = vpow2.f32 %v7110_v42 }
 0xa24   :  { %8239 = vpow2.f32 %v7103_v20 }
 0xa25   :  { %8241 = vpow2.f32 %v7098_v29  ;;  %v8222_v47 = vpop.eup %8221 }
 0xa26   :  { %8243 = vpow2.f32 %v7106_v4  ;;  %v3418_v56 = vadd.f32 1.0, %v8222_v47 }
 0xa27   :  { %8245 = vpow2.f32 %v7105_v34 }
 0xa28   :  { %8247 = vpow2.f32 %v7097_v37  ;;  %v8224_v57 = vpop.eup %8223 }
 0xa29   :  { %8249 = vpow2.f32 %v7096_v14  ;;  %v8226_v16 = vpop.eup %8225  ;;  %v3370_v23 = vadd.f32 1.0, %v8224_v57 }
 0xa2a   :  { %8251 = vpow2.f32 %v7104_v53  ;;  %v8228_v60 = vpop.eup %8227  ;;  %v3416_v53 = vadd.f32 1.0, %v8226_v16  ;;  %v3115_v16 = vrot.slane %v9474_v35, %v8935_v10 }
 0xa2b   :  { %8253 = vrcp.f32 %v3418_v56  ;;  %v3368_v57 = vadd.f32 1.0, %v8228_v60  ;;  %v3233_v60 = vpop.f32.mrf.mxu0 }
 0xa2c   :  { %v8230_v52 = vpop.eup %8229  ;;  %8255 = vrcp.f32 %v3370_v23  ;;  %v9521_v35 = vadd.f32 %v9476_v51, %v3115_v16 }
 0xa2d   :  { %v8232_v18 = vpop.eup %8231  ;;  %v3371_v55 = vadd.f32 1.0, %v8230_v52 }
 0xa2e   :  { %v8234_v49 = vpop.eup %8233  ;;  %v3369_v29 = vadd.f32 1.0, %v8232_v18 }
 0xa2f   :  { %v8236_v42 = vpop.eup %8235  ;;  %8257 = vrcp.f32 %v3371_v55  ;;  %v3417_v34 = vadd.f32 1.0, %v8234_v49 }
 0xa30   :  { %v8238_v46 = vpop.eup %8237  ;;  %v3420_v45 = vadd.f32 1.0, %v8236_v42 }
 0xa31   :  { %v8240_v30 = vpop.eup %8239  ;;  %v3419_v20 = vadd.f32 1.0, %v8238_v46 }
 0xa32   :  { %v8242_v4 = vpop.eup %8241  ;;  %8259 = vrcp.f32 %v3420_v45  ;;  %v3372_v37 = vadd.f32 1.0, %v8240_v30  ;;  %v9515_v30 = vadd.f32 %v9469_v43, %v3115_v16 }
 0xa33   :  { %v8244_v14 = vpop.eup %8243  ;;  %8261 = vrcp.f32 %v3419_v20  ;;  %v3367_v59 = vadd.f32 1.0, %v8242_v4  ;;  %v3234_v20 = vadd.f32 %v3233_v60, %v3115_v16 }
 0xa34   :  { %v8246_v47 = vpop.eup %8245  ;;  %8263 = vrcp.f32 %v3372_v37  ;;  %v3415_v23 = vadd.f32 1.0, %v8244_v14  ;;  %v3228_v37 = vadd.f32 %v9496_v15, %v3115_v16  ;;  %v9529_v43 = vmul.f32 %v10992_v33, %v9515_v30 }
 0xa35   :  { %v8248_v52 = vpop.eup %8247  ;;  %8265 = vrcp.f32 %v3369_v29  ;;  %v3414_v18 = vadd.f32 1.0, %v8246_v47 }
 0xa36   :  { %v8250_v56 = vpop.eup %8249  ;;  %8267 = vrcp.f32 %v3417_v34  ;;  %v3366_v55 = vadd.f32 1.0, %v8248_v52  ;;  %v3216_v52 = vadd.f32 %v9482_v19, %v3115_v16 }
 0xa37   :  { %v8252_v42 = vpop.eup %8251  ;;  %8269 = vrcp.f32 %v3416_v53  ;;  %v3365_v49 = vadd.f32 1.0, %v8250_v56  ;;  %v9525_v53 = vadd.f32 %v9467_v58, %v3115_v16  ;;  %v3460_v56 = vmul.f32 %v8663_v40, %v3234_v20 }
 0xa38   :  { %8271 = vrcp.f32 %v3368_v57  ;;  %v3413_v46 = vadd.f32 1.0, %v8252_v42  ;;  %v8254_v45 = vpop.eup %8253  ;;  %v3484_v58 = vmul.f32 %v8819_v27, %v3234_v20 }
 0xa39   :  { %8273 = vrcp.f32 %v3367_v59  ;;  %v8256_v29 = vpop.eup %8255  ;;  %v9518_v59 = vadd.f32 %v9471_v62, %v3115_v16  ;;  %v3222_v62 = vadd.f32 %v9489_v24, %v3115_v16  ;;  %v3480_v24 = vmul.f32 %v8811_v22, %v9521_v35 }
 0xa3a   :  { %8275 = vrcp.f32 %v3415_v23  ;;  %v3442_v27 = vmul.f32 %v8254_v45, %v9480_v9 }
 0xa3b   :  { %8277 = vrcp.f32 %v3414_v18  ;;  %v9542_v19 = vmul.f32 %v9518_v59, %v10988_v31  ;;  %v3481_v31 = vmul.f32 %v3216_v52, %v8817_v26  ;;  %v3482_v22 = vmul.f32 %v8815_v25, %v3222_v62 }
 0xa3c   :  { %8279 = vrcp.f32 %v3366_v55  ;;  %v8258_v4 = vpop.eup %8257  ;;  %v3458_v26 = vmul.f32 %v8659_v38, %v3222_v62 }
 0xa3d   :  { %8281 = vrcp.f32 %v3365_v49  ;;  %v3475_v42 = vmul.f32 %v8258_v4, %v9450_v44  ;;  %v3451_v40 = vmul.f32 %v8258_v4, %v9448_v7  ;;  %v3474_v44 = vmul.f32 %v8256_v29, %v9446_v32 }
 0xa3e   :  { %8283 = vrcp.f32 %v3413_v46  ;;  %v3450_v49 = vmul.f32 %v8256_v29, %v9444_v12  ;;  %v3459_v7 = vmul.f32 %v3228_v37, %v8665_v41 }
 0xa3f   :  { %v8260_v34 = vpop.eup %8259  ;;  %v3490_v12 = vadd.f32 %v3482_v22, %v3474_v44  ;;  %v7132_v44 = vld [vmem:[%s9026_s18 + $0x120] sm:$0xff] }
 0xa40   :  { %v8262_v14 = vpop.eup %8261  ;;  %v3444_v47 = vmul.f32 %v8260_v34, %v9494_v13  ;;  %v3467_v45 = vadd.f32 %v3459_v7, %v3451_v40  ;;  %v3466_v4 = vadd.f32 %v3458_v26, %v3450_v49  ;;  %v7129_v49 = vld [vmem:[%s9026_s18 + $0x108] sm:$0xff]  ;;  %v7128_v22 = vld [vmem:[%s9026_s18 + $0x100] sm:$0xff]  ;;  %v7127_v7 = vld [vmem:[%s9026_s18 + $0xf8] sm:$0xff] }
 0xa41   :  { %v8264_v57 = vpop.eup %8263  ;;  %v3443_v51 = vmul.f32 %v8262_v14, %v9498_v8  ;;  %v3483_v8 = vmul.f32 %v3228_v37, %v8821_v28  ;;  %v7120_v26 = vld [vmem:[%s9026_s18 + $0xc0] sm:$0xff] }
 0xa42   :  { %v8266_v15 = vpop.eup %8265  ;;  %v3452_v23 = vmul.f32 %v8264_v57, %v9452_v5  ;;  %7981 = vmatprep.subr.mxu0 %v3444_v47  ;;  %v3476_v33 = vmul.f32 %v8264_v57, %v9454_v21 }
 0xa43   :  { %v8268_v13 = vpop.eup %8267  ;;  %7982 = vmatpush3.msra.mxu0 %v3444_v47  ;;  %v3491_v9 = vadd.f32 %v3483_v8, %v3475_v42  ;;  %v3473_v46 = vmul.f32 %v8266_v15, %v9442_v63  ;;  %v3449_v32 = vmul.f32 %v8266_v15, %v9440_v17  ;;  %v3457_v63 = vmul.f32 %v3216_v52, %v8661_v39  ;;  %v11030_v52 = vld [vmem:[#allocation8_spill] sm:$0xff]  ;;  %v11036_v42 = vld [vmem:[#allocation7_spill] sm:$0xff]  ;;  %v11038_v8 = vld [vmem:[#allocation37_spill] sm:$0xff] }
 0xa44   :  { %v8270_v5 = vpop.eup %8269  ;;  %v3468_v18 = vadd.f32 %v3460_v56, %v3452_v23  ;;  %7983 = vmatprep.subr.mxu0 %v3443_v51  ;;  %v3492_v21 = vadd.f32 %v3484_v58, %v3476_v33  ;;  %v3441_v16 = vmul.f32 %v8268_v13, %v9492_v3  ;;  %v11033_v56 = vld [vmem:[#allocation17_spill] sm:$0xff]  ;;  %v3453_v13 = vmul.f32 %v9525_v53, %v11036_v42 }
 0xa45   :  { %v8272_v55 = vpop.eup %8271  ;;  %7984 = vmatpush3.msra.mxu0 %v3443_v51  ;;  %v3440_v41 = vmul.f32 %v8270_v5, %v9486_v0  ;;  %v3489_v34 = vadd.f32 %v3481_v31, %v3473_v46  ;;  %v11041_v5 = vmov 0.0   ;;  %v7130_v31 = vld [vmem:[%s9026_s18 + $0x110] sm:$0xff]  ;;  %v7123_v46 = vld [vmem:[%s9026_s18 + $0xd8] sm:$0xff] }
 0xa46   :  { %v8274_v28 = vpop.eup %8273  ;;  %7985 = vmatprep.subr.mxu0 %v3442_v27  ;;  %3509 = vmatprep.subr.mxu1 %v3492_v21  ;;  %v3472_v3 = vmul.f32 %v8272_v55, %v9438_v48  ;;  %v3448_v20 = vmul.f32 %v8272_v55, %v9436_v50  ;;  %v3456_v48 = vmul.f32 %v8653_v36, %v9521_v35  ;;  %v7133_v21 = vld [vmem:[%s9026_s18 + $0x128] sm:$0xff]  ;;  %v7131_v55 = vld [vmem:[%s9026_s18 + $0x118] sm:$0xff] }
 0xa47   :  { %v8276_v60 = vpop.eup %8275  ;;  %7986 = vmatpush3.msra.mxu0 %v3442_v27  ;;  %3510 = vmatpush1.msra.mxu1 %v3468_v18  ;;  %v3471_v0 = vmul.f32 %v8274_v28, %v9434_v11  ;;  %v3447_v14 = vmul.f32 %v8274_v28, %v9432_v6  ;;  %v3465_v50 = vadd.f32 %v3457_v63, %v3449_v32  ;;  %v11031_v6 = vld [vmem:[#allocation19_spill] sm:$0xff]  ;;  %v7135_v27 = vld [vmem:[%s9026_s18 + $0x138] sm:$0xff]  ;;  %v7134_v18 = vld [vmem:[%s9026_s18 + $0x130] sm:$0xff] }
 0xa48   :  { %v8278_v25 = vpop.eup %8277  ;;  %7987 = vmatprep.subr.mxu0 %v3441_v16  ;;  %3511 = vmatprep.subr.mxu1 %v3491_v9  ;;  %v3439_v17 = vmul.f32 %v8276_v60, %v9501_v61  ;;  %v3488_v47 = vadd.f32 %v3480_v24, %v3472_v3  ;;  %v3455_v11 = vmul.f32 %v9518_v59, %v11030_v52  ;;  %v11035_v59 = vld [vmem:[#allocation26_spill] sm:$0xff]  ;;  %v11037_v24 = vld [vmem:[#allocation36_spill] sm:$0xff]  ;;  %v7121_v32 = vld [vmem:[%s9026_s18 + $0xc8] sm:$0xff] }
 0xa49   :  { %v8280_v29 = vpop.eup %8279  ;;  %7988 = vmatpush3.msra.mxu0 %v3441_v16  ;;  %3512 = vmatpush1.msra.mxu1 %v3467_v45  ;;  %v3438_v39 = vmul.f32 %v8278_v25, %v9504_v1  ;;  %v3464_v62 = vadd.f32 %v3456_v48, %v3448_v20  ;;  %v3487_v35 = vadd.f32 %v9542_v19, %v3471_v0  ;;  %v11032_v1 = vld [vmem:[#allocation18_spill] sm:$0xff]  ;;  %v7126_v28 = vld [vmem:[%s9026_s18 + $0xf0] sm:$0xff]  ;;  %v7125_v16 = vld [vmem:[%s9026_s18 + $0xe8] sm:$0xff] }
 0xa4a   :  { %v8282_v38 = vpop.eup %8281  ;;  %7989 = vmatprep.subr.mxu0 %v3440_v41  ;;  %3513 = vmatprep.subr.mxu1 %v3490_v12  ;;  %v3470_v61 = vmul.f32 %v8280_v29, %v9430_v2  ;;  %v3446_v57 = vmul.f32 %v8280_v29, %v9428_v54  ;;  %v11034_v2 = vld [vmem:[#allocation6_spill] sm:$0xff]  ;;  %v3463_v54 = vadd.f32 %v3455_v11, %v3447_v14  ;;  %v7122_v60 = vld [vmem:[%s9026_s18 + $0xd0] sm:$0xff]  ;;  %v7143_v45 = vld [vmem:[%s9026_s18 + $0x178] sm:$0xff] }
 0xa4b   :  { %v8284_v37 = vpop.eup %8283  ;;  %7990 = vmatpush3.msra.mxu0 %v3440_v41  ;;  %3514 = vmatpush1.msra.mxu1 %v3466_v4  ;;  %v3469_v51 = vmul.f32 %v8282_v38, %v11032_v1  ;;  %v3445_v15 = vmul.f32 %v8282_v38, %v11033_v56  ;;  %v3454_v23 = vmul.f32 %v11034_v2, %v9515_v30  ;;  %v7124_v9 = vld [vmem:[%s9026_s18 + $0xe0] sm:$0xff]  ;;  %v7142_v25 = vld [vmem:[%s9026_s18 + $0x170] sm:$0xff]  ;;  %v7141_v41 = vld [vmem:[%s9026_s18 + $0x168] sm:$0xff] }
 0xa4c   :  { %7991 = vmatprep.subr.mxu0 %v3439_v17  ;;  %3515 = vmatprep.subr.mxu1 %v3489_v34  ;;  %v3437_v36 = vmul.f32 %v8284_v37, %v11031_v6  ;;  %v3477_v58 = vmul.f32 %v9525_v53, %v11035_v59  ;;  %v3486_v33 = vadd.f32 %v9529_v43, %v3470_v61  ;;  %v11039_v43 = vld [vmem:[#allocation27_spill] sm:$0xff]  ;;  %v11040_v53 = vld [vmem:[#allocation32_spill] sm:$0xff]  ;;  %v7140_v12 = vld [vmem:[%s9026_s18 + $0x160] sm:$0xff] }
 0xa4d   :  { %7992 = vmatpush3.msra.mxu0 %v3439_v17  ;;  %3516 = vmatpush1.msra.mxu1 %v3465_v50  ;;  %v3462_v19 = vadd.f32 %v3454_v23, %v3446_v57  ;;  %v3461_v40 = vadd.f32 %v3453_v13, %v3445_v15  ;;  %v7139_v3 = vld [vmem:[%s9026_s18 + $0x158] sm:$0xff]  ;;  %v7138_v29 = vld [vmem:[%s9026_s18 + $0x150] sm:$0xff]  ;;  %v7137_v20 = vld [vmem:[%s9026_s18 + $0x148] sm:$0xff] }
 0xa4e   :  { %7993 = vmatprep.subr.mxu0 %v3438_v39  ;;  %3517 = vmatprep.subr.mxu1 %v3488_v47  ;;  %v3485_v30 = vadd.f32 %v3477_v58, %v3469_v51  ;;  %v7136_v63 = vld [vmem:[%s9026_s18 + $0x140] sm:$0xff]  ;;  %s8393_s18 = smov 28  }
 0xa4f   :  { %7994 = vmatpush3.msra.mxu0 %v3438_v39  ;;  %3518 = vmatpush1.msra.mxu1 %v3464_v62  ;;  %s10433_s23 = sld [smem:[%s10883_s0 + %s8393_s18]]  }
 0xa50   :  { %7995 = vmatprep.subr.mxu0 %v3437_v36  ;;  %3519 = vmatprep.subr.mxu1 %v3487_v35 }
 0xa51   :  { %7996 = vmatpush3.msra.mxu0 %v3437_v36  ;;  %3520 = vmatpush1.msra.mxu1 %v3463_v54 }
 0xa52   :  { %7998 = vmatmul.mubr.msk.f32.vlgmr.msra.gmra.mxu0 %vm1219_vm3, %v11037_v24  ;;  %3521 = vmatprep.subr.mxu1 %v3486_v33 }
 0xa53   :  { %8000 = vmatprep.mubr.msk.f32.mxu0 %vm1219_vm3, %v11038_v8  ;;  %3522 = vmatpush1.msra.mxu1 %v3462_v19 }
 0xa54   :  { %3523 = vmatprep.subr.mxu1 %v3485_v30 }
 0xa55   :  { %3524 = vmatpush1.msra.mxu1 %v3461_v40 }
 0xa56   :  { %8001 = vmatmul.mubr.msk.f32.gmra.mxu0 %vm1219_vm3, %v11039_v43  ;;  %7112 = vmatmul.mubr.msk.f32.vlgmr.msra.gmra.mxu1 %vm1219_vm3, %v11040_v53 }
 0xa57   :  { %3563 = vmatprep.mubr.f32.mxu1 %v11041_v5  ;;  %3776 = vmatprep.subr.mxu1 %v11041_v5 }
 0xa58   :  { %3999 = vmatprep.mubr.f32.mxu0 %v11041_v5  ;;  %3777 = vmatpush1.msra.mxu1 %v7135_v27 }
 0xa59   :  { %3778 = vmatprep.subr.mxu1 %v11041_v5 }
 0xa5a   :  { %7113 = vmatmul.mubr.msk.f32.gmra.mxu1 %vm1219_vm3, %v11037_v24 }
 0xa5b   :  { %3569 = vmatprep.mubr.f32.mxu1 %v11041_v5  ;;  %3779 = vmatpush1.msra.mxu1 %v7134_v18 }
 0xa5c   :  { %3780 = vmatprep.subr.mxu1 %v11041_v5 }
 0xa5d   :  { %3781 = vmatpush1.msra.mxu1 %v7133_v21 }
 0xa5e   :  { %7114 = vmatmul.mubr.msk.f32.gmra.mxu1 %vm1219_vm3, %v11038_v8  ;;  %3782 = vmatprep.subr.mxu1 %v11041_v5 }
 0xa5f   :  { %3575 = vmatprep.mubr.f32.mxu1 %v11041_v5  ;;  %3783 = vmatpush1.msra.mxu1 %v7132_v44 }
 0xa60   :  { %3784 = vmatprep.subr.mxu1 %v11041_v5 }
 0xa61   :  { %3785 = vmatpush1.msra.mxu1 %v7131_v55 }
 0xa62   :  { %7115 = vmatmul.mubr.msk.f32.gmra.mxu1 %vm1219_vm3, %v11039_v43  ;;  %3786 = vmatprep.subr.mxu1 %v11041_v5  ;;  %v11042_v43 = vld [vmem:[#allocation29_spill] sm:$0xff] }
 0xa63   :  { %3787 = vmatpush1.msra.mxu1 %v7130_v31 }
 0xa64   :  { %3788 = vmatprep.subr.mxu1 %v11041_v5 }
 0xa65   :  { %3789 = vmatpush1.msra.mxu1 %v7129_v49  ;;  %v11043_v49 = vld [vmem:[#allocation25_spill] sm:$0xff] }
 0xa66   :  { %3790 = vmatprep.subr.mxu1 %v11041_v5 }
 0xa67   :  { %3791 = vmatpush1.msra.mxu1 %v7128_v22 }
 0xa68   :  { %3792 = vmatprep.subr.mxu1 %v11041_v5 }
 0xa69   :  { %3793 = vmatpush1.msra.mxu1 %v7127_v7 }
 0xa6a   :  { %3794 = vmatprep.subr.mxu1 %v11041_v5 }
 0xa6b   :  { %3795 = vmatpush1.msra.mxu1 %v7126_v28 }
 0xa6c   :  { %3796 = vmatprep.subr.mxu1 %v11041_v5 }
 0xa6d   :  { %3797 = vmatpush1.msra.mxu1 %v7125_v16 }
 0xa6e   :  { %3798 = vmatprep.subr.mxu1 %v11041_v5 }
 0xa6f   :  { %3799 = vmatpush1.msra.mxu1 %v7124_v9 }
 0xa70   :  { %3800 = vmatprep.subr.mxu1 %v11041_v5 }
 0xa71   :  { %3801 = vmatpush1.msra.mxu1 %v7123_v46 }
 0xa72   :  { %3802 = vmatprep.subr.mxu1 %v11041_v5 }
 0xa73   :  { %3803 = vmatpush1.msra.mxu1 %v7122_v60 }
 0xa74   :  { %3804 = vmatprep.subr.mxu1 %v11041_v5 }
 0xa75   :  { %3805 = vmatpush1.msra.mxu1 %v7121_v32  ;;  %v11044_v32 = vld [vmem:[#allocation30_spill] sm:$0xff] }
 0xa76   :  { %3806 = vmatprep.subr.mxu1 %v11041_v5 }
 0xa77   :  { %3807 = vmatpush1.msra.mxu1 %v7120_v26 }
 0xa78   :  { %3824 = vmatprep.subr.mxu1 %v11041_v5 }
 0xa79   :  { %3825 = vmatpush2.msra.mxu1 %v7143_v45 }
 0xa7a   :  { %3826 = vmatprep.subr.mxu1 %v11041_v5 }
 0xa7b   :  { %3827 = vmatpush2.msra.mxu1 %v7142_v25  ;;  %v11045_v25 = vld [vmem:[#allocation31_spill] sm:$0xff] }
 0xa7c   :  { %3828 = vmatprep.subr.mxu1 %v11041_v5 }
 0xa7d   :  { %3829 = vmatpush2.msra.mxu1 %v7141_v41 }
 0xa7e   :  { %3830 = vmatprep.subr.mxu1 %v11041_v5 }
 0xa7f   :  { %3831 = vmatpush2.msra.mxu1 %v7140_v12 }
 0xa80   :  { %3832 = vmatprep.subr.mxu1 %v11041_v5 }
 0xa81   :  { %3833 = vmatpush2.msra.mxu1 %v7139_v3 }
 0xa82   :  { %3834 = vmatprep.subr.mxu1 %v11041_v5 }
 0xa83   :  { %3835 = vmatpush2.msra.mxu1 %v7138_v29 }
 0xa84   :  { %3836 = vmatprep.subr.mxu1 %v11041_v5 }
 0xa85   :  { %3837 = vmatpush2.msra.mxu1 %v7137_v20  ;;  %v7185_v20 = vld [vmem:[%s9131_s25 + $0x1f8] sm:$0xff] }
 0xa86   :  { %3838 = vmatprep.subr.mxu1 %v11041_v5  ;;  %3935 = vmatprep.subr.mxu0 %v7185_v20 }
 0xa87   :  { %3839 = vmatpush2.msra.mxu1 %v7136_v63  ;;  %v7184_v63 = vld [vmem:[%s9131_s25 + $0x1f0] sm:$0xff] }
 0xa88   :  { %3936 = vmatpush1.msra.mxu0 %v7184_v63 }
 0xb12   :  { %v7999_v4 = vpop.f32.mrf.mxu0 }
 0xb14   :  { %v3648_v38 = vpop.f32.mrf.mxu0 }
 0xb15   :  { %3715 = vrot.lane.b32.xlu1 %v3648_v38, %s8381_s30  ;;  %v7182_v38 = vld [vmem:[%s9131_s25 + $0x1e0] sm:$0xff] }
 0xb16   :  { %v8002_v17 = vpop.f32.mrf.mxu0  ;;  %v9653_v0 = vpop.f32.mrf.mxu1 }
 0xb17   :  { %3721 = vrot.lane.b32.xlu0 %v8002_v17, %s8381_s30  ;;  %v3667_v61 = vmul.f32 %v9653_v0, %v9653_v0  ;;  %v7181_v17 = vld [vmem:[%s9131_s25 + $0x1d8] sm:$0xff] }
 0xb18   :  { %v3658_v34 = vpop.f32.mrf.mxu0  ;;  %v9655_v37 = vpop.f32.mrf.mxu1 }
 0xb19   :  { %3717 = vrot.lane.b32.xlu1 %v7999_v4, %s8381_s30  ;;  %v3671_v39 = vmul.f32 %v9655_v37, %v9655_v37  ;;  %v7183_v4 = vld [vmem:[%s9131_s25 + $0x1e8] sm:$0xff] }
 0xb1a   :  { %v9657_v14 = vpop.f32.mrf.mxu1  ;;  %3937 = vmatprep.subr.mxu0 %v7183_v4 }
 0xb1b   :  { %v3675_v57 = vadd.f32 %v3671_v39, %v3667_v61  ;;  %v3668_v62 = vmul.f32 %v9657_v14, %v9657_v14  ;;  %3938 = vmatpush1.msra.mxu0 %v7182_v38  ;;  %v7179_v39 = vld [vmem:[%s9131_s25 + $0x1c8] sm:$0xff]  ;;  %v7178_v61 = vld [vmem:[%s9131_s25 + $0x1c0] sm:$0xff] }
 0xb1c   :  { %v9659_v48 = vpop.f32.mrf.mxu1  ;;  %3939 = vmatprep.subr.mxu0 %v7181_v17 }
 0xb1d   :  { %3719 = vrot.lane.b32.xlu1 %v3658_v34, %s8381_s30  ;;  %v3672_v52 = vmul.f32 %v9659_v48, %v9659_v48  ;;  %v3679_v6 = vadd.f32 1e-08, %v3675_v57  ;;  %v7180_v34 = vld [vmem:[%s9131_s25 + $0x1d0] sm:$0xff]  ;;  %v7177_v57 = vld [vmem:[%s9131_s25 + $0x1b8] sm:$0xff] }
 0xb1e   :  { %v9661_v50 = vpop.f32.mrf.mxu1  ;;  %3940 = vmatpush1.msra.mxu0 %v7180_v34 }
 0xb1f   :  { %v3676_v36 = vadd.f32 %v3672_v52, %v3668_v62  ;;  %v3669_v51 = vmul.f32 %v9661_v50, %v9661_v50  ;;  %8285 = vrsqrt.f32 %v3679_v6  ;;  %vm3685_vm13 = vcmp.eq.f32.partialorder %v3679_v6, inf  ;;  %3941 = vmatprep.subr.mxu0 %v7179_v39  ;;  %v7176_v52 = vld [vmem:[%s9131_s25 + $0x1b0] sm:$0xff]  ;;  %v7175_v62 = vld [vmem:[%s9131_s25 + $0x1a8] sm:$0xff] }
 0xb20   :  { %v9665_v47 = vpop.f32.mrf.mxu1  ;;  %v3688_v8 = vand.u32 2147483648, %v3679_v6  ;;  %vm3687_vm14 = vcmp.eq.f32.partialorder %v3679_v6, 0.0  ;;  %3942 = vmatpush1.msra.mxu0 %v7178_v61 }
 0xb21   :  { %v3673_v35 = vmul.f32 %v9665_v47, %v9665_v47  ;;  %v3680_v56 = vadd.f32 1e-08, %v3676_v36  ;;  %3943 = vmatprep.subr.mxu0 %v7177_v57  ;;  %v7173_v36 = vld [vmem:[%s9131_s25 + $0x198] sm:$0xff] }
 0xb22   :  { %v9671_v11 = vpop.f32.mrf.mxu1  ;;  %3944 = vmatpush1.msra.mxu0 %v7176_v52 }
 0xb23   :  { %v3677_v15 = vadd.f32 %v3673_v35, %v3669_v51  ;;  %v3670_v23 = vmul.f32 %v9671_v11, %v9671_v11  ;;  %8287 = vrsqrt.f32 %v3680_v56  ;;  %vm3692_vm15 = vcmp.eq.f32.partialorder %v3680_v56, inf  ;;  %3945 = vmatprep.subr.mxu0 %v7175_v62  ;;  %v7172_v35 = vld [vmem:[%s9131_s25 + $0x190] sm:$0xff]  ;;  %v7171_v51 = vld [vmem:[%s9131_s25 + $0x188] sm:$0xff] }
 0xb24   :  { %v9677_v1 = vpop.f32.mrf.mxu1  ;;  %v3695_v31 = vand.u32 2147483648, %v3680_v56  ;;  %vm3694_vm0 = vcmp.eq.f32.partialorder %v3680_v56, 0.0 }
 0xb25   :  { %v3674_v2 = vmul.f32 %v9677_v1, %v9677_v1  ;;  %v3681_v54 = vadd.f32 1e-08, %v3677_v15  ;;  %v7169_v15 = vld [vmem:[%s9131_s25 + $0x178] sm:$0xff] }
 0xb27   :  { %v3678_v59 = vadd.f32 %v3674_v2, %v3670_v23  ;;  %8289 = vrsqrt.f32 %v3681_v54  ;;  %vm3699_vm1 = vcmp.eq.f32.partialorder %v3681_v54, inf  ;;  %v3702_v60 = vand.u32 2147483648, %v3681_v54  ;;  %v7168_v2 = vld [vmem:[%s9131_s25 + $0x170] sm:$0xff]  ;;  %v7167_v23 = vld [vmem:[%s9131_s25 + $0x168] sm:$0xff] }
 0xb28   :  { %vm3701_vm4 = vcmp.eq.f32.partialorder %v3681_v54, 0.0 }
 0xb29   :  { %v3682_v58 = vadd.f32 1e-08, %v3678_v59  ;;  %v7165_v59 = vld [vmem:[%s9131_s25 + $0x158] sm:$0xff] }
 0xb2b   :  { %8291 = vrsqrt.f32 %v3682_v58  ;;  %vm3706_vm5 = vcmp.eq.f32.partialorder %v3682_v58, inf  ;;  %v3709_v3 = vand.u32 2147483648, %v3682_v58  ;;  %vm3708_vm6 = vcmp.eq.f32.partialorder %v3682_v58, 0.0 }
 0xb2c   :  { %v8286_v33 = vpop.eup %8285 }
 0xb2d   :  { %v3684_v42 = vmul.f32 %v8286_v33, %v3679_v6  ;;  %v7163_v33 = vld [vmem:[%s9131_s25 + $0x148] sm:$0xff] }
 0xb2f   :  { %v3686_v19 = vsel %vm3685_vm13, %v3679_v6, %v3684_v42  ;;  %v7174_v6 = vld [vmem:[%s9131_s25 + $0x1a0] sm:$0xff] }
 0xb30   :  { %v8288_v13 = vpop.eup %8287  ;;  %v3689_v27 = vsel %vm3687_vm14, %v3688_v8, %v3686_v19  ;;  %3946 = vmatpush1.msra.mxu0 %v7174_v6  ;;  %v7162_v42 = vld [vmem:[%s9131_s25 + $0x140] sm:$0xff]  ;;  %v7160_v19 = vld [vmem:[%s9131_s25 + $0x130] sm:$0xff] }
 0xb31   :  { %v3691_v24 = vmul.f32 %v8288_v13, %v3680_v56  ;;  %3947 = vmatprep.subr.mxu0 %v7173_v36  ;;  %v7161_v13 = vld [vmem:[%s9131_s25 + $0x138] sm:$0xff]  ;;  %v7156_v8 = vld [vmem:[%s9131_s25 + $0x110] sm:$0xff] }
 0xb32   :  { %3948 = vmatpush1.msra.mxu0 %v7172_v35 }
 0xb33   :  { %v3693_v18 = vsel %vm3692_vm15, %v3680_v56, %v3691_v24  ;;  %3949 = vmatprep.subr.mxu0 %v7171_v51  ;;  %v7170_v56 = vld [vmem:[%s9131_s25 + $0x180] sm:$0xff]  ;;  %v7159_v24 = vld [vmem:[%s9131_s25 + $0x128] sm:$0xff] }
 0xb34   :  { %v8290_v30 = vpop.eup %8289  ;;  %v3696_v7 = vsel %vm3694_vm0, %v3695_v31, %v3693_v18  ;;  %3950 = vmatpush1.msra.mxu0 %v7170_v56  ;;  %v7145_v18 = vld [vmem:[%s9168_s2 + $0x1] ss:$0 sm:$0xff]  ;;  %v7186_v56 = vld [vmem:[%s9178_s7 + $0x2] sm:$0x3]  ;;  %s8395_s2 = smov 29   ;;  %s8396_s7 = smov 127  }
 0xb35   :  { %v3698_v21 = vmul.f32 %v8290_v30, %v3681_v54  ;;  %3951 = vmatprep.subr.mxu0 %v7169_v15  ;;  %v7158_v30 = vld [vmem:[%s9131_s25 + $0x120] sm:$0xff]  ;;  %v3932_v15 = vrot.slane %v7186_v56, %v8935_v10  ;;  %s6882_s6 = sld [smem:[%s10883_s0 + %s8395_s2]]  }
 0xb36   :  { %3952 = vmatpush1.msra.mxu0 %v7168_v2 }
 0xb37   :  { %v3700_v28 = vsel %vm3699_vm1, %v3681_v54, %v3698_v21  ;;  %3953 = vmatprep.subr.mxu0 %v7167_v23  ;;  %v7166_v54 = vld [vmem:[%s9131_s25 + $0x160] sm:$0xff] }
 0xb38   :  { %v8292_v44 = vpop.eup %8291  ;;  %v3703_v45 = vsel %vm3701_vm4, %v3702_v60, %v3700_v28  ;;  %3954 = vmatpush1.msra.mxu0 %v7166_v54 }
 0xb39   :  { %v3705_v16 = vmul.f32 %v8292_v44, %v3682_v58  ;;  %3955 = vmatprep.subr.mxu0 %v7165_v59 }
 0xb3b   :  { %v3707_v12 = vsel %vm3706_vm5, %v3682_v58, %v3705_v16  ;;  %v7164_v58 = vld [vmem:[%s9131_s25 + $0x150] sm:$0xff] }
 0xb3c   :  { %v3710_v29 = vsel %vm3708_vm6, %v3709_v3, %v3707_v12  ;;  %3956 = vmatpush1.msra.mxu0 %v7164_v58 }
 0xb3d   :  { %3957 = vmatprep.subr.mxu0 %v7163_v33 }
 0xb3e   :  { %3958 = vmatpush1.msra.mxu0 %v7162_v42 }
 0xb3f   :  { %3959 = vmatprep.subr.mxu0 %v7161_v13 }
 0xb40   :  { %3960 = vmatpush1.msra.mxu0 %v7160_v19 }
 0xb41   :  { %3961 = vmatprep.subr.mxu0 %v7159_v24 }
 0xb42   :  { %3962 = vmatpush1.msra.mxu0 %v7158_v30 }
 0xb87   :  { %v3716_v40 = vpop.permute.xlu1 %3715 }
 0xb88   :  { %v3727_v53 = vsel %vm775_vm2, %v11042_v43, %v3716_v40  ;;  %v7157_v40 = vld [vmem:[%s9131_s25 + $0x118] sm:$0xff] }
 0xb89   :  { %7146 = vmatprep.mubr.msk.f32.mxu1 %vm1219_vm3, %v3727_v53  ;;  %v3722_v9 = vpop.permute.xlu0 %3721  ;;  %3963 = vmatprep.subr.mxu0 %v7157_v40  ;;  %v7155_v53 = vld [vmem:[%s9131_s25 + $0x108] sm:$0xff] }
 0xb8a   :  { %3841 = vmatmul.mubr.f32.vlgmr.msra.gmra.mxu1 %v3689_v27  ;;  %v3730_v41 = vsel %vm775_vm2, %v11045_v25, %v3722_v9  ;;  %3964 = vmatpush1.msra.mxu0 %v7156_v8  ;;  %v7154_v27 = vld [vmem:[%s9131_s25 + $0x100] sm:$0xff]  ;;  %s8394_s25 = smov 27  }
 0xb8b   :  { %v3718_v55 = vpop.permute.xlu1 %3717  ;;  %3965 = vmatprep.subr.mxu0 %v7155_v53  ;;  %s10452_s1 = sld [smem:[%s10883_s0 + %s8394_s25]]  }
 0xb8c   :  { %v3728_v22 = vsel %vm775_vm2, %v11043_v49, %v3718_v55  ;;  %3966 = vmatpush1.msra.mxu0 %v7154_v27 }
 0xb8d   :  { %7147 = vmatprep.mubr.msk.f32.mxu1 %vm1219_vm3, %v3728_v22 }
 0xb8e   :  { %3846 = vmatmul.mubr.f32.gmra.mxu1 %v3696_v7 }
 0xb8f   :  { %v3720_v46 = vpop.permute.xlu1 %3719 }
 0xb90   :  { %v3729_v26 = vsel %vm775_vm2, %v11044_v32, %v3720_v46 }
 0xb91   :  { %7148 = vmatprep.mubr.msk.f32.mxu1 %vm1219_vm3, %v3729_v26 }
 0xb92   :  { %3851 = vmatmul.mubr.f32.gmra.mxu1 %v3703_v45 }
 0xb93   :  { %7149 = vmatprep.mubr.msk.f32.mxu1 %vm1219_vm3, %v3730_v41 }
 0xb96   :  { %3856 = vmatmul.mubr.f32.gmra.mxu1 %v3710_v29 }
 0xb97   :  { %4883 = vmatprep.mubr.f32.mxu1 %v11041_v5 }
 0xc4a   :  { %v3842_v21 = vpop.f32.mrf.mxu1 }
 0xc4b   :  { %v3843_v44 = vadd.f32 %v7145_v18, %v3842_v21 }
 0xc4c   :  { %v3844_v55 = vpop.f32.mrf.mxu1 }
 0xc4d   :  { %v7150_v31 = vmul.f32 -1.442695, %v3843_v44  ;;  %v4403_v55 = vld [vmem:[%s9761_s24 + $0x5a8] sm:$0xff] }
 0xc4e   :  { %v3847_v22 = vpop.f32.mrf.mxu1  ;;  %4730 = vmatprep.subr.mxu0 %v4403_v55 }
 0xc4f   :  { %8293 = vpow2.f32 %v7150_v31  ;;  %v3848_v7 = vadd.f32 %v7145_v18, %v3847_v22  ;;  %v4402_v31 = vld [vmem:[%s9761_s24 + $0x5a0] sm:$0xff]  ;;  %v4391_v22 = vld [vmem:[%s9761_s24 + $0x548] sm:$0xff] }
 0xc50   :  { %v3849_v28 = vpop.f32.mrf.mxu1 }
 0xc51   :  { %v7151_v16 = vmul.f32 -1.442695, %v3848_v7  ;;  %v4390_v28 = vld [vmem:[%s9761_s24 + $0x540] sm:$0xff] }
 0xc52   :  { %v3852_v9 = vpop.f32.mrf.mxu1 }
 0xc53   :  { %8295 = vpow2.f32 %v7151_v16  ;;  %v3853_v46 = vadd.f32 %v7145_v18, %v3852_v9  ;;  %v4379_v16 = vld [vmem:[%s9761_s24 + $0x4e8] sm:$0xff]  ;;  %v4378_v9 = vld [vmem:[%s9761_s24 + $0x4e0] sm:$0xff] }
 0xc54   :  { %v3854_v60 = vpop.f32.mrf.mxu1 }
 0xc55   :  { %v7152_v26 = vmul.f32 -1.442695, %v3853_v46 }
 0xc56   :  { %v3857_v45 = vpop.f32.mrf.mxu1 }
 0xc57   :  { %8297 = vpow2.f32 %v7152_v26  ;;  %v3858_v41 = vadd.f32 %v7145_v18, %v3857_v45  ;;  %v4366_v26 = vld [vmem:[%s9761_s24 + $0x480] sm:$0xff] }
 0xc58   :  { %v3859_v12 = vpop.f32.mrf.mxu1 }
 0xc59   :  { %v7153_v3 = vmul.f32 -1.442695, %v3858_v41  ;;  %v4354_v12 = vld [vmem:[%s9761_s24 + $0x420] sm:$0xff] }
 0xc5b   :  { %8299 = vpow2.f32 %v7153_v3  ;;  %v4343_v3 = vld [vmem:[%s9761_s24 + $0x3c8] sm:$0xff] }
 0xc5c   :  { %v8294_v29 = vpop.eup %8293 }
 0xc5d   :  { %v3873_v20 = vadd.f32 1.0, %v8294_v29  ;;  %v4342_v29 = vld [vmem:[%s9761_s24 + $0x3c0] sm:$0xff] }
 0xc5f   :  { %8301 = vrcp.f32 %v3873_v20 }
 0xc60   :  { %v8296_v63 = vpop.eup %8295 }
 0xc61   :  { %v3874_v4 = vadd.f32 1.0, %v8296_v63 }
 0xc63   :  { %8303 = vrcp.f32 %v3874_v4  ;;  %v4331_v4 = vld [vmem:[%s9761_s24 + $0x368] sm:$0xff] }
 0xc64   :  { %v8298_v38 = vpop.eup %8297 }
 0xc65   :  { %v3875_v17 = vadd.f32 1.0, %v8298_v38  ;;  %v4330_v38 = vld [vmem:[%s9761_s24 + $0x360] sm:$0xff] }
 0xc67   :  { %8305 = vrcp.f32 %v3875_v17  ;;  %v4319_v17 = vld [vmem:[%s9761_s24 + $0x308] sm:$0xff] }
 0xc68   :  { %v8300_v34 = vpop.eup %8299 }
 0xc69   :  { %v3876_v39 = vadd.f32 1.0, %v8300_v34  ;;  %v4318_v34 = vld [vmem:[%s9761_s24 + $0x300] sm:$0xff] }
 0xc6b   :  { %8307 = vrcp.f32 %v3876_v39 }
 0xc6c   :  { %v8302_v61 = vpop.eup %8301 }
 0xc6d   :  { %v3885_v57 = vmul.f32 %v8302_v61, %v3843_v44  ;;  %v4307_v61 = vld [vmem:[%s9761_s24 + $0x2a8] sm:$0xff] }
 0xc6f   :  { %4000 = vmatmul.mubr.f32.vlgmr.msra.gmra.mxu0 %v3885_v57  ;;  %v4306_v57 = vld [vmem:[%s9761_s24 + $0x2a0] sm:$0xff] }
 0xc70   :  { %v8304_v52 = vpop.eup %8303  ;;  %4005 = vmatprep.mubr.f32.mxu0 %v11041_v5  ;;  %4731 = vmatpush1.msra.mxu0 %v4402_v31 }
 0xc71   :  { %v3886_v62 = vmul.f32 %v8304_v52, %v3848_v7  ;;  %4732 = vmatprep.subr.mxu0 %v4391_v22  ;;  %v4295_v52 = vld [vmem:[%s9761_s24 + $0x248] sm:$0xff] }
 0xc72   :  { %4733 = vmatpush1.msra.mxu0 %v4390_v28 }
 0xc73   :  { %4006 = vmatmul.mubr.f32.gmra.mxu0 %v3886_v62  ;;  %4734 = vmatprep.subr.mxu0 %v4379_v16  ;;  %v4294_v62 = vld [vmem:[%s9761_s24 + $0x240] sm:$0xff] }
 0xc74   :  { %v8306_v6 = vpop.eup %8305  ;;  %4011 = vmatprep.mubr.f32.mxu0 %v11041_v5  ;;  %4735 = vmatpush1.msra.mxu0 %v4378_v9  ;;  %v11047_v9 = vld [vmem:[#allocation40_spill] sm:$0xff] }
 0xc75   :  { %v3887_v36 = vmul.f32 %v8306_v6, %v3853_v46  ;;  %v4367_v46 = vld [vmem:[%s9761_s24 + $0x488] sm:$0xff] }
 0xc76   :  { %4736 = vmatprep.subr.mxu0 %v4367_v46  ;;  %v4283_v6 = vld [vmem:[%s9761_s24 + $0x1e8] sm:$0xff] }
 0xc77   :  { %4012 = vmatmul.mubr.f32.gmra.mxu0 %v3887_v36  ;;  %v4282_v36 = vld [vmem:[%s9761_s24 + $0x1e0] sm:$0xff] }
 0xc78   :  { %v8308_v35 = vpop.eup %8307  ;;  %4017 = vmatprep.mubr.f32.mxu0 %v11041_v5  ;;  %4737 = vmatpush1.msra.mxu0 %v4366_v26 }
 0xc79   :  { %v3888_v51 = vmul.f32 %v8308_v35, %v3858_v41  ;;  %v4355_v41 = vld [vmem:[%s9761_s24 + $0x428] sm:$0xff] }
 0xc7a   :  { %4738 = vmatprep.subr.mxu0 %v4355_v41  ;;  %v4271_v35 = vld [vmem:[%s9761_s24 + $0x188] sm:$0xff] }
 0xc7b   :  { %4018 = vmatmul.mubr.f32.gmra.mxu0 %v3888_v51  ;;  %v4270_v51 = vld [vmem:[%s9761_s24 + $0x180] sm:$0xff] }
 0xc7c   :  { %4739 = vmatpush1.msra.mxu0 %v4354_v12 }
 0xc7d   :  { %4740 = vmatprep.subr.mxu0 %v4343_v3 }
 0xc7e   :  { %4741 = vmatpush1.msra.mxu0 %v4342_v29 }
 0xc7f   :  { %4742 = vmatprep.subr.mxu0 %v4331_v4  ;;  %v11050_v4 = vld [vmem:[#allocation2_spill] sm:$0xff] }
 0xc80   :  { %4743 = vmatpush1.msra.mxu0 %v4330_v38 }
 0xc81   :  { %4744 = vmatprep.subr.mxu0 %v4319_v17 }
 0xc82   :  { %4745 = vmatpush1.msra.mxu0 %v4318_v34 }
 0xc83   :  { %4746 = vmatprep.subr.mxu0 %v4307_v61 }
 0xc84   :  { %4747 = vmatpush1.msra.mxu0 %v4306_v57  ;;  %v11051_v57 = vld [vmem:[#allocation3_spill] sm:$0xff] }
 0xc85   :  { %4748 = vmatprep.subr.mxu0 %v4295_v52 }
 0xc86   :  { %4749 = vmatpush1.msra.mxu0 %v4294_v62  ;;  %v11052_v62 = vld [vmem:[#allocation4_spill] sm:$0xff] }
 0xc87   :  { %4750 = vmatprep.subr.mxu0 %v4283_v6 }
 0xc88   :  { %4751 = vmatpush1.msra.mxu0 %v4282_v36 }
 0xc89   :  { %4752 = vmatprep.subr.mxu0 %v4271_v35 }
 0xc8a   :  { %4753 = vmatpush1.msra.mxu0 %v4270_v51 }
 0xd2f   :  { %v4001_v2 = vpop.f32.mrf.mxu0 }
 0xd31   :  { %v4003_v23 = vpop.f32.mrf.mxu0 }
 0xd32   :  { %v4004_v54 = vadd.f32 %v4003_v23, %v3932_v15  ;;  %v4258_v23 = vld [vmem:[%s9761_s24 + $0x120] sm:$0xff] }
 0xd33   :  { %v4007_v59 = vpop.f32.mrf.mxu0 }
 0xd34   :  { %v9737_v58 = vadd.f32 %v4004_v54, %v11042_v43  ;;  %v4247_v54 = vld [vmem:[%s9761_s24 + $0xc8] sm:$0xff] }
 0xd35   :  { %v4009_v33 = vpop.f32.mrf.mxu0 }
 0xd36   :  { %v4010_v42 = vadd.f32 %v4009_v33, %v3932_v15  ;;  %v4068_v13 = vsel %vm775_vm2, %v9737_v58, 0.0  ;;  %v4246_v33 = vld [vmem:[%s9761_s24 + $0xc0] sm:$0xff] }
 0xd37   :  { %v4013_v19 = vpop.f32.mrf.mxu0  ;;  %4069 = vadd.xlane.f32.xlu1 %v4068_v13  ;;  %v4235_v13 = vld [vmem:[%s9761_s24 + $0x68] sm:$0xff] }
 0xd38   :  { %v9742_v24 = vadd.f32 %v4010_v42, %v11043_v49 }
 0xd39   :  { %v4015_v30 = vpop.f32.mrf.mxu0 }
 0xd3a   :  { %v4016_v40 = vadd.f32 %v4015_v30, %v3932_v15  ;;  %v4071_v8 = vsel %vm775_vm2, %v9742_v24, 0.0  ;;  %v4234_v30 = vld [vmem:[%s9761_s24 + $0x60] sm:$0xff] }
 0xd3b   :  { %4072 = vadd.xlane.f32.xlu1 %v4071_v8  ;;  %v9746_v53 = vpop.f32.mrf.mxu0  ;;  %v4222_v8 = vld [vmem:[%s9761_s24] sm:$0xff] }
 0xd3c   :  { %v9749_v43 = vadd.f32 %v4016_v40, %v11044_v32  ;;  %v11046_v32 = vld [vmem:[#allocation35_spill] sm:$0xff] }
 0xd3d   :  { %v4021_v27 = vpop.f32.mrf.mxu0  ;;  %v4223_v40 = vld [vmem:[%s9761_s24 + $0x8] sm:$0xff] }
 0xd3e   :  { %v4022_v18 = vadd.f32 %v4021_v27, %v3932_v15  ;;  %v4074_v21 = vsel %vm775_vm2, %v9749_v43, 0.0  ;;  %v4595_v27 = vld [vmem:[%s9761_s24 + $0xba8] sm:$0xff] }
 0xd3f   :  { %4075 = vadd.xlane.f32.xlu0 %v4074_v21 }
 0xd40   :  { %v9754_v49 = vadd.f32 %v4022_v18, %v11045_v25  ;;  %v3928_v25 = vrot.slane %v7186_v56, %v11046_v32 }
 0xd42   :  { %v4077_v44 = vsel %vm775_vm2, %v9754_v49, 0.0  ;;  %v4002_v7 = vadd.f32 %v4001_v2, %v3928_v25  ;;  %v4008_v45 = vadd.f32 %v4007_v59, %v3928_v25  ;;  %v4014_v63 = vadd.f32 %v4013_v19, %v3928_v25  ;;  %v4259_v2 = vld [vmem:[%s9761_s24 + $0x128] sm:$0xff] }
 0xd43   :  { %4078 = vadd.xlane.f32.xlu1 %v4077_v44  ;;  %v4020_v15 = vadd.f32 %v9746_v53, %v3928_v25  ;;  %4754 = vmatprep.subr.mxu0 %v4259_v2 }
 0xd44   :  { %v7187_v60 = vmul.f32 -1.442695, %v4002_v7  ;;  %v7188_v20 = vmul.f32 -1.442695, %v4008_v45  ;;  %v7189_v39 = vmul.f32 -1.442695, %v4014_v63  ;;  %4755 = vmatpush1.msra.mxu0 %v4258_v23 }
 0xd45   :  { %v7190_v42 = vmul.f32 -1.442695, %v4020_v15  ;;  %4756 = vmatprep.subr.mxu0 %v4247_v54 }
 0xd46   :  { %8309 = vpow2.f32 %v7187_v60  ;;  %4757 = vmatpush1.msra.mxu0 %v4246_v33  ;;  %v11048_v60 = vld [vmem:[#allocation39_spill] sm:$0xff] }
 0xd47   :  { %8311 = vpow2.f32 %v7188_v20  ;;  %4758 = vmatprep.subr.mxu0 %v4235_v13  ;;  %v11049_v20 = vld [vmem:[#allocation38_spill] sm:$0xff] }
 0xd48   :  { %8313 = vpow2.f32 %v7189_v39  ;;  %4759 = vmatpush1.msra.mxu0 %v4234_v30 }
 0xd49   :  { %4760 = vmatprep.subr.mxu0 %v4223_v40 }
 0xd4a   :  { %4761 = vmatpush1.msra.mxu0 %v4222_v8 }
 0xd4b   :  { %4762 = vmatprep.subr.mxu0 %v4595_v27  ;;  %v11053_v27 = vld [vmem:[#allocation5_spill] sm:$0xff] }
 0xd53   :  { %v8310_v56 = vpop.eup %8309 }
 0xd54   :  { %v4036_v59 = vadd.f32 1.0, %v8310_v56  ;;  %v8312_v19 = vpop.eup %8311 }
 0xd55   :  { %v4037_v53 = vadd.f32 1.0, %v8312_v19  ;;  %v8314_v18 = vpop.eup %8313 }
 0xd56   :  { %8315 = vrcp.f32 %v4036_v59  ;;  %v4038_v21 = vadd.f32 1.0, %v8314_v18 }
 0xd57   :  { %8317 = vpow2.f32 %v7190_v42  ;;  %v4594_v42 = vld [vmem:[%s9761_s24 + $0xba0] sm:$0xff] }
 0xd58   :  { %8319 = vrcp.f32 %v4037_v53  ;;  %4763 = vmatpush2.msra.mxu0 %v4594_v42  ;;  %v4582_v53 = vld [vmem:[%s9761_s24 + $0xb40] sm:$0xff] }
 0xd59   :  { %8321 = vrcp.f32 %v4038_v21  ;;  %v4438_v42 = vld [vmem:[%s9761_s24 + $0x6c0] sm:$0xff] }
 0xd63   :  { %v8316_v44 = vpop.eup %8315 }
 0xd64   :  { %v8318_v25 = vpop.eup %8317  ;;  %v4052_v55 = vmul.f32 %v8316_v44, %v9653_v0  ;;  %v4060_v31 = vmul.f32 %v8316_v44, %v9655_v37  ;;  %v4559_v44 = vld [vmem:[%s9761_s24 + $0xa88] sm:$0xff] }
 0xd65   :  { %v4039_v22 = vadd.f32 1.0, %v8318_v25  ;;  %v8320_v7 = vpop.eup %8319 }
 0xd66   :  { %v9801_v46 = vadd.f32 %v4052_v55, %v11047_v9  ;;  %v9804_v26 = vadd.f32 %v4060_v31, %v11048_v60  ;;  %v4053_v45 = vmul.f32 %v8320_v7, %v9657_v14  ;;  %v4061_v41 = vmul.f32 %v8320_v7, %v9659_v48  ;;  %v8322_v12 = vpop.eup %8321  ;;  %v4558_v31 = vld [vmem:[%s9761_s24 + $0xa80] sm:$0xff]  ;;  %v4535_v9 = vld [vmem:[%s9761_s24 + $0x9c8] sm:$0xff] }
 0xd67   :  { %8323 = vrcp.f32 %v4039_v22  ;;  %v4054_v48 = vmul.f32 %v8322_v12, %v9661_v50  ;;  %v4547_v22 = vld [vmem:[%s9761_s24 + $0xa28] sm:$0xff]  ;;  %v4546_v7 = vld [vmem:[%s9761_s24 + $0xa20] sm:$0xff] }
 0xd68   :  { %v4143_v3 = vmul.f32 %v9801_v46, %v9801_v46  ;;  %v4147_v29 = vmul.f32 %v9804_v26, %v9804_v26  ;;  %v9818_v63 = vadd.f32 %v4053_v45, %v11049_v20  ;;  %v9821_v14 = vadd.f32 %v4061_v41, %v11050_v4  ;;  %v4534_v45 = vld [vmem:[%s9761_s24 + $0x9c0] sm:$0xff]  ;;  %v4523_v41 = vld [vmem:[%s9761_s24 + $0x968] sm:$0xff] }
 0xd69   :  { %v9831_v52 = vadd.f32 %v4054_v48, %v11051_v57  ;;  %v4499_v20 = vld [vmem:[%s9761_s24 + $0x8a8] sm:$0xff]  ;;  %v4498_v48 = vld [vmem:[%s9761_s24 + $0x8a0] sm:$0xff] }
 0xd6a   :  { %v4151_v34 = vadd.f32 %v4147_v29, %v4143_v3  ;;  %v4144_v39 = vmul.f32 %v9818_v63, %v9818_v63  ;;  %v4148_v61 = vmul.f32 %v9821_v14, %v9821_v14  ;;  %v4511_v3 = vld [vmem:[%s9761_s24 + $0x908] sm:$0xff]  ;;  %v4510_v29 = vld [vmem:[%s9761_s24 + $0x900] sm:$0xff] }
 0xd6b   :  { %v4145_v56 = vmul.f32 %v9831_v52, %v9831_v52  ;;  %v4643_v4 = vld [vmem:[%s9761_s24 + $0xd28] sm:$0xff] }
 0xd6c   :  { %v4152_v51 = vadd.f32 %v4148_v61, %v4144_v39  ;;  %4843 = vmatprep.subr.mxu1 %v4643_v4  ;;  %v4630_v39 = vld [vmem:[%s9761_s24 + $0xcc0] sm:$0xff]  ;;  %v4475_v61 = vld [vmem:[%s9761_s24 + $0x7e8] sm:$0xff] }
 0xd6d   :  { %v4619_v57 = vld [vmem:[%s9761_s24 + $0xc68] sm:$0xff] }
 0xd74   :  { %v8324_v2 = vpop.eup %8323 }
 0xd75   :  { %v4055_v19 = vmul.f32 %v8324_v2, %v9671_v11  ;;  %v4063_v30 = vmul.f32 %v8324_v2, %v9677_v1  ;;  %v4571_v11 = vld [vmem:[%s9761_s24 + $0xae8] sm:$0xff]  ;;  %v4570_v1 = vld [vmem:[%s9761_s24 + $0xae0] sm:$0xff]  ;;  %v11055_v2 = vld [vmem:[#allocation13_spill] sm:$0xff] }
 0xd77   :  { %v9862_v18 = vadd.f32 %v4055_v19, %v11053_v27  ;;  %v11056_v19 = vld [vmem:[#allocation10_spill] sm:$0xff]  ;;  %v11061_v27 = vld [vmem:[#allocation9_spill] sm:$0xff] }
 0xdc0   :  { %v4070_v28 = vpop.xlane.xlu1 %4069 }
 0xdc1   :  { %v4081_v16 = vmul.f32 0.03125, %v4070_v28  ;;  %v4146_v28 = vmul.f32 %v9862_v18, %v9862_v18 }
 0xdc3   :  { %v9809_v0 = vsub.f32 %v9737_v58, %v4081_v16  ;;  %v4062_v58 = vmul.f32 %v8322_v12, %v9665_v47 }
 0xdc4   :  { %v4073_v17 = vpop.xlane.xlu1 %4072 }
 0xdc5   :  { %v4089_v37 = vmul.f32 %v9809_v0, %v9809_v0  ;;  %v9834_v6 = vadd.f32 %v4062_v58, %v11052_v62  ;;  %v4082_v50 = vmul.f32 0.03125, %v4073_v17  ;;  %v4642_v58 = vld [vmem:[%s9761_s24 + $0xd20] sm:$0xff]  ;;  %v4631_v17 = vld [vmem:[%s9761_s24 + $0xcc8] sm:$0xff] }
 0xdc6   :  { %4844 = vmatpush1.msra.mxu1 %v4642_v58  ;;  %v4474_v62 = vld [vmem:[%s9761_s24 + $0x7e0] sm:$0xff] }
 0xdc7   :  { %v4093_v38 = vsel %vm775_vm2, %v4089_v37, 0.0  ;;  %v4149_v15 = vmul.f32 %v9834_v6, %v9834_v6  ;;  %v9841_v23 = vsub.f32 %v9742_v24, %v4082_v50  ;;  %v4583_v24 = vld [vmem:[%s9761_s24 + $0xb48] sm:$0xff]  ;;  %v4522_v37 = vld [vmem:[%s9761_s24 + $0x960] sm:$0xff]  ;;  %4845 = vmatprep.subr.mxu1 %v4631_v17 }
 0xdc8   :  { %4094 = vadd.xlane.f32.xlu1 %v4093_v38  ;;  %v4076_v47 = vpop.xlane.xlu0 %4075  ;;  %4764 = vmatprep.subr.mxu0 %v4583_v24  ;;  %v4487_v38 = vld [vmem:[%s9761_s24 + $0x848] sm:$0xff]  ;;  %v4618_v50 = vld [vmem:[%s9761_s24 + $0xc60] sm:$0xff] }
 0xdc9   :  { %v4083_v54 = vmul.f32 0.03125, %v4076_v47  ;;  %v4153_v13 = vadd.f32 %v4149_v15, %v4145_v56  ;;  %v4090_v8 = vmul.f32 %v9841_v23, %v9841_v23  ;;  %4765 = vmatpush2.msra.mxu0 %v4582_v53  ;;  %4846 = vmatpush1.msra.mxu1 %v4630_v39  ;;  %v4463_v47 = vld [vmem:[%s9761_s24 + $0x788] sm:$0xff]  ;;  %v4405_v15 = vld [vmem:[%s9761_s24 + $0x5b8] sm:$0xff]  ;;  %v11058_v53 = vld [vmem:[#allocation12_spill] sm:$0xff] }
 0xdca   :  { %4766 = vmatprep.subr.mxu0 %v4571_v11  ;;  %4847 = vmatprep.subr.mxu1 %v4619_v57  ;;  %v4451_v56 = vld [vmem:[%s9761_s24 + $0x728] sm:$0xff]  ;;  %v11059_v11 = vld [vmem:[#allocation16_spill] sm:$0xff]  ;;  %v9947_v39 = vld [vmem:[%s6877_s11] ss:$0 sm:$0xff]  ;;  %s10861_s11 = sld [smem:[%s10883_s0 + %s8399_s9]]  }
 0xdcb   :  { %v9853_v40 = vsub.f32 %v9749_v43, %v4083_v54  ;;  %v11054_v43 = vld [vmem:[#allocation28_spill] sm:$0xff]  ;;  %v4096_v25 = vsel %vm775_vm2, %v4090_v8, 0.0  ;;  %4767 = vmatpush2.msra.mxu0 %v4570_v1  ;;  %4848 = vmatpush1.msra.mxu1 %v4618_v50  ;;  %v4450_v54 = vld [vmem:[%s9761_s24 + $0x720] sm:$0xff]  ;;  %v4415_v24 = vld [vmem:[%s9761_s24 + $0x608] sm:$0xff] }
 0xdcc   :  { %4155 = vadd.xlane.f32.xlu1 %v4151_v34  ;;  %v4079_v36 = vpop.xlane.xlu1 %4078  ;;  %v9865_v21 = vadd.f32 %v4063_v30, %v11054_v43  ;;  %4768 = vmatprep.subr.mxu0 %v4559_v44  ;;  %v4486_v34 = vld [vmem:[%s9761_s24 + $0x840] sm:$0xff]  ;;  %v11060_v1 = vld [vmem:[#allocation15_spill] sm:$0xff]  ;;  %v4645_v44 = vld [vmem:[%s9761_s24 + $0xd38] sm:$0xff] }
 0xdcd   :  { %v4084_v35 = vmul.f32 0.03125, %v4079_v36  ;;  %v4091_v55 = vmul.f32 %v9853_v40, %v9853_v40  ;;  %4769 = vmatpush2.msra.mxu0 %v4558_v31  ;;  %v4607_v36 = vld [vmem:[%s9761_s24 + $0xc08] sm:$0xff]  ;;  %v4426_v30 = vld [vmem:[%s9761_s24 + $0x660] sm:$0xff] }
 0xdce   :  { %v4150_v16 = vmul.f32 %v9865_v21, %v9865_v21  ;;  %4770 = vmatprep.subr.mxu0 %v4547_v22  ;;  %4849 = vmatprep.subr.mxu1 %v4607_v36  ;;  %v11057_v8 = vld [vmem:[#allocation14_spill] sm:$0xff]  ;;  %v11062_v43 = vld [vmem:[#allocation11_spill] sm:$0xff] }
 0xdcf   :  { %v9844_v59 = vsub.f32 %v9754_v49, %v4084_v35  ;;  %v4099_v60 = vsel %vm775_vm2, %v4091_v55, 0.0  ;;  %4771 = vmatpush2.msra.mxu0 %v4546_v7  ;;  %v4462_v35 = vld [vmem:[%s9761_s24 + $0x780] sm:$0xff] }
 0xdd0   :  { %4157 = vadd.xlane.f32.xlu1 %v4152_v51  ;;  %4772 = vmatprep.subr.mxu0 %v4535_v9  ;;  %v4154_v12 = vadd.f32 %v4150_v16, %v4146_v28  ;;  %v4606_v51 = vld [vmem:[%s9761_s24 + $0xc00] sm:$0xff] }
 0xdd1   :  { %v4092_v33 = vmul.f32 %v9844_v59, %v9844_v59  ;;  %4773 = vmatpush2.msra.mxu0 %v4534_v45  ;;  %4850 = vmatpush1.msra.mxu1 %v4606_v51  ;;  %v9950_v50 = vld [vmem:[%s6878_s16] ss:$0 sm:$0xff]  ;;  %v4404_v51 = vld [vmem:[%s9761_s24 + $0x5b0] sm:$0xff] }
 0xdd2   :  { %4774 = vmatprep.subr.mxu0 %v4523_v41  ;;  %4908 = vmatprep.subr.mxu1 %v4405_v15  ;;  %v4393_v15 = vld [vmem:[%s9761_s24 + $0x558] sm:$0xff] }
 0xdd3   :  { %v4102_v49 = vsel %vm775_vm2, %v4092_v33, 0.0  ;;  %4775 = vmatpush2.msra.mxu0 %v4522_v37  ;;  %v4439_v33 = vld [vmem:[%s9761_s24 + $0x6c8] sm:$0xff] }
 0xdd4   :  { %4159 = vadd.xlane.f32.xlu1 %v4153_v13  ;;  %4103 = vadd.xlane.f32.xlu0 %v4102_v49  ;;  %v4427_v13 = vld [vmem:[%s9761_s24 + $0x668] sm:$0xff]  ;;  %v4414_v49 = vld [vmem:[%s9761_s24 + $0x600] sm:$0xff] }
 0xdd5   :  { %4776 = vmatprep.subr.mxu0 %v4511_v3 }
 0xdd6   :  { %4777 = vmatpush2.msra.mxu0 %v4510_v29 }
 0xdd7   :  { %4778 = vmatprep.subr.mxu0 %v4499_v20 }
 0xdd8   :  { %4097 = vadd.xlane.f32.xlu1 %v4096_v25  ;;  %4779 = vmatpush2.msra.mxu0 %v4498_v48  ;;  %v9944_v48 = vld [vmem:[%s6876_s8] ss:$0 sm:$0xff]  ;;  %s6864_s8 = sld [smem:[%s10883_s0 + %s8398_s28]]  }
 0xdd9   :  { %4780 = vmatprep.subr.mxu0 %v4487_v38 }
 0xdda   :  { %4781 = vmatpush2.msra.mxu0 %v4486_v34 }
 0xddb   :  { %4782 = vmatprep.subr.mxu0 %v4475_v61 }
 0xddc   :  { %4100 = vadd.xlane.f32.xlu1 %v4099_v60  ;;  %4783 = vmatpush2.msra.mxu0 %v4474_v62 }
 0xddd   :  { %4784 = vmatprep.subr.mxu0 %v4463_v47 }
 0xdde   :  { %4785 = vmatpush2.msra.mxu0 %v4462_v35 }
 0xddf   :  { %4786 = vmatprep.subr.mxu0 %v4451_v56 }
 0xde0   :  { %4161 = vadd.xlane.f32.xlu1 %v4154_v12  ;;  %4787 = vmatpush2.msra.mxu0 %v4450_v54 }
 0xde1   :  { %4788 = vmatprep.subr.mxu0 %v4439_v33 }
 0xde2   :  { %4789 = vmatpush2.msra.mxu0 %v4438_v42 }
 0xde3   :  { %4790 = vmatprep.subr.mxu0 %v4427_v13  ;;  %v4381_v13 = vld [vmem:[%s9761_s24 + $0x4f8] sm:$0xff] }
 0xde4   :  { %4791 = vmatpush2.msra.mxu0 %v4426_v30 }
 0xde5   :  { %4792 = vmatprep.subr.mxu0 %v4415_v24 }
 0xde6   :  { %4793 = vmatpush2.msra.mxu0 %v4414_v49 }
 0xde7   :  { %5021 = vmatprep.subr.mxu0 %v4645_v44  ;;  %v4380_v44 = vld [vmem:[%s9761_s24 + $0x4f0] sm:$0xff] }
 0xdea   :  { %6677 = vrot.lane.b32.xlu0 %v11055_v2, %s8378_s17 }
 0xdee   :  { %6655 = vrot.lane.b32.xlu0 %v11056_v19, %s8379_s21 }
 0xdf1   :  { %6675 = vrot.lane.b32.xlu1 %v11057_v8, %s8378_s17 }
 0xdf2   :  { %6659 = vrot.lane.b32.xlu0 %v11058_v53, %s8379_s21 }
 0xdf5   :  { %6679 = vrot.lane.b32.xlu1 %v11059_v11, %s8378_s17 }
 0xdf6   :  { %6731 = vrot.lane.b32.xlu0 %v11056_v19, %s8378_s17 }
 0xdf9   :  { %6681 = vrot.lane.b32.xlu1 %v11060_v1, %s8378_s17 }
 0xdfa   :  { %6735 = vrot.lane.b32.xlu0 %v11058_v53, %s8378_s17 }
 0xdfd   :  { %6657 = vrot.lane.b32.xlu1 %v11061_v27, %s8379_s21 }
 0xe01   :  { %6661 = vrot.lane.b32.xlu1 %v11062_v43, %s8379_s21 }
 0xe05   :  { %6733 = vrot.lane.b32.xlu1 %v11061_v27, %s8378_s17 }
 0xe09   :  { %6737 = vrot.lane.b32.xlu1 %v11062_v43, %s8378_s17 }
 0xe51   :  { %v4095_v25 = vpop.xlane.xlu1 %4094 }
 0xe52   :  { %v4105_v55 = vmul.f32 0.03125, %v4095_v25 }
 0xe54   :  { %v4109_v31 = vadd.f32 1e-05, %v4105_v55  ;;  %v4369_v55 = vld [vmem:[%s9761_s24 + $0x498] sm:$0xff] }
 0xe55   :  { %v4156_v22 = vpop.xlane.xlu1 %4155 }
 0xe56   :  { %8325 = vrsqrt.f32 %v4109_v31  ;;  %v4163_v7 = vmul.f32 0.008928572, %v4156_v22 }
 0xe58   :  { %v4167_v28 = vadd.f32 1e-05, %v4163_v7 }
 0xe59   :  { %v4158_v16 = vpop.xlane.xlu1 %4157 }
 0xe5a   :  { %8327 = vrsqrt.f32 %v4167_v28  ;;  %v4164_v9 = vmul.f32 0.008928572, %v4158_v16  ;;  %v4368_v28 = vld [vmem:[%s9761_s24 + $0x490] sm:$0xff] }
 0xe5c   :  { %v4168_v60 = vadd.f32 1e-05, %v4164_v9 }
 0xe5d   :  { %v4160_v45 = vpop.xlane.xlu1 %4159  ;;  %v4104_v41 = vpop.xlane.xlu0 %4103 }
 0xe5e   :  { %8329 = vrsqrt.f32 %v4168_v60  ;;  %v4165_v12 = vmul.f32 0.008928572, %v4160_v45  ;;  %v4108_v3 = vmul.f32 0.03125, %v4104_v41  ;;  %v4357_v60 = vld [vmem:[%s9761_s24 + $0x438] sm:$0xff] }
 0xe60   :  { %v4169_v37 = vadd.f32 1e-05, %v4165_v12  ;;  %v4112_v17 = vadd.f32 1e-05, %v4108_v3  ;;  %v4644_v3 = vld [vmem:[%s9761_s24 + $0xd30] sm:$0xff] }
 0xe61   :  { %v4098_v29 = vpop.xlane.xlu1 %4097 }
 0xe62   :  { %v4106_v20 = vmul.f32 0.03125, %v4098_v29  ;;  %8331 = vrsqrt.f32 %v4169_v37 }
 0xe63   :  { %v8326_v4 = vpop.eup %8325 }
 0xe64   :  { %v4117_v58 = vmul.f32 %v8326_v4, %v9809_v0  ;;  %v4110_v38 = vadd.f32 1e-05, %v4106_v20  ;;  %v4345_v4 = vld [vmem:[%s9761_s24 + $0x3d8] sm:$0xff] }
 0xe65   :  { %v4101_v34 = vpop.xlane.xlu1 %4100 }
 0xe66   :  { %v4128_v61 = vmul.f32 %v9944_v48, %v4117_v58  ;;  %8333 = vrsqrt.f32 %v4110_v38  ;;  %v4107_v57 = vmul.f32 0.03125, %v4101_v34 }
 0xe67   :  { %v8328_v62 = vpop.eup %8327  ;;  %8335 = vrsqrt.f32 %v4112_v17 }
 0xe68   :  { %v4176_v47 = vmul.f32 %v8328_v62, %v9801_v46  ;;  %v4190_v36 = vmul.f32 %v8328_v62, %v9804_v26  ;;  %v4111_v0 = vadd.f32 1e-05, %v4107_v57  ;;  %v9955_v35 = vadd.f32 %v9947_v39, %v4128_v61  ;;  %v4392_v46 = vld [vmem:[%s9761_s24 + $0x550] sm:$0xff]  ;;  %v4333_v61 = vld [vmem:[%s9761_s24 + $0x378] sm:$0xff] }
 0xe69   :  { %v4162_v56 = vpop.xlane.xlu1 %4161  ;;  %v4332_v62 = vld [vmem:[%s9761_s24 + $0x370] sm:$0xff] }
 0xe6a   :  { %v4186_v54 = vmul.f32 %v9950_v50, %v4176_v47  ;;  %v4194_v33 = vmul.f32 %v9950_v50, %v4190_v36  ;;  %8337 = vrsqrt.f32 %v4111_v0  ;;  %v4166_v42 = vmul.f32 0.008928572, %v4162_v56  ;;  %7194 = vmatmul.mubr.msk.f32.vlgmr.msra.gmra.mxu1 %vm775_vm2, %v9955_v35  ;;  %v4633_v47 = vld [vmem:[%s9761_s24 + $0xcd8] sm:$0xff] }
 0xe6b   :  { %v8330_v26 = vpop.eup %8329  ;;  %4909 = vmatpush1.msra.mxu1 %v4404_v51  ;;  %4889 = vmatprep.mubr.f32.mxu1 %v11041_v5  ;;  %v4321_v36 = vld [vmem:[%s9761_s24 + $0x318] sm:$0xff] }
 0xe6c   :  { %v4177_v30 = vmul.f32 %v8330_v26, %v9818_v63  ;;  %v4191_v24 = vmul.f32 %v8330_v26, %v9821_v14  ;;  %v4170_v49 = vadd.f32 1e-05, %v4166_v42  ;;  %4910 = vmatprep.subr.mxu1 %v4393_v15  ;;  %v4210_v25 = vmul.f32 %v4186_v54, %v11057_v8  ;;  %v4320_v42 = vld [vmem:[%s9761_s24 + $0x310] sm:$0xff] }
 0xe6d   :  { %4911 = vmatpush1.msra.mxu1 %v4392_v46  ;;  %v4214_v31 = vmul.f32 %v4194_v33, %v11056_v19  ;;  %v4198_v22 = vmul.f32 %v4186_v54, %v11056_v19  ;;  %v4202_v7 = vmul.f32 %v4194_v33, %v11057_v8  ;;  %v4356_v19 = vld [vmem:[%s9761_s24 + $0x430] sm:$0xff] }
 0xe6e   :  { %v4187_v63 = vmul.f32 %v9950_v50, %v4177_v30  ;;  %v4195_v14 = vmul.f32 %v9950_v50, %v4191_v24  ;;  %8339 = vrsqrt.f32 %v4170_v49  ;;  %4912 = vmatprep.subr.mxu1 %v4381_v13  ;;  %v4632_v54 = vld [vmem:[%s9761_s24 + $0xcd0] sm:$0xff]  ;;  %v4621_v49 = vld [vmem:[%s9761_s24 + $0xc78] sm:$0xff] }
 0xe6f   :  { %4913 = vmatpush1.msra.mxu1 %v4380_v44  ;;  %v9977_v16 = vadd.f32 %v4214_v31, %v4210_v25  ;;  %v9979_v9 = vsub.f32 %v4198_v22, %v4202_v7  ;;  %v8332_v45 = vpop.eup %8331  ;;  %v4308_v25 = vld [vmem:[%s9761_s24 + $0x2b0] sm:$0xff] }
 0xe70   :  { %4914 = vmatprep.subr.mxu1 %v4369_v55  ;;  %v4211_v41 = vmul.f32 %v11055_v2, %v4187_v63  ;;  %v4215_v12 = vmul.f32 %v11061_v27, %v4195_v14  ;;  %v4199_v37 = vmul.f32 %v11061_v27, %v4187_v63  ;;  %v4178_v29 = vmul.f32 %v8332_v45, %v9831_v52  ;;  %v4344_v27 = vld [vmem:[%s9761_s24 + $0x3d0] sm:$0xff] }
 0xe71   :  { %v4192_v20 = vmul.f32 %v8332_v45, %v9834_v6  ;;  %4794 = vmatprep.mubr.f32.mxu0 %v9977_v16  ;;  %4915 = vmatpush1.msra.mxu1 %v4368_v28  ;;  %v4203_v58 = vmul.f32 %v11055_v2, %v4195_v14  ;;  %v4620_v31 = vld [vmem:[%s9761_s24 + $0xc70] sm:$0xff]  ;;  %v4285_v28 = vld [vmem:[%s9761_s24 + $0x1f8] sm:$0xff] }
 0xe72   :  { %4795 = vmatmul.mubr.f32.vlgmr.msra.gmra.mxu0 %v9979_v9  ;;  %4916 = vmatprep.subr.mxu1 %v4357_v60  ;;  %v9993_v38 = vadd.f32 %v4215_v12, %v4211_v41  ;;  %v4188_v52 = vmul.f32 %v9950_v50, %v4178_v29  ;;  %v4296_v7 = vld [vmem:[%s9761_s24 + $0x250] sm:$0xff] }
 0xe73   :  { %v8334_v17 = vpop.eup %8333  ;;  %v4196_v6 = vmul.f32 %v9950_v50, %v4192_v20  ;;  %4917 = vmatpush1.msra.mxu1 %v4356_v19  ;;  %v9998_v34 = vsub.f32 %v4199_v37, %v4203_v58  ;;  %5022 = vmatpush1.msra.mxu0 %v4644_v3  ;;  %v4284_v19 = vld [vmem:[%s9761_s24 + $0x1f0] sm:$0xff]  ;;  %v4261_v3 = vld [vmem:[%s9761_s24 + $0x138] sm:$0xff] }
 0xe74   :  { %v4118_v57 = vmul.f32 %v8334_v17, %v9841_v23  ;;  %4918 = vmatprep.subr.mxu1 %v4345_v4  ;;  %4800 = vmatprep.mubr.f32.mxu0 %v9993_v38  ;;  %v4212_v0 = vmul.f32 %v4188_v52, %v11059_v11  ;;  %v4200_v56 = vmul.f32 %v4188_v52, %v11058_v53  ;;  %v8336_v23 = vpop.eup %8335  ;;  %v4608_v12 = vld [vmem:[%s9761_s24 + $0xc10] sm:$0xff]  ;;  %v4249_v17 = vld [vmem:[%s9761_s24 + $0xd8] sm:$0xff] }
 0xe75   :  { %4919 = vmatpush1.msra.mxu1 %v4344_v27  ;;  %v4216_v51 = vmul.f32 %v4196_v6, %v11058_v53  ;;  %v4204_v15 = vmul.f32 %v4196_v6, %v11059_v11  ;;  %v4309_v53 = vld [vmem:[%s9761_s24 + $0x2b8] sm:$0xff]  ;;  %5023 = vmatprep.subr.mxu0 %v4633_v47  ;;  %v4120_v44 = vmul.f32 %v8336_v23, %v9844_v59  ;;  %v4272_v37 = vld [vmem:[%s9761_s24 + $0x190] sm:$0xff]  ;;  %v4383_v23 = vld [vmem:[%s9761_s24 + $0x508] sm:$0xff] }
 0xe76   :  { %v4129_v33 = vmul.f32 %v9944_v48, %v4118_v57  ;;  %4801 = vmatmul.mubr.f32.gmra.mxu0 %v9998_v34  ;;  %4920 = vmatprep.subr.mxu1 %v4333_v61  ;;  %v4609_v59 = vld [vmem:[%s9761_s24 + $0xc18] sm:$0xff]  ;;  %v4260_v58 = vld [vmem:[%s9761_s24 + $0x130] sm:$0xff] }
 0xe77   :  { %v8338_v46 = vpop.eup %8337  ;;  %4921 = vmatpush1.msra.mxu1 %v4332_v62  ;;  %v10014_v26 = vadd.f32 %v4216_v51, %v4212_v0  ;;  %v10016_v13 = vsub.f32 %v4200_v56, %v4204_v15  ;;  %5024 = vmatpush1.msra.mxu0 %v4632_v54  ;;  %v4131_v45 = vmul.f32 %v9944_v48, %v4120_v44  ;;  %v4237_v6 = vld [vmem:[%s9761_s24 + $0x78] sm:$0xff]  ;;  %v4236_v61 = vld [vmem:[%s9761_s24 + $0x70] sm:$0xff]  ;;  %v4395_v51 = vld [vmem:[%s9761_s24 + $0x568] sm:$0xff] }
 0xe78   :  { %v4119_v30 = vmul.f32 %v8338_v46, %v9853_v40  ;;  %4922 = vmatprep.subr.mxu1 %v4321_v36  ;;  %v10021_v24 = vadd.f32 %v9947_v39, %v4129_v33  ;;  %v4297_v40 = vld [vmem:[%s9761_s24 + $0x258] sm:$0xff]  ;;  %5025 = vmatprep.subr.mxu0 %v4621_v49  ;;  %v4224_v62 = vld [vmem:[%s9761_s24 + $0x10] sm:$0xff]  ;;  %v4406_v36 = vld [vmem:[%s9761_s24 + $0x5c0] sm:$0xff] }
 0xe79   :  { %4806 = vmatprep.mubr.f32.mxu0 %v10014_v26  ;;  %4923 = vmatpush1.msra.mxu1 %v4320_v42  ;;  %v10058_v4 = vadd.f32 %v9947_v39, %v4131_v45  ;;  %v4225_v57 = vld [vmem:[%s9761_s24 + $0x18] sm:$0xff]  ;;  %v4596_v0 = vld [vmem:[%s9761_s24 + $0xbb0] sm:$0xff]  ;;  %v4394_v15 = vld [vmem:[%s9761_s24 + $0x560] sm:$0xff] }
 0xe7a   :  { %v4130_v55 = vmul.f32 %v9944_v48, %v4119_v30  ;;  %4807 = vmatmul.mubr.f32.gmra.mxu0 %v10016_v13  ;;  %4924 = vmatprep.subr.mxu1 %v4309_v53  ;;  %v4407_v48 = vld [vmem:[%s9761_s24 + $0x5c8] sm:$0xff]  ;;  %v4597_v47 = vld [vmem:[%s9761_s24 + $0xbb8] sm:$0xff]  ;;  %v4584_v54 = vld [vmem:[%s9761_s24 + $0xb50] sm:$0xff] }
 0xe7b   :  { %v8340_v22 = vpop.eup %8339  ;;  %7195 = vmatmul.mubr.msk.f32.gmra.mxu1 %vm775_vm2, %v10021_v24  ;;  %5026 = vmatpush1.msra.mxu0 %v4620_v31  ;;  %v4585_v56 = vld [vmem:[%s9761_s24 + $0xb58] sm:$0xff]  ;;  %v4572_v42 = vld [vmem:[%s9761_s24 + $0xaf0] sm:$0xff]  ;;  %v4382_v46 = vld [vmem:[%s9761_s24 + $0x500] sm:$0xff] }
 0xe7c   :  { %v4179_v63 = vmul.f32 %v8340_v22, %v9862_v18  ;;  %v4193_v14 = vmul.f32 %v8340_v22, %v9865_v21  ;;  %4925 = vmatpush1.msra.mxu1 %v4308_v25  ;;  %4895 = vmatprep.mubr.f32.mxu1 %v11041_v5  ;;  %v10040_v60 = vadd.f32 %v9947_v39, %v4130_v55  ;;  %v4273_v21 = vld [vmem:[%s9761_s24 + $0x198] sm:$0xff]  ;;  %v4371_v30 = vld [vmem:[%s9761_s24 + $0x4a8] sm:$0xff]  ;;  %v4560_v49 = vld [vmem:[%s9761_s24 + $0xa90] sm:$0xff] }
 0xe7d   :  { %4926 = vmatprep.subr.mxu1 %v4297_v40  ;;  %5027 = vmatprep.subr.mxu0 %v4609_v59  ;;  %v4573_v33 = vld [vmem:[%s9761_s24 + $0xaf8] sm:$0xff]  ;;  %v4370_v44 = vld [vmem:[%s9761_s24 + $0x4a0] sm:$0xff]  ;;  %v4359_v25 = vld [vmem:[%s9761_s24 + $0x448] sm:$0xff] }
 0xe7e   :  { %v4189_v41 = vmul.f32 %v9950_v50, %v4179_v63  ;;  %v4197_v18 = vmul.f32 %v9950_v50, %v4193_v14  ;;  %4927 = vmatpush1.msra.mxu1 %v4296_v7  ;;  %5028 = vmatpush1.msra.mxu0 %v4608_v12  ;;  %v4561_v53 = vld [vmem:[%s9761_s24 + $0xa98] sm:$0xff]  ;;  %v4548_v40 = vld [vmem:[%s9761_s24 + $0xa30] sm:$0xff]  ;;  %v4358_v31 = vld [vmem:[%s9761_s24 + $0x440] sm:$0xff] }
 0xe7f   :  { %4928 = vmatprep.subr.mxu1 %v4285_v28  ;;  %7196 = vmatmul.mubr.msk.f32.gmra.mxu1 %vm775_vm2, %v10040_v60  ;;  %v4549_v55 = vld [vmem:[%s9761_s24 + $0xa38] sm:$0xff]  ;;  %v4347_v7 = vld [vmem:[%s9761_s24 + $0x3e8] sm:$0xff]  ;;  %v4536_v59 = vld [vmem:[%s9761_s24 + $0x9d0] sm:$0xff] }
 0xe80   :  { %4929 = vmatpush1.msra.mxu1 %v4284_v19  ;;  %4901 = vmatprep.mubr.f32.mxu1 %v11041_v5  ;;  %v4213_v29 = vmul.f32 %v11060_v1, %v4189_v41  ;;  %v4217_v50 = vmul.f32 %v11062_v43, %v4197_v18  ;;  %v4201_v20 = vmul.f32 %v11062_v43, %v4189_v41  ;;  %v4248_v43 = vld [vmem:[%s9761_s24 + $0xd0] sm:$0xff]  ;;  %v4537_v22 = vld [vmem:[%s9761_s24 + $0x9d8] sm:$0xff]  ;;  %v4346_v63 = vld [vmem:[%s9761_s24 + $0x3e0] sm:$0xff] }
 0xe81   :  { %4930 = vmatprep.subr.mxu1 %v4273_v21  ;;  %v4205_v27 = vmul.f32 %v11060_v1, %v4197_v18  ;;  %5086 = vmatprep.subr.mxu0 %v4407_v48  ;;  %v4335_v14 = vld [vmem:[%s9761_s24 + $0x388] sm:$0xff]  ;;  %v4525_v28 = vld [vmem:[%s9761_s24 + $0x978] sm:$0xff]  ;;  %v4524_v45 = vld [vmem:[%s9761_s24 + $0x970] sm:$0xff] }
 0xe82   :  { %4931 = vmatpush1.msra.mxu1 %v4272_v37  ;;  %v10063_v52 = vadd.f32 %v4217_v50, %v4213_v29  ;;  %v4334_v19 = vld [vmem:[%s9761_s24 + $0x380] sm:$0xff]  ;;  %v4323_v41 = vld [vmem:[%s9761_s24 + $0x328] sm:$0xff]  ;;  %v4513_v18 = vld [vmem:[%s9761_s24 + $0x918] sm:$0xff] }
 0xe83   :  { %4932 = vmatprep.subr.mxu1 %v4261_v3  ;;  %7197 = vmatmul.mubr.msk.f32.gmra.mxu1 %vm775_vm2, %v10058_v4  ;;  %v10068_v39 = vsub.f32 %v4201_v20, %v4205_v27  ;;  %v4322_v21 = vld [vmem:[%s9761_s24 + $0x320] sm:$0xff]  ;;  %v4512_v12 = vld [vmem:[%s9761_s24 + $0x910] sm:$0xff]  ;;  %v4311_v37 = vld [vmem:[%s9761_s24 + $0x2c8] sm:$0xff] }
 0xe84   :  { %4933 = vmatpush1.msra.mxu1 %v4260_v58  ;;  %4972 = vmatprep.mubr.f32.mxu1 %v9977_v16  ;;  %v4501_v48 = vld [vmem:[%s9761_s24 + $0x8b8] sm:$0xff]  ;;  %v4310_v3 = vld [vmem:[%s9761_s24 + $0x2c0] sm:$0xff]  ;;  %v4500_v29 = vld [vmem:[%s9761_s24 + $0x8b0] sm:$0xff] }
 0xe85   :  { %4934 = vmatprep.subr.mxu1 %v4249_v17  ;;  %4812 = vmatprep.mubr.f32.mxu0 %v10063_v52  ;;  %v4299_v50 = vld [vmem:[%s9761_s24 + $0x268] sm:$0xff]  ;;  %v4489_v20 = vld [vmem:[%s9761_s24 + $0x858] sm:$0xff]  ;;  %v4298_v58 = vld [vmem:[%s9761_s24 + $0x260] sm:$0xff] }
 0xe86   :  { %4935 = vmatpush1.msra.mxu1 %v4248_v43  ;;  %4813 = vmatmul.mubr.f32.gmra.mxu0 %v10068_v39  ;;  %v4488_v27 = vld [vmem:[%s9761_s24 + $0x850] sm:$0xff]  ;;  %v4287_v17 = vld [vmem:[%s9761_s24 + $0x208] sm:$0xff]  ;;  %v4477_v43 = vld [vmem:[%s9761_s24 + $0x7f8] sm:$0xff] }
 0xe87   :  { %4936 = vmatprep.subr.mxu1 %v4237_v6  ;;  %5061 = vmatprep.mubr.f32.mxu0 %v11041_v5  ;;  %v4286_v6 = vld [vmem:[%s9761_s24 + $0x200] sm:$0xff] }
 0xe88   :  { %4937 = vmatpush1.msra.mxu1 %v4236_v61  ;;  %v4476_v61 = vld [vmem:[%s9761_s24 + $0x7f0] sm:$0xff] }
 0xe89   :  { %4938 = vmatprep.subr.mxu1 %v4225_v57  ;;  %v4275_v57 = vld [vmem:[%s9761_s24 + $0x1a8] sm:$0xff] }
 0xe8a   :  { %4939 = vmatpush1.msra.mxu1 %v4224_v62  ;;  %7198 = vmatmul.mubr.msk.f32.vlgmr.msra.gmra.mxu0 %vm775_vm2, %v9955_v35  ;;  %v4465_v62 = vld [vmem:[%s9761_s24 + $0x798] sm:$0xff] }
 0xe8b   :  { %4940 = vmatprep.subr.mxu1 %v4597_v47  ;;  %5087 = vmatpush1.msra.mxu0 %v4406_v36  ;;  %v4274_v47 = vld [vmem:[%s9761_s24 + $0x1a0] sm:$0xff]  ;;  %v4464_v36 = vld [vmem:[%s9761_s24 + $0x790] sm:$0xff] }
 0xe8c   :  { %4941 = vmatpush2.msra.mxu1 %v4596_v0  ;;  %5088 = vmatprep.subr.mxu0 %v4395_v51  ;;  %v4263_v0 = vld [vmem:[%s9761_s24 + $0x148] sm:$0xff]  ;;  %v4453_v51 = vld [vmem:[%s9761_s24 + $0x738] sm:$0xff] }
 0xe8d   :  { %4942 = vmatprep.subr.mxu1 %v4585_v56  ;;  %5089 = vmatpush1.msra.mxu0 %v4394_v15  ;;  %v4262_v56 = vld [vmem:[%s9761_s24 + $0x140] sm:$0xff]  ;;  %v4452_v15 = vld [vmem:[%s9761_s24 + $0x730] sm:$0xff] }
 0xe8e   :  { %4943 = vmatpush2.msra.mxu1 %v4584_v54  ;;  %5067 = vmatprep.mubr.f32.mxu0 %v11041_v5  ;;  %v4251_v54 = vld [vmem:[%s9761_s24 + $0xe8] sm:$0xff] }
 0xe8f   :  { %5090 = vmatprep.subr.mxu0 %v4383_v23  ;;  %4944 = vmatprep.subr.mxu1 %v4573_v33  ;;  %v4441_v23 = vld [vmem:[%s9761_s24 + $0x6d8] sm:$0xff]  ;;  %v4250_v33 = vld [vmem:[%s9761_s24 + $0xe0] sm:$0xff] }
 0xe90   :  { %7199 = vmatmul.mubr.msk.f32.gmra.mxu0 %vm775_vm2, %v10021_v24  ;;  %4945 = vmatpush2.msra.mxu1 %v4572_v42  ;;  %v4440_v42 = vld [vmem:[%s9761_s24 + $0x6d0] sm:$0xff] }
 0xe91   :  { %5091 = vmatpush1.msra.mxu0 %v4382_v46  ;;  %4946 = vmatprep.subr.mxu1 %v4561_v53  ;;  %v4239_v46 = vld [vmem:[%s9761_s24 + $0x88] sm:$0xff]  ;;  %v4429_v53 = vld [vmem:[%s9761_s24 + $0x678] sm:$0xff] }
 0xe92   :  { %5092 = vmatprep.subr.mxu0 %v4371_v30  ;;  %4947 = vmatpush2.msra.mxu1 %v4560_v49  ;;  %v4238_v30 = vld [vmem:[%s9761_s24 + $0x80] sm:$0xff]  ;;  %v4428_v49 = vld [vmem:[%s9761_s24 + $0x670] sm:$0xff] }
 0xe93   :  { %5093 = vmatpush1.msra.mxu0 %v4370_v44  ;;  %5073 = vmatprep.mubr.f32.mxu0 %v11041_v5  ;;  %v4227_v44 = vld [vmem:[%s9761_s24 + $0x28] sm:$0xff] }
 0xe94   :  { %5094 = vmatprep.subr.mxu0 %v4359_v25  ;;  %4948 = vmatprep.subr.mxu1 %v4549_v55  ;;  %v4417_v25 = vld [vmem:[%s9761_s24 + $0x618] sm:$0xff]  ;;  %v4226_v55 = vld [vmem:[%s9761_s24 + $0x20] sm:$0xff] }
 0xe95   :  { %7200 = vmatmul.mubr.msk.f32.gmra.mxu0 %vm775_vm2, %v10040_v60  ;;  %4949 = vmatpush2.msra.mxu1 %v4548_v40  ;;  %v4416_v40 = vld [vmem:[%s9761_s24 + $0x610] sm:$0xff] }
 0xe96   :  { %5095 = vmatpush1.msra.mxu0 %v4358_v31  ;;  %4950 = vmatprep.subr.mxu1 %v4537_v22  ;;  %v4599_v31 = vld [vmem:[%s9761_s24 + $0xbc8] sm:$0xff]  ;;  %v4598_v22 = vld [vmem:[%s9761_s24 + $0xbc0] sm:$0xff] }
 0xe97   :  { %5096 = vmatprep.subr.mxu0 %v4347_v7  ;;  %4951 = vmatpush2.msra.mxu1 %v4536_v59  ;;  %v4587_v7 = vld [vmem:[%s9761_s24 + $0xb68] sm:$0xff] }
 0xe98   :  { %5097 = vmatpush1.msra.mxu0 %v4346_v63  ;;  %5079 = vmatprep.mubr.f32.mxu0 %v11041_v5  ;;  %v4647_v59 = vld [vmem:[%s9761_s24 + $0xd48] sm:$0xff]  ;;  %v4586_v63 = vld [vmem:[%s9761_s24 + $0xb60] sm:$0xff] }
 0xe99   :  { %5098 = vmatprep.subr.mxu0 %v4335_v14  ;;  %4952 = vmatprep.subr.mxu1 %v4525_v28  ;;  %v4646_v14 = vld [vmem:[%s9761_s24 + $0xd40] sm:$0xff]  ;;  %v4575_v28 = vld [vmem:[%s9761_s24 + $0xb08] sm:$0xff] }
 0xe9a   :  { %7201 = vmatmul.mubr.msk.f32.gmra.mxu0 %vm775_vm2, %v10058_v4  ;;  %4953 = vmatpush2.msra.mxu1 %v4524_v45  ;;  %v4574_v45 = vld [vmem:[%s9761_s24 + $0xb00] sm:$0xff] }
 0xe9b   :  { %5099 = vmatpush1.msra.mxu0 %v4334_v19  ;;  %5150 = vmatprep.mubr.f32.mxu0 %v9977_v16  ;;  %v4563_v19 = vld [vmem:[%s9761_s24 + $0xaa8] sm:$0xff] }
 0xe9c   :  { %5100 = vmatprep.subr.mxu0 %v4323_v41  ;;  %4954 = vmatprep.subr.mxu1 %v4513_v18  ;;  %v4635_v41 = vld [vmem:[%s9761_s24 + $0xce8] sm:$0xff]  ;;  %v4562_v18 = vld [vmem:[%s9761_s24 + $0xaa0] sm:$0xff] }
 0xe9d   :  { %5101 = vmatpush1.msra.mxu0 %v4322_v21  ;;  %4955 = vmatpush2.msra.mxu1 %v4512_v12  ;;  %v4634_v21 = vld [vmem:[%s9761_s24 + $0xce0] sm:$0xff]  ;;  %v4551_v12 = vld [vmem:[%s9761_s24 + $0xa48] sm:$0xff] }
 0xe9e   :  { %5102 = vmatprep.subr.mxu0 %v4311_v37  ;;  %4956 = vmatprep.subr.mxu1 %v4501_v48  ;;  %v4550_v37 = vld [vmem:[%s9761_s24 + $0xa40] sm:$0xff]  ;;  %v4539_v48 = vld [vmem:[%s9761_s24 + $0x9e8] sm:$0xff] }
 0xe9f   :  { %5103 = vmatpush1.msra.mxu0 %v4310_v3  ;;  %4957 = vmatpush2.msra.mxu1 %v4500_v29  ;;  %v4623_v3 = vld [vmem:[%s9761_s24 + $0xc88] sm:$0xff]  ;;  %v4538_v29 = vld [vmem:[%s9761_s24 + $0x9e0] sm:$0xff] }
 0xea0   :  { %5104 = vmatprep.subr.mxu0 %v4299_v50  ;;  %4958 = vmatprep.subr.mxu1 %v4489_v20  ;;  %v4622_v50 = vld [vmem:[%s9761_s24 + $0xc80] sm:$0xff]  ;;  %v4527_v20 = vld [vmem:[%s9761_s24 + $0x988] sm:$0xff] }
 0xea1   :  { %5105 = vmatpush1.msra.mxu0 %v4298_v58  ;;  %4959 = vmatpush2.msra.mxu1 %v4488_v27  ;;  %v4526_v58 = vld [vmem:[%s9761_s24 + $0x980] sm:$0xff]  ;;  %v4611_v27 = vld [vmem:[%s9761_s24 + $0xc28] sm:$0xff] }
 0xea2   :  { %5106 = vmatprep.subr.mxu0 %v4287_v17  ;;  %4960 = vmatprep.subr.mxu1 %v4477_v43  ;;  %v4515_v17 = vld [vmem:[%s9761_s24 + $0x928] sm:$0xff]  ;;  %v4610_v43 = vld [vmem:[%s9761_s24 + $0xc20] sm:$0xff] }
 0xea3   :  { %5107 = vmatpush1.msra.mxu0 %v4286_v6  ;;  %4961 = vmatpush2.msra.mxu1 %v4476_v61  ;;  %v4514_v6 = vld [vmem:[%s9761_s24 + $0x920] sm:$0xff]  ;;  %v4503_v61 = vld [vmem:[%s9761_s24 + $0x8c8] sm:$0xff] }
 0xea4   :  { %5108 = vmatprep.subr.mxu0 %v4275_v57  ;;  %4962 = vmatprep.subr.mxu1 %v4465_v62  ;;  %v4409_v57 = vld [vmem:[%s9761_s24 + $0x5d8] sm:$0xff]  ;;  %v4502_v62 = vld [vmem:[%s9761_s24 + $0x8c0] sm:$0xff] }
 0xea5   :  { %5109 = vmatpush1.msra.mxu0 %v4274_v47  ;;  %4963 = vmatpush2.msra.mxu1 %v4464_v36  ;;  %v4408_v47 = vld [vmem:[%s9761_s24 + $0x5d0] sm:$0xff]  ;;  %v4491_v36 = vld [vmem:[%s9761_s24 + $0x868] sm:$0xff] }
 0xea6   :  { %5110 = vmatprep.subr.mxu0 %v4263_v0  ;;  %4964 = vmatprep.subr.mxu1 %v4453_v51  ;;  %v4397_v0 = vld [vmem:[%s9761_s24 + $0x578] sm:$0xff]  ;;  %v4490_v51 = vld [vmem:[%s9761_s24 + $0x860] sm:$0xff] }
 0xea7   :  { %5111 = vmatpush1.msra.mxu0 %v4262_v56  ;;  %4965 = vmatpush2.msra.mxu1 %v4452_v15  ;;  %v4396_v56 = vld [vmem:[%s9761_s24 + $0x570] sm:$0xff]  ;;  %v4479_v15 = vld [vmem:[%s9761_s24 + $0x808] sm:$0xff] }
 0xea8   :  { %5112 = vmatprep.subr.mxu0 %v4251_v54  ;;  %4966 = vmatprep.subr.mxu1 %v4441_v23  ;;  %v4385_v54 = vld [vmem:[%s9761_s24 + $0x518] sm:$0xff]  ;;  %v4478_v23 = vld [vmem:[%s9761_s24 + $0x800] sm:$0xff] }
 0xea9   :  { %5113 = vmatpush1.msra.mxu0 %v4250_v33  ;;  %4967 = vmatpush2.msra.mxu1 %v4440_v42  ;;  %v4384_v33 = vld [vmem:[%s9761_s24 + $0x510] sm:$0xff]  ;;  %v4467_v42 = vld [vmem:[%s9761_s24 + $0x7a8] sm:$0xff] }
 0xeaa   :  { %5114 = vmatprep.subr.mxu0 %v4239_v46  ;;  %4968 = vmatprep.subr.mxu1 %v4429_v53  ;;  %v4373_v46 = vld [vmem:[%s9761_s24 + $0x4b8] sm:$0xff]  ;;  %v4466_v53 = vld [vmem:[%s9761_s24 + $0x7a0] sm:$0xff] }
 0xeab   :  { %5115 = vmatpush1.msra.mxu0 %v4238_v30  ;;  %4969 = vmatpush2.msra.mxu1 %v4428_v49  ;;  %v4372_v30 = vld [vmem:[%s9761_s24 + $0x4b0] sm:$0xff]  ;;  %v4455_v49 = vld [vmem:[%s9761_s24 + $0x748] sm:$0xff] }
 0xeac   :  { %5116 = vmatprep.subr.mxu0 %v4227_v44  ;;  %4970 = vmatprep.subr.mxu1 %v4417_v25  ;;  %v4361_v44 = vld [vmem:[%s9761_s24 + $0x458] sm:$0xff]  ;;  %v4454_v25 = vld [vmem:[%s9761_s24 + $0x740] sm:$0xff] }
 0xead   :  { %5117 = vmatpush1.msra.mxu0 %v4226_v55  ;;  %4971 = vmatpush2.msra.mxu1 %v4416_v40  ;;  %v4360_v55 = vld [vmem:[%s9761_s24 + $0x450] sm:$0xff]  ;;  %v4443_v40 = vld [vmem:[%s9761_s24 + $0x6e8] sm:$0xff] }
 0xeae   :  { %5118 = vmatprep.subr.mxu0 %v4599_v31  ;;  %4973 = vmatmul.mubr.f32.vlgmr.msra.gmra.mxu1 %v9979_v9  ;;  %v4349_v31 = vld [vmem:[%s9761_s24 + $0x3f8] sm:$0xff] }
 0xeaf   :  { %5119 = vmatpush2.msra.mxu0 %v4598_v22  ;;  %4978 = vmatprep.mubr.f32.mxu1 %v9993_v38  ;;  %v4442_v22 = vld [vmem:[%s9761_s24 + $0x6e0] sm:$0xff] }
 0xeb0   :  { %5120 = vmatprep.subr.mxu0 %v4587_v7  ;;  %5199 = vmatprep.subr.mxu1 %v4647_v59  ;;  %v4348_v7 = vld [vmem:[%s9761_s24 + $0x3f0] sm:$0xff]  ;;  %v4431_v59 = vld [vmem:[%s9761_s24 + $0x688] sm:$0xff] }
 0xeb1   :  { %5121 = vmatpush2.msra.mxu0 %v4586_v63  ;;  %5200 = vmatpush1.msra.mxu1 %v4646_v14  ;;  %v4337_v63 = vld [vmem:[%s9761_s24 + $0x398] sm:$0xff]  ;;  %v4430_v14 = vld [vmem:[%s9761_s24 + $0x680] sm:$0xff] }
 0xeb2   :  { %5122 = vmatprep.subr.mxu0 %v4575_v28  ;;  %4979 = vmatmul.mubr.f32.gmra.mxu1 %v9998_v34  ;;  %v4336_v28 = vld [vmem:[%s9761_s24 + $0x390] sm:$0xff] }
 0xeb3   :  { %5123 = vmatpush2.msra.mxu0 %v4574_v45  ;;  %4984 = vmatprep.mubr.f32.mxu1 %v10014_v26  ;;  %v4419_v45 = vld [vmem:[%s9761_s24 + $0x628] sm:$0xff] }
 0xeb4   :  { %5124 = vmatprep.subr.mxu0 %v4563_v19  ;;  %5201 = vmatprep.subr.mxu1 %v4635_v41  ;;  %v4325_v19 = vld [vmem:[%s9761_s24 + $0x338] sm:$0xff]  ;;  %v4418_v41 = vld [vmem:[%s9761_s24 + $0x620] sm:$0xff] }
 0xeb5   :  { %5125 = vmatpush2.msra.mxu0 %v4562_v18  ;;  %5202 = vmatpush1.msra.mxu1 %v4634_v21  ;;  %v4324_v18 = vld [vmem:[%s9761_s24 + $0x330] sm:$0xff]  ;;  %v4313_v21 = vld [vmem:[%s9761_s24 + $0x2d8] sm:$0xff] }
 0xeb6   :  { %5126 = vmatprep.subr.mxu0 %v4551_v12  ;;  %4985 = vmatmul.mubr.f32.gmra.mxu1 %v10016_v13  ;;  %v4312_v12 = vld [vmem:[%s9761_s24 + $0x2d0] sm:$0xff] }
 0xeb7   :  { %5127 = vmatpush2.msra.mxu0 %v4550_v37  ;;  %4990 = vmatprep.mubr.f32.mxu1 %v10063_v52  ;;  %v4301_v37 = vld [vmem:[%s9761_s24 + $0x278] sm:$0xff] }
 0xeb8   :  { %5128 = vmatprep.subr.mxu0 %v4539_v48  ;;  %5203 = vmatprep.subr.mxu1 %v4623_v3  ;;  %v4649_v48 = vld [vmem:[%s9761_s24 + $0xd58] sm:$0xff]  ;;  %v4300_v3 = vld [vmem:[%s9761_s24 + $0x270] sm:$0xff] }
 0xeb9   :  { %5129 = vmatpush2.msra.mxu0 %v4538_v29  ;;  %5204 = vmatpush1.msra.mxu1 %v4622_v50  ;;  %v4648_v29 = vld [vmem:[%s9761_s24 + $0xd50] sm:$0xff]  ;;  %v4289_v50 = vld [vmem:[%s9761_s24 + $0x218] sm:$0xff] }
 0xeba   :  { %5130 = vmatprep.subr.mxu0 %v4527_v20  ;;  %4991 = vmatmul.mubr.f32.gmra.mxu1 %v10068_v39  ;;  %v4288_v20 = vld [vmem:[%s9761_s24 + $0x210] sm:$0xff] }
 0xebb   :  { %5131 = vmatpush2.msra.mxu0 %v4526_v58  ;;  %5205 = vmatprep.subr.mxu1 %v4611_v27  ;;  %v4277_v58 = vld [vmem:[%s9761_s24 + $0x1b8] sm:$0xff] }
 0xebc   :  { %5132 = vmatprep.subr.mxu0 %v4515_v17  ;;  %5206 = vmatpush1.msra.mxu1 %v4610_v43  ;;  %v4637_v27 = vld [vmem:[%s9761_s24 + $0xcf8] sm:$0xff]  ;;  %v4276_v17 = vld [vmem:[%s9761_s24 + $0x1b0] sm:$0xff] }
 0xebd   :  { %5133 = vmatpush2.msra.mxu0 %v4514_v6  ;;  %5239 = vmatprep.mubr.f32.mxu1 %v11041_v5  ;;  %v4636_v43 = vld [vmem:[%s9761_s24 + $0xcf0] sm:$0xff]  ;;  %v4265_v6 = vld [vmem:[%s9761_s24 + $0x158] sm:$0xff] }
 0xebe   :  { %5134 = vmatprep.subr.mxu0 %v4503_v61  ;;  %5264 = vmatprep.subr.mxu1 %v4409_v57  ;;  %v4264_v61 = vld [vmem:[%s9761_s24 + $0x150] sm:$0xff]  ;;  %v4253_v57 = vld [vmem:[%s9761_s24 + $0xf8] sm:$0xff] }
 0xebf   :  { %5135 = vmatpush2.msra.mxu0 %v4502_v62  ;;  %7202 = vmatmul.mubr.msk.f32.vlgmr.msra.gmra.mxu1 %vm775_vm2, %v9955_v35  ;;  %v4625_v62 = vld [vmem:[%s9761_s24 + $0xc98] sm:$0xff] }
 0xec0   :  { %5265 = vmatpush1.msra.mxu1 %v4408_v47  ;;  %5136 = vmatprep.subr.mxu0 %v4491_v36  ;;  %v4252_v47 = vld [vmem:[%s9761_s24 + $0xf0] sm:$0xff] }
 0xec1   :  { %5266 = vmatprep.subr.mxu1 %v4397_v0  ;;  %5137 = vmatpush2.msra.mxu0 %v4490_v51  ;;  %v4624_v36 = vld [vmem:[%s9761_s24 + $0xc90] sm:$0xff]  ;;  %v4241_v0 = vld [vmem:[%s9761_s24 + $0x98] sm:$0xff] }
 0xec2   :  { %5267 = vmatpush1.msra.mxu1 %v4396_v56  ;;  %5138 = vmatprep.subr.mxu0 %v4479_v15  ;;  %v4240_v51 = vld [vmem:[%s9761_s24 + $0x90] sm:$0xff]  ;;  %v4613_v56 = vld [vmem:[%s9761_s24 + $0xc38] sm:$0xff] }
 0xec3   :  { %5245 = vmatprep.mubr.f32.mxu1 %v11041_v5  ;;  %5268 = vmatprep.subr.mxu1 %v4385_v54  ;;  %v4229_v15 = vld [vmem:[%s9761_s24 + $0x38] sm:$0xff]  ;;  %v4612_v54 = vld [vmem:[%s9761_s24 + $0xc30] sm:$0xff] }
 0xec4   :  { %5139 = vmatpush2.msra.mxu0 %v4478_v23  ;;  %7203 = vmatmul.mubr.msk.f32.gmra.mxu1 %vm775_vm2, %v10021_v24  ;;  %v4228_v23 = vld [vmem:[%s9761_s24 + $0x30] sm:$0xff] }
 0xec5   :  { %5269 = vmatpush1.msra.mxu1 %v4384_v33  ;;  %5140 = vmatprep.subr.mxu0 %v4467_v42  ;;  %v4411_v33 = vld [vmem:[%s9761_s24 + $0x5e8] sm:$0xff]  ;;  %v4601_v42 = vld [vmem:[%s9761_s24 + $0xbd8] sm:$0xff] }
 0xec6   :  { %5270 = vmatprep.subr.mxu1 %v4373_v46  ;;  %5141 = vmatpush2.msra.mxu0 %v4466_v53  ;;  %v4600_v46 = vld [vmem:[%s9761_s24 + $0xbd0] sm:$0xff]  ;;  %v4410_v53 = vld [vmem:[%s9761_s24 + $0x5e0] sm:$0xff] }
 0xec7   :  { %5271 = vmatpush1.msra.mxu1 %v4372_v30  ;;  %5142 = vmatprep.subr.mxu0 %v4455_v49  ;;  %v4589_v30 = vld [vmem:[%s9761_s24 + $0xb78] sm:$0xff]  ;;  %v4399_v49 = vld [vmem:[%s9761_s24 + $0x588] sm:$0xff] }
 0xec8   :  { %5251 = vmatprep.mubr.f32.mxu1 %v11041_v5  ;;  %5272 = vmatprep.subr.mxu1 %v4361_v44  ;;  %v4588_v44 = vld [vmem:[%s9761_s24 + $0xb70] sm:$0xff] }
 0xec9   :  { %5143 = vmatpush2.msra.mxu0 %v4454_v25  ;;  %7204 = vmatmul.mubr.msk.f32.gmra.mxu1 %vm775_vm2, %v10040_v60  ;;  %v4398_v25 = vld [vmem:[%s9761_s24 + $0x580] sm:$0xff] }
 0xeca   :  { %5273 = vmatpush1.msra.mxu1 %v4360_v55  ;;  %5144 = vmatprep.subr.mxu0 %v4443_v40  ;;  %v4387_v55 = vld [vmem:[%s9761_s24 + $0x528] sm:$0xff]  ;;  %v4577_v40 = vld [vmem:[%s9761_s24 + $0xb18] sm:$0xff] }
 0xecb   :  { %5274 = vmatprep.subr.mxu1 %v4349_v31  ;;  %5145 = vmatpush2.msra.mxu0 %v4442_v22  ;;  %v4576_v31 = vld [vmem:[%s9761_s24 + $0xb10] sm:$0xff]  ;;  %v4386_v22 = vld [vmem:[%s9761_s24 + $0x520] sm:$0xff] }
 0xecc   :  { %5275 = vmatpush1.msra.mxu1 %v4348_v7  ;;  %5146 = vmatprep.subr.mxu0 %v4431_v59  ;;  %v4565_v7 = vld [vmem:[%s9761_s24 + $0xab8] sm:$0xff]  ;;  %v4375_v59 = vld [vmem:[%s9761_s24 + $0x4c8] sm:$0xff] }
 0xecd   :  { %5257 = vmatprep.mubr.f32.mxu1 %v11041_v5  ;;  %5276 = vmatprep.subr.mxu1 %v4337_v63  ;;  %v4564_v63 = vld [vmem:[%s9761_s24 + $0xab0] sm:$0xff] }
 0xece   :  { %5147 = vmatpush2.msra.mxu0 %v4430_v14  ;;  %7205 = vmatmul.mubr.msk.f32.gmra.mxu1 %vm775_vm2, %v10058_v4  ;;  %v4374_v14 = vld [vmem:[%s9761_s24 + $0x4c0] sm:$0xff] }
 0xecf   :  { %5277 = vmatpush1.msra.mxu1 %v4336_v28  ;;  %5148 = vmatprep.subr.mxu0 %v4419_v45  ;;  %v4363_v28 = vld [vmem:[%s9761_s24 + $0x468] sm:$0xff]  ;;  %v4553_v45 = vld [vmem:[%s9761_s24 + $0xa58] sm:$0xff] }
 0xed0   :  { %5278 = vmatprep.subr.mxu1 %v4325_v19  ;;  %5328 = vmatprep.mubr.f32.mxu1 %v9977_v16  ;;  %v4552_v19 = vld [vmem:[%s9761_s24 + $0xa50] sm:$0xff] }
 0xed1   :  { %5149 = vmatpush2.msra.mxu0 %v4418_v41  ;;  %5279 = vmatpush1.msra.mxu1 %v4324_v18  ;;  %v4362_v41 = vld [vmem:[%s9761_s24 + $0x460] sm:$0xff]  ;;  %v4541_v18 = vld [vmem:[%s9761_s24 + $0x9f8] sm:$0xff] }
 0xed2   :  { %5151 = vmatmul.mubr.f32.vlgmr.msra.gmra.mxu0 %v9979_v9  ;;  %5280 = vmatprep.subr.mxu1 %v4313_v21  ;;  %v4351_v21 = vld [vmem:[%s9761_s24 + $0x408] sm:$0xff] }
 0xed3   :  { %5156 = vmatprep.mubr.f32.mxu0 %v9993_v38  ;;  %5281 = vmatpush1.msra.mxu1 %v4312_v12  ;;  %v4540_v12 = vld [vmem:[%s9761_s24 + $0x9f0] sm:$0xff] }
 0xed4   :  { %5282 = vmatprep.subr.mxu1 %v4301_v37  ;;  %5377 = vmatprep.subr.mxu0 %v4649_v48  ;;  %v4350_v37 = vld [vmem:[%s9761_s24 + $0x400] sm:$0xff]  ;;  %v4339_v48 = vld [vmem:[%s9761_s24 + $0x3a8] sm:$0xff] }
 0xed5   :  { %5283 = vmatpush1.msra.mxu1 %v4300_v3  ;;  %5378 = vmatpush1.msra.mxu0 %v4648_v29  ;;  %v4529_v3 = vld [vmem:[%s9761_s24 + $0x998] sm:$0xff]  ;;  %v4528_v29 = vld [vmem:[%s9761_s24 + $0x990] sm:$0xff] }
 0xed6   :  { %5157 = vmatmul.mubr.f32.gmra.mxu0 %v9998_v34  ;;  %5284 = vmatprep.subr.mxu1 %v4289_v50  ;;  %v4338_v50 = vld [vmem:[%s9761_s24 + $0x3a0] sm:$0xff] }
 0xed7   :  { %5162 = vmatprep.mubr.f32.mxu0 %v10014_v26  ;;  %5285 = vmatpush1.msra.mxu1 %v4288_v20  ;;  %v4327_v20 = vld [vmem:[%s9761_s24 + $0x348] sm:$0xff] }
 0xed8   :  { %5286 = vmatprep.subr.mxu1 %v4277_v58  ;;  %5379 = vmatprep.subr.mxu0 %v4637_v27  ;;  %v4517_v58 = vld [vmem:[%s9761_s24 + $0x938] sm:$0xff]  ;;  %v4326_v27 = vld [vmem:[%s9761_s24 + $0x340] sm:$0xff] }
 0xed9   :  { %5287 = vmatpush1.msra.mxu1 %v4276_v17  ;;  %5380 = vmatpush1.msra.mxu0 %v4636_v43  ;;  %v4516_v17 = vld [vmem:[%s9761_s24 + $0x930] sm:$0xff]  ;;  %v4315_v43 = vld [vmem:[%s9761_s24 + $0x2e8] sm:$0xff] }
 0xeda   :  { %5163 = vmatmul.mubr.f32.gmra.mxu0 %v10016_v13  ;;  %5288 = vmatprep.subr.mxu1 %v4265_v6  ;;  %v4505_v6 = vld [vmem:[%s9761_s24 + $0x8d8] sm:$0xff] }
 0xedb   :  { %5168 = vmatprep.mubr.f32.mxu0 %v10063_v52  ;;  %5289 = vmatpush1.msra.mxu1 %v4264_v61  ;;  %v4314_v61 = vld [vmem:[%s9761_s24 + $0x2e0] sm:$0xff] }
 0xedc   :  { %5290 = vmatprep.subr.mxu1 %v4253_v57  ;;  %5381 = vmatprep.subr.mxu0 %v4625_v62  ;;  %v4504_v57 = vld [vmem:[%s9761_s24 + $0x8d0] sm:$0xff]  ;;  %v4303_v62 = vld [vmem:[%s9761_s24 + $0x288] sm:$0xff] }
 0xedd   :  { %5291 = vmatpush1.msra.mxu1 %v4252_v47  ;;  %5382 = vmatpush1.msra.mxu0 %v4624_v36  ;;  %v4493_v47 = vld [vmem:[%s9761_s24 + $0x878] sm:$0xff]  ;;  %v4302_v36 = vld [vmem:[%s9761_s24 + $0x280] sm:$0xff] }
 0xede   :  { %5169 = vmatmul.mubr.f32.gmra.mxu0 %v10068_v39  ;;  %5292 = vmatprep.subr.mxu1 %v4241_v0  ;;  %v4492_v0 = vld [vmem:[%s9761_s24 + $0x870] sm:$0xff] }
 0xedf   :  { %5293 = vmatpush1.msra.mxu1 %v4240_v51  ;;  %5383 = vmatprep.subr.mxu0 %v4613_v56  ;;  %v4291_v51 = vld [vmem:[%s9761_s24 + $0x228] sm:$0xff]  ;;  %v4481_v56 = vld [vmem:[%s9761_s24 + $0x818] sm:$0xff] }
 0xee0   :  { %5294 = vmatprep.subr.mxu1 %v4229_v15  ;;  %5384 = vmatpush1.msra.mxu0 %v4612_v54  ;;  %v4290_v15 = vld [vmem:[%s9761_s24 + $0x220] sm:$0xff]  ;;  %v4480_v54 = vld [vmem:[%s9761_s24 + $0x810] sm:$0xff] }
 0xee1   :  { %5295 = vmatpush1.msra.mxu1 %v4228_v23  ;;  %5417 = vmatprep.mubr.f32.mxu0 %v11041_v5  ;;  %v4279_v23 = vld [vmem:[%s9761_s24 + $0x1c8] sm:$0xff] }
 0xee2   :  { %5442 = vmatprep.subr.mxu0 %v4411_v33  ;;  %5296 = vmatprep.subr.mxu1 %v4601_v42  ;;  %v4469_v33 = vld [vmem:[%s9761_s24 + $0x7b8] sm:$0xff]  ;;  %v4278_v42 = vld [vmem:[%s9761_s24 + $0x1c0] sm:$0xff] }
 0xee3   :  { %7206 = vmatmul.mubr.msk.f32.vlgmr.msra.gmra.mxu0 %vm775_vm2, %v9955_v35  ;;  %5297 = vmatpush2.msra.mxu1 %v4600_v46  ;;  %v4468_v46 = vld [vmem:[%s9761_s24 + $0x7b0] sm:$0xff] }
 0xee4   :  { %5443 = vmatpush1.msra.mxu0 %v4410_v53  ;;  %5298 = vmatprep.subr.mxu1 %v4589_v30  ;;  %v4267_v53 = vld [vmem:[%s9761_s24 + $0x168] sm:$0xff]  ;;  %v4457_v30 = vld [vmem:[%s9761_s24 + $0x758] sm:$0xff] }
 0xee5   :  { %5444 = vmatprep.subr.mxu0 %v4399_v49  ;;  %5299 = vmatpush2.msra.mxu1 %v4588_v44  ;;  %v4266_v49 = vld [vmem:[%s9761_s24 + $0x160] sm:$0xff]  ;;  %v4456_v44 = vld [vmem:[%s9761_s24 + $0x750] sm:$0xff] }
 0xee6   :  { %5445 = vmatpush1.msra.mxu0 %v4398_v25  ;;  %5423 = vmatprep.mubr.f32.mxu0 %v11041_v5  ;;  %v4255_v25 = vld [vmem:[%s9761_s24 + $0x108] sm:$0xff] }
 0xee7   :  { %5446 = vmatprep.subr.mxu0 %v4387_v55  ;;  %5300 = vmatprep.subr.mxu1 %v4577_v40  ;;  %v4445_v55 = vld [vmem:[%s9761_s24 + $0x6f8] sm:$0xff]  ;;  %v4254_v40 = vld [vmem:[%s9761_s24 + $0x100] sm:$0xff] }
 0xee8   :  { %7207 = vmatmul.mubr.msk.f32.gmra.mxu0 %vm775_vm2, %v10021_v24  ;;  %5301 = vmatpush2.msra.mxu1 %v4576_v31  ;;  %v4444_v31 = vld [vmem:[%s9761_s24 + $0x6f0] sm:$0xff] }
 0xee9   :  { %5447 = vmatpush1.msra.mxu0 %v4386_v22  ;;  %5302 = vmatprep.subr.mxu1 %v4565_v7  ;;  %v4243_v22 = vld [vmem:[%s9761_s24 + $0xa8] sm:$0xff]  ;;  %v4433_v7 = vld [vmem:[%s9761_s24 + $0x698] sm:$0xff] }
 0xeea   :  { %5448 = vmatprep.subr.mxu0 %v4375_v59  ;;  %5303 = vmatpush2.msra.mxu1 %v4564_v63  ;;  %v4242_v59 = vld [vmem:[%s9761_s24 + $0xa0] sm:$0xff]  ;;  %v4432_v63 = vld [vmem:[%s9761_s24 + $0x690] sm:$0xff] }
 0xeeb   :  { %5449 = vmatpush1.msra.mxu0 %v4374_v14  ;;  %5429 = vmatprep.mubr.f32.mxu0 %v11041_v5  ;;  %v4231_v14 = vld [vmem:[%s9761_s24 + $0x48] sm:$0xff] }
 0xeec   :  { %5450 = vmatprep.subr.mxu0 %v4363_v28  ;;  %5304 = vmatprep.subr.mxu1 %v4553_v45  ;;  %v4421_v28 = vld [vmem:[%s9761_s24 + $0x638] sm:$0xff]  ;;  %v4230_v45 = vld [vmem:[%s9761_s24 + $0x40] sm:$0xff] }
 0xeed   :  { %7208 = vmatmul.mubr.msk.f32.gmra.mxu0 %vm775_vm2, %v10040_v60  ;;  %5305 = vmatpush2.msra.mxu1 %v4552_v19  ;;  %v4420_v19 = vld [vmem:[%s9761_s24 + $0x630] sm:$0xff] }
 0xeee   :  { %5451 = vmatpush1.msra.mxu0 %v4362_v41  ;;  %5306 = vmatprep.subr.mxu1 %v4541_v18  ;;  %v4603_v41 = vld [vmem:[%s9761_s24 + $0xbe8] sm:$0xff]  ;;  %v4602_v18 = vld [vmem:[%s9761_s24 + $0xbe0] sm:$0xff] }
 0xeef   :  { %5452 = vmatprep.subr.mxu0 %v4351_v21  ;;  %5307 = vmatpush2.msra.mxu1 %v4540_v12  ;;  %v4591_v21 = vld [vmem:[%s9761_s24 + $0xb88] sm:$0xff] }
 0xef0   :  { %5453 = vmatpush1.msra.mxu0 %v4350_v37  ;;  %5435 = vmatprep.mubr.f32.mxu0 %v11041_v5  ;;  %v4651_v12 = vld [vmem:[%s9761_s24 + $0xd68] sm:$0xff]  ;;  %v4590_v37 = vld [vmem:[%s9761_s24 + $0xb80] sm:$0xff] }
 0xef1   :  { %5454 = vmatprep.subr.mxu0 %v4339_v48  ;;  %5308 = vmatprep.subr.mxu1 %v4529_v3  ;;  %v4650_v48 = vld [vmem:[%s9761_s24 + $0xd60] sm:$0xff]  ;;  %v4579_v3 = vld [vmem:[%s9761_s24 + $0xb28] sm:$0xff] }
 0xef2   :  { %7209 = vmatmul.mubr.msk.f32.gmra.mxu0 %vm775_vm2, %v10058_v4  ;;  %5309 = vmatpush2.msra.mxu1 %v4528_v29  ;;  %v4578_v29 = vld [vmem:[%s9761_s24 + $0xb20] sm:$0xff] }
 0xef3   :  { %5455 = vmatpush1.msra.mxu0 %v4338_v50  ;;  %5506 = vmatprep.mubr.f32.mxu0 %v9977_v16  ;;  %v4567_v50 = vld [vmem:[%s9761_s24 + $0xac8] sm:$0xff] }
 0xef4   :  { %5456 = vmatprep.subr.mxu0 %v4327_v20  ;;  %5310 = vmatprep.subr.mxu1 %v4517_v58  ;;  %v4639_v20 = vld [vmem:[%s9761_s24 + $0xd08] sm:$0xff]  ;;  %v4566_v58 = vld [vmem:[%s9761_s24 + $0xac0] sm:$0xff] }
 0xef5   :  { %5457 = vmatpush1.msra.mxu0 %v4326_v27  ;;  %5311 = vmatpush2.msra.mxu1 %v4516_v17  ;;  %v4638_v27 = vld [vmem:[%s9761_s24 + $0xd00] sm:$0xff]  ;;  %v4555_v17 = vld [vmem:[%s9761_s24 + $0xa68] sm:$0xff] }
 0xef6   :  { %5458 = vmatprep.subr.mxu0 %v4315_v43  ;;  %5312 = vmatprep.subr.mxu1 %v4505_v6  ;;  %v4554_v43 = vld [vmem:[%s9761_s24 + $0xa60] sm:$0xff]  ;;  %v4543_v6 = vld [vmem:[%s9761_s24 + $0xa08] sm:$0xff] }
 0xef7   :  { %5459 = vmatpush1.msra.mxu0 %v4314_v61  ;;  %5313 = vmatpush2.msra.mxu1 %v4504_v57  ;;  %v4627_v61 = vld [vmem:[%s9761_s24 + $0xca8] sm:$0xff]  ;;  %v4542_v57 = vld [vmem:[%s9761_s24 + $0xa00] sm:$0xff] }
 0xef8   :  { %5460 = vmatprep.subr.mxu0 %v4303_v62  ;;  %5314 = vmatprep.subr.mxu1 %v4493_v47  ;;  %v4626_v62 = vld [vmem:[%s9761_s24 + $0xca0] sm:$0xff]  ;;  %v4531_v47 = vld [vmem:[%s9761_s24 + $0x9a8] sm:$0xff] }
 0xef9   :  { %5461 = vmatpush1.msra.mxu0 %v4302_v36  ;;  %5315 = vmatpush2.msra.mxu1 %v4492_v0  ;;  %v4530_v36 = vld [vmem:[%s9761_s24 + $0x9a0] sm:$0xff]  ;;  %v4615_v0 = vld [vmem:[%s9761_s24 + $0xc48] sm:$0xff] }
 0xefa   :  { %5462 = vmatprep.subr.mxu0 %v4291_v51  ;;  %5316 = vmatprep.subr.mxu1 %v4481_v56  ;;  %v4519_v51 = vld [vmem:[%s9761_s24 + $0x948] sm:$0xff]  ;;  %v4614_v56 = vld [vmem:[%s9761_s24 + $0xc40] sm:$0xff] }
 0xefb   :  { %5463 = vmatpush1.msra.mxu0 %v4290_v15  ;;  %5317 = vmatpush2.msra.mxu1 %v4480_v54  ;;  %v4518_v15 = vld [vmem:[%s9761_s24 + $0x940] sm:$0xff]  ;;  %v4507_v54 = vld [vmem:[%s9761_s24 + $0x8e8] sm:$0xff] }
 0xefc   :  { %5464 = vmatprep.subr.mxu0 %v4279_v23  ;;  %5318 = vmatprep.subr.mxu1 %v4469_v33  ;;  %v4413_v23 = vld [vmem:[%s9761_s24 + $0x5f8] sm:$0xff]  ;;  %v4506_v33 = vld [vmem:[%s9761_s24 + $0x8e0] sm:$0xff] }
 0xefd   :  { %5465 = vmatpush1.msra.mxu0 %v4278_v42  ;;  %5319 = vmatpush2.msra.mxu1 %v4468_v46  ;;  %v4412_v42 = vld [vmem:[%s9761_s24 + $0x5f0] sm:$0xff]  ;;  %v4495_v46 = vld [vmem:[%s9761_s24 + $0x888] sm:$0xff] }
 0xefe   :  { %5466 = vmatprep.subr.mxu0 %v4267_v53  ;;  %5320 = vmatprep.subr.mxu1 %v4457_v30  ;;  %v4401_v53 = vld [vmem:[%s9761_s24 + $0x598] sm:$0xff]  ;;  %v4494_v30 = vld [vmem:[%s9761_s24 + $0x880] sm:$0xff] }
 0xeff   :  { %5467 = vmatpush1.msra.mxu0 %v4266_v49  ;;  %5321 = vmatpush2.msra.mxu1 %v4456_v44  ;;  %v4400_v49 = vld [vmem:[%s9761_s24 + $0x590] sm:$0xff]  ;;  %v4483_v44 = vld [vmem:[%s9761_s24 + $0x828] sm:$0xff] }
 0xf00   :  { %5468 = vmatprep.subr.mxu0 %v4255_v25  ;;  %5322 = vmatprep.subr.mxu1 %v4445_v55  ;;  %v4389_v25 = vld [vmem:[%s9761_s24 + $0x538] sm:$0xff]  ;;  %v4482_v55 = vld [vmem:[%s9761_s24 + $0x820] sm:$0xff] }
 0xf01   :  { %5469 = vmatpush1.msra.mxu0 %v4254_v40  ;;  %5323 = vmatpush2.msra.mxu1 %v4444_v31  ;;  %v4388_v40 = vld [vmem:[%s9761_s24 + $0x530] sm:$0xff]  ;;  %v4471_v31 = vld [vmem:[%s9761_s24 + $0x7c8] sm:$0xff] }
 0xf02   :  { %5470 = vmatprep.subr.mxu0 %v4243_v22  ;;  %5324 = vmatprep.subr.mxu1 %v4433_v7  ;;  %v4377_v22 = vld [vmem:[%s9761_s24 + $0x4d8] sm:$0xff]  ;;  %v4470_v7 = vld [vmem:[%s9761_s24 + $0x7c0] sm:$0xff] }
 0xf03   :  { %5471 = vmatpush1.msra.mxu0 %v4242_v59  ;;  %5325 = vmatpush2.msra.mxu1 %v4432_v63  ;;  %v4376_v59 = vld [vmem:[%s9761_s24 + $0x4d0] sm:$0xff]  ;;  %v4459_v63 = vld [vmem:[%s9761_s24 + $0x768] sm:$0xff] }
 0xf04   :  { %5472 = vmatprep.subr.mxu0 %v4231_v14  ;;  %5326 = vmatprep.subr.mxu1 %v4421_v28  ;;  %v4365_v14 = vld [vmem:[%s9761_s24 + $0x478] sm:$0xff]  ;;  %v4458_v28 = vld [vmem:[%s9761_s24 + $0x760] sm:$0xff] }
 0xf05   :  { %5473 = vmatpush1.msra.mxu0 %v4230_v45  ;;  %5327 = vmatpush2.msra.mxu1 %v4420_v19  ;;  %v4364_v45 = vld [vmem:[%s9761_s24 + $0x470] sm:$0xff]  ;;  %v4447_v19 = vld [vmem:[%s9761_s24 + $0x708] sm:$0xff] }
 0xf06   :  { %5474 = vmatprep.subr.mxu0 %v4603_v41  ;;  %5329 = vmatmul.mubr.f32.vlgmr.msra.gmra.mxu1 %v9979_v9  ;;  %v4353_v41 = vld [vmem:[%s9761_s24 + $0x418] sm:$0xff] }
 0xf07   :  { %5475 = vmatpush2.msra.mxu0 %v4602_v18  ;;  %5334 = vmatprep.mubr.f32.mxu1 %v9993_v38  ;;  %v4446_v18 = vld [vmem:[%s9761_s24 + $0x700] sm:$0xff] }
 0xf08   :  { %5476 = vmatprep.subr.mxu0 %v4591_v21  ;;  %5555 = vmatprep.subr.mxu1 %v4651_v12  ;;  %v4352_v21 = vld [vmem:[%s9761_s24 + $0x410] sm:$0xff]  ;;  %v4435_v12 = vld [vmem:[%s9761_s24 + $0x6a8] sm:$0xff] }
 0xf09   :  { %5477 = vmatpush2.msra.mxu0 %v4590_v37  ;;  %5556 = vmatpush1.msra.mxu1 %v4650_v48  ;;  %v4341_v37 = vld [vmem:[%s9761_s24 + $0x3b8] sm:$0xff]  ;;  %v4434_v48 = vld [vmem:[%s9761_s24 + $0x6a0] sm:$0xff] }
 0xf0a   :  { %5478 = vmatprep.subr.mxu0 %v4579_v3  ;;  %5335 = vmatmul.mubr.f32.gmra.mxu1 %v9998_v34  ;;  %v4340_v3 = vld [vmem:[%s9761_s24 + $0x3b0] sm:$0xff] }
 0xf0b   :  { %5479 = vmatpush2.msra.mxu0 %v4578_v29  ;;  %5340 = vmatprep.mubr.f32.mxu1 %v10014_v26  ;;  %v4423_v29 = vld [vmem:[%s9761_s24 + $0x648] sm:$0xff] }
 0xf0c   :  { %5480 = vmatprep.subr.mxu0 %v4567_v50  ;;  %5557 = vmatprep.subr.mxu1 %v4639_v20  ;;  %v4329_v50 = vld [vmem:[%s9761_s24 + $0x358] sm:$0xff]  ;;  %v4422_v20 = vld [vmem:[%s9761_s24 + $0x640] sm:$0xff] }
 0xf0d   :  { %5481 = vmatpush2.msra.mxu0 %v4566_v58  ;;  %5558 = vmatpush1.msra.mxu1 %v4638_v27  ;;  %v4328_v58 = vld [vmem:[%s9761_s24 + $0x350] sm:$0xff]  ;;  %v4317_v27 = vld [vmem:[%s9761_s24 + $0x2f8] sm:$0xff] }
 0xf0e   :  { %5482 = vmatprep.subr.mxu0 %v4555_v17  ;;  %5341 = vmatmul.mubr.f32.gmra.mxu1 %v10016_v13  ;;  %v4316_v17 = vld [vmem:[%s9761_s24 + $0x2f0] sm:$0xff] }
 0xf0f   :  { %5483 = vmatpush2.msra.mxu0 %v4554_v43  ;;  %5346 = vmatprep.mubr.f32.mxu1 %v10063_v52  ;;  %v4305_v43 = vld [vmem:[%s9761_s24 + $0x298] sm:$0xff] }
 0xf10   :  { %5484 = vmatprep.subr.mxu0 %v4543_v6  ;;  %5559 = vmatprep.subr.mxu1 %v4627_v61  ;;  %v4653_v6 = vld [vmem:[%s9761_s24 + $0xd78] sm:$0xff]  ;;  %v4304_v61 = vld [vmem:[%s9761_s24 + $0x290] sm:$0xff] }
 0xf11   :  { %5485 = vmatpush2.msra.mxu0 %v4542_v57  ;;  %5560 = vmatpush1.msra.mxu1 %v4626_v62  ;;  %v4652_v57 = vld [vmem:[%s9761_s24 + $0xd70] sm:$0xff]  ;;  %v4293_v62 = vld [vmem:[%s9761_s24 + $0x238] sm:$0xff] }
 0xf12   :  { %5486 = vmatprep.subr.mxu0 %v4531_v47  ;;  %5347 = vmatmul.mubr.f32.gmra.mxu1 %v10068_v39  ;;  %v4281_v47 = vld [vmem:[%s9761_s24 + $0x1d8] sm:$0xff] }
 0xf13   :  { %5487 = vmatpush2.msra.mxu0 %v4530_v36  ;;  %5561 = vmatprep.subr.mxu1 %v4615_v0  ;;  %v4641_v36 = vld [vmem:[%s9761_s24 + $0xd18] sm:$0xff]  ;;  %v4280_v0 = vld [vmem:[%s9761_s24 + $0x1d0] sm:$0xff] }
 0xf14   :  { %5488 = vmatprep.subr.mxu0 %v4519_v51  ;;  %5562 = vmatpush1.msra.mxu1 %v4614_v56  ;;  %v4640_v51 = vld [vmem:[%s9761_s24 + $0xd10] sm:$0xff]  ;;  %v4269_v56 = vld [vmem:[%s9761_s24 + $0x178] sm:$0xff] }
 0xf15   :  { %5489 = vmatpush2.msra.mxu0 %v4518_v15  ;;  %5595 = vmatprep.mubr.f32.mxu1 %v11041_v5  ;;  %v4268_v15 = vld [vmem:[%s9761_s24 + $0x170] sm:$0xff] }
 0xf16   :  { %5490 = vmatprep.subr.mxu0 %v4507_v54  ;;  %5620 = vmatprep.subr.mxu1 %v4413_v23  ;;  %v4257_v54 = vld [vmem:[%s9761_s24 + $0x118] sm:$0xff] }
 0xf17   :  { %5491 = vmatpush2.msra.mxu0 %v4506_v33  ;;  %7210 = vmatmul.mubr.msk.f32.vlgmr.msra.gmra.mxu1 %vm775_vm2, %v9955_v35  ;;  %v4629_v23 = vld [vmem:[%s9761_s24 + $0xcb8] sm:$0xff]  ;;  %v4256_v33 = vld [vmem:[%s9761_s24 + $0x110] sm:$0xff] }
 0xf18   :  { %5621 = vmatpush1.msra.mxu1 %v4412_v42  ;;  %5492 = vmatprep.subr.mxu0 %v4495_v46  ;;  %v4628_v42 = vld [vmem:[%s9761_s24 + $0xcb0] sm:$0xff]  ;;  %v4245_v46 = vld [vmem:[%s9761_s24 + $0xb8] sm:$0xff] }
 0xf19   :  { %5622 = vmatprep.subr.mxu1 %v4401_v53  ;;  %5493 = vmatpush2.msra.mxu0 %v4494_v30  ;;  %v4244_v53 = vld [vmem:[%s9761_s24 + $0xb0] sm:$0xff]  ;;  %v4617_v30 = vld [vmem:[%s9761_s24 + $0xc58] sm:$0xff] }
 0xf1a   :  { %5623 = vmatpush1.msra.mxu1 %v4400_v49  ;;  %5494 = vmatprep.subr.mxu0 %v4483_v44  ;;  %v4233_v49 = vld [vmem:[%s9761_s24 + $0x58] sm:$0xff]  ;;  %v4616_v44 = vld [vmem:[%s9761_s24 + $0xc50] sm:$0xff] }
 0xf1b   :  { %5601 = vmatprep.mubr.f32.mxu1 %v11041_v5  ;;  %5624 = vmatprep.subr.mxu1 %v4389_v25  ;;  %v4232_v25 = vld [vmem:[%s9761_s24 + $0x50] sm:$0xff] }
 0xf1c   :  { %5495 = vmatpush2.msra.mxu0 %v4482_v55  ;;  %7211 = vmatmul.mubr.msk.f32.gmra.mxu1 %vm775_vm2, %v10021_v24  ;;  %v5973_v55 = vld [vmem:[%s10433_s23 + $0xf8] sm:$0xff] }
 0xf1d   :  { %5625 = vmatpush1.msra.mxu1 %v4388_v40  ;;  %5496 = vmatprep.subr.mxu0 %v4471_v31  ;;  %v4605_v40 = vld [vmem:[%s9761_s24 + $0xbf8] sm:$0xff]  ;;  %v4604_v31 = vld [vmem:[%s9761_s24 + $0xbf0] sm:$0xff] }
 0xf1e   :  { %5626 = vmatprep.subr.mxu1 %v4377_v22  ;;  %5497 = vmatpush2.msra.mxu0 %v4470_v7  ;;  %v5957_v22 = vld [vmem:[%s10433_s23 + $0x78] sm:$0xff] }
 0xf1f   :  { %5627 = vmatpush1.msra.mxu1 %v4376_v59  ;;  %5498 = vmatprep.subr.mxu0 %v4459_v63  ;;  %v4593_v7 = vld [vmem:[%s9761_s24 + $0xb98] sm:$0xff]  ;;  %v5972_v59 = vld [vmem:[%s10433_s23 + $0xf0] sm:$0xff] }
 0xf20   :  { %5607 = vmatprep.mubr.f32.mxu1 %v11041_v5  ;;  %5628 = vmatprep.subr.mxu1 %v4365_v14  ;;  %v4592_v63 = vld [vmem:[%s9761_s24 + $0xb90] sm:$0xff] }
 0xf21   :  { %5499 = vmatpush2.msra.mxu0 %v4458_v28  ;;  %7212 = vmatmul.mubr.msk.f32.gmra.mxu1 %vm775_vm2, %v10040_v60  ;;  %v5956_v14 = vld [vmem:[%s10433_s23 + $0x70] sm:$0xff] }
 0xf22   :  { %5629 = vmatpush1.msra.mxu1 %v4364_v45  ;;  %5500 = vmatprep.subr.mxu0 %v4447_v19  ;;  %v5971_v45 = vld [vmem:[%s10433_s23 + $0xe8] sm:$0xff]  ;;  %v4581_v19 = vld [vmem:[%s9761_s24 + $0xb38] sm:$0xff] }
 0xf23   :  { %5630 = vmatprep.subr.mxu1 %v4353_v41  ;;  %5501 = vmatpush2.msra.mxu0 %v4446_v18  ;;  %v4580_v41 = vld [vmem:[%s9761_s24 + $0xb30] sm:$0xff]  ;;  %v5955_v18 = vld [vmem:[%s10433_s23 + $0x68] sm:$0xff] }
 0xf24   :  { %5631 = vmatpush1.msra.mxu1 %v4352_v21  ;;  %5502 = vmatprep.subr.mxu0 %v4435_v12  ;;  %v10474_v21 = vld [vmem:[%s10452_s1] sm:$0xff] }
 0xf25   :  { %5613 = vmatprep.mubr.f32.mxu1 %v11041_v5  ;;  %5632 = vmatprep.subr.mxu1 %v4341_v37  ;;  %v5970_v12 = vld [vmem:[%s10433_s23 + $0xe0] sm:$0xff]  ;;  %v4568_v37 = vld [vmem:[%s9761_s24 + $0xad0] sm:$0xff] }
 0xf26   :  { %5503 = vmatpush2.msra.mxu0 %v4434_v48  ;;  %7213 = vmatmul.mubr.msk.f32.gmra.mxu1 %vm775_vm2, %v10058_v4  ;;  %v10480_v48 = vrot.slane %v10474_v21, %v8935_v10 }
 0xf27   :  { %5633 = vmatpush1.msra.mxu1 %v4340_v3  ;;  %5504 = vmatprep.subr.mxu0 %v4423_v29  ;;  %v5954_v29 = vld [vmem:[%s10433_s23 + $0x60] sm:$0xff] }
 0xf28   :  { %5634 = vmatprep.subr.mxu1 %v4329_v50  ;;  %5684 = vmatprep.mubr.f32.mxu1 %v9977_v16  ;;  %v4292_v16 = vld [vmem:[%s9761_s24 + $0x230] sm:$0xff] }
 0xf29   :  { %5505 = vmatpush2.msra.mxu0 %v4422_v20  ;;  %5635 = vmatpush1.msra.mxu1 %v4328_v58  ;;  %v5969_v20 = vld [vmem:[%s10433_s23 + $0xd8] sm:$0xff] }
 0xf2a   :  { %5507 = vmatmul.mubr.f32.vlgmr.msra.gmra.mxu0 %v9979_v9  ;;  %5636 = vmatprep.subr.mxu1 %v4317_v27  ;;  %v10485_v50 = vpop.f32.mrf.mxu1  ;;  %v4557_v58 = vld [vmem:[%s9761_s24 + $0xa78] sm:$0xff]  ;;  %v4556_v27 = vld [vmem:[%s9761_s24 + $0xa70] sm:$0xff] }
 0xf2b   :  { %5512 = vmatprep.mubr.f32.mxu0 %v9993_v38  ;;  %5637 = vmatpush1.msra.mxu1 %v4316_v17  ;;  %v4545_v17 = vld [vmem:[%s9761_s24 + $0xa18] sm:$0xff] }
 0xf2c   :  { %5638 = vmatprep.subr.mxu1 %v4305_v43  ;;  %5733 = vmatprep.subr.mxu0 %v4653_v6 }
 0xf2d   :  { %5639 = vmatpush1.msra.mxu1 %v4304_v61  ;;  %5734 = vmatpush1.msra.mxu0 %v4652_v57  ;;  %v5968_v61 = vld [vmem:[%s10433_s23 + $0xd0] sm:$0xff] }
 0xf2e   :  { %5513 = vmatmul.mubr.f32.gmra.mxu0 %v9998_v34  ;;  %5640 = vmatprep.subr.mxu1 %v4293_v62  ;;  %v4544_v57 = vld [vmem:[%s9761_s24 + $0xa10] sm:$0xff]  ;;  %v4887_v62 = vpop.f32.mrf.mxu1 }
 0xf2f   :  { %5518 = vmatprep.mubr.f32.mxu0 %v10014_v26  ;;  %5641 = vmatpush1.msra.mxu1 %v4292_v16  ;;  %v5952_v16 = vld [vmem:[%s10433_s23 + $0x50] sm:$0xff] }
 0xf30   :  { %5642 = vmatprep.subr.mxu1 %v4281_v47  ;;  %5735 = vmatprep.subr.mxu0 %v4641_v36  ;;  %v5967_v47 = vld [vmem:[%s10433_s23 + $0xc8] sm:$0xff]  ;;  %v4533_v36 = vld [vmem:[%s9761_s24 + $0x9b8] sm:$0xff] }
 0xf31   :  { %5643 = vmatpush1.msra.mxu1 %v4280_v0  ;;  %5736 = vmatpush1.msra.mxu0 %v4640_v51  ;;  %v4532_v51 = vld [vmem:[%s9761_s24 + $0x9b0] sm:$0xff] }
 0xf32   :  { %5519 = vmatmul.mubr.f32.gmra.mxu0 %v10016_v13  ;;  %5644 = vmatprep.subr.mxu1 %v4269_v56  ;;  %v10465_v28 = vpop.f32.mrf.mxu0 }
 0xf33   :  { %5524 = vmatprep.mubr.f32.mxu0 %v10063_v52  ;;  %5645 = vmatpush1.msra.mxu1 %v4268_v15 }
 0xf34   :  { %5646 = vmatprep.subr.mxu1 %v4257_v54  ;;  %5737 = vmatprep.subr.mxu0 %v4629_v23  ;;  %v4798_v3 = vpop.f32.mrf.mxu0  ;;  %v4521_v54 = vld [vmem:[%s9761_s24 + $0x958] sm:$0xff]  ;;  %v5966_v23 = vld [vmem:[%s10433_s23 + $0xc0] sm:$0xff] }
 0xf35   :  { %5647 = vmatpush1.msra.mxu1 %v4256_v33  ;;  %5738 = vmatpush1.msra.mxu0 %v4628_v42  ;;  %v4799_v43 = vadd.f32 %v4798_v3, %v10480_v48  ;;  %v4520_v33 = vld [vmem:[%s9761_s24 + $0x950] sm:$0xff]  ;;  %v5950_v42 = vld [vmem:[%s10433_s23 + $0x40] sm:$0xff] }
 0xf36   :  { %5525 = vmatmul.mubr.f32.gmra.mxu0 %v10068_v39  ;;  %5648 = vmatprep.subr.mxu1 %v4245_v46  ;;  %v10494_v6 = vpop.f32.mrf.mxu0  ;;  %v4509_v46 = vld [vmem:[%s9761_s24 + $0x8f8] sm:$0xff]  ;;  %v5946_v3 = vld [vmem:[%s10433_s23 + $0x20] sm:$0xff] }
 0xf37   :  { %5649 = vmatpush1.msra.mxu1 %v4244_v53  ;;  %5739 = vmatprep.subr.mxu0 %v4617_v30  ;;  %v4888_v0 = vadd.f32 %v4887_v62, %v4799_v43  ;;  %v5965_v53 = vld [vmem:[%s10433_s23 + $0xb8] sm:$0xff] }
 0xf38   :  { %5650 = vmatprep.subr.mxu1 %v4233_v49  ;;  %5740 = vmatpush1.msra.mxu0 %v4616_v44  ;;  %v4804_v56 = vpop.f32.mrf.mxu0 }
 0xf39   :  { %5651 = vmatpush1.msra.mxu1 %v4232_v25  ;;  %5773 = vmatprep.mubr.f32.mxu0 %v11041_v5  ;;  %v5847_v49 = vmul.f32 0.01, %v4888_v0  ;;  %v5949_v25 = vld [vmem:[%s10433_s23 + $0x38] sm:$0xff] }
 0xf3a   :  { %7409 = vmatprep.subr.mxu0 %v5973_v55  ;;  %5652 = vmatprep.subr.mxu1 %v4605_v40  ;;  %v10517_v30 = vpop.f32.mrf.mxu0  ;;  %v10523_v55 = vrot.slane %v10474_v21, %v11046_v32  ;;  %v5964_v40 = vld [vmem:[%s10433_s23 + $0xb0] sm:$0xff] }
 0xf3b   :  { %7214 = vmatmul.mubr.msk.f32.vlgmr.msra.gmra.mxu0 %vm775_vm2, %v9955_v35  ;;  %5653 = vmatpush2.msra.mxu1 %v4604_v31  ;;  %v4569_v35 = vld [vmem:[%s9761_s24 + $0xad8] sm:$0xff]  ;;  %v10504_v15 = vpop.f32.mrf.mxu1  ;;  %v4496_v31 = vld [vmem:[%s9761_s24 + $0x890] sm:$0xff] }
 0xf3c   :  { %7410 = vmatpush3.msra.mxu0 %v5957_v22  ;;  %5654 = vmatprep.subr.mxu1 %v4593_v7  ;;  %v5948_v22 = vld [vmem:[%s10433_s23 + $0x30] sm:$0xff]  ;;  %v4485_v7 = vld [vmem:[%s9761_s24 + $0x838] sm:$0xff] }
 0xf3d   :  { %7411 = vmatprep.subr.mxu0 %v5972_v59  ;;  %5655 = vmatpush2.msra.mxu1 %v4592_v63  ;;  %v4893_v44 = vpop.f32.mrf.mxu1  ;;  %v5963_v59 = vld [vmem:[%s10433_s23 + $0xa8] sm:$0xff]  ;;  %v4810_v63 = vpop.f32.mrf.mxu0 }
 0xf3e   :  { %7412 = vmatpush3.msra.mxu0 %v5956_v14  ;;  %5779 = vmatprep.mubr.f32.mxu0 %v11041_v5 }
 0xf3f   :  { %7413 = vmatprep.subr.mxu0 %v5971_v45  ;;  %5656 = vmatprep.subr.mxu1 %v4581_v19  ;;  %v10530_v45 = vpop.f32.mrf.mxu1  ;;  %v5947_v19 = vld [vmem:[%s10433_s23 + $0x28] sm:$0xff] }
 0xf40   :  { %7215 = vmatmul.mubr.msk.f32.gmra.mxu0 %vm775_vm2, %v10021_v24  ;;  %5657 = vmatpush2.msra.mxu1 %v4580_v41  ;;  %v5953_v24 = vld [vmem:[%s10433_s23 + $0x58] sm:$0xff]  ;;  %v4484_v41 = vld [vmem:[%s9761_s24 + $0x830] sm:$0xff] }
 0xf41   :  { %7414 = vmatpush3.msra.mxu0 %v5955_v18  ;;  %5658 = vmatprep.subr.mxu1 %v4569_v35  ;;  %v4797_v18 = vadd.f32 %v10465_v28, %v10523_v55  ;;  %v5962_v35 = vld [vmem:[%s10433_s23 + $0xa0] sm:$0xff]  ;;  %v4805_v28 = vadd.f32 %v4804_v56, %v10480_v48  ;;  %v4437_v56 = vld [vmem:[%s9761_s24 + $0x6b8] sm:$0xff] }
 0xf42   :  { %7415 = vmatprep.subr.mxu0 %v5970_v12  ;;  %5659 = vmatpush2.msra.mxu1 %v4568_v37  ;;  %v4473_v12 = vld [vmem:[%s9761_s24 + $0x7d8] sm:$0xff] }
 0xf43   :  { %7416 = vmatpush3.msra.mxu0 %v5954_v29  ;;  %5785 = vmatprep.mubr.f32.mxu0 %v11041_v5  ;;  %v4472_v29 = vld [vmem:[%s9761_s24 + $0x7d0] sm:$0xff]  ;;  %v4886_v43 = vadd.f32 %v10485_v50, %v4797_v18 }
 0xf44   :  { %7417 = vmatprep.subr.mxu0 %v5969_v20  ;;  %5660 = vmatprep.subr.mxu1 %v4557_v58  ;;  %v5961_v20 = vld [vmem:[%s10433_s23 + $0x98] sm:$0xff] }
 0xf45   :  { %7216 = vmatmul.mubr.msk.f32.gmra.mxu0 %vm775_vm2, %v10040_v60  ;;  %5661 = vmatpush2.msra.mxu1 %v4556_v27  ;;  %v5951_v60 = vld [vmem:[%s10433_s23 + $0x48] sm:$0xff]  ;;  %v4461_v58 = vld [vmem:[%s9761_s24 + $0x778] sm:$0xff]  ;;  %v4899_v27 = vpop.f32.mrf.mxu1  ;;  %vm5798_vm3 = vcmp.ge.f32.partialorder %v4886_v43, 0.0 }
 0xf46   :  { %7418 = vmatpush3.msra.mxu0 %v5953_v24  ;;  %5662 = vmatprep.subr.mxu1 %v4545_v17  ;;  %v4814_v37 = vpop.f32.mrf.mxu0  ;;  %v5945_v24 = vld [vmem:[%s10433_s23 + $0x18] sm:$0xff]  ;;  %v4460_v17 = vld [vmem:[%s9761_s24 + $0x770] sm:$0xff] }
 0xf47   :  { %7419 = vmatprep.subr.mxu0 %v5968_v61  ;;  %5663 = vmatpush2.msra.mxu1 %v4544_v57  ;;  %v5960_v61 = vld [vmem:[%s10433_s23 + $0x90] sm:$0xff]  ;;  %v4449_v57 = vld [vmem:[%s9761_s24 + $0x718] sm:$0xff]  ;;  %v4903_v50 = vpop.f32.mrf.mxu1 }
 0xf48   :  { %7420 = vmatpush3.msra.mxu0 %v5952_v16  ;;  %5791 = vmatprep.mubr.f32.mxu0 %v11041_v5  ;;  %v4508_v5 = vld [vmem:[%s9761_s24 + $0x8f0] sm:$0xff]  ;;  %v4816_v62 = vpop.f32.mrf.mxu0  ;;  %v4894_v16 = vadd.f32 %v4893_v44, %v4805_v28  ;;  %v5942_v44 = vld [vmem:[%s10433_s23] sm:$0xff] }
 0xf49   :  { %7421 = vmatprep.subr.mxu0 %v5967_v47  ;;  %5664 = vmatprep.subr.mxu1 %v4533_v36  ;;  %v5944_v47 = vld [vmem:[%s10433_s23 + $0x10] sm:$0xff] }
 0xf4a   :  { %7217 = vmatmul.mubr.msk.f32.gmra.mxu0 %vm775_vm2, %v10058_v4  ;;  %5665 = vmatpush2.msra.mxu1 %v4532_v51  ;;  %v4497_v4 = vld [vmem:[%s9761_s24 + $0x898] sm:$0xff]  ;;  %vm5799_vm2 = vcmp.ge.f32.partialorder %v4888_v0, 0.0  ;;  %v4448_v36 = vld [vmem:[%s9761_s24 + $0x710] sm:$0xff]  ;;  %v5959_v51 = vld [vmem:[%s10433_s23 + $0x88] sm:$0xff]  ;;  %vm5811_vm7 = vcmp.ge.f32.partialorder %v4894_v16, 0.0  ;;  %v10582_v28 = vpop.f32.mrf.mxu0 }
 0xf4b   :  { %7422 = vmatpush3.msra.mxu0 %v5951_v60  ;;  %5666 = vmatprep.subr.mxu1 %v4521_v54  ;;  %v5895_v14 = vsel %vm5799_vm2, %v4888_v0, %v5847_v49  ;;  %v4803_v0 = vadd.f32 %v10494_v6, %v10523_v55  ;;  %v4811_v60 = vadd.f32 %v4810_v63, %v10480_v48  ;;  %v5943_v54 = vld [vmem:[%s10433_s23 + $0x8] sm:$0xff]  ;;  %v6037_v63 = vld [vmem:[%s10433_s23 + $0x2f8] sm:$0xff] }
 0xf4c   :  { %7423 = vmatprep.subr.mxu0 %v5966_v23  ;;  %5667 = vmatpush2.msra.mxu1 %v4520_v33  ;;  %v4436_v23 = vld [vmem:[%s9761_s24 + $0x6b0] sm:$0xff]  ;;  %v4817_v33 = vadd.f32 %v4816_v62, %v10480_v48  ;;  %v4905_v48 = vpop.f32.mrf.mxu1  ;;  %v11063_v62 = vld [vmem:[#allocation33_spill] sm:$0xff] }
 0xf4d   :  { %7424 = vmatpush3.msra.mxu0 %v5950_v42  ;;  %5668 = vmatprep.subr.mxu1 %v4509_v46  ;;  %v5846_v42 = vmul.f32 0.01, %v4886_v43  ;;  %v4892_v6 = vadd.f32 %v10504_v15, %v4803_v0  ;;  %v5958_v46 = vld [vmem:[%s10433_s23 + $0x80] sm:$0xff]  ;;  %v4900_v49 = vadd.f32 %v4899_v27, %v4811_v60  ;;  %v6003_v27 = vld [vmem:[%s10433_s23 + $0x1e8] sm:$0xff]  ;;  %v5985_v0 = vld [vmem:[%s10433_s23 + $0x158] sm:$0xff] }
 0xf4e   :  { %7425 = vmatprep.subr.mxu0 %v5965_v53  ;;  %5669 = vmatpush2.msra.mxu1 %v4508_v5  ;;  %v4425_v53 = vld [vmem:[%s9761_s24 + $0x658] sm:$0xff]  ;;  %v5859_v5 = vmul.f32 0.01, %v4894_v16  ;;  %v4906_v15 = vadd.f32 %v4905_v48, %v4817_v33  ;;  %v5984_v60 = vld [vmem:[%s10433_s23 + $0x150] sm:$0xff]  ;;  %v5999_v33 = vld [vmem:[%s10433_s23 + $0x1c8] sm:$0xff] }
 0xf4f   :  { %7426 = vmatpush3.msra.mxu0 %v5949_v25  ;;  %5670 = vmatprep.subr.mxu1 %v4497_v4  ;;  %v4424_v25 = vld [vmem:[%s9761_s24 + $0x650] sm:$0xff]  ;;  %v4809_v4 = vadd.f32 %v10517_v30, %v10523_v55  ;;  %vm5810_vm8 = vcmp.ge.f32.partialorder %v4892_v6, 0.0  ;;  %v5871_v30 = vmul.f32 0.01, %v4900_v49  ;;  %vm5823_vm9 = vcmp.ge.f32.partialorder %v4900_v49, 0.0  ;;  %v6014_v48 = vld [vmem:[%s10433_s23 + $0x240] sm:$0xff]  ;;  %s6865_s24 = sld [smem:[%s10883_s0 + %s8397_s29]]  }
 0xf50   :  { %7427 = vmatprep.subr.mxu0 %v5964_v40  ;;  %5671 = vmatpush2.msra.mxu1 %v4496_v31  ;;  %v5894_v40 = vsel %vm5798_vm3, %v4886_v43, %v5846_v42  ;;  %v5858_v31 = vmul.f32 0.01, %v4892_v6  ;;  %vm5835_vm10 = vcmp.ge.f32.partialorder %v4906_v15, 0.0  ;;  %v6034_v43 = vld [vmem:[%s10433_s23 + $0x2e0] sm:$0xff] }
 0xf51   :  { %7428 = vmatpush3.msra.mxu0 %v5948_v22  ;;  %5672 = vmatprep.subr.mxu1 %v4485_v7  ;;  %v4898_v22 = vadd.f32 %v10530_v45, %v4809_v4  ;;  %v4815_v7 = vadd.f32 %v4814_v37, %v10523_v55  ;;  %v5883_v55 = vmul.f32 0.01, %v4906_v15  ;;  %v5988_v37 = vld [vmem:[%s10433_s23 + $0x170] sm:$0xff] }
 0xf52   :  { %7429 = vmatprep.subr.mxu0 %v5963_v59  ;;  %6205 = vmatprep.mubr.f32.mxu0 %v5895_v14  ;;  %v6005_v59 = vld [vmem:[%s10433_s23 + $0x1f8] sm:$0xff]  ;;  %v5907_v14 = vsel %vm5811_vm7, %v4894_v16, %v5859_v5  ;;  %v6018_v16 = vld [vmem:[%s10433_s23 + $0x260] sm:$0xff] }
 0xf53   :  { %7430 = vmatpush3.msra.mxu0 %v5947_v19  ;;  %5673 = vmatpush2.msra.mxu1 %v4484_v41  ;;  %v5989_v19 = vld [vmem:[%s10433_s23 + $0x178] sm:$0xff]  ;;  %v5870_v45 = vmul.f32 0.01, %v4898_v22  ;;  %v4904_v18 = vadd.f32 %v4903_v50, %v4815_v7  ;;  %vm5822_vm11 = vcmp.ge.f32.partialorder %v4898_v22, 0.0  ;;  %v5998_v5 = vld [vmem:[%s10433_s23 + $0x1c0] sm:$0xff] }
 0xf54   :  { %7431 = vmatprep.subr.mxu0 %v5962_v35  ;;  %5674 = vmatprep.subr.mxu1 %v4473_v12  ;;  %v6021_v41 = vld [vmem:[%s10433_s23 + $0x278] sm:$0xff]  ;;  %v5906_v35 = vsel %vm5810_vm8, %v4892_v6, %v5858_v31  ;;  %v6036_v12 = vld [vmem:[%s10433_s23 + $0x2f0] sm:$0xff]  ;;  %v6031_v6 = vld [vmem:[%s10433_s23 + $0x2c8] sm:$0xff] }
 0xf55   :  { %7432 = vmatpush3.msra.mxu0 %v5946_v3  ;;  %5675 = vmatpush2.msra.mxu1 %v4472_v29  ;;  %v6020_v3 = vld [vmem:[%s10433_s23 + $0x270] sm:$0xff]  ;;  %v5931_v29 = vsel %vm5835_vm10, %v4906_v15, %v5883_v55  ;;  %vm5834_vm12 = vcmp.ge.f32.partialorder %v4904_v18, 0.0  ;;  %v6017_v50 = vld [vmem:[%s10433_s23 + $0x258] sm:$0xff] }
 0xf56   :  { %7433 = vmatprep.subr.mxu0 %v5961_v20  ;;  %5676 = vmatprep.subr.mxu1 %v4461_v58  ;;  %v5882_v20 = vmul.f32 0.01, %v4904_v18  ;;  %v5918_v58 = vsel %vm5822_vm11, %v4898_v22, %v5870_v45  ;;  %v6029_v22 = vld [vmem:[%s10433_s23 + $0x2b8] sm:$0xff]  ;;  %v6028_v55 = vld [vmem:[%s10433_s23 + $0x2b0] sm:$0xff] }
 0xf57   :  { %7434 = vmatpush3.msra.mxu0 %v5945_v24  ;;  %5677 = vmatpush2.msra.mxu1 %v4460_v17  ;;  %v6019_v24 = vld [vmem:[%s10433_s23 + $0x268] sm:$0xff]  ;;  %v6002_v17 = vld [vmem:[%s10433_s23 + $0x1e0] sm:$0xff]  ;;  %v5981_v7 = vld [vmem:[%s10433_s23 + $0x138] sm:$0xff] }
 0xf58   :  { %7435 = vmatprep.subr.mxu0 %v5960_v61  ;;  %5678 = vmatprep.subr.mxu1 %v4449_v57  ;;  %v5930_v61 = vsel %vm5834_vm12, %v4904_v18, %v5882_v20  ;;  %v5986_v57 = vld [vmem:[%s10433_s23 + $0x160] sm:$0xff]  ;;  %v5980_v45 = vld [vmem:[%s10433_s23 + $0x130] sm:$0xff]  ;;  %v6027_v20 = vld [vmem:[%s10433_s23 + $0x2a8] sm:$0xff] }
 0xf59   :  { %7436 = vmatpush3.msra.mxu0 %v5944_v47  ;;  %5679 = vmatpush2.msra.mxu1 %v4448_v36  ;;  %v5065_v47 = vpop.f32.mrf.mxu0  ;;  %v6033_v36 = vld [vmem:[%s10433_s23 + $0x2d8] sm:$0xff]  ;;  %v6012_v18 = vld [vmem:[%s10433_s23 + $0x230] sm:$0xff] }
 0xf5a   :  { %7437 = vmatprep.subr.mxu0 %v5959_v51  ;;  %5680 = vmatprep.subr.mxu1 %v4437_v56  ;;  %v6000_v51 = vld [vmem:[%s10433_s23 + $0x1d0] sm:$0xff] }
 0xf5b   :  { %7438 = vmatpush3.msra.mxu0 %v5943_v54  ;;  %5681 = vmatpush2.msra.mxu1 %v4436_v23  ;;  %v6032_v56 = vld [vmem:[%s10433_s23 + $0x2d0] sm:$0xff]  ;;  %v10607_v23 = vpop.f32.mrf.mxu0 }
 0xf5c   :  { %7439 = vmatprep.subr.mxu0 %v5958_v46  ;;  %5682 = vmatprep.subr.mxu1 %v4425_v53  ;;  %v6016_v54 = vld [vmem:[%s10433_s23 + $0x250] sm:$0xff]  ;;  %v5983_v46 = vld [vmem:[%s10433_s23 + $0x148] sm:$0xff] }
 0xf5d   :  { %7440 = vmatpush3.msra.mxu0 %v5942_v44  ;;  %5683 = vmatpush2.msra.mxu1 %v4424_v25  ;;  %v6015_v53 = vld [vmem:[%s10433_s23 + $0x248] sm:$0xff]  ;;  %v6030_v44 = vld [vmem:[%s10433_s23 + $0x2c0] sm:$0xff]  ;;  %v5071_v15 = vpop.f32.mrf.mxu0 }
 0xf5e   :  { %6206 = vmatmul.mubr.f32.vlgmr.msra.gmra.mxu0 %v5894_v40  ;;  %5685 = vmatmul.mubr.f32.vlgmr.msra.gmra.mxu1 %v9979_v9  ;;  %v6004_v9 = vld [vmem:[%s10433_s23 + $0x1f0] sm:$0xff]  ;;  %v5982_v25 = vld [vmem:[%s10433_s23 + $0x140] sm:$0xff]  ;;  %v5997_v40 = vld [vmem:[%s10433_s23 + $0x1b8] sm:$0xff] }
 0xf5f   :  { %6210 = vmatprep.mubr.f32.mxu0 %v5907_v14  ;;  %5690 = vmatprep.mubr.f32.mxu1 %v9993_v38  ;;  %v5919_v38 = vsel %vm5823_vm9, %v4900_v49, %v5871_v30  ;;  %v6013_v14 = vld [vmem:[%s10433_s23 + $0x238] sm:$0xff] }
 0xf60   :  { %7453 = vmatprep.subr.mxu1 %v6005_v59  ;;  %7497 = vmatprep.subr.mxu0 %v6037_v63  ;;  %v11064_v59 = vld [vmem:[#allocation34_spill] sm:$0xff] }
 0xf61   :  { %7454 = vmatpush3.msra.mxu1 %v5989_v19  ;;  %7498 = vmatpush3.msra.mxu0 %v6021_v41  ;;  %v10623_v63 = vrot.slane %v10474_v21, %v11064_v59  ;;  %v5996_v19 = vld [vmem:[%s10433_s23 + $0x1b0] sm:$0xff] }
 0xf62   :  { %6211 = vmatmul.mubr.f32.gmra.mxu0 %v5906_v35  ;;  %5691 = vmatmul.mubr.f32.gmra.mxu1 %v9998_v34  ;;  %v6035_v34 = vld [vmem:[%s10433_s23 + $0x2e8] sm:$0xff]  ;;  %v10630_v35 = vpop.f32.mrf.mxu0 }
 0xf63   :  { %6215 = vmatprep.mubr.f32.mxu0 %v5919_v38  ;;  %5696 = vmatprep.mubr.f32.mxu1 %v10014_v26  ;;  %v5987_v26 = vld [vmem:[%s10433_s23 + $0x168] sm:$0xff] }
 0xf64   :  { %7455 = vmatprep.subr.mxu1 %v6004_v9  ;;  %7499 = vmatprep.subr.mxu0 %v6036_v12  ;;  %v5995_v9 = vld [vmem:[%s10433_s23 + $0x1a8] sm:$0xff] }
 0xf65   :  { %7456 = vmatpush3.msra.mxu1 %v5988_v37  ;;  %7500 = vmatpush3.msra.mxu0 %v6020_v3  ;;  %v5979_v3 = vld [vmem:[%s10433_s23 + $0x128] sm:$0xff] }
 0xf66   :  { %6216 = vmatmul.mubr.f32.gmra.mxu0 %v5918_v58  ;;  %5697 = vmatmul.mubr.f32.gmra.mxu1 %v10016_v13  ;;  %v4672_v13 = vsub.s32 3, %v11063_v62  ;;  %v5994_v58 = vld [vmem:[%s10433_s23 + $0x1a0] sm:$0xff] }
 0xf67   :  { %6220 = vmatprep.mubr.f32.mxu0 %v5931_v29  ;;  %5702 = vmatprep.mubr.f32.mxu1 %v10063_v52  ;;  %v6001_v52 = vld [vmem:[%s10433_s23 + $0x1d8] sm:$0xff] }
 0xf68   :  { %7457 = vmatprep.subr.mxu1 %v6003_v27  ;;  %7501 = vmatprep.subr.mxu0 %v6035_v34 }
 0xf69   :  { %7458 = vmatpush3.msra.mxu1 %v5987_v26  ;;  %7502 = vmatpush3.msra.mxu0 %v6019_v24  ;;  %v6011_v26 = vld [vmem:[%s10433_s23 + $0x228] sm:$0xff]  ;;  %v5978_v24 = vld [vmem:[%s10433_s23 + $0x120] sm:$0xff] }
 0xf6a   :  { %6221 = vmatmul.mubr.f32.gmra.mxu0 %v5930_v61  ;;  %5703 = vmatmul.mubr.f32.gmra.mxu1 %v10068_v39  ;;  %v10604_v39 = vrot.slane %v10474_v21, %v4672_v13  ;;  %v5993_v61 = vld [vmem:[%s10433_s23 + $0x198] sm:$0xff] }
 0xf6b   :  { %7459 = vmatprep.subr.mxu1 %v6002_v17  ;;  %7503 = vmatprep.subr.mxu0 %v6034_v43  ;;  %v6026_v17 = vld [vmem:[%s10433_s23 + $0x2a0] sm:$0xff]  ;;  %v5077_v43 = vpop.f32.mrf.mxu0 }
 0xf6c   :  { %7460 = vmatpush3.msra.mxu1 %v5986_v57  ;;  %7504 = vmatpush3.msra.mxu0 %v6018_v16  ;;  %v6010_v16 = vld [vmem:[%s10433_s23 + $0x220] sm:$0xff] }
 0xf6d   :  { %7461 = vmatprep.subr.mxu1 %v6001_v52  ;;  %7505 = vmatprep.subr.mxu0 %v6033_v36  ;;  %v5977_v52 = vld [vmem:[%s10433_s23 + $0x118] sm:$0xff] }
 0xf6e   :  { %7462 = vmatpush3.msra.mxu1 %v5985_v0  ;;  %v4974_v42 = vpop.f32.mrf.mxu1  ;;  %7506 = vmatpush3.msra.mxu0 %v6017_v50  ;;  %v6025_v50 = vld [vmem:[%s10433_s23 + $0x298] sm:$0xff] }
 0xf6f   :  { %7463 = vmatprep.subr.mxu1 %v6000_v51  ;;  %7507 = vmatprep.subr.mxu0 %v6032_v56  ;;  %v4975_v37 = vadd.f32 %v4974_v42, %v10623_v63  ;;  %v5992_v56 = vld [vmem:[%s10433_s23 + $0x190] sm:$0xff]  ;;  %v5081_v42 = vpop.f32.mrf.mxu0 }
 0xf70   :  { %7464 = vmatpush3.msra.mxu1 %v5984_v60  ;;  %v4976_v49 = vpop.f32.mrf.mxu1  ;;  %7508 = vmatpush3.msra.mxu0 %v6016_v54  ;;  %v6009_v54 = vld [vmem:[%s10433_s23 + $0x218] sm:$0xff] }
 0xf71   :  { %7465 = vmatprep.subr.mxu1 %v5999_v33  ;;  %v4977_v4 = vadd.f32 %v4976_v49, %v10604_v39  ;;  %7509 = vmatprep.subr.mxu0 %v6031_v6  ;;  %v6024_v33 = vld [vmem:[%s10433_s23 + $0x290] sm:$0xff]  ;;  %v5991_v6 = vld [vmem:[%s10433_s23 + $0x188] sm:$0xff] }
 0xf72   :  { %7466 = vmatpush3.msra.mxu1 %v5983_v46  ;;  %v4980_v31 = vpop.f32.mrf.mxu1  ;;  %7510 = vmatpush3.msra.mxu0 %v6015_v53  ;;  %v6008_v46 = vld [vmem:[%s10433_s23 + $0x210] sm:$0xff] }
 0xf73   :  { %7467 = vmatprep.subr.mxu1 %v5998_v5  ;;  %v5066_v30 = vadd.f32 %v5065_v47, %v4977_v4  ;;  %7511 = vmatprep.subr.mxu0 %v6030_v44  ;;  %v5064_v47 = vadd.f32 %v10582_v28, %v4975_v37  ;;  %v4981_v51 = vadd.f32 %v4980_v31, %v10623_v63  ;;  %v5976_v28 = vld [vmem:[%s10433_s23 + $0x110] sm:$0xff]  ;;  %v5975_v5 = vld [vmem:[%s10433_s23 + $0x108] sm:$0xff] }
 0xf74   :  { %7468 = vmatpush3.msra.mxu1 %v5982_v25  ;;  %v4982_v41 = vpop.f32.mrf.mxu1  ;;  %7512 = vmatpush3.msra.mxu0 %v6014_v48  ;;  %v6023_v4 = vld [vmem:[%s10433_s23 + $0x288] sm:$0xff]  ;;  %v6068_v37 = vld [vmem:[%s10433_s23 + $0x3f0] sm:$0xff] }
 0xf75   :  { %7469 = vmatprep.subr.mxu1 %v5997_v40  ;;  %vm5801_vm13 = vcmp.ge.f32.partialorder %v5066_v30, 0.0  ;;  %7513 = vmatprep.subr.mxu0 %v6029_v22  ;;  %v5849_v38 = vmul.f32 0.01, %v5066_v30  ;;  %v4983_v29 = vadd.f32 %v4982_v41, %v10604_v39  ;;  %v5848_v53 = vmul.f32 0.01, %v5064_v47  ;;  %v5990_v40 = vld [vmem:[%s10433_s23 + $0x180] sm:$0xff] }
 0xf76   :  { %7470 = vmatpush3.msra.mxu1 %v5981_v7  ;;  %v4986_v12 = vpop.f32.mrf.mxu1  ;;  %7514 = vmatpush3.msra.mxu0 %v6013_v14  ;;  %vm5800_vm14 = vcmp.ge.f32.partialorder %v5064_v47, 0.0  ;;  %v5070_v48 = vadd.f32 %v10607_v23, %v4981_v51  ;;  %v6007_v31 = vld [vmem:[%s10433_s23 + $0x208] sm:$0xff]  ;;  %v5974_v22 = vld [vmem:[%s10433_s23 + $0x100] sm:$0xff]  ;;  %v6064_v51 = vld [vmem:[%s10433_s23 + $0x3d0] sm:$0xff] }
 0xf77   :  { %7471 = vmatprep.subr.mxu1 %v5996_v19  ;;  %7515 = vmatprep.subr.mxu0 %v6028_v55  ;;  %v5897_v34 = vsel %vm5801_vm13, %v5066_v30, %v5849_v38  ;;  %v5072_v36 = vadd.f32 %v5071_v15, %v4983_v29  ;;  %v4987_v15 = vadd.f32 %v4986_v12, %v10623_v63  ;;  %v6022_v7 = vld [vmem:[%s10433_s23 + $0x280] sm:$0xff]  ;;  %v6069_v55 = vld [vmem:[%s10433_s23 + $0x3f8] sm:$0xff] }
 0xf78   :  { %7472 = vmatpush3.msra.mxu1 %v5980_v45  ;;  %v4988_v27 = vpop.f32.mrf.mxu1  ;;  %7516 = vmatpush3.msra.mxu0 %v6012_v18  ;;  %v6006_v30 = vld [vmem:[%s10433_s23 + $0x200] sm:$0xff]  ;;  %v5896_v23 = vsel %vm5800_vm14, %v5064_v47, %v5848_v53  ;;  %v5860_v45 = vmul.f32 0.01, %v5070_v48  ;;  %v6053_v12 = vld [vmem:[%s10433_s23 + $0x378] sm:$0xff]  ;;  %vm5812_vm1 = vcmp.ge.f32.partialorder %v5070_v48, 0.0 }
 0xf79   :  { %7473 = vmatprep.subr.mxu1 %v5995_v9  ;;  %6290 = vmatprep.mubr.f32.mxu1 %v5897_v34  ;;  %v4989_v0 = vadd.f32 %v4988_v27, %v10604_v39  ;;  %v5861_v25 = vmul.f32 0.01, %v5072_v36  ;;  %vm5813_vm15 = vcmp.ge.f32.partialorder %v5072_v36, 0.0  ;;  %v5076_v18 = vadd.f32 %v10630_v35, %v4987_v15  ;;  %v6101_v38 = vld [vmem:[%s10433_s23 + $0x4f8] sm:$0xff]  ;;  %v6052_v35 = vld [vmem:[%s10433_s23 + $0x370] sm:$0xff]  ;;  %v6067_v34 = vld [vmem:[%s10433_s23 + $0x3e8] sm:$0xff] }
 0xf7a   :  { %7474 = vmatpush3.msra.mxu1 %v5979_v3  ;;  %v4992_v57 = vpop.f32.mrf.mxu1  ;;  %7517 = vmatprep.subr.mxu0 %v6027_v20  ;;  %v5908_v27 = vsel %vm5812_vm1, %v5070_v48, %v5860_v45  ;;  %v6062_v53 = vld [vmem:[%s10433_s23 + $0x3c0] sm:$0xff]  ;;  %v6045_v48 = vld [vmem:[%s10433_s23 + $0x338] sm:$0xff] }
 0xf7b   :  { %7475 = vmatprep.subr.mxu1 %v5994_v58  ;;  %7518 = vmatpush3.msra.mxu0 %v6011_v26  ;;  %v5078_v49 = vadd.f32 %v5077_v43, %v4989_v0  ;;  %v5909_v19 = vsel %vm5813_vm15, %v5072_v36, %v5861_v25  ;;  %v4993_v9 = vadd.f32 %v4992_v57, %v10623_v63  ;;  %v5872_v63 = vmul.f32 0.01, %v5076_v18  ;;  %v6051_v26 = vld [vmem:[%s10433_s23 + $0x368] sm:$0xff]  ;;  %v6050_v57 = vld [vmem:[%s10433_s23 + $0x360] sm:$0xff]  ;;  %v6049_v0 = vld [vmem:[%s10433_s23 + $0x358] sm:$0xff] }
 0xf7c   :  { %7476 = vmatpush3.msra.mxu1 %v5978_v24  ;;  %v4994_v60 = vpop.f32.mrf.mxu1  ;;  %7519 = vmatprep.subr.mxu0 %v6026_v17  ;;  %vm5824_vm5 = vcmp.ge.f32.partialorder %v5076_v18, 0.0  ;;  %v6066_v17 = vld [vmem:[%s10433_s23 + $0x3e0] sm:$0xff]  ;;  %v4680_v36 = vsub.s32 5, %v11063_v62  ;;  %v6061_v25 = vld [vmem:[%s10433_s23 + $0x3b8] sm:$0xff] }
 0xf7d   :  { %7477 = vmatprep.subr.mxu1 %v5993_v61  ;;  %7520 = vmatpush3.msra.mxu0 %v6010_v16  ;;  %v4995_v44 = vadd.f32 %v4994_v60, %v10604_v39  ;;  %v5083_v39 = vpop.f32.mrf.mxu0  ;;  %v5873_v41 = vmul.f32 0.01, %v5078_v49  ;;  %vm5825_vm0 = vcmp.ge.f32.partialorder %v5078_v49, 0.0  ;;  %v5082_v58 = vadd.f32 %v5081_v42, %v4993_v9  ;;  %v6048_v60 = vld [vmem:[%s10433_s23 + $0x350] sm:$0xff]  ;;  %v6047_v42 = vld [vmem:[%s10433_s23 + $0x348] sm:$0xff] }
 0xf7e   :  { %7478 = vmatpush3.msra.mxu1 %v5977_v52  ;;  %7521 = vmatprep.subr.mxu0 %v6025_v50  ;;  %v4676_v61 = vsub.s32 4, %v11063_v62  ;;  %v5920_v47 = vsel %vm5824_vm5, %v5076_v18, %v5872_v63  ;;  %v6065_v52 = vld [vmem:[%s10433_s23 + $0x3d8] sm:$0xff] }
 0xf7f   :  { %7479 = vmatprep.subr.mxu1 %v5992_v56  ;;  %7522 = vmatpush3.msra.mxu0 %v6009_v54  ;;  %v5084_v14 = vadd.f32 %v5083_v39, %v4995_v44  ;;  %v5241_v3 = vpop.f32.mrf.mxu1  ;;  %v5921_v29 = vsel %vm5825_vm0, %v5078_v49, %v5873_v41  ;;  %v5884_v16 = vmul.f32 0.01, %v5082_v58  ;;  %vm5836_vm6 = vcmp.ge.f32.partialorder %v5082_v58, 0.0  ;;  %v6046_v49 = vld [vmem:[%s10433_s23 + $0x340] sm:$0xff]  ;;  %v6044_v39 = vld [vmem:[%s10433_s23 + $0x330] sm:$0xff] }
 0xf80   :  { %7480 = vmatpush3.msra.mxu1 %v5976_v28  ;;  %7523 = vmatprep.subr.mxu0 %v6024_v33  ;;  %v10683_v56 = vrot.slane %v10474_v21, %v4676_v61  ;;  %v6063_v28 = vld [vmem:[%s10433_s23 + $0x3c8] sm:$0xff]  ;;  %v10688_v33 = vrot.slane %v10474_v21, %v4680_v36 }
 0xf81   :  { %7481 = vmatprep.subr.mxu1 %v5991_v6  ;;  %7524 = vmatpush3.msra.mxu0 %v6008_v46  ;;  %v5885_v20 = vmul.f32 0.01, %v5084_v14  ;;  %vm5837_vm4 = vcmp.ge.f32.partialorder %v5084_v14, 0.0  ;;  %v5243_v24 = vpop.f32.mrf.mxu1  ;;  %v5932_v54 = vsel %vm5836_vm6, %v5082_v58, %v5884_v16  ;;  %v6057_v58 = vld [vmem:[%s10433_s23 + $0x398] sm:$0xff]  ;;  %v6100_v16 = vld [vmem:[%s10433_s23 + $0x4f0] sm:$0xff] }
 0xf82   :  { %7482 = vmatpush3.msra.mxu1 %v5975_v5  ;;  %7525 = vmatprep.subr.mxu0 %v6023_v4 }
 0xf83   :  { %7483 = vmatprep.subr.mxu1 %v5990_v40  ;;  %7526 = vmatpush3.msra.mxu0 %v6007_v31  ;;  %v5933_v43 = vsel %vm5837_vm4, %v5084_v14, %v5885_v20  ;;  %v6060_v31 = vld [vmem:[%s10433_s23 + $0x3b0] sm:$0xff]  ;;  %v6059_v14 = vld [vmem:[%s10433_s23 + $0x3a8] sm:$0xff] }
 0xf84   :  { %7484 = vmatpush3.msra.mxu1 %v5974_v22  ;;  %7527 = vmatprep.subr.mxu0 %v6022_v7  ;;  %v5247_v50 = vpop.f32.mrf.mxu1 }
 0xf85   :  { %6291 = vmatmul.mubr.f32.vlgmr.msra.gmra.mxu1 %v5896_v23  ;;  %7528 = vmatpush3.msra.mxu0 %v6006_v30 }
 0xf86   :  { %6295 = vmatprep.mubr.f32.mxu1 %v5909_v19  ;;  %7541 = vmatprep.subr.mxu1 %v6069_v55  ;;  %v5249_v6 = vpop.f32.mrf.mxu1  ;;  %v6043_v55 = vld [vmem:[%s10433_s23 + $0x328] sm:$0xff] }
 0xf87   :  { %7542 = vmatpush3.msra.mxu1 %v6053_v12  ;;  %7585 = vmatprep.subr.mxu0 %v6101_v38  ;;  %v6058_v12 = vld [vmem:[%s10433_s23 + $0x3a0] sm:$0xff] }
 0xf88   :  { %7543 = vmatprep.subr.mxu1 %v6068_v37 }
 0xf89   :  { %6296 = vmatmul.mubr.f32.gmra.mxu1 %v5908_v27  ;;  %v5253_v15 = vpop.f32.mrf.mxu1  ;;  %v6085_v27 = vld [vmem:[%s10433_s23 + $0x478] sm:$0xff] }
 0xf8a   :  { %6300 = vmatprep.mubr.f32.mxu1 %v5921_v29  ;;  %7544 = vmatpush3.msra.mxu1 %v6052_v35 }
 0xf8b   :  { %7545 = vmatprep.subr.mxu1 %v6067_v34  ;;  %v5255_v45 = vpop.f32.mrf.mxu1 }
 0xf8c   :  { %7546 = vmatpush3.msra.mxu1 %v6051_v26 }
 0xf8d   :  { %6301 = vmatmul.mubr.f32.gmra.mxu1 %v5920_v47  ;;  %7547 = vmatprep.subr.mxu1 %v6066_v17  ;;  %v6041_v17 = vld [vmem:[%s10433_s23 + $0x318] sm:$0xff] }
 0xf8e   :  { %6305 = vmatprep.mubr.f32.mxu1 %v5933_v43  ;;  %7548 = vmatpush3.msra.mxu1 %v6050_v57  ;;  %v5259_v43 = vpop.f32.mrf.mxu1  ;;  %v6056_v57 = vld [vmem:[%s10433_s23 + $0x390] sm:$0xff] }
 0xf8f   :  { %7549 = vmatprep.subr.mxu1 %v6065_v52 }
 0xf90   :  { %7550 = vmatpush3.msra.mxu1 %v6049_v0  ;;  %v6040_v0 = vld [vmem:[%s10433_s23 + $0x310] sm:$0xff] }
 0xf91   :  { %6306 = vmatmul.mubr.f32.gmra.mxu1 %v5932_v54  ;;  %7551 = vmatprep.subr.mxu1 %v6064_v51  ;;  %v6055_v54 = vld [vmem:[%s10433_s23 + $0x388] sm:$0xff] }
 0xf92   :  { %v5152_v46 = vpop.f32.mrf.mxu0  ;;  %7552 = vmatpush3.msra.mxu1 %v6048_v60 }
 0xf93   :  { %v5153_v5 = vadd.f32 %v5152_v46, %v10683_v56  ;;  %7553 = vmatprep.subr.mxu1 %v6063_v28  ;;  %v6084_v28 = vld [vmem:[%s10433_s23 + $0x470] sm:$0xff]  ;;  %v6039_v46 = vld [vmem:[%s10433_s23 + $0x308] sm:$0xff] }
 0xf94   :  { %v5154_v44 = vpop.f32.mrf.mxu0  ;;  %7554 = vmatpush3.msra.mxu1 %v6047_v42 }
 0xf95   :  { %v5242_v4 = vadd.f32 %v5241_v3, %v5153_v5  ;;  %v5155_v21 = vadd.f32 %v5154_v44, %v10688_v33  ;;  %7555 = vmatprep.subr.mxu1 %v6062_v53  ;;  %v6042_v3 = vld [vmem:[%s10433_s23 + $0x320] sm:$0xff]  ;;  %v5261_v53 = vpop.f32.mrf.mxu1 }
 0xf96   :  { %v5158_v40 = vpop.f32.mrf.mxu0  ;;  %7556 = vmatpush3.msra.mxu1 %v6046_v49  ;;  %v6054_v5 = vld [vmem:[%s10433_s23 + $0x380] sm:$0xff]  ;;  %v6099_v49 = vld [vmem:[%s10433_s23 + $0x4e8] sm:$0xff] }
 0xf97   :  { %v5244_v22 = vadd.f32 %v5243_v24, %v5155_v21  ;;  %v5159_v7 = vadd.f32 %v5158_v40, %v10683_v56  ;;  %7557 = vmatprep.subr.mxu1 %v6061_v25  ;;  %v5850_v30 = vmul.f32 0.01, %v5242_v4  ;;  %vm5802_vm2 = vcmp.ge.f32.partialorder %v5242_v4, 0.0  ;;  %v6133_v21 = vld [vmem:[%s10433_s23 + $0x5f8] sm:$0xff] }
 0xf98   :  { %v5160_v23 = vpop.f32.mrf.mxu0  ;;  %7558 = vmatpush3.msra.mxu1 %v6045_v48 }
 0xf99   :  { %v5248_v19 = vadd.f32 %v5247_v50, %v5159_v7  ;;  %v5161_v41 = vadd.f32 %v5160_v23, %v10688_v33  ;;  %vm5803_vm3 = vcmp.ge.f32.partialorder %v5244_v22, 0.0  ;;  %7559 = vmatprep.subr.mxu1 %v6060_v31  ;;  %v5851_v9 = vmul.f32 0.01, %v5244_v22  ;;  %v6098_v31 = vld [vmem:[%s10433_s23 + $0x4e0] sm:$0xff] }
 0xf9a   :  { %v5164_v18 = vpop.f32.mrf.mxu0  ;;  %7560 = vmatpush3.msra.mxu1 %v6044_v39  ;;  %v5898_v29 = vsel %vm5802_vm2, %v5242_v4, %v5850_v30  ;;  %v6038_v4 = vld [vmem:[%s10433_s23 + $0x300] sm:$0xff]  ;;  %v6097_v39 = vld [vmem:[%s10433_s23 + $0x4d8] sm:$0xff] }
 0xf9b   :  { %v5250_v38 = vadd.f32 %v5249_v6, %v5161_v41  ;;  %v5165_v37 = vadd.f32 %v5164_v18, %v10683_v56  ;;  %7561 = vmatprep.subr.mxu1 %v6059_v14  ;;  %v5862_v20 = vmul.f32 0.01, %v5248_v19  ;;  %v5899_v63 = vsel %vm5803_vm3, %v5244_v22, %v5851_v9  ;;  %v6082_v22 = vld [vmem:[%s10433_s23 + $0x460] sm:$0xff]  ;;  %v6081_v30 = vld [vmem:[%s10433_s23 + $0x458] sm:$0xff]  ;;  %v6096_v14 = vld [vmem:[%s10433_s23 + $0x4d0] sm:$0xff] }
 0xf9c   :  { %v5166_v35 = vpop.f32.mrf.mxu0  ;;  %vm5814_vm7 = vcmp.ge.f32.partialorder %v5248_v19, 0.0  ;;  %7562 = vmatpush3.msra.mxu1 %v6043_v55  ;;  %6375 = vmatprep.mubr.f32.mxu0 %v5899_v63  ;;  %v6095_v41 = vld [vmem:[%s10433_s23 + $0x4c8] sm:$0xff]  ;;  %v6078_v18 = vld [vmem:[%s10433_s23 + $0x440] sm:$0xff]  ;;  %v6093_v9 = vld [vmem:[%s10433_s23 + $0x4b8] sm:$0xff] }
 0xf9d   :  { %v5254_v34 = vadd.f32 %v5253_v15, %v5165_v37  ;;  %v5167_v26 = vadd.f32 %v5166_v35, %v10688_v33  ;;  %vm5815_vm8 = vcmp.ge.f32.partialorder %v5250_v38, 0.0  ;;  %v5863_v24 = vmul.f32 0.01, %v5250_v38  ;;  %7563 = vmatprep.subr.mxu1 %v6058_v12  ;;  %6376 = vmatmul.mubr.f32.vlgmr.msra.gmra.mxu0 %v5898_v29  ;;  %v6079_v55 = vld [vmem:[%s10433_s23 + $0x448] sm:$0xff]  ;;  %v6077_v12 = vld [vmem:[%s10433_s23 + $0x438] sm:$0xff]  ;;  %v6076_v37 = vld [vmem:[%s10433_s23 + $0x430] sm:$0xff] }
 0xf9e   :  { %v5170_v61 = vpop.f32.mrf.mxu0  ;;  %7564 = vmatpush3.msra.mxu1 %v6042_v3  ;;  %7586 = vmatpush3.msra.mxu0 %v6085_v27  ;;  %v5910_v60 = vsel %vm5814_vm7, %v5248_v19, %v5862_v20  ;;  %v6080_v19 = vld [vmem:[%s10433_s23 + $0x450] sm:$0xff]  ;;  %v6091_v3 = vld [vmem:[%s10433_s23 + $0x4a8] sm:$0xff]  ;;  %v6090_v20 = vld [vmem:[%s10433_s23 + $0x4a0] sm:$0xff] }
 0xf9f   :  { %v5256_v47 = vadd.f32 %v5255_v45, %v5167_v26  ;;  %v5171_v52 = vadd.f32 %v5170_v61, %v10683_v56  ;;  %v5911_v36 = vsel %vm5815_vm8, %v5250_v38, %v5863_v24  ;;  %7565 = vmatprep.subr.mxu1 %v6057_v58  ;;  %v5874_v50 = vmul.f32 0.01, %v5254_v34  ;;  %7587 = vmatprep.subr.mxu0 %v6100_v16  ;;  %v6094_v45 = vld [vmem:[%s10433_s23 + $0x4c0] sm:$0xff]  ;;  %v6092_v38 = vld [vmem:[%s10433_s23 + $0x4b0] sm:$0xff]  ;;  %v6075_v29 = vld [vmem:[%s10433_s23 + $0x428] sm:$0xff] }
 0xfa0   :  { %v5172_v51 = vpop.f32.mrf.mxu0  ;;  %6380 = vmatprep.mubr.f32.mxu0 %v5911_v36  ;;  %7566 = vmatpush3.msra.mxu1 %v6041_v17  ;;  %vm5826_vm10 = vcmp.ge.f32.partialorder %v5254_v34, 0.0  ;;  %v6074_v35 = vld [vmem:[%s10433_s23 + $0x420] sm:$0xff]  ;;  %v6089_v63 = vld [vmem:[%s10433_s23 + $0x498] sm:$0xff]  ;;  %v6088_v27 = vld [vmem:[%s10433_s23 + $0x490] sm:$0xff]  ;;  %v4684_v16 = vsub.s32 6, %v11063_v62 }
 0xfa1   :  { %v5260_v42 = vadd.f32 %v5259_v43, %v5171_v52  ;;  %v5173_v6 = vadd.f32 %v5172_v51, %v10688_v33  ;;  %vm5827_vm9 = vcmp.ge.f32.partialorder %v5256_v47, 0.0  ;;  %v5875_v56 = vmul.f32 0.01, %v5256_v47  ;;  %7567 = vmatprep.subr.mxu1 %v6056_v57  ;;  %6381 = vmatmul.mubr.f32.gmra.mxu0 %v5910_v60  ;;  %v6083_v33 = vld [vmem:[%s10433_s23 + $0x468] sm:$0xff]  ;;  %v6073_v58 = vld [vmem:[%s10433_s23 + $0x418] sm:$0xff]  ;;  %v6072_v26 = vld [vmem:[%s10433_s23 + $0x410] sm:$0xff] }
 0xfa2   :  { %7568 = vmatpush3.msra.mxu1 %v6040_v0  ;;  %7588 = vmatpush3.msra.mxu0 %v6084_v28  ;;  %v5922_v15 = vsel %vm5826_vm10, %v5254_v34, %v5874_v50  ;;  %v6087_v24 = vld [vmem:[%s10433_s23 + $0x488] sm:$0xff]  ;;  %v6086_v43 = vld [vmem:[%s10433_s23 + $0x480] sm:$0xff] }
 0xfa3   :  { %v5262_v44 = vadd.f32 %v5261_v53, %v5173_v6  ;;  %v5923_v25 = vsel %vm5827_vm9, %v5256_v47, %v5875_v56  ;;  %7569 = vmatprep.subr.mxu1 %v6055_v54  ;;  %v5886_v48 = vmul.f32 0.01, %v5260_v42  ;;  %7589 = vmatprep.subr.mxu0 %v6099_v49  ;;  %vm5838_vm12 = vcmp.ge.f32.partialorder %v5260_v42, 0.0  ;;  %v5419_v34 = vpop.f32.mrf.mxu0  ;;  %v6071_v17 = vld [vmem:[%s10433_s23 + $0x408] sm:$0xff]  ;;  %v6070_v57 = vld [vmem:[%s10433_s23 + $0x400] sm:$0xff] }
 0xfa4   :  { %6385 = vmatprep.mubr.f32.mxu0 %v5923_v25  ;;  %7570 = vmatpush3.msra.mxu1 %v6039_v46  ;;  %v4688_v47 = vsub.s32 7, %v11063_v62  ;;  %v8365_v36 = vld [vmem:[%s10452_s1] sm:$0xff] }
 0xfa5   :  { %vm5839_vm11 = vcmp.ge.f32.partialorder %v5262_v44, 0.0  ;;  %v5887_v40 = vmul.f32 0.01, %v5262_v44  ;;  %7571 = vmatprep.subr.mxu1 %v6054_v5  ;;  %6386 = vmatmul.mubr.f32.gmra.mxu0 %v5922_v15  ;;  %v5934_v23 = vsel %vm5838_vm12, %v5260_v42, %v5886_v48  ;;  %v5421_v61 = vpop.f32.mrf.mxu0  ;;  %v4685_v0 = vrot.slane %v8365_v36, %v4684_v16 }
 0xfa6   :  { %7572 = vmatpush3.msra.mxu1 %v6038_v4  ;;  %7590 = vmatpush3.msra.mxu0 %v6083_v33  ;;  %v4689_v50 = vrot.slane %v8365_v36, %v4688_v47  ;;  %v6128_v36 = vld [vmem:[%s10433_s23 + $0x5d0] sm:$0xff] }
 0xfa7   :  { %v5935_v7 = vsel %vm5839_vm11, %v5262_v44, %v5887_v40  ;;  %7629 = vmatprep.subr.mxu1 %v6133_v21  ;;  %7591 = vmatprep.subr.mxu0 %v6098_v31 }
 0xfa8   :  { %6390 = vmatprep.mubr.f32.mxu0 %v5935_v7  ;;  %7592 = vmatpush3.msra.mxu0 %v6082_v22  ;;  %v5425_v52 = vpop.f32.mrf.mxu0 }
 0xfa9   :  { %6391 = vmatmul.mubr.f32.gmra.mxu0 %v5934_v23  ;;  %7593 = vmatprep.subr.mxu0 %v6097_v39 }
 0xfaa   :  { %7594 = vmatpush3.msra.mxu0 %v6081_v30  ;;  %v5427_v51 = vpop.f32.mrf.mxu0  ;;  %v6117_v30 = vld [vmem:[%s10433_s23 + $0x578] sm:$0xff] }
 0xfab   :  { %7595 = vmatprep.subr.mxu0 %v6096_v14 }
 0xfac   :  { %7596 = vmatpush3.msra.mxu0 %v6080_v19 }
 0xfad   :  { %7597 = vmatprep.subr.mxu0 %v6095_v41  ;;  %v5431_v56 = vpop.f32.mrf.mxu0  ;;  %v6132_v41 = vld [vmem:[%s10433_s23 + $0x5f0] sm:$0xff] }
 0xfae   :  { %7598 = vmatpush3.msra.mxu0 %v6079_v55 }
 0xfaf   :  { %7599 = vmatprep.subr.mxu0 %v6094_v45  ;;  %v5433_v33 = vpop.f32.mrf.mxu0 }
 0xfb0   :  { %7600 = vmatpush3.msra.mxu0 %v6078_v18  ;;  %v6116_v18 = vld [vmem:[%s10433_s23 + $0x570] sm:$0xff] }
 0xfb1   :  { %7601 = vmatprep.subr.mxu0 %v6093_v9 }
 0xfb2   :  { %7602 = vmatpush3.msra.mxu0 %v6077_v12  ;;  %v5437_v55 = vpop.f32.mrf.mxu0 }
 0xfb3   :  { %7603 = vmatprep.subr.mxu0 %v6092_v38 }
 0xfb4   :  { %7604 = vmatpush3.msra.mxu0 %v6076_v37  ;;  %v6131_v37 = vld [vmem:[%s10433_s23 + $0x5e8] sm:$0xff] }
 0xfb5   :  { %7605 = vmatprep.subr.mxu0 %v6091_v3 }
 0xfb6   :  { %7606 = vmatpush3.msra.mxu0 %v6075_v29 }
 0xfb7   :  { %7607 = vmatprep.subr.mxu0 %v6090_v20 }
 0xfb8   :  { %7608 = vmatpush3.msra.mxu0 %v6074_v35  ;;  %v6115_v35 = vld [vmem:[%s10433_s23 + $0x568] sm:$0xff] }
 0xfb9   :  { %7609 = vmatprep.subr.mxu0 %v6089_v63 }
 0xfba   :  { %7610 = vmatpush3.msra.mxu0 %v6073_v58 }
 0xfbb   :  { %7611 = vmatprep.subr.mxu0 %v6088_v27 }
 0xfbc   :  { %7612 = vmatpush3.msra.mxu0 %v6072_v26  ;;  %v5439_v26 = vpop.f32.mrf.mxu0 }
 0xfbd   :  { %7613 = vmatprep.subr.mxu0 %v6087_v24  ;;  %v6114_v24 = vld [vmem:[%s10433_s23 + $0x560] sm:$0xff] }
 0xfbe   :  { %7614 = vmatpush3.msra.mxu0 %v6071_v17 }
 0xfbf   :  { %7615 = vmatprep.subr.mxu0 %v6086_v43 }
 0xfc0   :  { %7616 = vmatpush3.msra.mxu0 %v6070_v57  ;;  %v6113_v57 = vld [vmem:[%s10433_s23 + $0x558] sm:$0xff] }
 0xfc6   :  { %v5330_v60 = vpop.f32.mrf.mxu1 }
 0xfc7   :  { %v5331_v54 = vadd.f32 %v5330_v60, %v4685_v0  ;;  %v6111_v60 = vld [vmem:[%s10433_s23 + $0x548] sm:$0xff] }
 0xfc8   :  { %v5332_v28 = vpop.f32.mrf.mxu1 }
 0xfc9   :  { %v5420_v42 = vadd.f32 %v5419_v34, %v5331_v54  ;;  %v5333_v6 = vadd.f32 %v5332_v28, %v4689_v50  ;;  %v6130_v34 = vld [vmem:[%s10433_s23 + $0x5e0] sm:$0xff] }
 0xfca   :  { %v5336_v46 = vpop.f32.mrf.mxu1  ;;  %v6126_v28 = vld [vmem:[%s10433_s23 + $0x5c0] sm:$0xff] }
 0xfcb   :  { %v5422_v53 = vadd.f32 %v5421_v61, %v5333_v6  ;;  %v5337_v5 = vadd.f32 %v5336_v46, %v4685_v0  ;;  %v5852_v49 = vmul.f32 0.01, %v5420_v42  ;;  %vm5804_vm13 = vcmp.ge.f32.partialorder %v5420_v42, 0.0  ;;  %v6129_v61 = vld [vmem:[%s10433_s23 + $0x5d8] sm:$0xff]  ;;  %v6110_v6 = vld [vmem:[%s10433_s23 + $0x540] sm:$0xff] }
 0xfcc   :  { %v5338_v44 = vpop.f32.mrf.mxu1  ;;  %v6109_v46 = vld [vmem:[%s10433_s23 + $0x538] sm:$0xff] }
 0xfcd   :  { %v5426_v25 = vadd.f32 %v5425_v52, %v5337_v5  ;;  %v5339_v4 = vadd.f32 %v5338_v44, %v4689_v50  ;;  %vm5805_vm14 = vcmp.ge.f32.partialorder %v5422_v53, 0.0  ;;  %v5853_v48 = vmul.f32 0.01, %v5422_v53  ;;  %v6123_v44 = vld [vmem:[%s10433_s23 + $0x5a8] sm:$0xff] }
 0xfce   :  { %v5342_v21 = vpop.f32.mrf.mxu1  ;;  %v5900_v31 = vsel %vm5804_vm13, %v5420_v42, %v5852_v49  ;;  %v6108_v49 = vld [vmem:[%s10433_s23 + $0x530] sm:$0xff] }
 0xfcf   :  { %v5428_v15 = vadd.f32 %v5427_v51, %v5339_v4  ;;  %v5343_v40 = vadd.f32 %v5342_v21, %v4685_v0  ;;  %v5864_v22 = vmul.f32 0.01, %v5426_v25  ;;  %v5901_v39 = vsel %vm5805_vm14, %v5422_v53, %v5853_v48  ;;  %v6127_v51 = vld [vmem:[%s10433_s23 + $0x5c8] sm:$0xff]  ;;  %v6124_v53 = vld [vmem:[%s10433_s23 + $0x5b0] sm:$0xff]  ;;  %v6106_v48 = vld [vmem:[%s10433_s23 + $0x520] sm:$0xff] }
 0xfd0   :  { %v5344_v7 = vpop.f32.mrf.mxu1  ;;  %vm5816_vm15 = vcmp.ge.f32.partialorder %v5426_v25, 0.0  ;;  %6460 = vmatprep.mubr.f32.mxu1 %v5901_v39  ;;  %v6107_v4 = vld [vmem:[%s10433_s23 + $0x528] sm:$0xff] }
 0xfd1   :  { %v5432_v23 = vadd.f32 %v5431_v56, %v5343_v40  ;;  %v5345_v14 = vadd.f32 %v5344_v7, %v4689_v50  ;;  %vm5817_vm0 = vcmp.ge.f32.partialorder %v5428_v15, 0.0  ;;  %v5865_v19 = vmul.f32 0.01, %v5428_v15  ;;  %6461 = vmatmul.mubr.f32.vlgmr.msra.gmra.mxu1 %v5900_v31  ;;  %v6125_v56 = vld [vmem:[%s10433_s23 + $0x5b8] sm:$0xff]  ;;  %v6120_v7 = vld [vmem:[%s10433_s23 + $0x590] sm:$0xff] }
 0xfd2   :  { %v5348_v45 = vpop.f32.mrf.mxu1  ;;  %7630 = vmatpush3.msra.mxu1 %v6117_v30  ;;  %v5912_v20 = vsel %vm5816_vm15, %v5426_v25, %v5864_v22  ;;  %v10775_v25 = vld [vmem:[%s10452_s1 + $0x8] sm:$0xf]  ;;  %v6121_v40 = vld [vmem:[%s10433_s23 + $0x598] sm:$0xff] }
 0xfd3   :  { %v5434_v9 = vadd.f32 %v5433_v33, %v5345_v14  ;;  %v5349_v12 = vadd.f32 %v5348_v45, %v4685_v0  ;;  %v5913_v38 = vsel %vm5817_vm0, %v5428_v15, %v5865_v19  ;;  %v5876_v3 = vmul.f32 0.01, %v5432_v23  ;;  %7631 = vmatprep.subr.mxu1 %v6132_v41  ;;  %v6112_v0 = vld [vmem:[%s10433_s23 + $0x550] sm:$0xff]  ;;  %v6122_v33 = vld [vmem:[%s10433_s23 + $0x5a0] sm:$0xff]  ;;  %v6105_v31 = vld [vmem:[%s10433_s23 + $0x518] sm:$0xff] }
 0xfd4   :  { %v5350_v29 = vpop.f32.mrf.mxu1  ;;  %6465 = vmatprep.mubr.f32.mxu1 %v5913_v38  ;;  %7632 = vmatpush3.msra.mxu1 %v6116_v18  ;;  %vm5828_vm4 = vcmp.ge.f32.partialorder %v5432_v23, 0.0  ;;  %v4693_v15 = vrot.slane %v10775_v25, %v11046_v32  ;;  %v4697_v22 = vrot.slane %v10775_v25, %v8935_v10  ;;  %v6119_v19 = vld [vmem:[%s10433_s23 + $0x588] sm:$0xff]  ;;  %v6118_v18 = vld [vmem:[%s10433_s23 + $0x580] sm:$0xff] }
 0xfd5   :  { %v5438_v63 = vadd.f32 %v5437_v55, %v5349_v12  ;;  %v5351_v58 = vadd.f32 %v5350_v29, %v4689_v50  ;;  %vm5829_vm1 = vcmp.ge.f32.partialorder %v5434_v9, 0.0  ;;  %v5877_v27 = vmul.f32 0.01, %v5434_v9  ;;  %6466 = vmatmul.mubr.f32.gmra.mxu1 %v5912_v20  ;;  %7633 = vmatprep.subr.mxu1 %v6131_v37  ;;  %v6103_v41 = vld [vmem:[%s10433_s23 + $0x508] sm:$0xff]  ;;  %v6102_v12 = vld [vmem:[%s10433_s23 + $0x500] sm:$0xff] }
 0xfd6   :  { %7634 = vmatpush3.msra.mxu1 %v6115_v35  ;;  %v5924_v47 = vsel %vm5828_vm4, %v5432_v23, %v5876_v3  ;;  %v6104_v23 = vld [vmem:[%s10433_s23 + $0x510] sm:$0xff] }
 0xfd7   :  { %v5440_v17 = vadd.f32 %v5439_v26, %v5351_v58  ;;  %v5925_v43 = vsel %vm5829_vm1, %v5434_v9, %v5877_v27  ;;  %7635 = vmatprep.subr.mxu1 %v6130_v34  ;;  %v5888_v16 = vmul.f32 0.01, %v5438_v63  ;;  %vm5840_vm6 = vcmp.ge.f32.partialorder %v5438_v63, 0.0  ;;  %v5597_v42 = vpop.f32.mrf.mxu1 }
 0xfd8   :  { %6470 = vmatprep.mubr.f32.mxu1 %v5925_v43  ;;  %7636 = vmatpush3.msra.mxu1 %v6114_v24 }
 0xfd9   :  { %vm5841_vm5 = vcmp.ge.f32.partialorder %v5440_v17, 0.0  ;;  %v5889_v52 = vmul.f32 0.01, %v5440_v17  ;;  %6471 = vmatmul.mubr.f32.gmra.mxu1 %v5924_v47  ;;  %7637 = vmatprep.subr.mxu1 %v6129_v61  ;;  %v5936_v54 = vsel %vm5840_vm6, %v5438_v63, %v5888_v16  ;;  %v5599_v5 = vpop.f32.mrf.mxu1 }
 0xfda   :  { %7638 = vmatpush3.msra.mxu1 %v6113_v57 }
 0xfdb   :  { %v5937_v50 = vsel %vm5841_vm5, %v5440_v17, %v5889_v52  ;;  %7639 = vmatprep.subr.mxu1 %v6128_v36 }
 0xfdc   :  { %6475 = vmatprep.mubr.f32.mxu1 %v5937_v50  ;;  %7640 = vmatpush3.msra.mxu1 %v6112_v0  ;;  %v5603_v21 = vpop.f32.mrf.mxu1 }
 0xfdd   :  { %6476 = vmatmul.mubr.f32.gmra.mxu1 %v5936_v54  ;;  %7641 = vmatprep.subr.mxu1 %v6127_v51 }
 0xfde   :  { %7642 = vmatpush3.msra.mxu1 %v6111_v60  ;;  %v5605_v39 = vpop.f32.mrf.mxu1 }
 0xfdf   :  { %7643 = vmatprep.subr.mxu1 %v6126_v28 }
 0xfe0   :  { %7644 = vmatpush3.msra.mxu1 %v6110_v6 }
 0xfe1   :  { %7645 = vmatprep.subr.mxu1 %v6125_v56  ;;  %v5609_v9 = vpop.f32.mrf.mxu1 }
 0xfe2   :  { %7646 = vmatpush3.msra.mxu1 %v6109_v46 }
 0xfe3   :  { %7647 = vmatprep.subr.mxu1 %v6124_v53  ;;  %v5611_v63 = vpop.f32.mrf.mxu1 }
 0xfe4   :  { %7648 = vmatpush3.msra.mxu1 %v6108_v49 }
 0xfe5   :  { %7649 = vmatprep.subr.mxu1 %v6123_v44 }
 0xfe6   :  { %7650 = vmatpush3.msra.mxu1 %v6107_v4  ;;  %v5615_v52 = vpop.f32.mrf.mxu1 }
 0xfe7   :  { %7651 = vmatprep.subr.mxu1 %v6122_v33 }
 0xfe8   :  { %7652 = vmatpush3.msra.mxu1 %v6106_v48  ;;  %v5617_v46 = vpop.f32.mrf.mxu1 }
 0xfe9   :  { %7653 = vmatprep.subr.mxu1 %v6121_v40 }
 0xfea   :  { %v5508_v30 = vpop.f32.mrf.mxu0  ;;  %7654 = vmatpush3.msra.mxu1 %v6105_v31  ;;  %v4701_v31 = vrot.slane %v10775_v25, %v11064_v59 }
 0xfeb   :  { %v5509_v14 = vadd.f32 %v5508_v30, %v4693_v15  ;;  %7655 = vmatprep.subr.mxu1 %v6120_v7 }
 0xfec   :  { %v5510_v32 = vpop.f32.mrf.mxu0  ;;  %7656 = vmatpush3.msra.mxu1 %v6104_v23 }
 0xfed   :  { %v5598_v55 = vadd.f32 %v5597_v42, %v5509_v14  ;;  %v5511_v45 = vadd.f32 %v5510_v32, %v4697_v22  ;;  %7657 = vmatprep.subr.mxu1 %v6119_v19 }
 0xfee   :  { %v5514_v10 = vpop.f32.mrf.mxu0  ;;  %7658 = vmatpush3.msra.mxu1 %v6103_v41 }
 0xfef   :  { %v5600_v38 = vadd.f32 %v5599_v5, %v5511_v45  ;;  %v5515_v37 = vadd.f32 %v5514_v10, %v4693_v15  ;;  %v5854_v3 = vmul.f32 0.01, %v5598_v55  ;;  %7659 = vmatprep.subr.mxu1 %v6118_v18  ;;  %vm5806_vm2 = vcmp.ge.f32.partialorder %v5598_v55, 0.0 }
 0xff0   :  { %v5516_v29 = vpop.f32.mrf.mxu0  ;;  %7660 = vmatpush3.msra.mxu1 %v6102_v12 }
 0xff1   :  { %v5604_v20 = vadd.f32 %v5603_v21, %v5515_v37  ;;  %v5517_v35 = vadd.f32 %v5516_v29, %v4697_v22  ;;  %vm5807_vm3 = vcmp.ge.f32.partialorder %v5600_v38, 0.0  ;;  %v5855_v27 = vmul.f32 0.01, %v5600_v38 }
 0xff2   :  { %v5520_v58 = vpop.f32.mrf.mxu0  ;;  %v5902_v24 = vsel %vm5806_vm2, %v5598_v55, %v5854_v3  ;;  %vm6835_vm2 = vcmask 7168  }
 0xff3   :  { %v5606_v34 = vadd.f32 %v5605_v39, %v5517_v35  ;;  %v5521_v26 = vadd.f32 %v5520_v58, %v4693_v15  ;;  %v5866_v17 = vmul.f32 0.01, %v5604_v20  ;;  %v5903_v61 = vsel %vm5807_vm3, %v5600_v38, %v5855_v27 }
 0xff4   :  { %v5522_v43 = vpop.f32.mrf.mxu0  ;;  %vm5818_vm7 = vcmp.ge.f32.partialorder %v5604_v20, 0.0  ;;  %6545 = vmatprep.mubr.f32.mxu0 %v5903_v61  ;;  %vm6840_vm3 = vcmask 15360  }
 0xff5   :  { %v5610_v57 = vadd.f32 %v5609_v9, %v5521_v26  ;;  %v5523_v16 = vadd.f32 %v5522_v43, %v4697_v22  ;;  %vm5819_vm8 = vcmp.ge.f32.partialorder %v5606_v34, 0.0  ;;  %v5867_v47 = vmul.f32 0.01, %v5606_v34  ;;  %6546 = vmatmul.mubr.f32.vlgmr.msra.gmra.mxu0 %v5902_v24 }
 0xff6   :  { %v5526_v36 = vpop.f32.mrf.mxu0  ;;  %v5914_v28 = vsel %vm5818_vm7, %v5604_v20, %v5866_v17  ;;  %vm6845_vm7 = vcmask 23552  }
 0xff7   :  { %v5612_v0 = vadd.f32 %v5611_v63, %v5523_v16  ;;  %v5527_v50 = vadd.f32 %v5526_v36, %v4693_v15  ;;  %v5915_v51 = vsel %vm5819_vm8, %v5606_v34, %v5867_v47  ;;  %v5878_v60 = vmul.f32 0.01, %v5610_v57 }
 0xff8   :  { %v5528_v54 = vpop.f32.mrf.mxu0  ;;  %6550 = vmatprep.mubr.f32.mxu0 %v5915_v51  ;;  %vm5830_vm10 = vcmp.ge.f32.partialorder %v5610_v57, 0.0 }
 0xff9   :  { %v5616_v42 = vadd.f32 %v5615_v52, %v5527_v50  ;;  %v5529_v6 = vadd.f32 %v5528_v54, %v4697_v22  ;;  %vm5831_vm9 = vcmp.ge.f32.partialorder %v5612_v0, 0.0  ;;  %v5879_v56 = vmul.f32 0.01, %v5612_v0  ;;  %6551 = vmatmul.mubr.f32.gmra.mxu0 %v5914_v28 }
 0xffa   :  { %v5926_v44 = vsel %vm5830_vm10, %v5610_v57, %v5878_v60  ;;  %v4705_v22 = vrot.slane %v10775_v25, %v4672_v13 }
 0xffb   :  { %v5618_v53 = vadd.f32 %v5617_v46, %v5529_v6  ;;  %v5927_v5 = vsel %vm5831_vm9, %v5612_v0, %v5879_v56  ;;  %v5890_v49 = vmul.f32 0.01, %v5616_v42  ;;  %vm5842_vm12 = vcmp.ge.f32.partialorder %v5616_v42, 0.0  ;;  %v5775_v48 = vpop.f32.mrf.mxu0 }
 0xffc   :  { %6555 = vmatprep.mubr.f32.mxu0 %v5927_v5 }
 0xffd   :  { %vm5843_vm11 = vcmp.ge.f32.partialorder %v5618_v53, 0.0  ;;  %v5891_v4 = vmul.f32 0.01, %v5618_v53  ;;  %6556 = vmatmul.mubr.f32.gmra.mxu0 %v5926_v44  ;;  %v5938_v21 = vsel %vm5842_vm12, %v5616_v42, %v5890_v49  ;;  %v5777_v15 = vpop.f32.mrf.mxu0 }
 0xfff   :  { %v5939_v33 = vsel %vm5843_vm11, %v5618_v53, %v5891_v4 }
0x1000   :  { %6560 = vmatprep.mubr.f32.mxu0 %v5939_v33  ;;  %v5781_v40 = vpop.f32.mrf.mxu0 }
0x1001   :  { %6561 = vmatmul.mubr.f32.gmra.mxu0 %v5938_v21 }
0x1002   :  { %v5783_v7 = vpop.f32.mrf.mxu0 }
0x1005   :  { %v5787_v32 = vpop.f32.mrf.mxu0 }
0x1007   :  { %v5789_v59 = vpop.f32.mrf.mxu0 }
0x100a   :  { %v5793_v58 = vpop.f32.mrf.mxu0 }
0x100c   :  { %v5795_v52 = vpop.f32.mrf.mxu0 }
0x101e   :  { %v5686_v39 = vpop.f32.mrf.mxu1  ;;  %v7441_v6 = vpop.f32.mrf.mxu0 }
0x101f   :  { %v5687_v30 = vadd.f32 %v5686_v39, %v4701_v31 }
0x1020   :  { %v5688_v23 = vpop.f32.mrf.mxu1  ;;  %v7442_v56 = vpop.f32.mrf.mxu0 }
0x1021   :  { %v5776_v14 = vadd.f32 %v5775_v48, %v5687_v30  ;;  %v5689_v19 = vadd.f32 %v5688_v23, %v4705_v22 }
0x1022   :  { %v5692_v41 = vpop.f32.mrf.mxu1  ;;  %v7444_v46 = vpop.f32.mrf.mxu0 }
0x1023   :  { %v5778_v55 = vadd.f32 %v5777_v15, %v5689_v19  ;;  %v5856_v45 = vmul.f32 0.01, %v5776_v14  ;;  %v5693_v18 = vadd.f32 %v5692_v41, %v4701_v31  ;;  %vm5808_vm13 = vcmp.ge.f32.partialorder %v5776_v14, 0.0 }
0x1024   :  { %v5694_v9 = vpop.f32.mrf.mxu1  ;;  %v7445_v53 = vpop.f32.mrf.mxu0 }
0x1025   :  { %v5695_v10 = vadd.f32 %v5694_v9, %v4705_v22  ;;  %vm5809_vm14 = vcmp.ge.f32.partialorder %v5778_v55, 0.0  ;;  %v5782_v12 = vadd.f32 %v5781_v40, %v5693_v18  ;;  %v5857_v38 = vmul.f32 0.01, %v5778_v55 }
0x1026   :  { %v5698_v62 = vpop.f32.mrf.mxu1  ;;  %v5904_v37 = vsel %vm5808_vm13, %v5776_v14, %v5856_v45  ;;  %v7447_v5 = vpop.f32.mrf.mxu0 }
0x1027   :  { %v5784_v13 = vadd.f32 %v5783_v7, %v5695_v10  ;;  %v5699_v25 = vadd.f32 %v5698_v62, %v4701_v31  ;;  %v5868_v3 = vmul.f32 0.01, %v5782_v12  ;;  %v5905_v20 = vsel %vm5809_vm14, %v5778_v55, %v5857_v38 }
0x1028   :  { %v5700_v29 = vpop.f32.mrf.mxu1  ;;  %6630 = vmatprep.mubr.f32.mxu1 %v5905_v20  ;;  %vm5820_vm0 = vcmp.ge.f32.partialorder %v5782_v12, 0.0  ;;  %v7448_v49 = vpop.f32.mrf.mxu0 }
0x1029   :  { %v5788_v35 = vadd.f32 %v5787_v32, %v5699_v25  ;;  %v5701_v63 = vadd.f32 %v5700_v29, %v4705_v22  ;;  %vm5821_vm15 = vcmp.ge.f32.partialorder %v5784_v13, 0.0  ;;  %6631 = vmatmul.mubr.f32.vlgmr.msra.gmra.mxu1 %v5904_v37  ;;  %v5869_v34 = vmul.f32 0.01, %v5784_v13  ;;  %v7218_v37 = vld [vmem:[%s6882_s6] ss:$0 sm:$0xff] }
0x102a   :  { %v5704_v27 = vpop.f32.mrf.mxu1  ;;  %v5916_v61 = vsel %vm5820_vm0, %v5782_v12, %v5868_v3  ;;  %v7450_v4 = vpop.f32.mrf.mxu0  ;;  %v7443_v25 = vadd.f32 %v7442_v56, %v7441_v6 }
0x102b   :  { %v5790_v26 = vadd.f32 %v5789_v59, %v5701_v63  ;;  %v5705_v24 = vadd.f32 %v5704_v27, %v4701_v31  ;;  %v5917_v43 = vsel %vm5821_vm15, %v5784_v13, %v5869_v34  ;;  %v5880_v57 = vmul.f32 0.01, %v5788_v35  ;;  %v6676_v34 = vpop.permute.xlu1 %6675 }
0x102c   :  { %v5706_v17 = vpop.f32.mrf.mxu1  ;;  %6635 = vmatprep.mubr.f32.mxu1 %v5917_v43  ;;  %vm5832_vm4 = vcmp.ge.f32.partialorder %v5788_v35, 0.0  ;;  %v7451_v21 = vpop.f32.mrf.mxu0  ;;  %v7446_v63 = vadd.f32 %v7445_v53, %v7444_v46  ;;  %v7449_v43 = vadd.f32 %v7448_v49, %v7447_v5 }
0x102d   :  { %v5794_v16 = vadd.f32 %v5793_v58, %v5705_v24  ;;  %v5707_v47 = vadd.f32 %v5706_v17, %v4705_v22  ;;  %vm5833_vm1 = vcmp.ge.f32.partialorder %v5790_v26, 0.0  ;;  %6636 = vmatmul.mubr.f32.gmra.mxu1 %v5916_v61  ;;  %v5881_v36 = vmul.f32 0.01, %v5790_v26 }
0x102e   :  { %v5928_v60 = vsel %vm5832_vm4, %v5788_v35, %v5880_v57  ;;  %v6208_v35 = vadd.f32 %v7443_v25, %v7218_v37  ;;  %v6213_v57 = vadd.f32 %v7446_v63, %v7218_v37 }
0x102f   :  { %v5796_v0 = vadd.f32 %v5795_v52, %v5707_v47  ;;  %v5929_v50 = vsel %vm5833_vm1, %v5790_v26, %v5881_v36  ;;  %v5892_v51 = vmul.f32 0.01, %v5794_v16  ;;  %vm5844_vm6 = vcmp.ge.f32.partialorder %v5794_v16, 0.0  ;;  %v6680_v46 = vpop.permute.xlu1 %6679 }
0x1030   :  { %6640 = vmatprep.mubr.f32.mxu1 %v5929_v50 }
0x1031   :  { %vm5845_vm5 = vcmp.ge.f32.partialorder %v5796_v0, 0.0  ;;  %v5893_v54 = vmul.f32 0.01, %v5796_v0  ;;  %6641 = vmatmul.mubr.f32.gmra.mxu1 %v5928_v60  ;;  %v5940_v42 = vsel %vm5844_vm6, %v5794_v16, %v5892_v51 }
0x1033   :  { %v5941_v28 = vsel %vm5845_vm5, %v5796_v0, %v5893_v54 }
0x1034   :  { %6645 = vmatprep.mubr.f32.mxu1 %v5941_v28  ;;  %v6218_v28 = vadd.f32 %v7449_v43, %v7218_v37 }
0x1035   :  { %6646 = vmatmul.mubr.f32.gmra.mxu1 %v5940_v42  ;;  %v7452_v42 = vadd.f32 %v7451_v21, %v7450_v4 }
0x1045   :  { %v7485_v44 = vpop.f32.mrf.mxu1 }
0x1047   :  { %v7486_v33 = vpop.f32.mrf.mxu1 }
0x1048   :  { %v7487_v29 = vadd.f32 %v7486_v33, %v7485_v44 }
0x1049   :  { %v7488_v48 = vpop.f32.mrf.mxu1 }
0x104a   :  { %v6293_v26 = vadd.f32 %v7487_v29, %v6208_v35 }
0x104b   :  { %v7489_v40 = vpop.f32.mrf.mxu1 }
0x104c   :  { %v7490_v24 = vadd.f32 %v7489_v40, %v7488_v48 }
0x104d   :  { %v7491_v22 = vpop.f32.mrf.mxu1 }
0x104e   :  { %v6298_v51 = vadd.f32 %v7490_v24, %v6213_v57 }
0x104f   :  { %v7492_v39 = vpop.f32.mrf.mxu1 }
0x1050   :  { %v7493_v36 = vadd.f32 %v7492_v39, %v7491_v22  ;;  %v6678_v39 = vpop.permute.xlu0 %6677 }
0x1051   :  { %v7494_v23 = vpop.f32.mrf.mxu1 }
0x1052   :  { %v6303_v49 = vadd.f32 %v7493_v36, %v6218_v28 }
0x1053   :  { %v7495_v19 = vpop.f32.mrf.mxu1 }
0x1054   :  { %v7496_v48 = vadd.f32 %v7495_v19, %v7494_v23  ;;  %v6656_v29 = vpop.permute.xlu0 %6655 }
0x1058   :  { %v6660_v43 = vpop.permute.xlu0 %6659 }
0x105d   :  { %v7529_v15 = vpop.f32.mrf.mxu0 }
0x105f   :  { %v7530_v31 = vpop.f32.mrf.mxu0 }
0x1060   :  { %v7531_v58 = vadd.f32 %v7530_v31, %v7529_v15 }
0x1061   :  { %v7532_v7 = vpop.f32.mrf.mxu0 }
0x1062   :  { %v6378_v16 = vadd.f32 %v7531_v58, %v6293_v26 }
0x1063   :  { %v7533_v30 = vpop.f32.mrf.mxu0 }
0x1064   :  { %v7534_v47 = vadd.f32 %v7533_v30, %v7532_v7  ;;  %v6223_v30 = vadd.f32 %v7452_v42, %v7218_v37 }
0x1065   :  { %v7535_v14 = vpop.f32.mrf.mxu0 }
0x1066   :  { %v6383_v53 = vadd.f32 %v7534_v47, %v6298_v51 }
0x1067   :  { %v7536_v32 = vpop.f32.mrf.mxu0 }
0x1068   :  { %v7537_v6 = vadd.f32 %v7536_v32, %v7535_v14 }
0x1069   :  { %v7538_v55 = vpop.f32.mrf.mxu0 }
0x106b   :  { %v7539_v18 = vpop.f32.mrf.mxu0 }
0x1091   :  { %v7573_v41 = vpop.f32.mrf.mxu1 }
0x1093   :  { %v7574_v45 = vpop.f32.mrf.mxu1 }
0x1094   :  { %v7575_v17 = vadd.f32 %v7574_v45, %v7573_v41  ;;  %v6388_v41 = vadd.f32 %v7537_v6, %v6303_v49  ;;  %v7540_v45 = vadd.f32 %v7539_v18, %v7538_v55 }
0x1095   :  { %v7576_v9 = vpop.f32.mrf.mxu1 }
0x1096   :  { %v6463_v60 = vadd.f32 %v7575_v17, %v6378_v16  ;;  %v6732_v16 = vpop.permute.xlu0 %6731 }
0x1097   :  { %v7577_v59 = vpop.f32.mrf.mxu1 }
0x1098   :  { %v7578_v54 = vadd.f32 %v7577_v59, %v7576_v9 }
0x1099   :  { %v7579_v62 = vpop.f32.mrf.mxu1 }
0x109a   :  { %v6468_v31 = vadd.f32 %v7578_v54, %v6383_v53  ;;  %v6736_v36 = vpop.permute.xlu0 %6735 }
0x109b   :  { %v7580_v13 = vpop.f32.mrf.mxu1 }
0x109c   :  { %v7581_v22 = vadd.f32 %v7580_v13, %v7579_v62  ;;  %v6682_v62 = vpop.permute.xlu1 %6681 }
0x109d   :  { %v7582_v20 = vpop.f32.mrf.mxu1 }
0x109e   :  { %v6473_v23 = vadd.f32 %v7581_v22, %v6388_v41 }
0x109f   :  { %v7583_v61 = vpop.f32.mrf.mxu1 }
0x10a0   :  { %v7584_v19 = vadd.f32 %v7583_v61, %v7582_v20  ;;  %v6658_v24 = vpop.permute.xlu1 %6657 }
0x10a4   :  { %v6662_v57 = vpop.permute.xlu1 %6661 }
0x10b5   :  { %v7617_v10 = vpop.f32.mrf.mxu0 }
0x10b7   :  { %v7618_v12 = vpop.f32.mrf.mxu0 }
0x10b8   :  { %v7619_v52 = vadd.f32 %v7618_v12, %v7617_v10  ;;  %v6308_v10 = vadd.f32 %v7496_v48, %v6223_v30 }
0x10b9   :  { %v7620_v38 = vpop.f32.mrf.mxu0 }
0x10ba   :  { %v6548_v44 = vadd.f32 %v7619_v52, %v6463_v60  ;;  %v6393_v13 = vadd.f32 %v7540_v45, %v6308_v10  ;;  %v6734_v52 = vpop.permute.xlu1 %6733  ;;  %v6768_v10 = vld [vmem:[%s6865_s24 + $0x8] sm:$0xff] }
0x10bb   :  { %v7621_v3 = vpop.f32.mrf.mxu0 }
0x10bc   :  { %v7622_v33 = vadd.f32 %v7621_v3, %v7620_v38  ;;  %v6478_v63 = vadd.f32 %v7584_v19, %v6393_v13 }
0x10bd   :  { %v7623_v27 = vpop.f32.mrf.mxu0 }
0x10be   :  { %v6553_v21 = vadd.f32 %v7622_v33, %v6468_v31 }
0x10bf   :  { %v7624_v0 = vpop.f32.mrf.mxu0 }
0x10c0   :  { %v7625_v14 = vadd.f32 %v7624_v0, %v7623_v27 }
0x10c1   :  { %v7626_v15 = vpop.f32.mrf.mxu0 }
0x10c2   :  { %v6558_v55 = vadd.f32 %v7625_v14, %v6473_v23 }
0x10c3   :  { %v7627_v59 = vpop.f32.mrf.mxu0 }
0x10c4   :  { %v7628_v18 = vadd.f32 %v7627_v59, %v7626_v15 }
0x10c6   :  { %v6563_v27 = vadd.f32 %v7628_v18, %v6478_v63 }
0x10e9   :  { %v7661_v50 = vpop.f32.mrf.mxu1 }
0x10eb   :  { %v7662_v56 = vpop.f32.mrf.mxu1 }
0x10ec   :  { %v7663_v5 = vadd.f32 %v7662_v56, %v7661_v50 }
0x10ed   :  { %v7664_v40 = vpop.f32.mrf.mxu1 }
0x10ee   :  { %v10800_v7 = vadd.f32 %v7663_v5, %v6548_v44 }
0x10ef   :  { %v7665_v4 = vpop.f32.mrf.mxu1 }
0x10f0   :  { %v7666_v32 = vadd.f32 %v7665_v4, %v7664_v40  ;;  %v6687_v9 = vmul.f32 %v6676_v34, %v10800_v7  ;;  %v6743_v47 = vmul.f32 %v6732_v16, %v10800_v7  ;;  %v6667_v50 = vmul.f32 %v6656_v29, %v10800_v7 }
0x10f1   :  { %v7667_v12 = vpop.f32.mrf.mxu1  ;;  %v6711_v15 = vsub.f32 0.0, %v10800_v7 }
0x10f2   :  { %v10803_v38 = vadd.f32 %v7666_v32, %v6553_v21  ;;  %6695 = vrot.lane.b32.xlu0 %v6687_v9, %s8396_s7 }
0x10f3   :  { %v7668_v25 = vpop.f32.mrf.mxu1 }
0x10f4   :  { %v7669_v37 = vadd.f32 %v7668_v25, %v7667_v12  ;;  %v6688_v3 = vmul.f32 %v6678_v39, %v10803_v38  ;;  %v6744_v0 = vmul.f32 %v6734_v52, %v10803_v38  ;;  %v6767_v39 = vld [vmem:[%s6865_s24] sm:$0xff]  ;;  %v6712_v45 = vsub.f32 0.0, %v10803_v38  ;;  %v6769_v12 = vld [vmem:[%s6865_s24 + $0x10] sm:$0xff] }
0x10f5   :  { %v7670_v35 = vpop.f32.mrf.mxu1 }
0x10f6   :  { %v10807_v58 = vadd.f32 %v7669_v37, %v6558_v55  ;;  %6697 = vrot.lane.b32.xlu1 %v6688_v3, %s8396_s7  ;;  %v6770_v55 = vld [vmem:[%s6865_s24 + $0x18] sm:$0xff] }
0x10f7   :  { %v7671_v20 = vpop.f32.mrf.mxu1 }
0x10f8   :  { %v7672_v34 = vadd.f32 %v7671_v20, %v7670_v35  ;;  %v6689_v26 = vmul.f32 %v6680_v46, %v10807_v58  ;;  %v6669_v42 = vmul.f32 %v6660_v43, %v10807_v58  ;;  %v6713_v5 = vsub.f32 0.0, %v10807_v58  ;;  %v6771_v43 = vld [vmem:[%s6864_s8] sm:$0xff] }
0x10fa   :  { %v10811_v17 = vadd.f32 %v7672_v34, %v6563_v27  ;;  %6699 = vrot.lane.b32.xlu0 %v6689_v26, %s8396_s7 }
0x10fc   :  { %v6690_v61 = vmul.f32 %v6682_v62, %v10811_v17  ;;  %v6670_v46 = vmul.f32 %v6662_v57, %v10811_v17  ;;  %v6714_v22 = vsub.f32 0.0, %v10811_v17 }
0x10fe   :  { %6715 = vrot.lane.b32.xlu0 %v11057_v8, %s8379_s21  ;;  %6701 = vrot.lane.b32.xlu1 %v6690_v61, %s8396_s7  ;;  %v6745_v8 = vmul.f32 %v6736_v36, %v10807_v58  ;;  %v6775_v61 = vadd.f32 %v6771_v43, %v10800_v7 }
0x1102   :  { %6719 = vrot.lane.b32.xlu0 %v11059_v11, %s8379_s21  ;;  %6717 = vrot.lane.b32.xlu1 %v11055_v2, %s8379_s21  ;;  %v6738_v11 = vpop.permute.xlu1 %6737 }
0x1103   :  { %v6746_v2 = vmul.f32 %v6738_v11, %v10811_v17 }
0x1106   :  { %6751 = vrot.lane.b32.xlu0 %v6743_v47, %s8396_s7  ;;  %6721 = vrot.lane.b32.xlu1 %v11060_v1, %s8379_s21  ;;  %v6668_v1 = vmul.f32 %v6658_v24, %v10803_v38  ;;  %v6772_v47 = vld [vmem:[%s6864_s8 + $0x8] sm:$0xff] }
0x110a   :  { %6755 = vrot.lane.b32.xlu0 %v6745_v8, %s8396_s7  ;;  %6753 = vrot.lane.b32.xlu1 %v6744_v0, %s8396_s7  ;;  %v6776_v8 = vadd.f32 %v6772_v47, %v10803_v38 }
0x110e   :  { %6757 = vrot.lane.b32.xlu1 %v6746_v2, %s8396_s7  ;;  %v6773_v2 = vld [vmem:[%s6864_s8 + $0x10] sm:$0xff] }
0x1164   :  { %v6696_v51 = vpop.permute.xlu0 %6695 }
0x1165   :  { %v6707_v60 = vadd.f32 %v6696_v51, %v6667_v50  ;;  %v6777_v51 = vadd.f32 %v6773_v2, %v10807_v58 }
0x1167   :  { %6783 = vrot.lane.b32.xlu0 %v6707_v60, %s8396_s7  ;;  %v6774_v60 = vld [vmem:[%s6864_s8 + $0x18] sm:$0xff] }
0x1168   :  { %v6698_v54 = vpop.permute.xlu1 %6697  ;;  %v6778_v38 = vadd.f32 %v6774_v60, %v10811_v17 }
0x1169   :  { %v6708_v28 = vadd.f32 %v6698_v54, %v6668_v1 }
0x116b   :  { %6785 = vrot.lane.b32.xlu1 %v6708_v28, %s8396_s7 }
0x116c   :  { %v6700_v6 = vpop.permute.xlu0 %6699 }
0x116d   :  { %v6709_v56 = vadd.f32 %v6700_v6, %v6669_v42 }
0x116f   :  { %6787 = vrot.lane.b32.xlu0 %v6709_v56, %s8396_s7 }
0x1170   :  { %v6716_v53 = vpop.permute.xlu0 %6715  ;;  %v6702_v44 = vpop.permute.xlu1 %6701 }
0x1171   :  { %v6710_v33 = vadd.f32 %v6702_v44, %v6670_v46  ;;  %v6727_v31 = vmul.f32 %v6716_v53, %v6711_v15 }
0x1173   :  { %6789 = vrot.lane.b32.xlu1 %v6710_v33, %s8396_s7 }
0x1174   :  { %v6720_v49 = vpop.permute.xlu0 %6719  ;;  %v6718_v48 = vpop.permute.xlu1 %6717 }
0x1175   :  { %v6729_v40 = vmul.f32 %v6720_v49, %v6713_v5  ;;  %v6728_v14 = vmul.f32 %v6718_v48, %v6712_v45 }
0x1178   :  { %v6752_v30 = vpop.permute.xlu0 %6751  ;;  %v6722_v41 = vpop.permute.xlu1 %6721 }
0x1179   :  { %v6763_v4 = vadd.f32 %v6752_v30, %v6727_v31  ;;  %v6730_v21 = vmul.f32 %v6722_v41, %v6714_v22 }
0x117b   :  { %v6799_v32 = vadd.f32 %v6767_v39, %v6763_v4 }
0x117c   :  { %v6756_v9 = vpop.permute.xlu0 %6755  ;;  %v6754_v59 = vpop.permute.xlu1 %6753 }
0x117d   :  { %v6765_v23 = vadd.f32 %v6756_v9, %v6729_v40  ;;  %v6764_v19 = vadd.f32 %v6754_v59, %v6728_v14  ;;  %6823 = vrot.lane.b32.xlu0 %v6799_v32, %s8379_s21 }
0x117f   :  { %v6800_v62 = vadd.f32 %v6768_v10, %v6764_v19  ;;  %v6801_v13 = vadd.f32 %v6769_v12, %v6765_v23 }
0x1180   :  { %v6758_v25 = vpop.permute.xlu1 %6757 }
0x1181   :  { %v6766_v18 = vadd.f32 %v6758_v25, %v6730_v21  ;;  %6825 = vrot.lane.b32.xlu1 %v6800_v62, %s8379_s21 }
0x1183   :  { %v6802_v37 = vadd.f32 %v6770_v55, %v6766_v18 }
0x11d9   :  { %v6784_v3 = vpop.permute.xlu0 %6783 }
0x11da   :  { %v6795_v29 = vadd.f32 %v6784_v3, %v6767_v39 }
0x11dc   :  { %6807 = vrot.lane.b32.xlu0 %v6795_v29, %s8379_s21 }
0x11dd   :  { %v6786_v35 = vpop.permute.xlu1 %6785 }
0x11de   :  { %v6796_v63 = vadd.f32 %v6786_v35, %v6768_v10 }
0x11e0   :  { %6809 = vrot.lane.b32.xlu1 %v6796_v63, %s8379_s21 }
0x11e1   :  { %v6788_v20 = vpop.permute.xlu0 %6787 }
0x11e2   :  { %v6797_v27 = vadd.f32 %v6788_v20, %v6769_v12 }
0x11e4   :  { %6811 = vrot.lane.b32.xlu0 %v6797_v27, %s8379_s21 }
0x11e5   :  { %v6790_v34 = vpop.permute.xlu1 %6789 }
0x11e6   :  { %v6798_v26 = vadd.f32 %v6790_v34, %v6770_v55 }
0x11e8   :  { %6827 = vrot.lane.b32.xlu0 %v6801_v13, %s8379_s21  ;;  %6813 = vrot.lane.b32.xlu1 %v6798_v26, %s8379_s21 }
0x11ec   :  { %6829 = vrot.lane.b32.xlu1 %v6802_v37, %s8379_s21 }
0x11ef   :  { %v6824_v24 = vpop.permute.xlu0 %6823 }
0x11f3   :  { %v6826_v57 = vpop.permute.xlu1 %6825 }
0x124e   :  { %v6808_v16 = vpop.permute.xlu0 %6807 }
0x124f   :  { %v6836_v52 = vsel %vm6835_vm2, %v6775_v61, %v6808_v16 }
0x1250   :  { %v6841_v36 = vsel %vm6840_vm3, %v6836_v52, %v6824_v24 }
0x1251   :  { %6846 = vst.msk [vmem:[%s10861_s11] sm:$0xff] %vm6845_vm7, %v6841_v36 }
0x1252   :  { %v6810_v0 = vpop.permute.xlu1 %6809 }
0x1253   :  { %v6837_v11 = vsel %vm6835_vm2, %v6776_v8, %v6810_v0 }
0x1254   :  { %v6842_v7 = vsel %vm6840_vm3, %v6837_v11, %v6826_v57 }
0x1255   :  { %6847 = vst.msk [vmem:[%s10861_s11 + $0x8] sm:$0xff] %vm6845_vm7, %v6842_v7 }
0x1256   :  { %v6812_v50 = vpop.permute.xlu0 %6811 }
0x1257   :  { %v6838_v1 = vsel %vm6835_vm2, %v6777_v51, %v6812_v50 }
0x125a   :  { %v6828_v54 = vpop.permute.xlu0 %6827  ;;  %v6814_v28 = vpop.permute.xlu1 %6813 }
0x125b   :  { %v6843_v42 = vsel %vm6840_vm3, %v6838_v1, %v6828_v54  ;;  %v6839_v6 = vsel %vm6835_vm2, %v6778_v38, %v6814_v28 }
0x125c   :  { %6848 = vst.msk [vmem:[%s10861_s11 + $0x10] sm:$0xff] %vm6845_vm7, %v6843_v42 }
0x125e   :  { %v6830_v56 = vpop.permute.xlu1 %6829 }
0x125f   :  { %v6844_v46 = vsel %vm6840_vm3, %v6839_v6, %v6830_v56 }
0x1260   :  { %6849 = vst.msk [vmem:[%s10861_s11 + $0x18] sm:$0xff] %vm6845_vm7, %v6844_v46 }

</bundles_post_ra>
